<compile_context>
chip_gen: v7x
topology: tpu7x:2x2x1
jax: 0.10.0
libtpu: 0.0.40
codegen_flags: <defaults>
</compile_context>

<pallas_src>
import functools

import jax
import jax.numpy as jnp
from jax import lax
from jax.experimental import pallas as pl
from jax.experimental.pallas import tpu as pltpu


def _round_up(x, m):
    return (x + m - 1) // m * m


def _vmem_capacity_bytes():
    try:
        return int(pltpu.get_tpu_info().vmem_capacity_bytes)
    except Exception:
        return 128 * 1024 * 1024          # v5e/v6e physical VMEM


def _vmem_budget_bytes():
    # Working budget / scoped limit: well under physical on every generation
    # (v7x: 64 MiB physical -> ~48 MiB; v5e/v6e: 128 MiB -> 96 MiB).
    return min(int(0.75 * _vmem_capacity_bytes()), 96 * 1024 * 1024)


def _tensorcores_per_chip():
    # The leading "parallel" batch axis only pays off when a second TensorCore
    # exists to shard it onto (v7x, v4/v5p megacore).  On v5e/v6e it would just
    # serialize the loop and halve the already-tiny matmul M.
    try:
        kind = jax.devices()[0].device_kind.lower()
    except Exception:
        return 1
    return 2 if any(tag in kind for tag in ("v7", "7x", "v4", "v5p")) else 1


# ----------------------------------------------------------------------------
# Kernel 1: fused 2-layer LSTM over time chunks
#   - per-chunk layer-0 input projection into VMEM scratch (big-M bf16 matmul)
#   - per-step recurrence in an unrolled fori_loop, h/c state in VMEM scratch
# ----------------------------------------------------------------------------
def _lstm_kernel(x_ref,      # (TT, Bs, E)  bf16 input chunk (time-major)
                 wih0_ref,   # (E, 4H)      bf16
                 whh0_ref,   # (H, 4H)      bf16
                 wih1_ref,   # (H, 4H)      bf16
                 whh1_ref,   # (H, 4H)      bf16
                 b0_ref,     # (1, 4H)      f32  (b_ih0 + b_hh0)
                 b1_ref,     # (1, 4H)      f32  (b_ih1 + b_hh1)
                 out_ref,    # (TT, Bs, H)  bf16 top-layer hidden states
                 gx_scr,     # (TT, Bs, 4H) f32  per-chunk layer-0 input gates
                 h_scr,      # (2, Bs, H)   f32  hidden state per layer (chunk carry)
                 c_scr,      # (2, Bs, H)   f32  cell state per layer (chunk carry)
                 *, unroll):
    # Fresh recurrence at the first time chunk of each batch shard.
    @pl.when(pl.program_id(1) == 0)
    def _():
        h_scr[...] = jnp.zeros_like(h_scr)
        c_scr[...] = jnp.zeros_like(c_scr)

    tt, bs, e = x_ref.shape
    h_dim = h_scr.shape[-1]

    # Fused (hoisted) layer-0 input projection for the whole chunk: one big-M
    # bf16 MXU matmul per chunk; the result lives only in VMEM.
    x2d = x_ref[...].reshape(tt * bs, e)
    gx = jnp.dot(x2d, wih0_ref[...], preferred_element_type=jnp.float32) + b0_ref[...]
    gx_scr[...] = gx.reshape(tt, bs, 4 * h_dim)

    whh0 = whh0_ref[...]
    wih1 = wih1_ref[...]
    whh1 = whh1_ref[...]
    # Hoist the bias broadcast out of the per-step loop (no CSE inside fori_loop).
    b1 = jnp.broadcast_to(b1_ref[...], (bs, 4 * h_dim))

    def act(gates, c_prev):                       # PyTorch gate order: i, f, g, o
        i = jax.nn.sigmoid(gates[:, 0:h_dim])
        f = jax.nn.sigmoid(gates[:, h_dim:2 * h_dim])
        g = jnp.tanh(gates[:, 2 * h_dim:3 * h_dim])
        o = jax.nn.sigmoid(gates[:, 3 * h_dim:4 * h_dim])
        c_new = f * c_prev + i * g
        return o * jnp.tanh(c_new), c_new

    def step(t, carry):
        h0, c0, h1, c1 = carry
        # Layer-1 recurrent matmul depends only on the previous step's h1 -> it is
        # issued first and overlaps the layer-0 matmul/activations (off the serial
        # critical path).  bf16 operands, f32 accumulation.
        g1_rec = jnp.dot(h1.astype(jnp.bfloat16), whh1,
                         preferred_element_type=jnp.float32)
        # Layer 0: only the recurrent matmul remains on the critical path.
        g0 = gx_scr[t] + jnp.dot(h0.astype(jnp.bfloat16), whh0,
                                 preferred_element_type=jnp.float32)
        h0, c0 = act(g0, c0)
        # Layer 1: add the already-in-flight recurrent term.
        g1 = g1_rec + jnp.dot(h0.astype(jnp.bfloat16), wih1,
                              preferred_element_type=jnp.float32) + b1
        h1, c1 = act(g1, c1)
        out_ref[t] = h1.astype(out_ref.dtype)
        return h0, c0, h1, c1

    carry = (h_scr[0], c_scr[0], h_scr[1], c_scr[1])
    h0, c0, h1, c1 = lax.fori_loop(0, tt, step, carry, unroll=unroll)
    h_scr[0] = h0
    c_scr[0] = c0
    h_scr[1] = h1
    c_scr[1] = c1


def lstm_2layer(x_tbe, wih0, whh0, wih1, whh1, b0, b1, *, batch_split=1):
    """x_tbe: (T, B, E) bf16 time-major inputs -> (T, B, H) bf16 top-layer output."""
    t, b, e = x_tbe.shape
    h = whh0.shape[0]
    g = 4 * h
    assert b % batch_split == 0
    bs = b // batch_split

    # Derive the time-chunk from the chip's VMEM capacity (v7x: 64 MiB physical).
    budget = _vmem_budget_bytes() - (4 << 20)              # margin
    per_t = bs * (2 * e * 2 + 2 * h * 2 + g * 4)           # x/out double-buf + gx scr
    fixed = 2 * 2 * (e + 3 * h) * g + 2 * 2 * bs * h * 4 + 2 * g * 4
    tt = max(1, min(t, (budget - fixed) // per_t, 256))
    if tt >= 4:
        tt -= tt % 4                                       # remainder-free unroll
    tp = _round_up(t, tt)
    if tp != t:
        # Padded trailing timesteps only advance state that is never consumed.
        x_tbe = jnp.pad(x_tbe, ((0, tp - t), (0, 0), (0, 0)))

    unroll = tt if tt <= 8 else 4
    kernel = functools.partial(_lstm_kernel, unroll=unroll)

    out = pl.pallas_call(
        kernel,
        out_shape=jax.ShapeDtypeStruct((tp, b, h), jnp.bfloat16),
        grid_spec=pltpu.PrefetchScalarGridSpec(
            num_scalar_prefetch=0,
            grid=(batch_split, tp // tt),      # time chunks innermost: state carry
            in_specs=[
                pl.BlockSpec((tt, bs, e), lambda s, c: (c, s, 0)),
                pl.BlockSpec((e, g), lambda s, c: (0, 0)),
                pl.BlockSpec((h, g), lambda s, c: (0, 0)),
                pl.BlockSpec((h, g), lambda s, c: (0, 0)),
                pl.BlockSpec((h, g), lambda s, c: (0, 0)),
                pl.BlockSpec((1, g), lambda s, c: (0, 0)),
                pl.BlockSpec((1, g), lambda s, c: (0, 0)),
            ],
            out_specs=pl.BlockSpec((tt, bs, h), lambda s, c: (c, s, 0)),
            scratch_shapes=[
                pltpu.VMEM((tt, bs, g), jnp.float32),    # per-chunk layer-0 gates
                pltpu.VMEM((2, bs, h), jnp.float32),     # h per layer
                pltpu.VMEM((2, bs, h), jnp.float32),     # c per layer
            ],
        ),
        compiler_params=pltpu.CompilerParams(
            dimension_semantics=("parallel", "arbitrary"),
            vmem_limit_bytes=_vmem_budget_bytes()),
    )(x_tbe, wih0, whh0, wih1, whh1, b0, b1)
    return out[:t]


# ----------------------------------------------------------------------------
# Kernel 2: Linear(H -> V) + LogSoftmax with a double vocab sweep
#   sweep 1: online max / sum-exp over vocab tiles (LSE in VMEM scratch)
#   sweep 2: recompute logits tile, write (logits - lse) -> single HBM write
# ----------------------------------------------------------------------------
def _fc_logsoftmax_kernel(x_ref, w_ref, b_ref, out_ref, m_scr, l_scr):
    j = pl.program_id(1)
    nv = pl.num_programs(1) // 2

    @pl.when(j == 0)
    def _():
        m_scr[...] = jnp.full_like(m_scr, -jnp.inf)
        l_scr[...] = jnp.zeros_like(l_scr)

    logits = (jnp.dot(x_ref[...], w_ref[...], preferred_element_type=jnp.float32)
              + b_ref[...])

    @pl.when(j < nv)                       # sweep 1: online log-sum-exp
    def _():
        m_prev = m_scr[...]
        m_new = jnp.maximum(m_prev, jnp.max(logits, axis=-1, keepdims=True))
        l_scr[...] = (l_scr[...] * jnp.exp(m_prev - m_new)
                      + jnp.sum(jnp.exp(logits - m_new), axis=-1, keepdims=True))
        m_scr[...] = m_new

    @pl.when(j == nv - 1)                  # fold lse = m + log(l) into m_scr
    def _():
        m_scr[...] = m_scr[...] + jnp.log(l_scr[...])

    @pl.when(j >= nv)                      # sweep 2: write normalized log-probs
    def _():
        out_ref[...] = logits - m_scr[...]


def fc_logsoftmax(x_nh, w_hv, b_v, *, row_block=256, v_block=2048):
    """log_softmax(x @ W + b, axis=-1); (N, V) output written to HBM exactly once."""
    n, h = x_nh.shape
    v = w_hv.shape[1]
    nt = min(row_block, _round_up(n, 16))           # 16-sublane aligned for bf16 x
    np_ = _round_up(n, nt)
    if np_ != n:
        x_nh = jnp.pad(x_nh, ((0, np_ - n), (0, 0)))
    vt = min(v_block, _round_up(v, 128))
    vp = _round_up(v, vt)
    if vp != v:
        # Pad vocab with a LARGE FINITE negative bias (not -inf: -inf would give
        # inf - inf = NaN in the online-LSE update).  exp() underflows to 0 so the
        # padded columns never perturb the log-sum-exp; they are sliced off below.
        w_hv = jnp.pad(w_hv, ((0, 0), (0, vp - v)))
        b_v = jnp.pad(b_v, ((0, 0), (0, vp - v)), constant_values=-1e30)
    nv = vp // vt

    out = pl.pallas_call(
        _fc_logsoftmax_kernel,
        out_shape=jax.ShapeDtypeStruct((np_, vp), jnp.float32),
        grid_spec=pltpu.PrefetchScalarGridSpec(
            num_scalar_prefetch=0,
            # Vocab axis swept twice per row tile: j in [0, nv) accumulates the
            # online LSE, j in [nv, 2nv) recomputes each logits tile (re-streaming
            # the bf16 W tile, cheaper than a second (N, V) f32 HBM pass) and
            # writes the already-normalized output block.
            grid=(np_ // nt, 2 * nv),
            in_specs=[
                pl.BlockSpec((nt, h), lambda i, j: (i, 0)),
                pl.BlockSpec((h, vt), lambda i, j: (0, j % nv)),
                pl.BlockSpec((1, vt), lambda i, j: (0, j % nv)),
            ],
            out_specs=pl.BlockSpec((nt, vt),
                                   lambda i, j: (i, jnp.maximum(j - nv, 0))),
            scratch_shapes=[pltpu.VMEM((nt, 1), jnp.float32),   # running max / lse
                            pltpu.VMEM((nt, 1), jnp.float32)],  # running sum-exp
        ),
        compiler_params=pltpu.CompilerParams(
            dimension_semantics=("parallel", "arbitrary"),
            vmem_limit_bytes=_vmem_budget_bytes()),
        cost_estimate=pl.CostEstimate(
            flops=2 * 2 * np_ * h * vp,
            transcendentals=np_ * vp,
            bytes_accessed=2 * (np_ * h + 2 * h * vp) + 4 * (np_ * vp + 2 * vp)),
    )(x_nh, w_hv, b_v)
    return out[:n, :v]


# ----------------------------------------------------------------------------
# DecoderRNN forward (glue in plain JAX, hot path in Pallas)
# ----------------------------------------------------------------------------
def prepare_params(params_f32):
    """Cast the streamed matrices to bf16 once (f32 accumulation inside kernels);
    biases stay f32."""
    p = dict(params_f32)
    for k in ("embed", "wih0", "whh0", "wih1", "whh1", "fc_w"):
        p[k] = params_f32[k].astype(jnp.bfloat16)
    return p


def decoder_rnn_forward(params, features, captions, *, batch_split=None):
    """features: (B, E), captions: (B, Tc) int32 -> (B, Tc, V) f32 log-probs."""
    b, e = features.shape
    t = captions.shape[1]
    h = params["whh0"].shape[0]
    v = params["fc_w"].shape[1]

    # Build the LSTM input directly in time-major (T, B, E): only the tiny int32
    # caption matrix is transposed, never a wide activation tensor.
    cap_t = jnp.transpose(captions)                                   # (Tc, B)
    cap_emb_t = jnp.take(params["embed"], cap_t, axis=0)              # (Tc, B, E)
    x_tbe = jnp.concatenate(
        [features.astype(jnp.bfloat16)[None, :, :],
         cap_emb_t[:-1].astype(jnp.bfloat16)], axis=0)                # (T, B, E) bf16

    if batch_split is None:
        # Only shard the batch when a 2nd TensorCore exists AND the shard stays
        # bf16-sublane aligned (multiple of 16 rows).
        cores = _tensorcores_per_chip()
        batch_split = 2 if (cores >= 2 and b % 2 == 0 and (b // 2) % 16 == 0) else 1

    lstm_out_tbh = lstm_2layer(
        x_tbe,
        params["wih0"].astype(jnp.bfloat16), params["whh0"].astype(jnp.bfloat16),
        params["wih1"].astype(jnp.bfloat16), params["whh1"].astype(jnp.bfloat16),
        params["b0"].astype(jnp.float32), params["b1"].astype(jnp.float32),
        batch_split=batch_split)                                      # (T, B, H) bf16

    # The single surviving layout change, on the narrow bf16 (T, B, H) tensor.
    lstm_out = jnp.transpose(lstm_out_tbh, (1, 0, 2))                 # (B, T, H)

    scores = fc_logsoftmax(lstm_out.reshape(b * t, h),
                           params["fc_w"].astype(jnp.bfloat16),
                           params["fc_b"].astype(jnp.float32),
                           row_block=256, v_block=2048)               # (B*T, V) f32
    return scores.reshape(b, t, v)


# ----------------------------------------------------------------------------
# Pure-JAX f32 reference (for correctness check)
# ----------------------------------------------------------------------------
def decoder_rnn_reference(params, features, captions):
    cap_emb = jnp.take(params["embed"], captions, axis=0)
    inputs = jnp.concatenate([features[:, None, :], cap_emb[:, :-1, :]], axis=1)
    b, t, e = inputs.shape
    h = params["whh0"].shape[0]

    def cell(x, hh, cc, wih, whh, bias):
        gg = x @ wih + hh @ whh + bias
        i = jax.nn.sigmoid(gg[:, 0:h]); f = jax.nn.sigmoid(gg[:, h:2 * h])
        g = jnp.tanh(gg[:, 2 * h:3 * h]); o = jax.nn.sigmoid(gg[:, 3 * h:4 * h])
        cc = f * cc + i * g
        return o * jnp.tanh(cc), cc

    def step(carry, x_t):
        h0, c0, h1, c1 = carry
        h0, c0 = cell(x_t, h0, c0, params["wih0"], params["whh0"], params["b0"])
        h1, c1 = cell(h0, h1, c1, params["wih1"], params["whh1"], params["b1"])
        return (h0, c0, h1, c1), h1

    z = jnp.zeros((b, h), jnp.float32)
    _, outs = jax.lax.scan(step, (z, z, z, z), jnp.transpose(inputs, (1, 0, 2)))
    lstm_out = jnp.transpose(outs, (1, 0, 2))
    logits = lstm_out @ params["fc_w"] + params["fc_b"]
    return jax.nn.log_softmax(logits, axis=-1)


if __name__ == "__main__":
    # Small but lane/sublane-aligned shapes: H, E, V multiples of 128, B a multiple
    # of 16 (bf16 sublane packing).
    embed_size, hidden_size, vocab_size = 128, 128, 256
    batch, tc = 16, 8

    key = jax.random.PRNGKey(0)
    ks = jax.random.split(key, 12)
    e, h, v = embed_size, hidden_size, vocab_size

    def init(k, shape, scale=0.1):
        return (scale * jax.random.normal(k, shape)).astype(jnp.float32)

    # PyTorch stores W_ih as (4H, in); pre-transposed to (in, 4H) for the kernels.
    # b* = b_ih + b_hh combined.
    params_f32 = {
        "embed": init(ks[0], (v, e)),
        "wih0": init(ks[1], (e, 4 * h)),
        "whh0": init(ks[2], (h, 4 * h)),
        "b0":   init(ks[3], (1, 4 * h)),
        "wih1": init(ks[4], (h, 4 * h)),
        "whh1": init(ks[5], (h, 4 * h)),
        "b1":   init(ks[6], (1, 4 * h)),
        "fc_w": init(ks[7], (h, v)),
        "fc_b": init(ks[8], (1, v)),
    }
    params = prepare_params(params_f32)      # bf16 streamed weights, f32 biases

    features = init(ks[9], (batch, e), scale=1.0)
    captions = jax.random.randint(ks[10], (batch, tc), 0, v, dtype=jnp.int32)

    out = jax.jit(decoder_rnn_forward)(params, features, captions)
    out = jax.block_until_ready(out)
    assert out.shape == (batch, tc, v), out.shape

    ref = decoder_rnn_reference(params_f32, features, captions)
    err = float(jnp.max(jnp.abs(out - ref)))
    # bf16 matmul operands (f32 accumulation) vs. the pure-f32 reference.
    assert err < 0.1, err
    # log-softmax rows must sum (in prob space) to 1: checks the online LSE and the
    # second-sweep renormalization exactly (sweep-2 logits are bit-identical).
    assert jnp.allclose(jnp.sum(jnp.exp(out), axis=-1), 1.0, atol=1e-4)

    print("KERNEL_OK")
</pallas_src>

<mosaic_0001>
module attributes {stable_mosaic.version = 11 : i64} {
  func.func @_fc_logsoftmax_kernel(%arg0: i32, %arg1: i32, %arg2: memref<128x128xbf16, #tpu.memory_space<vmem>>, %arg3: memref<128x256xbf16, #tpu.memory_space<vmem>>, %arg4: memref<1x256xf32, #tpu.memory_space<vmem>>, %arg5: memref<128x256xf32, #tpu.memory_space<vmem>>, %arg6: memref<128x1xf32, #tpu.memory_space<vmem>>, %arg7: memref<128x1xf32, #tpu.memory_space<vmem>>) attributes {dimension_semantics = [#tpu.dimension_semantics<parallel>, #tpu.dimension_semantics<arbitrary>], iteration_bounds = array<i64: 1, 2>, scalar_prefetch = 0 : i64, scratch_operands = 2 : i64, tpu.core_type = #tpu.core_type<tc>, window_params = [{transform_indices = @transform_0, window_bounds = array<i64: 128, 128>}, {transform_indices = @transform_1, window_bounds = array<i64: 128, 256>}, {transform_indices = @transform_2, window_bounds = array<i64: 1, 256>}, {transform_indices = @transform_3, window_bounds = array<i64: 128, 256>}]} {
    %c0_i32 = arith.constant 0 : i32
    %0 = arith.cmpi eq, %arg1, %c0_i32 : i32
    %1 = arith.extui %0 : i1 to i32
    %c0_i32_0 = arith.constant 0 : i32
    %2 = arith.cmpi ne, %1, %c0_i32_0 : i32
    scf.if %2 {
      %cst_11 = arith.constant 0xFF800000 : f32
      %18 = vector.broadcast %cst_11 : f32 to vector<128x1xf32>
      %c0_12 = arith.constant 0 : index
      %c0_13 = arith.constant 0 : index
      %19 = vector.load %arg6[%c0_12, %c0_13] : memref<128x1xf32, #tpu.memory_space<vmem>>, vector<128x1xf32>
      tpu.vector_store %arg6[%c0_12, %c0_13], %18 {strides = array<i32>} : memref<128x1xf32, #tpu.memory_space<vmem>>, vector<128x1xf32>,
      %cst_14 = arith.constant 0.000000e+00 : f32
      %20 = vector.broadcast %cst_14 : f32 to vector<128x1xf32>
      %c0_15 = arith.constant 0 : index
      %c0_16 = arith.constant 0 : index
      %21 = vector.load %arg7[%c0_15, %c0_16] : memref<128x1xf32, #tpu.memory_space<vmem>>, vector<128x1xf32>
      tpu.vector_store %arg7[%c0_15, %c0_16], %20 {strides = array<i32>} : memref<128x1xf32, #tpu.memory_space<vmem>>, vector<128x1xf32>,
    } else {
    }
    %c0 = arith.constant 0 : index
    %c0_1 = arith.constant 0 : index
    %3 = vector.load %arg2[%c0, %c0_1] : memref<128x128xbf16, #tpu.memory_space<vmem>>, vector<128x128xbf16>
    %c0_2 = arith.constant 0 : index
    %c0_3 = arith.constant 0 : index
    %4 = vector.load %arg3[%c0_2, %c0_3] : memref<128x256xbf16, #tpu.memory_space<vmem>>, vector<128x256xbf16>
    %cst = arith.constant dense<0.000000e+00> : vector<128x256xf32>
    %5 = tpu.matmul %3, %4, %cst {dimension_numbers = #tpu.dot_dimension_numbers<[1], [0], [0], [1], [0, 0, 1, 1], [], []>} : vector<128x128xbf16>, vector<128x256xbf16>, vector<128x256xf32> -> vector<128x256xf32>
    %c0_4 = arith.constant 0 : index
    %c0_5 = arith.constant 0 : index
    %6 = vector.load %arg4[%c0_4, %c0_5] : memref<1x256xf32, #tpu.memory_space<vmem>>, vector<1x256xf32>
    %7 = vector.broadcast %6 : vector<1x256xf32> to vector<128x256xf32>
    %8 = arith.addf %5, %7 : vector<128x256xf32>
    %c1_i32 = arith.constant 1 : i32
    %9 = arith.cmpi slt, %arg1, %c1_i32 : i32
    %10 = arith.extui %9 : i1 to i32
    %c0_i32_6 = arith.constant 0 : i32
    %11 = arith.cmpi ne, %10, %c0_i32_6 : i32
    scf.if %11 {
      %c0_11 = arith.constant 0 : index
      %c0_12 = arith.constant 0 : index
      %18 = vector.load %arg6[%c0_11, %c0_12] : memref<128x1xf32, #tpu.memory_space<vmem>>, vector<128x1xf32>
      %cst_13 = arith.constant dense<0xFF800000> : vector<128xf32>
      %19 = vector.multi_reduction <maximumf>, %8, %cst_13 [1] : vector<128x256xf32> to vector<128xf32>
      %20 = vector.shape_cast %19 : vector<128xf32> to vector<128x1xf32>
      %21 = arith.maximumf %18, %20 : vector<128x1xf32>
      %c0_14 = arith.constant 0 : index
      %c0_15 = arith.constant 0 : index
      %22 = vector.load %arg7[%c0_14, %c0_15] : memref<128x1xf32, #tpu.memory_space<vmem>>, vector<128x1xf32>
      %23 = arith.subf %18, %21 : vector<128x1xf32>
      %24 = math.exp %23 : vector<128x1xf32>
      %25 = arith.mulf %22, %24 : vector<128x1xf32>
      %26 = vector.broadcast %21 : vector<128x1xf32> to vector<128x256xf32>
      %27 = arith.subf %8, %26 : vector<128x256xf32>
      %28 = math.exp %27 : vector<128x256xf32>
      %cst_16 = arith.constant dense<0.000000e+00> : vector<128xf32>
      %29 = vector.multi_reduction <add>, %28, %cst_16 [1] : vector<128x256xf32> to vector<128xf32>
      %30 = vector.shape_cast %29 : vector<128xf32> to vector<128x1xf32>
      %31 = arith.addf %25, %30 : vector<128x1xf32>
      %c0_17 = arith.constant 0 : index
      %c0_18 = arith.constant 0 : index
      %32 = vector.load %arg7[%c0_17, %c0_18] : memref<128x1xf32, #tpu.memory_space<vmem>>, vector<128x1xf32>
      tpu.vector_store %arg7[%c0_17, %c0_18], %31 {strides = array<i32>} : memref<128x1xf32, #tpu.memory_space<vmem>>, vector<128x1xf32>,
      %c0_19 = arith.constant 0 : index
      %c0_20 = arith.constant 0 : index
      %33 = vector.load %arg6[%c0_19, %c0_20] : memref<128x1xf32, #tpu.memory_space<vmem>>, vector<128x1xf32>
      tpu.vector_store %arg6[%c0_19, %c0_20], %21 {strides = array<i32>} : memref<128x1xf32, #tpu.memory_space<vmem>>, vector<128x1xf32>,
    } else {
    }
    %c0_i32_7 = arith.constant 0 : i32
    %12 = arith.cmpi eq, %arg1, %c0_i32_7 : i32
    %13 = arith.extui %12 : i1 to i32
    %c0_i32_8 = arith.constant 0 : i32
    %14 = arith.cmpi ne, %13, %c0_i32_8 : i32
    scf.if %14 {
      %c0_11 = arith.constant 0 : index
      %c0_12 = arith.constant 0 : index
      %18 = vector.load %arg6[%c0_11, %c0_12] : memref<128x1xf32, #tpu.memory_space<vmem>>, vector<128x1xf32>
      %c0_13 = arith.constant 0 : index
      %c0_14 = arith.constant 0 : index
      %19 = vector.load %arg7[%c0_13, %c0_14] : memref<128x1xf32, #tpu.memory_space<vmem>>, vector<128x1xf32>
      %20 = math.log %19 : vector<128x1xf32>
      %21 = arith.addf %18, %20 : vector<128x1xf32>
      %c0_15 = arith.constant 0 : index
      %c0_16 = arith.constant 0 : index
      %22 = vector.load %arg6[%c0_15, %c0_16] : memref<128x1xf32, #tpu.memory_space<vmem>>, vector<128x1xf32>
      tpu.vector_store %arg6[%c0_15, %c0_16], %21 {strides = array<i32>} : memref<128x1xf32, #tpu.memory_space<vmem>>, vector<128x1xf32>,
    } else {
    }
    %c1_i32_9 = arith.constant 1 : i32
    %15 = arith.cmpi sge, %arg1, %c1_i32_9 : i32
    %16 = arith.extui %15 : i1 to i32
    %c0_i32_10 = arith.constant 0 : i32
    %17 = arith.cmpi ne, %16, %c0_i32_10 : i32
    scf.if %17 {
      %c0_11 = arith.constant 0 : index
      %c0_12 = arith.constant 0 : index
      %18 = vector.load %arg6[%c0_11, %c0_12] : memref<128x1xf32, #tpu.memory_space<vmem>>, vector<128x1xf32>
      %19 = vector.broadcast %18 : vector<128x1xf32> to vector<128x256xf32>
      %20 = arith.subf %8, %19 : vector<128x256xf32>
      %c0_13 = arith.constant 0 : index
      %c0_14 = arith.constant 0 : index
      %21 = vector.load %arg5[%c0_13, %c0_14] : memref<128x256xf32, #tpu.memory_space<vmem>>, vector<128x256xf32>
      tpu.vector_store %arg5[%c0_13, %c0_14], %20 {strides = array<i32>} : memref<128x256xf32, #tpu.memory_space<vmem>>, vector<128x256xf32>,
    } else {
    }
    return
  }
  func.func @transform_0(%arg0: i32, %arg1: i32) -> (i32, i32) {
    %c0_i32 = arith.constant 0 : i32
    %c0_i32_0 = arith.constant 0 : i32
    return %arg0, %c0_i32 : i32, i32
  }
  func.func @transform_1(%arg0: i32, %arg1: i32) -> (i32, i32) {
    %c1_i32 = arith.constant 1 : i32
    %c0_i32 = arith.constant 0 : i32
    %0 = arith.cmpi eq, %c1_i32, %c0_i32 : i32
    %c1_i32_0 = arith.constant 1 : i32
    %1 = arith.select %0, %c1_i32_0, %c1_i32 : i32
    %2 = arith.remsi %arg1, %1 : i32
    %c0_i32_1 = arith.constant 0 : i32
    %3 = arith.cmpi ne, %2, %c0_i32_1 : i32
    %c0_i32_2 = arith.constant 0 : i32
    %4 = arith.cmpi slt, %2, %c0_i32_2 : i32
    %c0_i32_3 = arith.constant 0 : i32
    %5 = arith.cmpi slt, %1, %c0_i32_3 : i32
    %6 = arith.xori %4, %5 : i1
    %7 = arith.andi %6, %3 : i1
    %8 = arith.addi %2, %1 : i32
    %9 = arith.select %7, %8, %2 : i32
    %c0_i32_4 = arith.constant 0 : i32
    %c0_i32_5 = arith.constant 0 : i32
    return %c0_i32_4, %9 : i32, i32
  }
  func.func @transform_2(%arg0: i32, %arg1: i32) -> (i32, i32) {
    %c1_i32 = arith.constant 1 : i32
    %c0_i32 = arith.constant 0 : i32
    %0 = arith.cmpi eq, %c1_i32, %c0_i32 : i32
    %c1_i32_0 = arith.constant 1 : i32
    %1 = arith.select %0, %c1_i32_0, %c1_i32 : i32
    %2 = arith.remsi %arg1, %1 : i32
    %c0_i32_1 = arith.constant 0 : i32
    %3 = arith.cmpi ne, %2, %c0_i32_1 : i32
    %c0_i32_2 = arith.constant 0 : i32
    %4 = arith.cmpi slt, %2, %c0_i32_2 : i32
    %c0_i32_3 = arith.constant 0 : i32
    %5 = arith.cmpi slt, %1, %c0_i32_3 : i32
    %6 = arith.xori %4, %5 : i1
    %7 = arith.andi %6, %3 : i1
    %8 = arith.addi %2, %1 : i32
    %9 = arith.select %7, %8, %2 : i32
    %c0_i32_4 = arith.constant 0 : i32
    %c0_i32_5 = arith.constant 0 : i32
    return %c0_i32_4, %9 : i32, i32
  }
  func.func @transform_3(%arg0: i32, %arg1: i32) -> (i32, i32) {
    %c1_i32 = arith.constant 1 : i32
    %0 = arith.subi %arg1, %c1_i32 : i32
    %c0_i32 = arith.constant 0 : i32
    %1 = arith.maxsi %0, %c0_i32 : i32
    %c0_i32_0 = arith.constant 0 : i32
    return %arg0, %1 : i32, i32
  }
}

module attributes {stable_mosaic.version = 11 : i64} {
  func.func @_lstm_kernel(%arg0: i32, %arg1: i32, %arg2: memref<8x16x128xbf16, #tpu.memory_space<vmem>>, %arg3: memref<128x512xbf16, #tpu.memory_space<vmem>>, %arg4: memref<128x512xbf16, #tpu.memory_space<vmem>>, %arg5: memref<128x512xbf16, #tpu.memory_space<vmem>>, %arg6: memref<128x512xbf16, #tpu.memory_space<vmem>>, %arg7: memref<1x512xf32, #tpu.memory_space<vmem>>, %arg8: memref<1x512xf32, #tpu.memory_space<vmem>>, %arg9: memref<8x16x128xbf16, #tpu.memory_space<vmem>>, %arg10: memref<8x16x512xf32, #tpu.memory_space<vmem>>, %arg11: memref<2x16x128xf32, #tpu.memory_space<vmem>>, %arg12: memref<2x16x128xf32, #tpu.memory_space<vmem>>) attributes {dimension_semantics = [#tpu.dimension_semantics<parallel>, #tpu.dimension_semantics<arbitrary>], iteration_bounds = array<i64: 1, 1>, scalar_prefetch = 0 : i64, scratch_operands = 3 : i64, tpu.core_type = #tpu.core_type<tc>, window_params = [{transform_indices = @transform_0, window_bounds = array<i64: 8, 16, 128>}, {pipeline_mode = #tpu.pipeline_mode<synchronous>, transform_indices = @transform_1, window_bounds = array<i64: 128, 512>}, {pipeline_mode = #tpu.pipeline_mode<synchronous>, transform_indices = @transform_2, window_bounds = array<i64: 128, 512>}, {pipeline_mode = #tpu.pipeline_mode<synchronous>, transform_indices = @transform_3, window_bounds = array<i64: 128, 512>}, {pipeline_mode = #tpu.pipeline_mode<synchronous>, transform_indices = @transform_4, window_bounds = array<i64: 128, 512>}, {pipeline_mode = #tpu.pipeline_mode<synchronous>, transform_indices = @transform_5, window_bounds = array<i64: 1, 512>}, {pipeline_mode = #tpu.pipeline_mode<synchronous>, transform_indices = @transform_6, window_bounds = array<i64: 1, 512>}, {transform_indices = @transform_7, window_bounds = array<i64: 8, 16, 128>}]} {
    %c0_i32 = arith.constant 0 : i32
    %0 = arith.cmpi eq, %arg1, %c0_i32 : i32
    %1 = arith.extui %0 : i1 to i32
    %c0_i32_0 = arith.constant 0 : i32
    %2 = arith.cmpi ne, %1, %c0_i32_0 : i32
    scf.if %2 {
      %cst_146 = arith.constant 0.000000e+00 : f32
      %574 = vector.broadcast %cst_146 : f32 to vector<2x16x128xf32>
      %c0_147 = arith.constant 0 : index
      %c0_148 = arith.constant 0 : index
      %c0_149 = arith.constant 0 : index
      %575 = vector.load %arg11[%c0_147, %c0_148, %c0_149] : memref<2x16x128xf32, #tpu.memory_space<vmem>>, vector<2x16x128xf32>
      tpu.vector_store %arg11[%c0_147, %c0_148, %c0_149], %574 {strides = array<i32>} : memref<2x16x128xf32, #tpu.memory_space<vmem>>, vector<2x16x128xf32>,
      %cst_150 = arith.constant 0.000000e+00 : f32
      %576 = vector.broadcast %cst_150 : f32 to vector<2x16x128xf32>
      %c0_151 = arith.constant 0 : index
      %c0_152 = arith.constant 0 : index
      %c0_153 = arith.constant 0 : index
      %577 = vector.load %arg12[%c0_151, %c0_152, %c0_153] : memref<2x16x128xf32, #tpu.memory_space<vmem>>, vector<2x16x128xf32>
      tpu.vector_store %arg12[%c0_151, %c0_152, %c0_153], %576 {strides = array<i32>} : memref<2x16x128xf32, #tpu.memory_space<vmem>>, vector<2x16x128xf32>,
    } else {
    }
    %c0 = arith.constant 0 : index
    %c0_1 = arith.constant 0 : index
    %c0_2 = arith.constant 0 : index
    %3 = vector.load %arg2[%c0, %c0_1, %c0_2] : memref<8x16x128xbf16, #tpu.memory_space<vmem>>, vector<8x16x128xbf16>
    %4 = vector.shape_cast %3 : vector<8x16x128xbf16> to vector<128x128xbf16>
    %c0_3 = arith.constant 0 : index
    %c0_4 = arith.constant 0 : index
    %5 = vector.load %arg3[%c0_3, %c0_4] : memref<128x512xbf16, #tpu.memory_space<vmem>>, vector<128x512xbf16>
    %cst = arith.constant dense<0.000000e+00> : vector<128x512xf32>
    %6 = tpu.matmul %4, %5, %cst {dimension_numbers = #tpu.dot_dimension_numbers<[1], [0], [0], [1], [0, 0, 1, 1], [], []>} : vector<128x128xbf16>, vector<128x512xbf16>, vector<128x512xf32> -> vector<128x512xf32>
    %c0_5 = arith.constant 0 : index
    %c0_6 = arith.constant 0 : index
    %7 = vector.load %arg7[%c0_5, %c0_6] : memref<1x512xf32, #tpu.memory_space<vmem>>, vector<1x512xf32>
    %8 = vector.broadcast %7 : vector<1x512xf32> to vector<128x512xf32>
    %9 = arith.addf %6, %8 : vector<128x512xf32>
    %10 = vector.shape_cast %9 : vector<128x512xf32> to vector<8x16x512xf32>
    %c0_7 = arith.constant 0 : index
    %c0_8 = arith.constant 0 : index
    %c0_9 = arith.constant 0 : index
    %11 = vector.load %arg10[%c0_7, %c0_8, %c0_9] : memref<8x16x512xf32, #tpu.memory_space<vmem>>, vector<8x16x512xf32>
    tpu.vector_store %arg10[%c0_7, %c0_8, %c0_9], %10 {strides = array<i32>} : memref<8x16x512xf32, #tpu.memory_space<vmem>>, vector<8x16x512xf32>,
    %c0_10 = arith.constant 0 : index
    %c0_11 = arith.constant 0 : index
    %12 = vector.load %arg4[%c0_10, %c0_11] : memref<128x512xbf16, #tpu.memory_space<vmem>>, vector<128x512xbf16>
    %c0_12 = arith.constant 0 : index
    %c0_13 = arith.constant 0 : index
    %13 = vector.load %arg5[%c0_12, %c0_13] : memref<128x512xbf16, #tpu.memory_space<vmem>>, vector<128x512xbf16>
    %c0_14 = arith.constant 0 : index
    %c0_15 = arith.constant 0 : index
    %14 = vector.load %arg6[%c0_14, %c0_15] : memref<128x512xbf16, #tpu.memory_space<vmem>>, vector<128x512xbf16>
    %c0_16 = arith.constant 0 : index
    %c0_17 = arith.constant 0 : index
    %15 = vector.load %arg8[%c0_16, %c0_17] : memref<1x512xf32, #tpu.memory_space<vmem>>, vector<1x512xf32>
    %16 = vector.shape_cast %15 : vector<1x512xf32> to vector<1x512xf32>
    %17 = vector.broadcast %16 : vector<1x512xf32> to vector<16x512xf32>
    %c0_18 = arith.constant 0 : index
    %c0_19 = arith.constant 0 : index
    %c0_20 = arith.constant 0 : index
    %18 = vector.load %arg11[%c0_18, %c0_19, %c0_20] : memref<2x16x128xf32, #tpu.memory_space<vmem>>, vector<1x16x128xf32>
    %19 = vector.shape_cast %18 : vector<1x16x128xf32> to vector<16x128xf32>
    %c0_21 = arith.constant 0 : index
    %c0_22 = arith.constant 0 : index
    %c0_23 = arith.constant 0 : index
    %20 = vector.load %arg12[%c0_21, %c0_22, %c0_23] : memref<2x16x128xf32, #tpu.memory_space<vmem>>, vector<1x16x128xf32>
    %21 = vector.shape_cast %20 : vector<1x16x128xf32> to vector<16x128xf32>
    %c1 = arith.constant 1 : index
    %c0_24 = arith.constant 0 : index
    %c0_25 = arith.constant 0 : index
    %22 = vector.load %arg11[%c1, %c0_24, %c0_25] : memref<2x16x128xf32, #tpu.memory_space<vmem>>, vector<1x16x128xf32>
    %23 = vector.shape_cast %22 : vector<1x16x128xf32> to vector<16x128xf32>
    %c1_26 = arith.constant 1 : index
    %c0_27 = arith.constant 0 : index
    %c0_28 = arith.constant 0 : index
    %24 = vector.load %arg12[%c1_26, %c0_27, %c0_28] : memref<2x16x128xf32, #tpu.memory_space<vmem>>, vector<1x16x128xf32>
    %25 = vector.shape_cast %24 : vector<1x16x128xf32> to vector<16x128xf32>
    %c0_i32_29 = arith.constant 0 : i32
    %26 = arith.truncf %23 : vector<16x128xf32> to vector<16x128xbf16>
    %cst_30 = arith.constant dense<0.000000e+00> : vector<16x512xf32>
    %27 = tpu.matmul %26, %14, %cst_30 {dimension_numbers = #tpu.dot_dimension_numbers<[1], [0], [0], [1], [0, 0, 1, 1], [], []>} : vector<16x128xbf16>, vector<128x512xbf16>, vector<16x512xf32> -> vector<16x512xf32>
    %28 = arith.index_cast %c0_i32_29 : i32 to index
    %c0_31 = arith.constant 0 : index
    %c0_32 = arith.constant 0 : index
    %29 = vector.load %arg10[%28, %c0_31, %c0_32] : memref<8x16x512xf32, #tpu.memory_space<vmem>>, vector<1x16x512xf32>
    %30 = vector.shape_cast %29 : vector<1x16x512xf32> to vector<16x512xf32>
    %31 = arith.truncf %19 : vector<16x128xf32> to vector<16x128xbf16>
    %cst_33 = arith.constant dense<0.000000e+00> : vector<16x512xf32>
    %32 = tpu.matmul %31, %12, %cst_33 {dimension_numbers = #tpu.dot_dimension_numbers<[1], [0], [0], [1], [0, 0, 1, 1], [], []>} : vector<16x128xbf16>, vector<128x512xbf16>, vector<16x512xf32> -> vector<16x512xf32>
    %33 = arith.addf %30, %32 : vector<16x512xf32>
    %34 = vector.extract_strided_slice %33 {offsets = [0, 0], sizes = [16, 128], strides = [1, 1]} : vector<16x512xf32> to vector<16x128xf32>
    %35 = arith.negf %34 : vector<16x128xf32>
    %36 = math.exp %35 : vector<16x128xf32>
    %cst_34 = arith.constant 1.000000e+00 : f32
    %37 = vector.broadcast %cst_34 : f32 to vector<16x128xf32>
    %38 = arith.addf %37, %36 : vector<16x128xf32>
    %39 = arith.divf %37, %38 : vector<16x128xf32>
    %40 = vector.extract_strided_slice %33 {offsets = [0, 128], sizes = [16, 128], strides = [1, 1]} : vector<16x512xf32> to vector<16x128xf32>
    %41 = arith.negf %40 : vector<16x128xf32>
    %42 = math.exp %41 : vector<16x128xf32>
    %cst_35 = arith.constant 1.000000e+00 : f32
    %43 = vector.broadcast %cst_35 : f32 to vector<16x128xf32>
    %44 = arith.addf %43, %42 : vector<16x128xf32>
    %45 = arith.divf %43, %44 : vector<16x128xf32>
    %46 = vector.extract_strided_slice %33 {offsets = [0, 256], sizes = [16, 128], strides = [1, 1]} : vector<16x512xf32> to vector<16x128xf32>
    %47 = math.tanh %46 : vector<16x128xf32>
    %48 = vector.extract_strided_slice %33 {offsets = [0, 384], sizes = [16, 128], strides = [1, 1]} : vector<16x512xf32> to vector<16x128xf32>
    %49 = arith.negf %48 : vector<16x128xf32>
    %50 = math.exp %49 : vector<16x128xf32>
    %cst_36 = arith.constant 1.000000e+00 : f32
    %51 = vector.broadcast %cst_36 : f32 to vector<16x128xf32>
    %52 = arith.addf %51, %50 : vector<16x128xf32>
    %53 = arith.divf %51, %52 : vector<16x128xf32>
    %54 = arith.mulf %45, %21 : vector<16x128xf32>
    %55 = arith.mulf %39, %47 : vector<16x128xf32>
    %56 = arith.addf %54, %55 : vector<16x128xf32>
    %57 = math.tanh %56 : vector<16x128xf32>
    %58 = arith.mulf %53, %57 : vector<16x128xf32>
    %59 = arith.truncf %58 : vector<16x128xf32> to vector<16x128xbf16>
    %cst_37 = arith.constant dense<0.000000e+00> : vector<16x512xf32>
    %60 = tpu.matmul %59, %13, %cst_37 {dimension_numbers = #tpu.dot_dimension_numbers<[1], [0], [0], [1], [0, 0, 1, 1], [], []>} : vector<16x128xbf16>, vector<128x512xbf16>, vector<16x512xf32> -> vector<16x512xf32>
    %61 = arith.addf %27, %60 : vector<16x512xf32>
    %62 = arith.addf %61, %17 : vector<16x512xf32>
    %63 = vector.extract_strided_slice %62 {offsets = [0, 0], sizes = [16, 128], strides = [1, 1]} : vector<16x512xf32> to vector<16x128xf32>
    %64 = arith.negf %63 : vector<16x128xf32>
    %65 = math.exp %64 : vector<16x128xf32>
    %cst_38 = arith.constant 1.000000e+00 : f32
    %66 = vector.broadcast %cst_38 : f32 to vector<16x128xf32>
    %67 = arith.addf %66, %65 : vector<16x128xf32>
    %68 = arith.divf %66, %67 : vector<16x128xf32>
    %69 = vector.extract_strided_slice %62 {offsets = [0, 128], sizes = [16, 128], strides = [1, 1]} : vector<16x512xf32> to vector<16x128xf32>
    %70 = arith.negf %69 : vector<16x128xf32>
    %71 = math.exp %70 : vector<16x128xf32>
    %cst_39 = arith.constant 1.000000e+00 : f32
    %72 = vector.broadcast %cst_39 : f32 to vector<16x128xf32>
    %73 = arith.addf %72, %71 : vector<16x128xf32>
    %74 = arith.divf %72, %73 : vector<16x128xf32>
    %75 = vector.extract_strided_slice %62 {offsets = [0, 256], sizes = [16, 128], strides = [1, 1]} : vector<16x512xf32> to vector<16x128xf32>
    %76 = math.tanh %75 : vector<16x128xf32>
    %77 = vector.extract_strided_slice %62 {offsets = [0, 384], sizes = [16, 128], strides = [1, 1]} : vector<16x512xf32> to vector<16x128xf32>
    %78 = arith.negf %77 : vector<16x128xf32>
    %79 = math.exp %78 : vector<16x128xf32>
    %cst_40 = arith.constant 1.000000e+00 : f32
    %80 = vector.broadcast %cst_40 : f32 to vector<16x128xf32>
    %81 = arith.addf %80, %79 : vector<16x128xf32>
    %82 = arith.divf %80, %81 : vector<16x128xf32>
    %83 = arith.mulf %74, %25 : vector<16x128xf32>
    %84 = arith.mulf %68, %76 : vector<16x128xf32>
    %85 = arith.addf %83, %84 : vector<16x128xf32>
    %86 = math.tanh %85 : vector<16x128xf32>
    %87 = arith.mulf %82, %86 : vector<16x128xf32>
    %88 = arith.truncf %87 : vector<16x128xf32> to vector<16x128xbf16>
    %89 = arith.index_cast %c0_i32_29 : i32 to index
    %c0_41 = arith.constant 0 : index
    %c0_42 = arith.constant 0 : index
    %90 = vector.load %arg9[%89, %c0_41, %c0_42] : memref<8x16x128xbf16, #tpu.memory_space<vmem>>, vector<1x16x128xbf16>
    %91 = vector.shape_cast %90 : vector<1x16x128xbf16> to vector<16x128xbf16>
    %92 = vector.shape_cast %88 : vector<16x128xbf16> to vector<1x16x128xbf16>
    tpu.vector_store %arg9[%89, %c0_41, %c0_42], %92 {strides = array<i32>} : memref<8x16x128xbf16, #tpu.memory_space<vmem>>, vector<1x16x128xbf16>,
    %c1_i32 = arith.constant 1 : i32
    %93 = arith.truncf %87 : vector<16x128xf32> to vector<16x128xbf16>
    %cst_43 = arith.constant dense<0.000000e+00> : vector<16x512xf32>
    %94 = tpu.matmul %93, %14, %cst_43 {dimension_numbers = #tpu.dot_dimension_numbers<[1], [0], [0], [1], [0, 0, 1, 1], [], []>} : vector<16x128xbf16>, vector<128x512xbf16>, vector<16x512xf32> -> vector<16x512xf32>
    %95 = arith.index_cast %c1_i32 : i32 to index
    %c0_44 = arith.constant 0 : index
    %c0_45 = arith.constant 0 : index
    %96 = vector.load %arg10[%95, %c0_44, %c0_45] : memref<8x16x512xf32, #tpu.memory_space<vmem>>, vector<1x16x512xf32>
    %97 = vector.shape_cast %96 : vector<1x16x512xf32> to vector<16x512xf32>
    %98 = arith.truncf %58 : vector<16x128xf32> to vector<16x128xbf16>
    %cst_46 = arith.constant dense<0.000000e+00> : vector<16x512xf32>
    %99 = tpu.matmul %98, %12, %cst_46 {dimension_numbers = #tpu.dot_dimension_numbers<[1], [0], [0], [1], [0, 0, 1, 1], [], []>} : vector<16x128xbf16>, vector<128x512xbf16>, vector<16x512xf32> -> vector<16x512xf32>
    %100 = arith.addf %97, %99 : vector<16x512xf32>
    %101 = vector.extract_strided_slice %100 {offsets = [0, 0], sizes = [16, 128], strides = [1, 1]} : vector<16x512xf32> to vector<16x128xf32>
    %102 = arith.negf %101 : vector<16x128xf32>
    %103 = math.exp %102 : vector<16x128xf32>
    %cst_47 = arith.constant 1.000000e+00 : f32
    %104 = vector.broadcast %cst_47 : f32 to vector<16x128xf32>
    %105 = arith.addf %104, %103 : vector<16x128xf32>
    %106 = arith.divf %104, %105 : vector<16x128xf32>
    %107 = vector.extract_strided_slice %100 {offsets = [0, 128], sizes = [16, 128], strides = [1, 1]} : vector<16x512xf32> to vector<16x128xf32>
    %108 = arith.negf %107 : vector<16x128xf32>
    %109 = math.exp %108 : vector<16x128xf32>
    %cst_48 = arith.constant 1.000000e+00 : f32
    %110 = vector.broadcast %cst_48 : f32 to vector<16x128xf32>
    %111 = arith.addf %110, %109 : vector<16x128xf32>
    %112 = arith.divf %110, %111 : vector<16x128xf32>
    %113 = vector.extract_strided_slice %100 {offsets = [0, 256], sizes = [16, 128], strides = [1, 1]} : vector<16x512xf32> to vector<16x128xf32>
    %114 = math.tanh %113 : vector<16x128xf32>
    %115 = vector.extract_strided_slice %100 {offsets = [0, 384], sizes = [16, 128], strides = [1, 1]} : vector<16x512xf32> to vector<16x128xf32>
    %116 = arith.negf %115 : vector<16x128xf32>
    %117 = math.exp %116 : vector<16x128xf32>
    %cst_49 = arith.constant 1.000000e+00 : f32
    %118 = vector.broadcast %cst_49 : f32 to vector<16x128xf32>
    %119 = arith.addf %118, %117 : vector<16x128xf32>
    %120 = arith.divf %118, %119 : vector<16x128xf32>
    %121 = arith.mulf %112, %56 : vector<16x128xf32>
    %122 = arith.mulf %106, %114 : vector<16x128xf32>
    %123 = arith.addf %121, %122 : vector<16x128xf32>
    %124 = math.tanh %123 : vector<16x128xf32>
    %125 = arith.mulf %120, %124 : vector<16x128xf32>
    %126 = arith.truncf %125 : vector<16x128xf32> to vector<16x128xbf16>
    %cst_50 = arith.constant dense<0.000000e+00> : vector<16x512xf32>
    %127 = tpu.matmul %126, %13, %cst_50 {dimension_numbers = #tpu.dot_dimension_numbers<[1], [0], [0], [1], [0, 0, 1, 1], [], []>} : vector<16x128xbf16>, vector<128x512xbf16>, vector<16x512xf32> -> vector<16x512xf32>
    %128 = arith.addf %94, %127 : vector<16x512xf32>
    %129 = arith.addf %128, %17 : vector<16x512xf32>
    %130 = vector.extract_strided_slice %129 {offsets = [0, 0], sizes = [16, 128], strides = [1, 1]} : vector<16x512xf32> to vector<16x128xf32>
    %131 = arith.negf %130 : vector<16x128xf32>
    %132 = math.exp %131 : vector<16x128xf32>
    %cst_51 = arith.constant 1.000000e+00 : f32
    %133 = vector.broadcast %cst_51 : f32 to vector<16x128xf32>
    %134 = arith.addf %133, %132 : vector<16x128xf32>
    %135 = arith.divf %133, %134 : vector<16x128xf32>
    %136 = vector.extract_strided_slice %129 {offsets = [0, 128], sizes = [16, 128], strides = [1, 1]} : vector<16x512xf32> to vector<16x128xf32>
    %137 = arith.negf %136 : vector<16x128xf32>
    %138 = math.exp %137 : vector<16x128xf32>
    %cst_52 = arith.constant 1.000000e+00 : f32
    %139 = vector.broadcast %cst_52 : f32 to vector<16x128xf32>
    %140 = arith.addf %139, %138 : vector<16x128xf32>
    %141 = arith.divf %139, %140 : vector<16x128xf32>
    %142 = vector.extract_strided_slice %129 {offsets = [0, 256], sizes = [16, 128], strides = [1, 1]} : vector<16x512xf32> to vector<16x128xf32>
    %143 = math.tanh %142 : vector<16x128xf32>
    %144 = vector.extract_strided_slice %129 {offsets = [0, 384], sizes = [16, 128], strides = [1, 1]} : vector<16x512xf32> to vector<16x128xf32>
    %145 = arith.negf %144 : vector<16x128xf32>
    %146 = math.exp %145 : vector<16x128xf32>
    %cst_53 = arith.constant 1.000000e+00 : f32
    %147 = vector.broadcast %cst_53 : f32 to vector<16x128xf32>
    %148 = arith.addf %147, %146 : vector<16x128xf32>
    %149 = arith.divf %147, %148 : vector<16x128xf32>
    %150 = arith.mulf %141, %85 : vector<16x128xf32>
    %151 = arith.mulf %135, %143 : vector<16x128xf32>
    %152 = arith.addf %150, %151 : vector<16x128xf32>
    %153 = math.tanh %152 : vector<16x128xf32>
    %154 = arith.mulf %149, %153 : vector<16x128xf32>
    %155 = arith.truncf %154 : vector<16x128xf32> to vector<16x128xbf16>
    %156 = arith.index_cast %c1_i32 : i32 to index
    %c0_54 = arith.constant 0 : index
    %c0_55 = arith.constant 0 : index
    %157 = vector.load %arg9[%156, %c0_54, %c0_55] : memref<8x16x128xbf16, #tpu.memory_space<vmem>>, vector<1x16x128xbf16>
    %158 = vector.shape_cast %157 : vector<1x16x128xbf16> to vector<16x128xbf16>
    %159 = vector.shape_cast %155 : vector<16x128xbf16> to vector<1x16x128xbf16>
    tpu.vector_store %arg9[%156, %c0_54, %c0_55], %159 {strides = array<i32>} : memref<8x16x128xbf16, #tpu.memory_space<vmem>>, vector<1x16x128xbf16>,
    %c2_i32 = arith.constant 2 : i32
    %160 = arith.truncf %154 : vector<16x128xf32> to vector<16x128xbf16>
    %cst_56 = arith.constant dense<0.000000e+00> : vector<16x512xf32>
    %161 = tpu.matmul %160, %14, %cst_56 {dimension_numbers = #tpu.dot_dimension_numbers<[1], [0], [0], [1], [0, 0, 1, 1], [], []>} : vector<16x128xbf16>, vector<128x512xbf16>, vector<16x512xf32> -> vector<16x512xf32>
    %162 = arith.index_cast %c2_i32 : i32 to index
    %c0_57 = arith.constant 0 : index
    %c0_58 = arith.constant 0 : index
    %163 = vector.load %arg10[%162, %c0_57, %c0_58] : memref<8x16x512xf32, #tpu.memory_space<vmem>>, vector<1x16x512xf32>
    %164 = vector.shape_cast %163 : vector<1x16x512xf32> to vector<16x512xf32>
    %165 = arith.truncf %125 : vector<16x128xf32> to vector<16x128xbf16>
    %cst_59 = arith.constant dense<0.000000e+00> : vector<16x512xf32>
    %166 = tpu.matmul %165, %12, %cst_59 {dimension_numbers = #tpu.dot_dimension_numbers<[1], [0], [0], [1], [0, 0, 1, 1], [], []>} : vector<16x128xbf16>, vector<128x512xbf16>, vector<16x512xf32> -> vector<16x512xf32>
    %167 = arith.addf %164, %166 : vector<16x512xf32>
    %168 = vector.extract_strided_slice %167 {offsets = [0, 0], sizes = [16, 128], strides = [1, 1]} : vector<16x512xf32> to vector<16x128xf32>
    %169 = arith.negf %168 : vector<16x128xf32>
    %170 = math.exp %169 : vector<16x128xf32>
    %cst_60 = arith.constant 1.000000e+00 : f32
    %171 = vector.broadcast %cst_60 : f32 to vector<16x128xf32>
    %172 = arith.addf %171, %170 : vector<16x128xf32>
    %173 = arith.divf %171, %172 : vector<16x128xf32>
    %174 = vector.extract_strided_slice %167 {offsets = [0, 128], sizes = [16, 128], strides = [1, 1]} : vector<16x512xf32> to vector<16x128xf32>
    %175 = arith.negf %174 : vector<16x128xf32>
    %176 = math.exp %175 : vector<16x128xf32>
    %cst_61 = arith.constant 1.000000e+00 : f32
    %177 = vector.broadcast %cst_61 : f32 to vector<16x128xf32>
    %178 = arith.addf %177, %176 : vector<16x128xf32>
    %179 = arith.divf %177, %178 : vector<16x128xf32>
    %180 = vector.extract_strided_slice %167 {offsets = [0, 256], sizes = [16, 128], strides = [1, 1]} : vector<16x512xf32> to vector<16x128xf32>
    %181 = math.tanh %180 : vector<16x128xf32>
    %182 = vector.extract_strided_slice %167 {offsets = [0, 384], sizes = [16, 128], strides = [1, 1]} : vector<16x512xf32> to vector<16x128xf32>
    %183 = arith.negf %182 : vector<16x128xf32>
    %184 = math.exp %183 : vector<16x128xf32>
    %cst_62 = arith.constant 1.000000e+00 : f32
    %185 = vector.broadcast %cst_62 : f32 to vector<16x128xf32>
    %186 = arith.addf %185, %184 : vector<16x128xf32>
    %187 = arith.divf %185, %186 : vector<16x128xf32>
    %188 = arith.mulf %179, %123 : vector<16x128xf32>
    %189 = arith.mulf %173, %181 : vector<16x128xf32>
    %190 = arith.addf %188, %189 : vector<16x128xf32>
    %191 = math.tanh %190 : vector<16x128xf32>
    %192 = arith.mulf %187, %191 : vector<16x128xf32>
    %193 = arith.truncf %192 : vector<16x128xf32> to vector<16x128xbf16>
    %cst_63 = arith.constant dense<0.000000e+00> : vector<16x512xf32>
    %194 = tpu.matmul %193, %13, %cst_63 {dimension_numbers = #tpu.dot_dimension_numbers<[1], [0], [0], [1], [0, 0, 1, 1], [], []>} : vector<16x128xbf16>, vector<128x512xbf16>, vector<16x512xf32> -> vector<16x512xf32>
    %195 = arith.addf %161, %194 : vector<16x512xf32>
    %196 = arith.addf %195, %17 : vector<16x512xf32>
    %197 = vector.extract_strided_slice %196 {offsets = [0, 0], sizes = [16, 128], strides = [1, 1]} : vector<16x512xf32> to vector<16x128xf32>
    %198 = arith.negf %197 : vector<16x128xf32>
    %199 = math.exp %198 : vector<16x128xf32>
    %cst_64 = arith.constant 1.000000e+00 : f32
    %200 = vector.broadcast %cst_64 : f32 to vector<16x128xf32>
    %201 = arith.addf %200, %199 : vector<16x128xf32>
    %202 = arith.divf %200, %201 : vector<16x128xf32>
    %203 = vector.extract_strided_slice %196 {offsets = [0, 128], sizes = [16, 128], strides = [1, 1]} : vector<16x512xf32> to vector<16x128xf32>
    %204 = arith.negf %203 : vector<16x128xf32>
    %205 = math.exp %204 : vector<16x128xf32>
    %cst_65 = arith.constant 1.000000e+00 : f32
    %206 = vector.broadcast %cst_65 : f32 to vector<16x128xf32>
    %207 = arith.addf %206, %205 : vector<16x128xf32>
    %208 = arith.divf %206, %207 : vector<16x128xf32>
    %209 = vector.extract_strided_slice %196 {offsets = [0, 256], sizes = [16, 128], strides = [1, 1]} : vector<16x512xf32> to vector<16x128xf32>
    %210 = math.tanh %209 : vector<16x128xf32>
    %211 = vector.extract_strided_slice %196 {offsets = [0, 384], sizes = [16, 128], strides = [1, 1]} : vector<16x512xf32> to vector<16x128xf32>
    %212 = arith.negf %211 : vector<16x128xf32>
    %213 = math.exp %212 : vector<16x128xf32>
    %cst_66 = arith.constant 1.000000e+00 : f32
    %214 = vector.broadcast %cst_66 : f32 to vector<16x128xf32>
    %215 = arith.addf %214, %213 : vector<16x128xf32>
    %216 = arith.divf %214, %215 : vector<16x128xf32>
    %217 = arith.mulf %208, %152 : vector<16x128xf32>
    %218 = arith.mulf %202, %210 : vector<16x128xf32>
    %219 = arith.addf %217, %218 : vector<16x128xf32>
    %220 = math.tanh %219 : vector<16x128xf32>
    %221 = arith.mulf %216, %220 : vector<16x128xf32>
    %222 = arith.truncf %221 : vector<16x128xf32> to vector<16x128xbf16>
    %223 = arith.index_cast %c2_i32 : i32 to index
    %c0_67 = arith.constant 0 : index
    %c0_68 = arith.constant 0 : index
    %224 = vector.load %arg9[%223, %c0_67, %c0_68] : memref<8x16x128xbf16, #tpu.memory_space<vmem>>, vector<1x16x128xbf16>
    %225 = vector.shape_cast %224 : vector<1x16x128xbf16> to vector<16x128xbf16>
    %226 = vector.shape_cast %222 : vector<16x128xbf16> to vector<1x16x128xbf16>
    tpu.vector_store %arg9[%223, %c0_67, %c0_68], %226 {strides = array<i32>} : memref<8x16x128xbf16, #tpu.memory_space<vmem>>, vector<1x16x128xbf16>,
    %c3_i32 = arith.constant 3 : i32
    %227 = arith.truncf %221 : vector<16x128xf32> to vector<16x128xbf16>
    %cst_69 = arith.constant dense<0.000000e+00> : vector<16x512xf32>
    %228 = tpu.matmul %227, %14, %cst_69 {dimension_numbers = #tpu.dot_dimension_numbers<[1], [0], [0], [1], [0, 0, 1, 1], [], []>} : vector<16x128xbf16>, vector<128x512xbf16>, vector<16x512xf32> -> vector<16x512xf32>
    %229 = arith.index_cast %c3_i32 : i32 to index
    %c0_70 = arith.constant 0 : index
    %c0_71 = arith.constant 0 : index
    %230 = vector.load %arg10[%229, %c0_70, %c0_71] : memref<8x16x512xf32, #tpu.memory_space<vmem>>, vector<1x16x512xf32>
    %231 = vector.shape_cast %230 : vector<1x16x512xf32> to vector<16x512xf32>
    %232 = arith.truncf %192 : vector<16x128xf32> to vector<16x128xbf16>
    %cst_72 = arith.constant dense<0.000000e+00> : vector<16x512xf32>
    %233 = tpu.matmul %232, %12, %cst_72 {dimension_numbers = #tpu.dot_dimension_numbers<[1], [0], [0], [1], [0, 0, 1, 1], [], []>} : vector<16x128xbf16>, vector<128x512xbf16>, vector<16x512xf32> -> vector<16x512xf32>
    %234 = arith.addf %231, %233 : vector<16x512xf32>
    %235 = vector.extract_strided_slice %234 {offsets = [0, 0], sizes = [16, 128], strides = [1, 1]} : vector<16x512xf32> to vector<16x128xf32>
    %236 = arith.negf %235 : vector<16x128xf32>
    %237 = math.exp %236 : vector<16x128xf32>
    %cst_73 = arith.constant 1.000000e+00 : f32
    %238 = vector.broadcast %cst_73 : f32 to vector<16x128xf32>
    %239 = arith.addf %238, %237 : vector<16x128xf32>
    %240 = arith.divf %238, %239 : vector<16x128xf32>
    %241 = vector.extract_strided_slice %234 {offsets = [0, 128], sizes = [16, 128], strides = [1, 1]} : vector<16x512xf32> to vector<16x128xf32>
    %242 = arith.negf %241 : vector<16x128xf32>
    %243 = math.exp %242 : vector<16x128xf32>
    %cst_74 = arith.constant 1.000000e+00 : f32
    %244 = vector.broadcast %cst_74 : f32 to vector<16x128xf32>
    %245 = arith.addf %244, %243 : vector<16x128xf32>
    %246 = arith.divf %244, %245 : vector<16x128xf32>
    %247 = vector.extract_strided_slice %234 {offsets = [0, 256], sizes = [16, 128], strides = [1, 1]} : vector<16x512xf32> to vector<16x128xf32>
    %248 = math.tanh %247 : vector<16x128xf32>
    %249 = vector.extract_strided_slice %234 {offsets = [0, 384], sizes = [16, 128], strides = [1, 1]} : vector<16x512xf32> to vector<16x128xf32>
    %250 = arith.negf %249 : vector<16x128xf32>
    %251 = math.exp %250 : vector<16x128xf32>
    %cst_75 = arith.constant 1.000000e+00 : f32
    %252 = vector.broadcast %cst_75 : f32 to vector<16x128xf32>
    %253 = arith.addf %252, %251 : vector<16x128xf32>
    %254 = arith.divf %252, %253 : vector<16x128xf32>
    %255 = arith.mulf %246, %190 : vector<16x128xf32>
    %256 = arith.mulf %240, %248 : vector<16x128xf32>
    %257 = arith.addf %255, %256 : vector<16x128xf32>
    %258 = math.tanh %257 : vector<16x128xf32>
    %259 = arith.mulf %254, %258 : vector<16x128xf32>
    %260 = arith.truncf %259 : vector<16x128xf32> to vector<16x128xbf16>
    %cst_76 = arith.constant dense<0.000000e+00> : vector<16x512xf32>
    %261 = tpu.matmul %260, %13, %cst_76 {dimension_numbers = #tpu.dot_dimension_numbers<[1], [0], [0], [1], [0, 0, 1, 1], [], []>} : vector<16x128xbf16>, vector<128x512xbf16>, vector<16x512xf32> -> vector<16x512xf32>
    %262 = arith.addf %228, %261 : vector<16x512xf32>
    %263 = arith.addf %262, %17 : vector<16x512xf32>
    %264 = vector.extract_strided_slice %263 {offsets = [0, 0], sizes = [16, 128], strides = [1, 1]} : vector<16x512xf32> to vector<16x128xf32>
    %265 = arith.negf %264 : vector<16x128xf32>
    %266 = math.exp %265 : vector<16x128xf32>
    %cst_77 = arith.constant 1.000000e+00 : f32
    %267 = vector.broadcast %cst_77 : f32 to vector<16x128xf32>
    %268 = arith.addf %267, %266 : vector<16x128xf32>
    %269 = arith.divf %267, %268 : vector<16x128xf32>
    %270 = vector.extract_strided_slice %263 {offsets = [0, 128], sizes = [16, 128], strides = [1, 1]} : vector<16x512xf32> to vector<16x128xf32>
    %271 = arith.negf %270 : vector<16x128xf32>
    %272 = math.exp %271 : vector<16x128xf32>
    %cst_78 = arith.constant 1.000000e+00 : f32
    %273 = vector.broadcast %cst_78 : f32 to vector<16x128xf32>
    %274 = arith.addf %273, %272 : vector<16x128xf32>
    %275 = arith.divf %273, %274 : vector<16x128xf32>
    %276 = vector.extract_strided_slice %263 {offsets = [0, 256], sizes = [16, 128], strides = [1, 1]} : vector<16x512xf32> to vector<16x128xf32>
    %277 = math.tanh %276 : vector<16x128xf32>
    %278 = vector.extract_strided_slice %263 {offsets = [0, 384], sizes = [16, 128], strides = [1, 1]} : vector<16x512xf32> to vector<16x128xf32>
    %279 = arith.negf %278 : vector<16x128xf32>
    %280 = math.exp %279 : vector<16x128xf32>
    %cst_79 = arith.constant 1.000000e+00 : f32
    %281 = vector.broadcast %cst_79 : f32 to vector<16x128xf32>
    %282 = arith.addf %281, %280 : vector<16x128xf32>
    %283 = arith.divf %281, %282 : vector<16x128xf32>
    %284 = arith.mulf %275, %219 : vector<16x128xf32>
    %285 = arith.mulf %269, %277 : vector<16x128xf32>
    %286 = arith.addf %284, %285 : vector<16x128xf32>
    %287 = math.tanh %286 : vector<16x128xf32>
    %288 = arith.mulf %283, %287 : vector<16x128xf32>
    %289 = arith.truncf %288 : vector<16x128xf32> to vector<16x128xbf16>
    %290 = arith.index_cast %c3_i32 : i32 to index
    %c0_80 = arith.constant 0 : index
    %c0_81 = arith.constant 0 : index
    %291 = vector.load %arg9[%290, %c0_80, %c0_81] : memref<8x16x128xbf16, #tpu.memory_space<vmem>>, vector<1x16x128xbf16>
    %292 = vector.shape_cast %291 : vector<1x16x128xbf16> to vector<16x128xbf16>
    %293 = vector.shape_cast %289 : vector<16x128xbf16> to vector<1x16x128xbf16>
    tpu.vector_store %arg9[%290, %c0_80, %c0_81], %293 {strides = array<i32>} : memref<8x16x128xbf16, #tpu.memory_space<vmem>>, vector<1x16x128xbf16>,
    %c4_i32 = arith.constant 4 : i32
    %294 = arith.truncf %288 : vector<16x128xf32> to vector<16x128xbf16>
    %cst_82 = arith.constant dense<0.000000e+00> : vector<16x512xf32>
    %295 = tpu.matmul %294, %14, %cst_82 {dimension_numbers = #tpu.dot_dimension_numbers<[1], [0], [0], [1], [0, 0, 1, 1], [], []>} : vector<16x128xbf16>, vector<128x512xbf16>, vector<16x512xf32> -> vector<16x512xf32>
    %296 = arith.index_cast %c4_i32 : i32 to index
    %c0_83 = arith.constant 0 : index
    %c0_84 = arith.constant 0 : index
    %297 = vector.load %arg10[%296, %c0_83, %c0_84] : memref<8x16x512xf32, #tpu.memory_space<vmem>>, vector<1x16x512xf32>
    %298 = vector.shape_cast %297 : vector<1x16x512xf32> to vector<16x512xf32>
    %299 = arith.truncf %259 : vector<16x128xf32> to vector<16x128xbf16>
    %cst_85 = arith.constant dense<0.000000e+00> : vector<16x512xf32>
    %300 = tpu.matmul %299, %12, %cst_85 {dimension_numbers = #tpu.dot_dimension_numbers<[1], [0], [0], [1], [0, 0, 1, 1], [], []>} : vector<16x128xbf16>, vector<128x512xbf16>, vector<16x512xf32> -> vector<16x512xf32>
    %301 = arith.addf %298, %300 : vector<16x512xf32>
    %302 = vector.extract_strided_slice %301 {offsets = [0, 0], sizes = [16, 128], strides = [1, 1]} : vector<16x512xf32> to vector<16x128xf32>
    %303 = arith.negf %302 : vector<16x128xf32>
    %304 = math.exp %303 : vector<16x128xf32>
    %cst_86 = arith.constant 1.000000e+00 : f32
    %305 = vector.broadcast %cst_86 : f32 to vector<16x128xf32>
    %306 = arith.addf %305, %304 : vector<16x128xf32>
    %307 = arith.divf %305, %306 : vector<16x128xf32>
    %308 = vector.extract_strided_slice %301 {offsets = [0, 128], sizes = [16, 128], strides = [1, 1]} : vector<16x512xf32> to vector<16x128xf32>
    %309 = arith.negf %308 : vector<16x128xf32>
    %310 = math.exp %309 : vector<16x128xf32>
    %cst_87 = arith.constant 1.000000e+00 : f32
    %311 = vector.broadcast %cst_87 : f32 to vector<16x128xf32>
    %312 = arith.addf %311, %310 : vector<16x128xf32>
    %313 = arith.divf %311, %312 : vector<16x128xf32>
    %314 = vector.extract_strided_slice %301 {offsets = [0, 256], sizes = [16, 128], strides = [1, 1]} : vector<16x512xf32> to vector<16x128xf32>
    %315 = math.tanh %314 : vector<16x128xf32>
    %316 = vector.extract_strided_slice %301 {offsets = [0, 384], sizes = [16, 128], strides = [1, 1]} : vector<16x512xf32> to vector<16x128xf32>
    %317 = arith.negf %316 : vector<16x128xf32>
    %318 = math.exp %317 : vector<16x128xf32>
    %cst_88 = arith.constant 1.000000e+00 : f32
    %319 = vector.broadcast %cst_88 : f32 to vector<16x128xf32>
    %320 = arith.addf %319, %318 : vector<16x128xf32>
    %321 = arith.divf %319, %320 : vector<16x128xf32>
    %322 = arith.mulf %313, %257 : vector<16x128xf32>
    %323 = arith.mulf %307, %315 : vector<16x128xf32>
    %324 = arith.addf %322, %323 : vector<16x128xf32>
    %325 = math.tanh %324 : vector<16x128xf32>
    %326 = arith.mulf %321, %325 : vector<16x128xf32>
    %327 = arith.truncf %326 : vector<16x128xf32> to vector<16x128xbf16>
    %cst_89 = arith.constant dense<0.000000e+00> : vector<16x512xf32>
    %328 = tpu.matmul %327, %13, %cst_89 {dimension_numbers = #tpu.dot_dimension_numbers<[1], [0], [0], [1], [0, 0, 1, 1], [], []>} : vector<16x128xbf16>, vector<128x512xbf16>, vector<16x512xf32> -> vector<16x512xf32>
    %329 = arith.addf %295, %328 : vector<16x512xf32>
    %330 = arith.addf %329, %17 : vector<16x512xf32>
    %331 = vector.extract_strided_slice %330 {offsets = [0, 0], sizes = [16, 128], strides = [1, 1]} : vector<16x512xf32> to vector<16x128xf32>
    %332 = arith.negf %331 : vector<16x128xf32>
    %333 = math.exp %332 : vector<16x128xf32>
    %cst_90 = arith.constant 1.000000e+00 : f32
    %334 = vector.broadcast %cst_90 : f32 to vector<16x128xf32>
    %335 = arith.addf %334, %333 : vector<16x128xf32>
    %336 = arith.divf %334, %335 : vector<16x128xf32>
    %337 = vector.extract_strided_slice %330 {offsets = [0, 128], sizes = [16, 128], strides = [1, 1]} : vector<16x512xf32> to vector<16x128xf32>
    %338 = arith.negf %337 : vector<16x128xf32>
    %339 = math.exp %338 : vector<16x128xf32>
    %cst_91 = arith.constant 1.000000e+00 : f32
    %340 = vector.broadcast %cst_91 : f32 to vector<16x128xf32>
    %341 = arith.addf %340, %339 : vector<16x128xf32>
    %342 = arith.divf %340, %341 : vector<16x128xf32>
    %343 = vector.extract_strided_slice %330 {offsets = [0, 256], sizes = [16, 128], strides = [1, 1]} : vector<16x512xf32> to vector<16x128xf32>
    %344 = math.tanh %343 : vector<16x128xf32>
    %345 = vector.extract_strided_slice %330 {offsets = [0, 384], sizes = [16, 128], strides = [1, 1]} : vector<16x512xf32> to vector<16x128xf32>
    %346 = arith.negf %345 : vector<16x128xf32>
    %347 = math.exp %346 : vector<16x128xf32>
    %cst_92 = arith.constant 1.000000e+00 : f32
    %348 = vector.broadcast %cst_92 : f32 to vector<16x128xf32>
    %349 = arith.addf %348, %347 : vector<16x128xf32>
    %350 = arith.divf %348, %349 : vector<16x128xf32>
    %351 = arith.mulf %342, %286 : vector<16x128xf32>
    %352 = arith.mulf %336, %344 : vector<16x128xf32>
    %353 = arith.addf %351, %352 : vector<16x128xf32>
    %354 = math.tanh %353 : vector<16x128xf32>
    %355 = arith.mulf %350, %354 : vector<16x128xf32>
    %356 = arith.truncf %355 : vector<16x128xf32> to vector<16x128xbf16>
    %357 = arith.index_cast %c4_i32 : i32 to index
    %c0_93 = arith.constant 0 : index
    %c0_94 = arith.constant 0 : index
    %358 = vector.load %arg9[%357, %c0_93, %c0_94] : memref<8x16x128xbf16, #tpu.memory_space<vmem>>, vector<1x16x128xbf16>
    %359 = vector.shape_cast %358 : vector<1x16x128xbf16> to vector<16x128xbf16>
    %360 = vector.shape_cast %356 : vector<16x128xbf16> to vector<1x16x128xbf16>
    tpu.vector_store %arg9[%357, %c0_93, %c0_94], %360 {strides = array<i32>} : memref<8x16x128xbf16, #tpu.memory_space<vmem>>, vector<1x16x128xbf16>,
    %c5_i32 = arith.constant 5 : i32
    %361 = arith.truncf %355 : vector<16x128xf32> to vector<16x128xbf16>
    %cst_95 = arith.constant dense<0.000000e+00> : vector<16x512xf32>
    %362 = tpu.matmul %361, %14, %cst_95 {dimension_numbers = #tpu.dot_dimension_numbers<[1], [0], [0], [1], [0, 0, 1, 1], [], []>} : vector<16x128xbf16>, vector<128x512xbf16>, vector<16x512xf32> -> vector<16x512xf32>
    %363 = arith.index_cast %c5_i32 : i32 to index
    %c0_96 = arith.constant 0 : index
    %c0_97 = arith.constant 0 : index
    %364 = vector.load %arg10[%363, %c0_96, %c0_97] : memref<8x16x512xf32, #tpu.memory_space<vmem>>, vector<1x16x512xf32>
    %365 = vector.shape_cast %364 : vector<1x16x512xf32> to vector<16x512xf32>
    %366 = arith.truncf %326 : vector<16x128xf32> to vector<16x128xbf16>
    %cst_98 = arith.constant dense<0.000000e+00> : vector<16x512xf32>
    %367 = tpu.matmul %366, %12, %cst_98 {dimension_numbers = #tpu.dot_dimension_numbers<[1], [0], [0], [1], [0, 0, 1, 1], [], []>} : vector<16x128xbf16>, vector<128x512xbf16>, vector<16x512xf32> -> vector<16x512xf32>
    %368 = arith.addf %365, %367 : vector<16x512xf32>
    %369 = vector.extract_strided_slice %368 {offsets = [0, 0], sizes = [16, 128], strides = [1, 1]} : vector<16x512xf32> to vector<16x128xf32>
    %370 = arith.negf %369 : vector<16x128xf32>
    %371 = math.exp %370 : vector<16x128xf32>
    %cst_99 = arith.constant 1.000000e+00 : f32
    %372 = vector.broadcast %cst_99 : f32 to vector<16x128xf32>
    %373 = arith.addf %372, %371 : vector<16x128xf32>
    %374 = arith.divf %372, %373 : vector<16x128xf32>
    %375 = vector.extract_strided_slice %368 {offsets = [0, 128], sizes = [16, 128], strides = [1, 1]} : vector<16x512xf32> to vector<16x128xf32>
    %376 = arith.negf %375 : vector<16x128xf32>
    %377 = math.exp %376 : vector<16x128xf32>
    %cst_100 = arith.constant 1.000000e+00 : f32
    %378 = vector.broadcast %cst_100 : f32 to vector<16x128xf32>
    %379 = arith.addf %378, %377 : vector<16x128xf32>
    %380 = arith.divf %378, %379 : vector<16x128xf32>
    %381 = vector.extract_strided_slice %368 {offsets = [0, 256], sizes = [16, 128], strides = [1, 1]} : vector<16x512xf32> to vector<16x128xf32>
    %382 = math.tanh %381 : vector<16x128xf32>
    %383 = vector.extract_strided_slice %368 {offsets = [0, 384], sizes = [16, 128], strides = [1, 1]} : vector<16x512xf32> to vector<16x128xf32>
    %384 = arith.negf %383 : vector<16x128xf32>
    %385 = math.exp %384 : vector<16x128xf32>
    %cst_101 = arith.constant 1.000000e+00 : f32
    %386 = vector.broadcast %cst_101 : f32 to vector<16x128xf32>
    %387 = arith.addf %386, %385 : vector<16x128xf32>
    %388 = arith.divf %386, %387 : vector<16x128xf32>
    %389 = arith.mulf %380, %324 : vector<16x128xf32>
    %390 = arith.mulf %374, %382 : vector<16x128xf32>
    %391 = arith.addf %389, %390 : vector<16x128xf32>
    %392 = math.tanh %391 : vector<16x128xf32>
    %393 = arith.mulf %388, %392 : vector<16x128xf32>
    %394 = arith.truncf %393 : vector<16x128xf32> to vector<16x128xbf16>
    %cst_102 = arith.constant dense<0.000000e+00> : vector<16x512xf32>
    %395 = tpu.matmul %394, %13, %cst_102 {dimension_numbers = #tpu.dot_dimension_numbers<[1], [0], [0], [1], [0, 0, 1, 1], [], []>} : vector<16x128xbf16>, vector<128x512xbf16>, vector<16x512xf32> -> vector<16x512xf32>
    %396 = arith.addf %362, %395 : vector<16x512xf32>
    %397 = arith.addf %396, %17 : vector<16x512xf32>
    %398 = vector.extract_strided_slice %397 {offsets = [0, 0], sizes = [16, 128], strides = [1, 1]} : vector<16x512xf32> to vector<16x128xf32>
    %399 = arith.negf %398 : vector<16x128xf32>
    %400 = math.exp %399 : vector<16x128xf32>
    %cst_103 = arith.constant 1.000000e+00 : f32
    %401 = vector.broadcast %cst_103 : f32 to vector<16x128xf32>
    %402 = arith.addf %401, %400 : vector<16x128xf32>
    %403 = arith.divf %401, %402 : vector<16x128xf32>
    %404 = vector.extract_strided_slice %397 {offsets = [0, 128], sizes = [16, 128], strides = [1, 1]} : vector<16x512xf32> to vector<16x128xf32>
    %405 = arith.negf %404 : vector<16x128xf32>
    %406 = math.exp %405 : vector<16x128xf32>
    %cst_104 = arith.constant 1.000000e+00 : f32
    %407 = vector.broadcast %cst_104 : f32 to vector<16x128xf32>
    %408 = arith.addf %407, %406 : vector<16x128xf32>
    %409 = arith.divf %407, %408 : vector<16x128xf32>
    %410 = vector.extract_strided_slice %397 {offsets = [0, 256], sizes = [16, 128], strides = [1, 1]} : vector<16x512xf32> to vector<16x128xf32>
    %411 = math.tanh %410 : vector<16x128xf32>
    %412 = vector.extract_strided_slice %397 {offsets = [0, 384], sizes = [16, 128], strides = [1, 1]} : vector<16x512xf32> to vector<16x128xf32>
    %413 = arith.negf %412 : vector<16x128xf32>
    %414 = math.exp %413 : vector<16x128xf32>
    %cst_105 = arith.constant 1.000000e+00 : f32
    %415 = vector.broadcast %cst_105 : f32 to vector<16x128xf32>
    %416 = arith.addf %415, %414 : vector<16x128xf32>
    %417 = arith.divf %415, %416 : vector<16x128xf32>
    %418 = arith.mulf %409, %353 : vector<16x128xf32>
    %419 = arith.mulf %403, %411 : vector<16x128xf32>
    %420 = arith.addf %418, %419 : vector<16x128xf32>
    %421 = math.tanh %420 : vector<16x128xf32>
    %422 = arith.mulf %417, %421 : vector<16x128xf32>
    %423 = arith.truncf %422 : vector<16x128xf32> to vector<16x128xbf16>
    %424 = arith.index_cast %c5_i32 : i32 to index
    %c0_106 = arith.constant 0 : index
    %c0_107 = arith.constant 0 : index
    %425 = vector.load %arg9[%424, %c0_106, %c0_107] : memref<8x16x128xbf16, #tpu.memory_space<vmem>>, vector<1x16x128xbf16>
    %426 = vector.shape_cast %425 : vector<1x16x128xbf16> to vector<16x128xbf16>
    %427 = vector.shape_cast %423 : vector<16x128xbf16> to vector<1x16x128xbf16>
    tpu.vector_store %arg9[%424, %c0_106, %c0_107], %427 {strides = array<i32>} : memref<8x16x128xbf16, #tpu.memory_space<vmem>>, vector<1x16x128xbf16>,
    %c6_i32 = arith.constant 6 : i32
    %428 = arith.truncf %422 : vector<16x128xf32> to vector<16x128xbf16>
    %cst_108 = arith.constant dense<0.000000e+00> : vector<16x512xf32>
    %429 = tpu.matmul %428, %14, %cst_108 {dimension_numbers = #tpu.dot_dimension_numbers<[1], [0], [0], [1], [0, 0, 1, 1], [], []>} : vector<16x128xbf16>, vector<128x512xbf16>, vector<16x512xf32> -> vector<16x512xf32>
    %430 = arith.index_cast %c6_i32 : i32 to index
    %c0_109 = arith.constant 0 : index
    %c0_110 = arith.constant 0 : index
    %431 = vector.load %arg10[%430, %c0_109, %c0_110] : memref<8x16x512xf32, #tpu.memory_space<vmem>>, vector<1x16x512xf32>
    %432 = vector.shape_cast %431 : vector<1x16x512xf32> to vector<16x512xf32>
    %433 = arith.truncf %393 : vector<16x128xf32> to vector<16x128xbf16>
    %cst_111 = arith.constant dense<0.000000e+00> : vector<16x512xf32>
    %434 = tpu.matmul %433, %12, %cst_111 {dimension_numbers = #tpu.dot_dimension_numbers<[1], [0], [0], [1], [0, 0, 1, 1], [], []>} : vector<16x128xbf16>, vector<128x512xbf16>, vector<16x512xf32> -> vector<16x512xf32>
    %435 = arith.addf %432, %434 : vector<16x512xf32>
    %436 = vector.extract_strided_slice %435 {offsets = [0, 0], sizes = [16, 128], strides = [1, 1]} : vector<16x512xf32> to vector<16x128xf32>
    %437 = arith.negf %436 : vector<16x128xf32>
    %438 = math.exp %437 : vector<16x128xf32>
    %cst_112 = arith.constant 1.000000e+00 : f32
    %439 = vector.broadcast %cst_112 : f32 to vector<16x128xf32>
    %440 = arith.addf %439, %438 : vector<16x128xf32>
    %441 = arith.divf %439, %440 : vector<16x128xf32>
    %442 = vector.extract_strided_slice %435 {offsets = [0, 128], sizes = [16, 128], strides = [1, 1]} : vector<16x512xf32> to vector<16x128xf32>
    %443 = arith.negf %442 : vector<16x128xf32>
    %444 = math.exp %443 : vector<16x128xf32>
    %cst_113 = arith.constant 1.000000e+00 : f32
    %445 = vector.broadcast %cst_113 : f32 to vector<16x128xf32>
    %446 = arith.addf %445, %444 : vector<16x128xf32>
    %447 = arith.divf %445, %446 : vector<16x128xf32>
    %448 = vector.extract_strided_slice %435 {offsets = [0, 256], sizes = [16, 128], strides = [1, 1]} : vector<16x512xf32> to vector<16x128xf32>
    %449 = math.tanh %448 : vector<16x128xf32>
    %450 = vector.extract_strided_slice %435 {offsets = [0, 384], sizes = [16, 128], strides = [1, 1]} : vector<16x512xf32> to vector<16x128xf32>
    %451 = arith.negf %450 : vector<16x128xf32>
    %452 = math.exp %451 : vector<16x128xf32>
    %cst_114 = arith.constant 1.000000e+00 : f32
    %453 = vector.broadcast %cst_114 : f32 to vector<16x128xf32>
    %454 = arith.addf %453, %452 : vector<16x128xf32>
    %455 = arith.divf %453, %454 : vector<16x128xf32>
    %456 = arith.mulf %447, %391 : vector<16x128xf32>
    %457 = arith.mulf %441, %449 : vector<16x128xf32>
    %458 = arith.addf %456, %457 : vector<16x128xf32>
    %459 = math.tanh %458 : vector<16x128xf32>
    %460 = arith.mulf %455, %459 : vector<16x128xf32>
    %461 = arith.truncf %460 : vector<16x128xf32> to vector<16x128xbf16>
    %cst_115 = arith.constant dense<0.000000e+00> : vector<16x512xf32>
    %462 = tpu.matmul %461, %13, %cst_115 {dimension_numbers = #tpu.dot_dimension_numbers<[1], [0], [0], [1], [0, 0, 1, 1], [], []>} : vector<16x128xbf16>, vector<128x512xbf16>, vector<16x512xf32> -> vector<16x512xf32>
    %463 = arith.addf %429, %462 : vector<16x512xf32>
    %464 = arith.addf %463, %17 : vector<16x512xf32>
    %465 = vector.extract_strided_slice %464 {offsets = [0, 0], sizes = [16, 128], strides = [1, 1]} : vector<16x512xf32> to vector<16x128xf32>
    %466 = arith.negf %465 : vector<16x128xf32>
    %467 = math.exp %466 : vector<16x128xf32>
    %cst_116 = arith.constant 1.000000e+00 : f32
    %468 = vector.broadcast %cst_116 : f32 to vector<16x128xf32>
    %469 = arith.addf %468, %467 : vector<16x128xf32>
    %470 = arith.divf %468, %469 : vector<16x128xf32>
    %471 = vector.extract_strided_slice %464 {offsets = [0, 128], sizes = [16, 128], strides = [1, 1]} : vector<16x512xf32> to vector<16x128xf32>
    %472 = arith.negf %471 : vector<16x128xf32>
    %473 = math.exp %472 : vector<16x128xf32>
    %cst_117 = arith.constant 1.000000e+00 : f32
    %474 = vector.broadcast %cst_117 : f32 to vector<16x128xf32>
    %475 = arith.addf %474, %473 : vector<16x128xf32>
    %476 = arith.divf %474, %475 : vector<16x128xf32>
    %477 = vector.extract_strided_slice %464 {offsets = [0, 256], sizes = [16, 128], strides = [1, 1]} : vector<16x512xf32> to vector<16x128xf32>
    %478 = math.tanh %477 : vector<16x128xf32>
    %479 = vector.extract_strided_slice %464 {offsets = [0, 384], sizes = [16, 128], strides = [1, 1]} : vector<16x512xf32> to vector<16x128xf32>
    %480 = arith.negf %479 : vector<16x128xf32>
    %481 = math.exp %480 : vector<16x128xf32>
    %cst_118 = arith.constant 1.000000e+00 : f32
    %482 = vector.broadcast %cst_118 : f32 to vector<16x128xf32>
    %483 = arith.addf %482, %481 : vector<16x128xf32>
    %484 = arith.divf %482, %483 : vector<16x128xf32>
    %485 = arith.mulf %476, %420 : vector<16x128xf32>
    %486 = arith.mulf %470, %478 : vector<16x128xf32>
    %487 = arith.addf %485, %486 : vector<16x128xf32>
    %488 = math.tanh %487 : vector<16x128xf32>
    %489 = arith.mulf %484, %488 : vector<16x128xf32>
    %490 = arith.truncf %489 : vector<16x128xf32> to vector<16x128xbf16>
    %491 = arith.index_cast %c6_i32 : i32 to index
    %c0_119 = arith.constant 0 : index
    %c0_120 = arith.constant 0 : index
    %492 = vector.load %arg9[%491, %c0_119, %c0_120] : memref<8x16x128xbf16, #tpu.memory_space<vmem>>, vector<1x16x128xbf16>
    %493 = vector.shape_cast %492 : vector<1x16x128xbf16> to vector<16x128xbf16>
    %494 = vector.shape_cast %490 : vector<16x128xbf16> to vector<1x16x128xbf16>
    tpu.vector_store %arg9[%491, %c0_119, %c0_120], %494 {strides = array<i32>} : memref<8x16x128xbf16, #tpu.memory_space<vmem>>, vector<1x16x128xbf16>,
    %c7_i32 = arith.constant 7 : i32
    %495 = arith.truncf %489 : vector<16x128xf32> to vector<16x128xbf16>
    %cst_121 = arith.constant dense<0.000000e+00> : vector<16x512xf32>
    %496 = tpu.matmul %495, %14, %cst_121 {dimension_numbers = #tpu.dot_dimension_numbers<[1], [0], [0], [1], [0, 0, 1, 1], [], []>} : vector<16x128xbf16>, vector<128x512xbf16>, vector<16x512xf32> -> vector<16x512xf32>
    %497 = arith.index_cast %c7_i32 : i32 to index
    %c0_122 = arith.constant 0 : index
    %c0_123 = arith.constant 0 : index
    %498 = vector.load %arg10[%497, %c0_122, %c0_123] : memref<8x16x512xf32, #tpu.memory_space<vmem>>, vector<1x16x512xf32>
    %499 = vector.shape_cast %498 : vector<1x16x512xf32> to vector<16x512xf32>
    %500 = arith.truncf %460 : vector<16x128xf32> to vector<16x128xbf16>
    %cst_124 = arith.constant dense<0.000000e+00> : vector<16x512xf32>
    %501 = tpu.matmul %500, %12, %cst_124 {dimension_numbers = #tpu.dot_dimension_numbers<[1], [0], [0], [1], [0, 0, 1, 1], [], []>} : vector<16x128xbf16>, vector<128x512xbf16>, vector<16x512xf32> -> vector<16x512xf32>
    %502 = arith.addf %499, %501 : vector<16x512xf32>
    %503 = vector.extract_strided_slice %502 {offsets = [0, 0], sizes = [16, 128], strides = [1, 1]} : vector<16x512xf32> to vector<16x128xf32>
    %504 = arith.negf %503 : vector<16x128xf32>
    %505 = math.exp %504 : vector<16x128xf32>
    %cst_125 = arith.constant 1.000000e+00 : f32
    %506 = vector.broadcast %cst_125 : f32 to vector<16x128xf32>
    %507 = arith.addf %506, %505 : vector<16x128xf32>
    %508 = arith.divf %506, %507 : vector<16x128xf32>
    %509 = vector.extract_strided_slice %502 {offsets = [0, 128], sizes = [16, 128], strides = [1, 1]} : vector<16x512xf32> to vector<16x128xf32>
    %510 = arith.negf %509 : vector<16x128xf32>
    %511 = math.exp %510 : vector<16x128xf32>
    %cst_126 = arith.constant 1.000000e+00 : f32
    %512 = vector.broadcast %cst_126 : f32 to vector<16x128xf32>
    %513 = arith.addf %512, %511 : vector<16x128xf32>
    %514 = arith.divf %512, %513 : vector<16x128xf32>
    %515 = vector.extract_strided_slice %502 {offsets = [0, 256], sizes = [16, 128], strides = [1, 1]} : vector<16x512xf32> to vector<16x128xf32>
    %516 = math.tanh %515 : vector<16x128xf32>
    %517 = vector.extract_strided_slice %502 {offsets = [0, 384], sizes = [16, 128], strides = [1, 1]} : vector<16x512xf32> to vector<16x128xf32>
    %518 = arith.negf %517 : vector<16x128xf32>
    %519 = math.exp %518 : vector<16x128xf32>
    %cst_127 = arith.constant 1.000000e+00 : f32
    %520 = vector.broadcast %cst_127 : f32 to vector<16x128xf32>
    %521 = arith.addf %520, %519 : vector<16x128xf32>
    %522 = arith.divf %520, %521 : vector<16x128xf32>
    %523 = arith.mulf %514, %458 : vector<16x128xf32>
    %524 = arith.mulf %508, %516 : vector<16x128xf32>
    %525 = arith.addf %523, %524 : vector<16x128xf32>
    %526 = math.tanh %525 : vector<16x128xf32>
    %527 = arith.mulf %522, %526 : vector<16x128xf32>
    %528 = arith.truncf %527 : vector<16x128xf32> to vector<16x128xbf16>
    %cst_128 = arith.constant dense<0.000000e+00> : vector<16x512xf32>
    %529 = tpu.matmul %528, %13, %cst_128 {dimension_numbers = #tpu.dot_dimension_numbers<[1], [0], [0], [1], [0, 0, 1, 1], [], []>} : vector<16x128xbf16>, vector<128x512xbf16>, vector<16x512xf32> -> vector<16x512xf32>
    %530 = arith.addf %496, %529 : vector<16x512xf32>
    %531 = arith.addf %530, %17 : vector<16x512xf32>
    %532 = vector.extract_strided_slice %531 {offsets = [0, 0], sizes = [16, 128], strides = [1, 1]} : vector<16x512xf32> to vector<16x128xf32>
    %533 = arith.negf %532 : vector<16x128xf32>
    %534 = math.exp %533 : vector<16x128xf32>
    %cst_129 = arith.constant 1.000000e+00 : f32
    %535 = vector.broadcast %cst_129 : f32 to vector<16x128xf32>
    %536 = arith.addf %535, %534 : vector<16x128xf32>
    %537 = arith.divf %535, %536 : vector<16x128xf32>
    %538 = vector.extract_strided_slice %531 {offsets = [0, 128], sizes = [16, 128], strides = [1, 1]} : vector<16x512xf32> to vector<16x128xf32>
    %539 = arith.negf %538 : vector<16x128xf32>
    %540 = math.exp %539 : vector<16x128xf32>
    %cst_130 = arith.constant 1.000000e+00 : f32
    %541 = vector.broadcast %cst_130 : f32 to vector<16x128xf32>
    %542 = arith.addf %541, %540 : vector<16x128xf32>
    %543 = arith.divf %541, %542 : vector<16x128xf32>
    %544 = vector.extract_strided_slice %531 {offsets = [0, 256], sizes = [16, 128], strides = [1, 1]} : vector<16x512xf32> to vector<16x128xf32>
    %545 = math.tanh %544 : vector<16x128xf32>
    %546 = vector.extract_strided_slice %531 {offsets = [0, 384], sizes = [16, 128], strides = [1, 1]} : vector<16x512xf32> to vector<16x128xf32>
    %547 = arith.negf %546 : vector<16x128xf32>
    %548 = math.exp %547 : vector<16x128xf32>
    %cst_131 = arith.constant 1.000000e+00 : f32
    %549 = vector.broadcast %cst_131 : f32 to vector<16x128xf32>
    %550 = arith.addf %549, %548 : vector<16x128xf32>
    %551 = arith.divf %549, %550 : vector<16x128xf32>
    %552 = arith.mulf %543, %487 : vector<16x128xf32>
    %553 = arith.mulf %537, %545 : vector<16x128xf32>
    %554 = arith.addf %552, %553 : vector<16x128xf32>
    %555 = math.tanh %554 : vector<16x128xf32>
    %556 = arith.mulf %551, %555 : vector<16x128xf32>
    %557 = arith.truncf %556 : vector<16x128xf32> to vector<16x128xbf16>
    %558 = arith.index_cast %c7_i32 : i32 to index
    %c0_132 = arith.constant 0 : index
    %c0_133 = arith.constant 0 : index
    %559 = vector.load %arg9[%558, %c0_132, %c0_133] : memref<8x16x128xbf16, #tpu.memory_space<vmem>>, vector<1x16x128xbf16>
    %560 = vector.shape_cast %559 : vector<1x16x128xbf16> to vector<16x128xbf16>
    %561 = vector.shape_cast %557 : vector<16x128xbf16> to vector<1x16x128xbf16>
    tpu.vector_store %arg9[%558, %c0_132, %c0_133], %561 {strides = array<i32>} : memref<8x16x128xbf16, #tpu.memory_space<vmem>>, vector<1x16x128xbf16>,
    %c8_i32 = arith.constant 8 : i32
    %c0_134 = arith.constant 0 : index
    %c0_135 = arith.constant 0 : index
    %c0_136 = arith.constant 0 : index
    %562 = vector.load %arg11[%c0_134, %c0_135, %c0_136] : memref<2x16x128xf32, #tpu.memory_space<vmem>>, vector<1x16x128xf32>
    %563 = vector.shape_cast %562 : vector<1x16x128xf32> to vector<16x128xf32>
    %564 = vector.shape_cast %527 : vector<16x128xf32> to vector<1x16x128xf32>
    tpu.vector_store %arg11[%c0_134, %c0_135, %c0_136], %564 {strides = array<i32>} : memref<2x16x128xf32, #tpu.memory_space<vmem>>, vector<1x16x128xf32>,
    %c0_137 = arith.constant 0 : index
    %c0_138 = arith.constant 0 : index
    %c0_139 = arith.constant 0 : index
    %565 = vector.load %arg12[%c0_137, %c0_138, %c0_139] : memref<2x16x128xf32, #tpu.memory_space<vmem>>, vector<1x16x128xf32>
    %566 = vector.shape_cast %565 : vector<1x16x128xf32> to vector<16x128xf32>
    %567 = vector.shape_cast %525 : vector<16x128xf32> to vector<1x16x128xf32>
    tpu.vector_store %arg12[%c0_137, %c0_138, %c0_139], %567 {strides = array<i32>} : memref<2x16x128xf32, #tpu.memory_space<vmem>>, vector<1x16x128xf32>,
    %c1_140 = arith.constant 1 : index
    %c0_141 = arith.constant 0 : index
    %c0_142 = arith.constant 0 : index
    %568 = vector.load %arg11[%c1_140, %c0_141, %c0_142] : memref<2x16x128xf32, #tpu.memory_space<vmem>>, vector<1x16x128xf32>
    %569 = vector.shape_cast %568 : vector<1x16x128xf32> to vector<16x128xf32>
    %570 = vector.shape_cast %556 : vector<16x128xf32> to vector<1x16x128xf32>
    tpu.vector_store %arg11[%c1_140, %c0_141, %c0_142], %570 {strides = array<i32>} : memref<2x16x128xf32, #tpu.memory_space<vmem>>, vector<1x16x128xf32>,
    %c1_143 = arith.constant 1 : index
    %c0_144 = arith.constant 0 : index
    %c0_145 = arith.constant 0 : index
    %571 = vector.load %arg12[%c1_143, %c0_144, %c0_145] : memref<2x16x128xf32, #tpu.memory_space<vmem>>, vector<1x16x128xf32>
    %572 = vector.shape_cast %571 : vector<1x16x128xf32> to vector<16x128xf32>
    %573 = vector.shape_cast %554 : vector<16x128xf32> to vector<1x16x128xf32>
    tpu.vector_store %arg12[%c1_143, %c0_144, %c0_145], %573 {strides = array<i32>} : memref<2x16x128xf32, #tpu.memory_space<vmem>>, vector<1x16x128xf32>,
    return
  }
  func.func @transform_0(%arg0: i32, %arg1: i32) -> (i32, i32, i32) {
    %c0_i32 = arith.constant 0 : i32
    %c0_i32_0 = arith.constant 0 : i32
    return %arg1, %arg0, %c0_i32 : i32, i32, i32
  }
  func.func @transform_1(%arg0: i32, %arg1: i32) -> (i32, i32) {
    %c0_i32 = arith.constant 0 : i32
    %c0_i32_0 = arith.constant 0 : i32
    %c0_i32_1 = arith.constant 0 : i32
    return %c0_i32, %c0_i32_0 : i32, i32
  }
  func.func @transform_2(%arg0: i32, %arg1: i32) -> (i32, i32) {
    %c0_i32 = arith.constant 0 : i32
    %c0_i32_0 = arith.constant 0 : i32
    %c0_i32_1 = arith.constant 0 : i32
    return %c0_i32, %c0_i32_0 : i32, i32
  }
  func.func @transform_3(%arg0: i32, %arg1: i32) -> (i32, i32) {
    %c0_i32 = arith.constant 0 : i32
    %c0_i32_0 = arith.constant 0 : i32
    %c0_i32_1 = arith.constant 0 : i32
    return %c0_i32, %c0_i32_0 : i32, i32
  }
  func.func @transform_4(%arg0: i32, %arg1: i32) -> (i32, i32) {
    %c0_i32 = arith.constant 0 : i32
    %c0_i32_0 = arith.constant 0 : i32
    %c0_i32_1 = arith.constant 0 : i32
    return %c0_i32, %c0_i32_0 : i32, i32
  }
  func.func @transform_5(%arg0: i32, %arg1: i32) -> (i32, i32) {
    %c0_i32 = arith.constant 0 : i32
    %c0_i32_0 = arith.constant 0 : i32
    %c0_i32_1 = arith.constant 0 : i32
    return %c0_i32, %c0_i32_0 : i32, i32
  }
  func.func @transform_6(%arg0: i32, %arg1: i32) -> (i32, i32) {
    %c0_i32 = arith.constant 0 : i32
    %c0_i32_0 = arith.constant 0 : i32
    %c0_i32_1 = arith.constant 0 : i32
    return %c0_i32, %c0_i32_0 : i32, i32
  }
  func.func @transform_7(%arg0: i32, %arg1: i32) -> (i32, i32, i32) {
    %c0_i32 = arith.constant 0 : i32
    %c0_i32_0 = arith.constant 0 : i32
    return %arg1, %arg0, %c0_i32 : i32, i32, i32
  }
}

</mosaic_0001>

<bundles_post_ra>
// kernel: decoder_rnn_forward.3
= control target key start
LH: loop header
LB: loop body
LE: loop exit
PB: predicated region body
PF: predicated region fallthrough
CT: control target
= control target key end

     0   :  { %8 = vsyncpa [#allocation5], 0  ;;  %s2576_s0 = inlined_call_operand.hbm [shape: bf16[128,128], index: 0, kind: input, shape index: {}]   ;;  %s2577_s1 = inlined_call_operand.hbm [shape: bf16[128,256], index: 1, kind: input, shape index: {}]   ;;  %s2578_s2 = inlined_call_operand.hbm [shape: f32[1,256], index: 2, kind: input, shape index: {}]   ;;  %s2579_s3 = inlined_call_operand.hbm [shape: f32[128,256], index: 3, kind: output, shape index: {}]  }
   0x1   :  { %9 = vsyncpa [#allocation8], 0 }
   0x2   :  { %10 = vsyncpa [#allocation6], 0 }
   0x3   :  { %12 = vsyncpa [#allocation6 + $0x1], 0  ;;  %s1892_s12 = smov 0   ;;  %s1894_s13 = smov 0  }
   0x4   :  { %s1896_s14 = smov 0   ;;  %s1898_s15 = smov 0  }
   0x5   :  { %s1900_s16 = smov 0  }
   0x6 LB: > { %s1363_s17 = sadd.s32 4294967295, %s1855_s16   ;;  %s1364_s18 = sadd.s32 4294967294, %s1855_s16   ;;  %s1855_s16 = sphi %s1900_s16, %s18_s16   ;;  %s1851_s15 = sphi %s1898_s15, %s2678_s15   ;;  %s1847_s14 = sphi %s1896_s14, %s2677_s14   ;;  %s1843_s13 = sphi %s1894_s13, %s2566_s13   ;;  %s1839_s12 = sphi %s1892_s12, %s2676_s12  }
   0x7   : > { %s27_s19 = sadd.s32 1, %s1851_s15  ;;  %p1836_p1 = scmp.ne.s32.totalorder %s1843_s13, 0 }
   0x8   : > { %p28_p0 = scmp.ge.s32.totalorder %s27_s19, 2  ;;  %p124_p2 = scmp.eq.s32.totalorder %s1363_s17, 1 }
   0x9   : > { %p129_p3 = scmp.ne.s32.totalorder %s1843_s13, %s1839_s12  ;;  %p130_p5 = scmp.eq.s32.totalorder %s1364_s18, 1 }
   0xa   : > { %s2680_s19 = smov (%p28_p0, %s27_s19), 0  ;;  %p1925_p4 = por %p1836_p1, %p124_p2 }
   0xb   : > { %p1929_p6 = por %p130_p5, %p129_p3  ;;  %p1367_p7 = scmp.ge.s32.totalorder %s1855_s16, 1 }
   0xc   : > { %s2606_s20 = scalar_select %p1925_p4, 1, 0 }
   0xd   : > { %s2607_s21 = scalar_select %p1929_p6, 1, 0 }
   0xe   : > { %p137_p8 = scmp.lt.s32.totalorder %s1855_s16, 3  ;;  %p1939_p10 = scmp.eq.s32.totalorder %s1363_s17, 0 }
   0xf   : > { %s1857_s24 = smov [#allocation7]   ;;  %s1688_s29 = scalar_lea.hbm %s2577_s1, 2048 }
  0x10   : > { %p1935_p9 = pnand %p1367_p7, %p137_p8  ;;  %s165_s25 = sshll.u32 %s1857_s24, 4  ;;  %s166_s25 = int_to_ptr.vmem [resolvable:$true] %s165_s25 }
  0x11   : > { %s2609_s23 = scalar_select %p1939_p10, 1, 0 }
  0x12   : > { %s2608_s22 = scalar_select %p1935_p9, 1, 0 }
  0x13   : > { %p1441_p11 = pneg %p1935_p9  ;;  %p1689_p13 = scmp.ne.s32.totalorder %s2577_s1, %s1688_s29 }
  0x14   : > { %p1695_p3 = scmp.lt.u32.totalorder %s1688_s29, %s2577_s1 }
  0x15   : > { %p1947_p12 = pnand %p1939_p10, %p1441_p11 }
  0x17   : > { %p1959_p0 = pneg %p1947_p12 }
  0x19   : > { %p1691_p1 = pnand %p1959_p0, %p1689_p13 }
  0x1b   : > { %p1692_p2 = pneg %p1691_p1 }
  0x1d   : > { %p1697_p5 = pnand %p1695_p3, %p1692_p2 }
  0x1f   : > { %1700 = shalt.err (!%p1697_p5)
}
  0x20   : > { %s1701_s8 = scalar_lea.vmem %s166_s25, 2048  ;;  %p1709_p6 = scmp.lt.s32.totalorder %s166_s25, %s166_s25 }
  0x21   : > { %p1702_p7 = scmp.ne.s32.totalorder %s166_s25, %s1701_s8  ;;  %p1710_p4 = scmp.lt.s32.totalorder %s1701_s8, %s1701_s8 }
  0x23   : > { %p1704_p8 = pnand %p1702_p7, %p1959_p0  ;;  %p1711_p10 = por %p1710_p4, %p1709_p6 }
  0x25   : > { %p1705_p11 = pneg %p1704_p8 }
  0x27   : > { %p1712_p9 = pnand %p1711_p10, %p1705_p11 }
  0x29   : > { %1715 = shalt.err (!%p1712_p9)
}
  0x2a   : > { %s1858_s9 = smov 128   ;;  %s1859_s10 = smov 8  }
  0x2b   : > { %1447 = dma.hbm_to_vmem [thread:$0]  (!%p1947_p12), %s2577_s1, 2048, %s166_s25, [#allocation8], %s1858_s9, %s1858_s9, %s1859_s10  }
  0x2c   : > { %s1860_s18 = smov [#allocation4]   ;;  %s1716_s29 = scalar_lea.hbm %s2576_s0, 1024 }
  0x2d   : > { %s152_s24 = sshll.u32 %s1860_s18, 4  ;;  %p1717_p4 = scmp.ne.s32.totalorder %s2576_s0, %s1716_s29  ;;  %s153_s24 = int_to_ptr.vmem [resolvable:$true] %s152_s24 }
  0x2e   : > { %p1723_p10 = scmp.lt.u32.totalorder %s1716_s29, %s2576_s0 }
  0x2f   : > { %p1719_p6 = pnand %p1717_p4, %p1959_p0 }
  0x31   : > { %p1720_p9 = pneg %p1719_p6 }
  0x33   : > { %p1725_p13 = pnand %p1723_p10, %p1720_p9 }
  0x35   : > { %1728 = shalt.err (!%p1725_p13)
}
  0x36   : > { %s1729_s25 = scalar_lea.vmem %s153_s24, 1024  ;;  %p1737_p5 = scmp.lt.s32.totalorder %s153_s24, %s153_s24 }
  0x37   : > { %p1730_p1 = scmp.ne.s32.totalorder %s153_s24, %s1729_s25  ;;  %p1738_p7 = scmp.lt.s32.totalorder %s1729_s25, %s1729_s25 }
  0x39   : > { %p1732_p2 = pnand %p1730_p1, %p1959_p0  ;;  %p1739_p8 = por %p1738_p7, %p1737_p5 }
  0x3b   : > { %p1733_p3 = pneg %p1732_p2 }
  0x3d   : > { %p1740_p11 = pnand %p1739_p8, %p1733_p3 }
  0x3f   : > { %1743 = shalt.err (!%p1740_p11)
}
  0x40   : > { %s1861_s8 = smov 64   ;;  %s1862_s9 = smov 4  }
  0x41   : > { %1444 = dma.hbm_to_vmem [thread:$0]  (!%p1947_p12), %s2576_s0, 1024, %s153_s24, [#allocation5], %s1861_s8, %s1861_s8, %s1862_s9  }
  0x42   : > { %s1863_s17 = smov [#allocation9]   ;;  %s1744_s29 = scalar_lea.hbm %s2578_s2, 32 }
  0x43   : > { %s179_s18 = sshll.u32 %s1863_s17, 4  ;;  %p1745_p4 = scmp.ne.s32.totalorder %s2578_s2, %s1744_s29  ;;  %s180_s18 = int_to_ptr.vmem [resolvable:$true] %s179_s18 }
  0x44   : > { %p1751_p10 = scmp.lt.u32.totalorder %s1744_s29, %s2578_s2 }
  0x45   : > { %p1747_p6 = pnand %p1745_p4, %p1959_p0 }
  0x47   : > { %p1748_p9 = pneg %p1747_p6 }
  0x49   : > { %p1753_p13 = pnand %p1751_p10, %p1748_p9 }
  0x4b   : > { %1756 = shalt.err (!%p1753_p13)
}
  0x4c   : > { %s1757_s24 = scalar_lea.vmem %s180_s18, 32  ;;  %p1765_p5 = scmp.lt.s32.totalorder %s180_s18, %s180_s18 }
  0x4d   : > { %p1758_p1 = scmp.ne.s32.totalorder %s180_s18, %s1757_s24  ;;  %p1766_p7 = scmp.lt.s32.totalorder %s1757_s24, %s1757_s24 }
  0x4f   : > { %p1760_p2 = pnand %p1758_p1, %p1959_p0  ;;  %p1767_p8 = por %p1766_p7, %p1765_p5 }
  0x51   : > { %p1761_p3 = pneg %p1760_p2 }
  0x53   : > { %p1768_p11 = pnand %p1767_p8, %p1761_p3 }
  0x55   : > { %1771 = shalt.err (!%p1768_p11)
}
  0x56   : > { %1450 = dma.hbm_to_vmem [thread:$0]  (!%p1947_p12), %s2578_s2, 32, %s180_s18, [#allocation8]  }
  0x57   : > { %p2612_p4 = scmp.ne.s32.totalorder %s2608_s22, 0 }
  0x59   : > { %192 = sbr.rel (%p2612_p4) target bundleno = 1097 (0x449), region = 32 }
  0x60   : > { %p2613_p6 = scmp.ne.s32.totalorder %s2609_s23, 0 }
  0x62   : > { %1825 = dma.done.wait (%p2613_p6), [#allocation5], 1024  }
  0x63   : > { %1827 = vsyncadd (%p2613_p6), [#allocation5], 4294966272 }
  0x64   : > { %1829 = dma.done.wait (%p2613_p6), [#allocation8], 2080  }
  0x65   : > { %1831 = vsyncadd (%p2613_p6), [#allocation8], 4294965216  ;;  %s216_s26 = sand.u32 1, %s1843_s13   ;;  %p1376_p12 = scmp.ne.s32.totalorder %s1847_s14, 0 }
  0x66   : > { %s1375_s5 = sshll.u32 %s216_s26, 8  ;;  %vm230_vm0 = vcmask (!%p1376_p12), 7168   ;;  %v1864_v0 = vmov (!%p1376_p12), -inf   ;;  %v1865_v1 = vmov (!%p1376_p12), 0.0  }
  0x67   : > { %s2024_s9 = scalar_lea.vmem [#allocation10], %s1375_s5  ;;  %229 = sbr.rel (%p1376_p12) target bundleno = 119 (0x77), region = 48  ;;  %231 = vst.msk [vmem:[#allocation2] sm:$0xff] (!%p1376_p12), %vm230_vm0, %v1864_v0  ;;  %232 = vst.msk [vmem:[#allocation2 + $0x8] sm:$0xff] (!%p1376_p12), %vm230_vm0, %v1864_v0 }
  0x68   : > { %233 = vst.msk [vmem:[#allocation2 + $0x10] sm:$0xff] (!%p1376_p12), %vm230_vm0, %v1864_v0  ;;  %234 = vst.msk [vmem:[#allocation2 + $0x18] sm:$0xff] (!%p1376_p12), %vm230_vm0, %v1864_v0 }
  0x69   : > { %235 = vst.msk [vmem:[#allocation2 + $0x20] sm:$0xff] (!%p1376_p12), %vm230_vm0, %v1864_v0  ;;  %236 = vst.msk [vmem:[#allocation2 + $0x28] sm:$0xff] (!%p1376_p12), %vm230_vm0, %v1864_v0 }
  0x6a   : > { %237 = vst.msk [vmem:[#allocation2 + $0x30] sm:$0xff] (!%p1376_p12), %vm230_vm0, %v1864_v0  ;;  %238 = vst.msk [vmem:[#allocation2 + $0x38] sm:$0xff] (!%p1376_p12), %vm230_vm0, %v1864_v0 }
  0x6b   : > { %239 = vst.msk [vmem:[#allocation2 + $0x40] sm:$0xff] (!%p1376_p12), %vm230_vm0, %v1864_v0  ;;  %240 = vst.msk [vmem:[#allocation2 + $0x48] sm:$0xff] (!%p1376_p12), %vm230_vm0, %v1864_v0 }
  0x6c   : > { %241 = vst.msk [vmem:[#allocation2 + $0x50] sm:$0xff] (!%p1376_p12), %vm230_vm0, %v1864_v0  ;;  %242 = vst.msk [vmem:[#allocation2 + $0x58] sm:$0xff] (!%p1376_p12), %vm230_vm0, %v1864_v0 }
  0x6d   : > { %243 = vst.msk [vmem:[#allocation2 + $0x60] sm:$0xff] (!%p1376_p12), %vm230_vm0, %v1864_v0  ;;  %244 = vst.msk [vmem:[#allocation2 + $0x68] sm:$0xff] (!%p1376_p12), %vm230_vm0, %v1864_v0 }
  0x6e   : > { %245 = vst.msk [vmem:[#allocation2 + $0x70] sm:$0xff] %vm230_vm0, %v1864_v0  ;;  %246 = vst.msk [vmem:[#allocation2 + $0x78] sm:$0xff] %vm230_vm0, %v1864_v0 }
  0x6f   : > { %247 = vst.msk [vmem:[#allocation3] sm:$0xff] %vm230_vm0, %v1865_v1  ;;  %248 = vst.msk [vmem:[#allocation3 + $0x8] sm:$0xff] %vm230_vm0, %v1865_v1 }
  0x70   : > { %249 = vst.msk [vmem:[#allocation3 + $0x10] sm:$0xff] %vm230_vm0, %v1865_v1  ;;  %250 = vst.msk [vmem:[#allocation3 + $0x18] sm:$0xff] %vm230_vm0, %v1865_v1 }
  0x71   : > { %251 = vst.msk [vmem:[#allocation3 + $0x20] sm:$0xff] %vm230_vm0, %v1865_v1  ;;  %252 = vst.msk [vmem:[#allocation3 + $0x28] sm:$0xff] %vm230_vm0, %v1865_v1 }
  0x72   : > { %253 = vst.msk [vmem:[#allocation3 + $0x30] sm:$0xff] %vm230_vm0, %v1865_v1  ;;  %254 = vst.msk [vmem:[#allocation3 + $0x38] sm:$0xff] %vm230_vm0, %v1865_v1 }
  0x73   : > { %255 = vst.msk [vmem:[#allocation3 + $0x40] sm:$0xff] %vm230_vm0, %v1865_v1  ;;  %256 = vst.msk [vmem:[#allocation3 + $0x48] sm:$0xff] %vm230_vm0, %v1865_v1 }
  0x74   : > { %257 = vst.msk [vmem:[#allocation3 + $0x50] sm:$0xff] %vm230_vm0, %v1865_v1  ;;  %258 = vst.msk [vmem:[#allocation3 + $0x58] sm:$0xff] %vm230_vm0, %v1865_v1 }
  0x75   : > { %259 = vst.msk [vmem:[#allocation3 + $0x60] sm:$0xff] %vm230_vm0, %v1865_v1  ;;  %260 = vst.msk [vmem:[#allocation3 + $0x68] sm:$0xff] %vm230_vm0, %v1865_v1 }
  0x76   : > { %261 = vst.msk [vmem:[#allocation3 + $0x70] sm:$0xff] %vm230_vm0, %v1865_v1  ;;  %262 = vst.msk [vmem:[#allocation3 + $0x78] sm:$0xff] %vm230_vm0, %v1865_v1 }
  0x77 PF: > { %v1524_v2 = vld [vmem:[#allocation7 + $0x4] ss:$8 sps:$4 sm:$0xff]   ;;  %v1526_v3 = vld [vmem:[#allocation7] ss:$8 sps:$4 sm:$0xff]   ;;  %v1866_v4 = vmov 0   ;;  %v1552_v23 = vld [vmem:[#allocation4 + $0x10] sm:$0xff]   ;;  %v297_v27 = vlaneseq }
  0x78   : > { %467 = vmatprep.mubr.bf16.mxu0 %v1866_v4  ;;  %507 = vmatprep.mubr.bf16.mxu1 %v1866_v4  ;;  %v1527_v5 = vld [vmem:[#allocation7 + $0x14] ss:$8 sps:$4 sm:$0xff]   ;;  %v1529_v6 = vld [vmem:[#allocation7 + $0x10] ss:$8 sps:$4 sm:$0xff]   ;;  %v1530_v7 = vld [vmem:[#allocation7 + $0x24] ss:$8 sps:$4 sm:$0xff]  }
  0x79   : > { %435 = vmatprep.subr.bf16.mxu0 %v1524_v2  ;;  %1411 = vmatprep.subr.bf16.mxu1 %v1524_v2  ;;  %v1532_v8 = vld [vmem:[#allocation7 + $0x20] ss:$8 sps:$4 sm:$0xff]   ;;  %v1533_v9 = vld [vmem:[#allocation7 + $0x34] ss:$8 sps:$4 sm:$0xff]   ;;  %v1535_v10 = vld [vmem:[#allocation7 + $0x30] ss:$8 sps:$4 sm:$0xff]  }
  0x7a   : > { %436 = vmatpush1.bf16.msra.mxu0 %v1526_v3  ;;  %1419 = vmatpush1.bf16.msra.mxu1 %v1526_v3  ;;  %v1536_v11 = vld [vmem:[#allocation7 + $0x44] ss:$8 sps:$4 sm:$0xff]   ;;  %v1538_v12 = vld [vmem:[#allocation7 + $0x40] ss:$8 sps:$4 sm:$0xff]   ;;  %v1539_v13 = vld [vmem:[#allocation7 + $0x54] ss:$8 sps:$4 sm:$0xff]  }
  0x7b   : > { %437 = vmatprep.subr.bf16.mxu0 %v1527_v5  ;;  %1412 = vmatprep.subr.bf16.mxu1 %v1527_v5  ;;  %v1541_v14 = vld [vmem:[#allocation7 + $0x50] ss:$8 sps:$4 sm:$0xff]   ;;  %v1542_v15 = vld [vmem:[#allocation7 + $0x64] ss:$8 sps:$4 sm:$0xff]   ;;  %v1544_v16 = vld [vmem:[#allocation7 + $0x60] ss:$8 sps:$4 sm:$0xff]  }
  0x7c   : > { %v1545_v17 = vld [vmem:[#allocation7 + $0x74] ss:$8 sps:$4 sm:$0xff]   ;;  %v1547_v18 = vld [vmem:[#allocation7 + $0x70] ss:$8 sps:$4 sm:$0xff]   ;;  %v1548_v19 = vld [vmem:[#allocation4] sm:$0xff]   ;;  %v298_v28 = vshrl.u32 %v297_v27, 7 }
  0x7d   : > { %v1549_v20 = vld [vmem:[#allocation4 + $0x20] sm:$0xff]   ;;  %v1550_v21 = vld [vmem:[#allocation4 + $0x8] sm:$0xff]   ;;  %v1553_v24 = vld [vmem:[#allocation4 + $0x30] sm:$0xff]   ;;  %p1401_p0 = scmp.ge.s32.totalorder %s1847_s14, 1 }
  0x7e   : > { %438 = vmatpush1.bf16.msra.mxu0 %v1529_v6  ;;  %1420 = vmatpush1.bf16.msra.mxu1 %v1529_v6  ;;  %v1551_v22 = vld [vmem:[#allocation4 + $0x28] sm:$0xff]   ;;  %v1554_v25 = vld [vmem:[#allocation4 + $0x18] sm:$0xff]   ;;  %v299_v29 = vsub.s32 0, %v298_v28  ;;  %v295_v30 = vld [vmem:[#allocation9] sm:$0x3]  ;;  %v303_v31 = vsub.s32 1, %v298_v28 }
  0x7f   : > { %439 = vmatprep.subr.bf16.mxu0 %v1530_v7  ;;  %1413 = vmatprep.subr.bf16.mxu1 %v1530_v7  ;;  %v1555_v26 = vld [vmem:[#allocation4 + $0x38] sm:$0xff]  }
  0x80   : > { %v300_v32 = vrot.slane %v295_v30, %v299_v29  ;;  %v2069_v33 = vrot.slane %v295_v30, %v303_v31 }
  0x82   : > { %440 = vmatpush1.bf16.msra.mxu0 %v1532_v8  ;;  %1421 = vmatpush1.bf16.msra.mxu1 %v1532_v8 }
  0x83   : > { %441 = vmatprep.subr.bf16.mxu0 %v1533_v9  ;;  %1414 = vmatprep.subr.bf16.mxu1 %v1533_v9 }
  0x86   : > { %442 = vmatpush1.bf16.msra.mxu0 %v1535_v10  ;;  %1422 = vmatpush1.bf16.msra.mxu1 %v1535_v10 }
  0x87   : > { %443 = vmatprep.subr.bf16.mxu0 %v1536_v11  ;;  %1415 = vmatprep.subr.bf16.mxu1 %v1536_v11 }
  0x8a   : > { %444 = vmatpush1.bf16.msra.mxu0 %v1538_v12  ;;  %1423 = vmatpush1.bf16.msra.mxu1 %v1538_v12 }
  0x8b   : > { %445 = vmatprep.subr.bf16.mxu0 %v1539_v13  ;;  %1416 = vmatprep.subr.bf16.mxu1 %v1539_v13 }
  0x8e   : > { %446 = vmatpush1.bf16.msra.mxu0 %v1541_v14  ;;  %1424 = vmatpush1.bf16.msra.mxu1 %v1541_v14 }
  0x8f   : > { %447 = vmatprep.subr.bf16.mxu0 %v1542_v15  ;;  %1417 = vmatprep.subr.bf16.mxu1 %v1542_v15 }
  0x92   : > { %448 = vmatpush1.bf16.msra.mxu0 %v1544_v16  ;;  %1425 = vmatpush1.bf16.msra.mxu1 %v1544_v16 }
  0x93   : > { %449 = vmatprep.subr.bf16.mxu0 %v1545_v17  ;;  %1418 = vmatprep.subr.bf16.mxu1 %v1545_v17 }
  0x96   : > { %450 = vmatpush1.bf16.msra.mxu0 %v1547_v18  ;;  %1426 = vmatpush1.bf16.msra.mxu1 %v1547_v18 }
  0x99   : > { %468 = vmatmul.mubr.bf16.vlgmr.msra.gmra.mrb[0].mxu0 %v1548_v19  ;;  %508 = vmatmul.mubr.bf16.vlgmr.msra.gmra.mrb[0].mxu1 %v1549_v20 }
  0x9a   : > { %477 = vmatprep.mubr.bf16.mxu0 %v1866_v4  ;;  %517 = vmatprep.mubr.bf16.mxu1 %v1866_v4 }
  0xa1   : > { %478 = vmatmul.mubr.bf16.gmra.mrb[4].mxu0 %v1550_v21  ;;  %518 = vmatmul.mubr.bf16.gmra.mrb[4].mxu1 %v1551_v22 }
  0xa2   : > { %487 = vmatprep.mubr.bf16.mxu0 %v1866_v4  ;;  %527 = vmatprep.mubr.bf16.mxu1 %v1866_v4 }
  0xa9   : > { %488 = vmatmul.mubr.bf16.gmra.mrb[8].mxu0 %v1552_v23  ;;  %528 = vmatmul.mubr.bf16.gmra.mrb[8].mxu1 %v1553_v24 }
  0xaa   : > { %497 = vmatprep.mubr.bf16.mxu0 %v1866_v4  ;;  %537 = vmatprep.mubr.bf16.mxu1 %v1866_v4 }
  0xb1   : > { %498 = vmatmul.mubr.bf16.gmra.mrb[12].mxu0 %v1554_v25  ;;  %538 = vmatmul.mubr.bf16.gmra.mrb[12].mxu1 %v1555_v26 }
 0x16c   : > { %v469_v34 = vpop.f32.mrb[0].mxu0  ;;  %v509_v35 = vpop.f32.mrb[0].mxu1 }
 0x16d   : > { %v2071_v36 = vadd.f32 %v469_v34, %v300_v32  ;;  %v2073_v37 = vadd.f32 %v509_v35, %v300_v32  ;;  %v471_v38 = vpop.f32.mrb[1].mxu0  ;;  %v511_v39 = vpop.f32.mrb[1].mxu1 }
 0x16e   : > { %v2076_v40 = vadd.f32 %v471_v38, %v2069_v33  ;;  %v2079_v41 = vadd.f32 %v511_v39, %v2069_v33  ;;  %v473_v42 = vpop.f32.mrb[2].mxu0  ;;  %v513_v43 = vpop.f32.mrb[2].mxu1 }
 0x16f   : > { %2614 = vst [vmem:[#allocation14_spill] sm:$0xff] %v2071_v36  ;;  %v2081_v44 = vadd.f32 %v473_v42, %v300_v32  ;;  %v2083_v45 = vadd.f32 %v513_v43, %v300_v32  ;;  %v475_v46 = vpop.f32.mrb[3].mxu0  ;;  %v515_v47 = vpop.f32.mrb[3].mxu1 }
 0x170   : > { %v2086_v48 = vadd.f32 %v475_v46, %v2069_v33  ;;  %v2089_v49 = vadd.f32 %v515_v47, %v2069_v33 }
 0x171   : > { %2615 = vst [vmem:[#allocation15_spill] sm:$0xff] %v2081_v44  ;;  %2616 = vst [vmem:[#allocation16_spill] sm:$0xff] %v2083_v45 }
 0x172   : > { %2617 = vst [vmem:[#allocation17_spill] sm:$0xff] %v2086_v48 }
 0x174   : > { %v479_v50 = vpop.f32.mrb[4].mxu0  ;;  %v519_v51 = vpop.f32.mrb[4].mxu1 }
 0x175   : > { %v2091_v52 = vadd.f32 %v479_v50, %v300_v32  ;;  %v2093_v53 = vadd.f32 %v519_v51, %v300_v32  ;;  %v481_v54 = vpop.f32.mrb[5].mxu0  ;;  %v521_v55 = vpop.f32.mrb[5].mxu1 }
 0x176   : > { %v2096_v56 = vadd.f32 %v481_v54, %v2069_v33  ;;  %v2099_v57 = vadd.f32 %v521_v55, %v2069_v33  ;;  %v483_v58 = vpop.f32.mrb[6].mxu0  ;;  %v523_v59 = vpop.f32.mrb[6].mxu1 }
 0x177   : > { %v2101_v60 = vadd.f32 %v483_v58, %v300_v32  ;;  %v2103_v61 = vadd.f32 %v523_v59, %v300_v32  ;;  %v485_v62 = vpop.f32.mrb[7].mxu0  ;;  %v525_v63 = vpop.f32.mrb[7].mxu1 }
 0x178   : > { %v2106_v0 = vadd.f32 %v485_v62, %v2069_v33  ;;  %v2109_v1 = vadd.f32 %v525_v63, %v2069_v33 }
 0x179   : > { %2618 = vst [vmem:[#allocation18_spill] sm:$0xff] %v2101_v60  ;;  %2619 = vst [vmem:[#allocation19_spill] sm:$0xff] %v2103_v61 }
 0x17a   : > { %2620 = vst [vmem:[#allocation20_spill] sm:$0xff] %v2106_v0 }
 0x17c   : > { %v489_v2 = vpop.f32.mrb[8].mxu0  ;;  %v529_v3 = vpop.f32.mrb[8].mxu1 }
 0x17d   : > { %v2111_v4 = vadd.f32 %v489_v2, %v300_v32  ;;  %v2113_v5 = vadd.f32 %v529_v3, %v300_v32  ;;  %v491_v6 = vpop.f32.mrb[9].mxu0  ;;  %v531_v7 = vpop.f32.mrb[9].mxu1 }
 0x17e   : > { %v2116_v8 = vadd.f32 %v491_v6, %v2069_v33  ;;  %v2119_v9 = vadd.f32 %v531_v7, %v2069_v33  ;;  %v493_v10 = vpop.f32.mrb[10].mxu0  ;;  %v533_v11 = vpop.f32.mrb[10].mxu1 }
 0x17f   : > { %2621 = vst [vmem:[#allocation21_spill] sm:$0xff] %v2111_v4  ;;  %v2121_v12 = vadd.f32 %v493_v10, %v300_v32  ;;  %v2123_v13 = vadd.f32 %v533_v11, %v300_v32  ;;  %v495_v14 = vpop.f32.mrb[11].mxu0  ;;  %v535_v15 = vpop.f32.mrb[11].mxu1 }
 0x180   : > { %v2126_v16 = vadd.f32 %v495_v14, %v2069_v33  ;;  %v2129_v17 = vadd.f32 %v535_v15, %v2069_v33 }
 0x182   : > { %551 = sbr.rel (%p1401_p0) target bundleno = 874 (0x36a), region = 52 }
 0x184   : > { %v499_v18 = vpop.f32.mrb[12].mxu0  ;;  %v539_v19 = vpop.f32.mrb[12].mxu1 }
 0x185   : > { %v2131_v20 = vadd.f32 %v499_v18, %v300_v32  ;;  %v2133_v21 = vadd.f32 %v539_v19, %v300_v32  ;;  %v501_v22 = vpop.f32.mrb[13].mxu0  ;;  %v541_v23 = vpop.f32.mrb[13].mxu1 }
 0x186   : > { %v2136_v24 = vadd.f32 %v501_v22, %v2069_v33  ;;  %v2139_v25 = vadd.f32 %v541_v23, %v2069_v33  ;;  %v503_v26 = vpop.f32.mrb[14].mxu0  ;;  %v543_v27 = vpop.f32.mrb[14].mxu1 }
 0x187   : > { %v2141_v28 = vadd.f32 %v503_v26, %v300_v32  ;;  %v2143_v29 = vadd.f32 %v543_v27, %v300_v32  ;;  %v505_v30 = vpop.f32.mrb[15].mxu0  ;;  %v545_v31 = vpop.f32.mrb[15].mxu1 }
 0x188   : > { %2622 = vst [vmem:[#allocation22_spill] sm:$0xff] %v2136_v24  ;;  %v2146_v34 = vadd.f32 %v505_v30, %v2069_v33  ;;  %v2149_v35 = vadd.f32 %v545_v31, %v2069_v33 }
 0x189   : > { %v574_v38 = vmax.f32 %v2091_v52, %v2096_v56  ;;  %v568_v39 = vmax.f32 %v2071_v36, %v2076_v40  ;;  %v577_v32 = vmax.f32 %v2101_v60, %v2106_v0  ;;  %v571_v42 = vmax.f32 %v2081_v44, %v2086_v48  ;;  %v2184_v3 = vld [vmem:[#allocation2 + $0x10] sm:$0xff]  ;;  %v2186_v6 = vld [vmem:[#allocation2] sm:$0xff]  ;;  %v2194_v15 = vld [vmem:[#allocation2 + $0x18] sm:$0xff] }
 0x18a   : > { %v583_v33 = vmax.f32 %v2121_v12, %v2126_v16  ;;  %v580_v43 = vmax.f32 %v2111_v4, %v2116_v8  ;;  %v589_v46 = vmax.f32 %v2141_v28, %v2146_v34  ;;  %v586_v47 = vmax.f32 %v2131_v20, %v2136_v24  ;;  %v2196_v18 = vld [vmem:[#allocation2 + $0x8] sm:$0xff]  ;;  %v2310_v22 = vld [vmem:[#allocation2 + $0x78] sm:$0xff] }
 0x18b   : > { %575 = vmax.xlane.f32.xlu1 %v574_v38  ;;  %569 = vmax.xlane.f32.xlu0 %v568_v39  ;;  %v595_v50 = vmax.f32 %v2083_v45, %v2089_v49  ;;  %v592_v51 = vmax.f32 %v2073_v37, %v2079_v41  ;;  %v601_v54 = vmax.f32 %v2103_v61, %v2109_v1  ;;  %v1867_v58 = vmov 0   ;;  %v2213_v31 = vld [vmem:[#allocation2 + $0x28] sm:$0xff]  ;;  %v2215_v38 = vld [vmem:[#allocation2 + $0x20] sm:$0xff] }
 0x18c   : > { %v598_v55 = vmax.f32 %v2093_v53, %v2099_v57  ;;  %1556 = vset.pattern.permute.xlu0 %v1867_v58  ;;  %1557 = vset.pattern.permute.xlu1 %v1867_v58  ;;  %v607_v59 = vmax.f32 %v2123_v13, %v2129_v17  ;;  %v604_v62 = vmax.f32 %v2113_v5, %v2119_v9  ;;  %vm952_vm1 = vcmask 7168   ;;  %v2292_v39 = vld [vmem:[#allocation2 + $0x60] sm:$0xff] }
 0x18d   : > { %v613_v63 = vmax.f32 %v2143_v29, %v2149_v35  ;;  %v610_v2 = vmax.f32 %v2133_v21, %v2139_v25  ;;  %2629 = vst [vmem:[#allocation29_spill] sm:$0xff] %v2292_v39  ;;  %2632 = vst [vmem:[#allocation32_spill] sm:$0xff] %v2310_v22 }
 0x18f   : > { %578 = vmax.xlane.f32.xlu1 %v577_v32  ;;  %572 = vmax.xlane.f32.xlu0 %v571_v42 }
 0x193   : > { %584 = vmax.xlane.f32.xlu1 %v583_v33  ;;  %581 = vmax.xlane.f32.xlu0 %v580_v43 }
 0x197   : > { %590 = vmax.xlane.f32.xlu1 %v589_v46  ;;  %587 = vmax.xlane.f32.xlu0 %v586_v47  ;;  %v2232_v47 = vld [vmem:[#allocation2 + $0x38] sm:$0xff] }
 0x19b   : > { %596 = vmax.xlane.f32.xlu1 %v595_v50  ;;  %593 = vmax.xlane.f32.xlu0 %v592_v51  ;;  %v2234_v50 = vld [vmem:[#allocation2 + $0x30] sm:$0xff] }
 0x19f   : > { %602 = vmax.xlane.f32.xlu1 %v601_v54  ;;  %599 = vmax.xlane.f32.xlu0 %v598_v55  ;;  %v2290_v54 = vld [vmem:[#allocation2 + $0x68] sm:$0xff] }
 0x1a0   : > { %2628 = vst [vmem:[#allocation28_spill] sm:$0xff] %v2290_v54 }
 0x1a3   : > { %608 = vmax.xlane.f32.xlu1 %v607_v59  ;;  %605 = vmax.xlane.f32.xlu0 %v604_v62 }
 0x1a7   : > { %614 = vmax.xlane.f32.xlu1 %v613_v63  ;;  %611 = vmax.xlane.f32.xlu0 %v610_v2  ;;  %v2251_v63 = vld [vmem:[#allocation2 + $0x48] sm:$0xff]  ;;  %v2253_v2 = vld [vmem:[#allocation2 + $0x40] sm:$0xff] }
 0x218   : > { %v576_v7 = vpop.xlane.xlu1 %575  ;;  %v570_v10 = vpop.xlane.xlu0 %569 }
 0x219   : > { %v2189_v11 = vmax.f32 %v2184_v3, %v576_v7  ;;  %v2192_v14 = vmax.f32 %v2186_v6, %v570_v10 }
 0x21b   : > { %971 = vst.msk [vmem:[#allocation2 + $0x10] sm:$0xff] %vm952_vm1, %v2189_v11  ;;  %969 = vst.msk [vmem:[#allocation2] sm:$0xff] %vm952_vm1, %v2192_v14  ;;  %714 = vperm.xlu0 %1556, %v2192_v14  }
 0x21c   : > { %v579_v23 = vpop.xlane.xlu1 %578  ;;  %v573_v26 = vpop.xlane.xlu0 %572 }
 0x21d   : > { %v2208_v27 = vmax.f32 %v2194_v15, %v579_v23  ;;  %v2211_v30 = vmax.f32 %v2196_v18, %v573_v26 }
 0x21f   : > { %972 = vst.msk [vmem:[#allocation2 + $0x18] sm:$0xff] %vm952_vm1, %v2208_v27  ;;  %970 = vst.msk [vmem:[#allocation2 + $0x8] sm:$0xff] %vm952_vm1, %v2211_v30  ;;  %719 = vperm.xlu1 %1557, %v2211_v30  }
 0x220   : > { %v585_v42 = vpop.xlane.xlu1 %584  ;;  %v582_v33 = vpop.xlane.xlu0 %581 }
 0x221   : > { %v2227_v43 = vmax.f32 %v2213_v31, %v585_v42  ;;  %v2230_v46 = vmax.f32 %v2215_v38, %v582_v33 }
 0x223   : > { %974 = vst.msk [vmem:[#allocation2 + $0x28] sm:$0xff] %vm952_vm1, %v2227_v43  ;;  %724 = vperm.xlu1 %1557, %v2189_v11   ;;  %973 = vst.msk [vmem:[#allocation2 + $0x20] sm:$0xff] %vm952_vm1, %v2230_v46 }
 0x224   : > { %v591_v55 = vpop.xlane.xlu1 %590  ;;  %v588_v58 = vpop.xlane.xlu0 %587 }
 0x225   : > { %v2246_v59 = vmax.f32 %v2232_v47, %v591_v55  ;;  %v2249_v62 = vmax.f32 %v2234_v50, %v588_v58  ;;  %v2270_v55 = vld [vmem:[#allocation2 + $0x58] sm:$0xff]  ;;  %v2272_v58 = vld [vmem:[#allocation2 + $0x50] sm:$0xff] }
 0x226   : > { %2624 = vst [vmem:[#allocation24_spill] sm:$0xff] %v2270_v55  ;;  %2625 = vst [vmem:[#allocation25_spill] sm:$0xff] %v2272_v58 }
 0x227   : > { %976 = vst.msk [vmem:[#allocation2 + $0x38] sm:$0xff] %vm952_vm1, %v2246_v59  ;;  %729 = vperm.xlu1 %1557, %v2208_v27   ;;  %975 = vst.msk [vmem:[#allocation2 + $0x30] sm:$0xff] %vm952_vm1, %v2249_v62 }
 0x228   : > { %v597_v23 = vpop.xlane.xlu1 %596  ;;  %v594_v26 = vpop.xlane.xlu0 %593 }
 0x229   : > { %v2265_v42 = vmax.f32 %v2251_v63, %v597_v23  ;;  %v2268_v33 = vmax.f32 %v2253_v2, %v594_v26 }
 0x22b   : > { %2623 = vst [vmem:[#allocation23_spill] sm:$0xff] %v2268_v33  ;;  %978 = vst.msk [vmem:[#allocation2 + $0x48] sm:$0xff] %vm952_vm1, %v2265_v42  ;;  %734 = vperm.xlu1 %1557, %v2230_v46   ;;  %759 = vperm.xlu0 %1556, %v2265_v42  }
 0x22c   : > { %977 = vst.msk [vmem:[#allocation2 + $0x40] sm:$0xff] %vm952_vm1, %v2268_v33  ;;  %v603_v26 = vpop.xlane.xlu1 %602  ;;  %v600_v10 = vpop.xlane.xlu0 %599 }
 0x22d   : > { %v2285_v51 = vmax.f32 %v2270_v55, %v603_v26  ;;  %v2288_v7 = vmax.f32 %v2272_v58, %v600_v10  ;;  %v2312_v55 = vld [vmem:[#allocation2 + $0x70] sm:$0xff] }
 0x22e   : > { %2633 = vst [vmem:[#allocation33_spill] sm:$0xff] %v2312_v55 }
 0x22f   : > { %2626 = vst [vmem:[#allocation26_spill] sm:$0xff] %v2285_v51  ;;  %2627 = vst [vmem:[#allocation27_spill] sm:$0xff] %v2288_v7  ;;  %739 = vperm.xlu1 %1557, %v2227_v43   ;;  %769 = vperm.xlu0 %1556, %v2285_v51  }
 0x230   : > { %980 = vst.msk [vmem:[#allocation2 + $0x58] sm:$0xff] %vm952_vm1, %v2285_v51  ;;  %979 = vst.msk [vmem:[#allocation2 + $0x50] sm:$0xff] %vm952_vm1, %v2288_v7  ;;  %v609_v10 = vpop.xlane.xlu1 %608  ;;  %v606_v23 = vpop.xlane.xlu0 %605 }
 0x231   : > { %v2305_v32 = vmax.f32 %v2290_v54, %v609_v10  ;;  %v2308_v19 = vmax.f32 %v2292_v39, %v606_v23 }
 0x233   : > { %2630 = vst [vmem:[#allocation30_spill] sm:$0xff] %v2305_v32  ;;  %2631 = vst [vmem:[#allocation31_spill] sm:$0xff] %v2308_v19  ;;  %744 = vperm.xlu1 %1557, %v2249_v62   ;;  %779 = vperm.xlu0 %1556, %v2305_v32  }
 0x234   : > { %982 = vst.msk [vmem:[#allocation2 + $0x68] sm:$0xff] %vm952_vm1, %v2305_v32  ;;  %981 = vst.msk [vmem:[#allocation2 + $0x60] sm:$0xff] %vm952_vm1, %v2308_v19  ;;  %v615_v23 = vpop.xlane.xlu1 %614  ;;  %v612_v26 = vpop.xlane.xlu0 %611 }
 0x235   : > { %v2325_v58 = vmax.f32 %v2310_v22, %v615_v23  ;;  %v2328_v51 = vmax.f32 %v2312_v55, %v612_v26 }
 0x237   : > { %2634 = vst [vmem:[#allocation34_spill] sm:$0xff] %v2325_v58  ;;  %2635 = vst [vmem:[#allocation35_spill] sm:$0xff] %v2328_v51  ;;  %749 = vperm.xlu1 %1557, %v2246_v59   ;;  %789 = vperm.xlu0 %1556, %v2325_v58  }
 0x238   : > { %984 = vst.msk [vmem:[#allocation2 + $0x78] sm:$0xff] %vm952_vm1, %v2325_v58  ;;  %983 = vst.msk [vmem:[#allocation2 + $0x70] sm:$0xff] %vm952_vm1, %v2328_v51 }
 0x23b   : > { %754 = vperm.xlu1 %1557, %v2268_v33  }
 0x23f   : > { %764 = vperm.xlu1 %1557, %v2288_v7  }
 0x243   : > { %774 = vperm.xlu1 %1557, %v2308_v19  }
 0x247   : > { %784 = vperm.xlu1 %1557, %v2328_v51  }
 0x29a   : > { %v715_v26 = vpop.permute.xlu0 %714 }
 0x29b   : > { %v792_v23 = vsub.f32 %v2071_v36, %v715_v26  ;;  %v793_v54 = vsub.f32 %v2076_v40, %v715_v26 }
 0x29d   : > { %v824_v58 = vmul.f32 1.442695, %v792_v23  ;;  %v826_v22 = vmul.f32 1.442695, %v793_v54 }
 0x29e   : > { %v720_v39 = vpop.permute.xlu1 %719 }
 0x29f   : > { %1558 = vpow2.f32 %v824_v58  ;;  %v794_v10 = vsub.f32 %v2081_v44, %v720_v39  ;;  %v795_v55 = vsub.f32 %v2086_v48, %v720_v39 }
 0x2a0   : > { %1560 = vpow2.f32 %v826_v22 }
 0x2a1   : > { %v828_v32 = vmul.f32 1.442695, %v794_v10  ;;  %v830_v7 = vmul.f32 1.442695, %v795_v55 }
 0x2a2   : > { %v725_v33 = vpop.permute.xlu1 %724 }
 0x2a3   : > { %1562 = vpow2.f32 %v828_v32  ;;  %v796_v51 = vsub.f32 %v2091_v52, %v725_v33  ;;  %v797_v19 = vsub.f32 %v2096_v56, %v725_v33 }
 0x2a4   : > { %1564 = vpow2.f32 %v830_v7 }
 0x2a5   : > { %v832_v36 = vmul.f32 1.442695, %v796_v51  ;;  %v834_v26 = vmul.f32 1.442695, %v797_v19 }
 0x2a6   : > { %v730_v23 = vpop.permute.xlu1 %729 }
 0x2a7   : > { %1566 = vpow2.f32 %v832_v36  ;;  %v798_v54 = vsub.f32 %v2101_v60, %v730_v23  ;;  %v799_v58 = vsub.f32 %v2106_v0, %v730_v23 }
 0x2a8   : > { %1568 = vpow2.f32 %v834_v26 }
 0x2a9   : > { %v1559_v39 = vpop.eup %1558  ;;  %v836_v22 = vmul.f32 1.442695, %v798_v54  ;;  %v838_v10 = vmul.f32 1.442695, %v799_v58 }
 0x2aa   : > { %v1561_v55 = vpop.eup %1560  ;;  %v735_v48 = vpop.permute.xlu1 %734 }
 0x2ab   : > { %1570 = vpow2.f32 %v836_v22  ;;  %v800_v32 = vsub.f32 %v2111_v4, %v735_v48  ;;  %v801_v33 = vsub.f32 %v2116_v8, %v735_v48  ;;  %v760_v51 = vpop.permute.xlu0 %759  ;;  %v888_v19 = vadd.f32 %v1561_v55, %v1559_v39 }
 0x2ac   : > { %1572 = vpow2.f32 %v838_v10  ;;  %v810_v10 = vsub.f32 %v2083_v45, %v760_v51 }
 0x2ad   : > { %v1563_v7 = vpop.eup %1562  ;;  %v840_v36 = vmul.f32 1.442695, %v800_v32  ;;  %v842_v44 = vmul.f32 1.442695, %v801_v33  ;;  %889 = vadd.xlane.f32.xlu1 %v888_v19 }
 0x2ae   : > { %v1565_v60 = vpop.eup %1564  ;;  %v740_v23 = vpop.permute.xlu1 %739 }
 0x2af   : > { %1574 = vpow2.f32 %v840_v36  ;;  %v802_v26 = vsub.f32 %v2121_v12, %v740_v23  ;;  %v803_v54 = vsub.f32 %v2126_v16, %v740_v23  ;;  %v891_v58 = vadd.f32 %v1565_v60, %v1563_v7  ;;  %v770_v39 = vpop.permute.xlu0 %769 }
 0x2b0   : > { %1576 = vpow2.f32 %v842_v44  ;;  %v811_v44 = vsub.f32 %v2089_v49, %v760_v51 }
 0x2b1   : > { %v1567_v22 = vpop.eup %1566  ;;  %v844_v4 = vmul.f32 1.442695, %v802_v26  ;;  %v846_v0 = vmul.f32 1.442695, %v803_v54  ;;  %892 = vadd.xlane.f32.xlu0 %v891_v58  ;;  %v860_v26 = vmul.f32 1.442695, %v810_v10  ;;  %v814_v54 = vsub.f32 %v2103_v61, %v770_v39 }
 0x2b2   : > { %v1569_v48 = vpop.eup %1568  ;;  %v745_v55 = vpop.permute.xlu1 %744  ;;  %v815_v10 = vsub.f32 %v2109_v1, %v770_v39 }
 0x2b3   : > { %1578 = vpow2.f32 %v844_v4  ;;  %v804_v32 = vsub.f32 %v2131_v20, %v745_v55  ;;  %v805_v33 = vsub.f32 %v2136_v24, %v745_v55  ;;  %v894_v19 = vadd.f32 %v1569_v48, %v1567_v22  ;;  %v780_v55 = vpop.permute.xlu0 %779 }
 0x2b4   : > { %1580 = vpow2.f32 %v846_v0  ;;  %v862_v48 = vmul.f32 1.442695, %v811_v44  ;;  %v870_v39 = vmul.f32 1.442695, %v815_v10 }
 0x2b5   : > { %v1571_v36 = vpop.eup %1570  ;;  %v848_v60 = vmul.f32 1.442695, %v804_v32  ;;  %v850_v7 = vmul.f32 1.442695, %v805_v33  ;;  %895 = vadd.xlane.f32.xlu0 %v894_v19  ;;  %v868_v33 = vmul.f32 1.442695, %v814_v54  ;;  %v819_v54 = vsub.f32 %v2129_v17, %v780_v55 }
 0x2b6   : > { %v1573_v23 = vpop.eup %1572  ;;  %v750_v45 = vpop.permute.xlu1 %749 }
 0x2b7   : > { %1582 = vpow2.f32 %v848_v60  ;;  %v806_v4 = vsub.f32 %v2141_v28, %v750_v45  ;;  %v807_v58 = vsub.f32 %v2146_v34, %v750_v45  ;;  %v897_v0 = vadd.f32 %v1573_v23, %v1571_v36 }
 0x2b8   : > { %1584 = vpow2.f32 %v850_v7  ;;  %v818_v36 = vsub.f32 %v2123_v13, %v780_v55  ;;  %v878_v10 = vmul.f32 1.442695, %v819_v54 }
 0x2b9   : > { %v1575_v22 = vpop.eup %1574  ;;  %v852_v24 = vmul.f32 1.442695, %v806_v4  ;;  %v854_v51 = vmul.f32 1.442695, %v807_v58  ;;  %1586 = vpow2.f32 %v860_v26  ;;  %898 = vadd.xlane.f32.xlu1 %v897_v0  ;;  %v790_v4 = vpop.permute.xlu0 %789 }
 0x2ba   : > { %v1577_v32 = vpop.eup %1576  ;;  %v755_v19 = vpop.permute.xlu1 %754  ;;  %v823_v55 = vsub.f32 %v2149_v35, %v790_v4 }
 0x2bb   : > { %1588 = vpow2.f32 %v852_v24  ;;  %v808_v60 = vsub.f32 %v2073_v37, %v755_v19  ;;  %v809_v61 = vsub.f32 %v2079_v41, %v755_v19  ;;  %v900_v45 = vadd.f32 %v1577_v32, %v1575_v22 }
 0x2bc   : > { %1590 = vpow2.f32 %v854_v51  ;;  %v876_v51 = vmul.f32 1.442695, %v818_v36  ;;  %v822_v32 = vsub.f32 %v2143_v29, %v790_v4 }
 0x2bd   : > { %v1579_v7 = vpop.eup %1578  ;;  %1592 = vpow2.f32 %v862_v48  ;;  %v856_v44 = vmul.f32 1.442695, %v808_v60  ;;  %v858_v23 = vmul.f32 1.442695, %v809_v61  ;;  %901 = vadd.xlane.f32.xlu0 %v900_v45 }
 0x2be   : > { %v1581_v26 = vpop.eup %1580  ;;  %1594 = vpow2.f32 %v868_v33  ;;  %v765_v24 = vpop.permute.xlu1 %764 }
 0x2bf   : > { %1596 = vpow2.f32 %v856_v44  ;;  %v812_v58 = vsub.f32 %v2093_v53, %v765_v24  ;;  %v813_v0 = vsub.f32 %v2099_v57, %v765_v24  ;;  %v903_v22 = vadd.f32 %v1581_v26, %v1579_v7 }
 0x2c0   : > { %1598 = vpow2.f32 %v858_v23  ;;  %v884_v26 = vmul.f32 1.442695, %v822_v32 }
 0x2c1   : > { %v1583_v48 = vpop.eup %1582  ;;  %v864_v61 = vmul.f32 1.442695, %v812_v58  ;;  %v866_v19 = vmul.f32 1.442695, %v813_v0  ;;  %904 = vadd.xlane.f32.xlu1 %v903_v22  ;;  %1600 = vpow2.f32 %v870_v39  ;;  %v886_v39 = vmul.f32 1.442695, %v823_v55 }
 0x2c2   : > { %v1585_v33 = vpop.eup %1584  ;;  %v775_v60 = vpop.permute.xlu1 %774 }
 0x2c3   : > { %1602 = vpow2.f32 %v864_v61  ;;  %v816_v45 = vsub.f32 %v2113_v5, %v775_v60  ;;  %v817_v44 = vsub.f32 %v2119_v9, %v775_v60  ;;  %v906_v7 = vadd.f32 %v1585_v33, %v1583_v48  ;;  %v1587_v23 = vpop.eup %1586 }
 0x2c4   : > { %1604 = vpow2.f32 %v866_v19 }
 0x2c5   : > { %v1589_v36 = vpop.eup %1588  ;;  %1606 = vpow2.f32 %v876_v51  ;;  %v872_v24 = vmul.f32 1.442695, %v816_v45  ;;  %v874_v58 = vmul.f32 1.442695, %v817_v44  ;;  %907 = vadd.xlane.f32.xlu0 %v906_v7 }
 0x2c6   : > { %v1591_v0 = vpop.eup %1590  ;;  %1608 = vpow2.f32 %v878_v10  ;;  %v785_v54 = vpop.permute.xlu1 %784 }
 0x2c7   : > { %v1593_v4 = vpop.eup %1592  ;;  %1610 = vpow2.f32 %v872_v24  ;;  %v820_v22 = vsub.f32 %v2133_v21, %v785_v54  ;;  %v821_v61 = vsub.f32 %v2139_v25, %v785_v54  ;;  %v909_v60 = vadd.f32 %v1591_v0, %v1589_v36 }
 0x2c8   : > { %v1595_v48 = vpop.eup %1594  ;;  %1612 = vpow2.f32 %v874_v58  ;;  %v915_v55 = vadd.f32 %v1593_v4, %v1587_v23 }
 0x2c9   : > { %v1597_v19 = vpop.eup %1596  ;;  %1614 = vpow2.f32 %v884_v26  ;;  %v880_v51 = vmul.f32 1.442695, %v820_v22  ;;  %v882_v32 = vmul.f32 1.442695, %v821_v61  ;;  %910 = vadd.xlane.f32.xlu1 %v909_v60 }
 0x2ca   : > { %v1599_v33 = vpop.eup %1598  ;;  %1616 = vpow2.f32 %v886_v39 }
 0x2cb   : > { %1618 = vpow2.f32 %v880_v51  ;;  %v912_v10 = vadd.f32 %v1599_v33, %v1597_v19  ;;  %v1601_v45 = vpop.eup %1600  ;;  %v2637_v33 = vsub.f32 %v2196_v18, %v2211_v30 }
 0x2cc   : > { %1620 = vpow2.f32 %v882_v32  ;;  %v921_v0 = vadd.f32 %v1601_v45, %v1595_v48  ;;  %v2636_v48 = vsub.f32 %v2186_v6, %v2192_v14  ;;  %v2640_v6 = vsub.f32 %v2215_v38, %v2230_v46 }
 0x2cd   : > { %v1603_v44 = vpop.eup %1602  ;;  %913 = vadd.xlane.f32.xlu0 %v912_v10  ;;  %916 = vadd.xlane.f32.xlu1 %v915_v55  ;;  %v666_v10 = vmul.f32 1.442695, %v2637_v33  ;;  %v2638_v55 = vsub.f32 %v2184_v3, %v2189_v11  ;;  %v2641_v3 = vsub.f32 %v2213_v31, %v2227_v43  ;;  %v2642_v38 = vsub.f32 %v2234_v50, %v2249_v62  ;;  %v635_v43 = vld [vmem:[#allocation3 + $0x18] sm:$0xff] }
 0x2ce   : > { %v1605_v7 = vpop.eup %1604  ;;  %v664_v32 = vmul.f32 1.442695, %v2636_v48  ;;  %v672_v14 = vmul.f32 1.442695, %v2640_v6  ;;  %v2644_v50 = vsub.f32 %v2251_v63, %v2265_v42  ;;  %v2648_v6 = vld [vmem:[#allocation26_spill] sm:$0xff]  ;;  %v2650_v42 = vld [vmem:[#allocation25_spill] sm:$0xff] }
 0x2cf   : > { %v1607_v24 = vpop.eup %1606  ;;  %v918_v36 = vadd.f32 %v1605_v7, %v1603_v44  ;;  %v668_v45 = vmul.f32 1.442695, %v2638_v55  ;;  %v2639_v44 = vsub.f32 %v2194_v15, %v2208_v27  ;;  %v674_v11 = vmul.f32 1.442695, %v2641_v3 }
 0x2d0   : > { %v1609_v58 = vpop.eup %1608  ;;  %1622 = vpow2.f32 %v664_v32  ;;  %v676_v46 = vmul.f32 1.442695, %v2642_v38  ;;  %v636_v32 = vld [vmem:[#allocation3 + $0x20] sm:$0xff]  ;;  %v682_v62 = vmul.f32 1.442695, %v2644_v50 }
 0x2d1   : > { %v1611_v54 = vpop.eup %1610  ;;  %919 = vadd.xlane.f32.xlu0 %v918_v36  ;;  %922 = vadd.xlane.f32.xlu1 %v921_v0  ;;  %v927_v39 = vadd.f32 %v1609_v58, %v1607_v24  ;;  %1624 = vpow2.f32 %v666_v10  ;;  %v670_v7 = vmul.f32 1.442695, %v2639_v44  ;;  %v632_v36 = vld [vmem:[#allocation3] sm:$0xff]  ;;  %v633_v58 = vld [vmem:[#allocation3 + $0x8] sm:$0xff] }
 0x2d2   : > { %v1613_v26 = vpop.eup %1612  ;;  %1626 = vpow2.f32 %v668_v45  ;;  %v2645_v10 = vld [vmem:[#allocation23_spill] sm:$0xff] }
 0x2d3   : > { %v1615_v22 = vpop.eup %1614  ;;  %v924_v61 = vadd.f32 %v1613_v26, %v1611_v54  ;;  %1628 = vpow2.f32 %v670_v7  ;;  %v2646_v55 = vsub.f32 %v2253_v2, %v2645_v10 }
 0x2d4   : > { %v1617_v60 = vpop.eup %1616  ;;  %1630 = vpow2.f32 %v672_v14 }
 0x2d5   : > { %v1619_v19 = vpop.eup %1618  ;;  %925 = vadd.xlane.f32.xlu0 %v924_v61  ;;  %928 = vadd.xlane.f32.xlu1 %v927_v39  ;;  %v933_v51 = vadd.f32 %v1617_v60, %v1615_v22  ;;  %v634_v22 = vld [vmem:[#allocation3 + $0x10] sm:$0xff]  ;;  %1632 = vpow2.f32 %v674_v11  ;;  %v680_v45 = vmul.f32 1.442695, %v2646_v55 }
 0x2d6   : > { %v1621_v23 = vpop.eup %1620  ;;  %1634 = vpow2.f32 %v676_v46  ;;  %v2656_v46 = vld [vmem:[#allocation29_spill] sm:$0xff] }
 0x2d7   : > { %v930_v4 = vadd.f32 %v1621_v23, %v1619_v19  ;;  %v2643_v19 = vsub.f32 %v2232_v47, %v2246_v59 }
 0x2d9   : > { %931 = vadd.xlane.f32.xlu0 %v930_v4  ;;  %934 = vadd.xlane.f32.xlu1 %v933_v51  ;;  %v678_v23 = vmul.f32 1.442695, %v2643_v19 }
 0x2da   : > { %v1623_v24 = vpop.eup %1622 }
 0x2db   : > { %v696_v0 = vmul.f32 %v1623_v24, %v632_v36  ;;  %v1625_v18 = vpop.eup %1624  ;;  %1636 = vpow2.f32 %v678_v23  ;;  %v637_v24 = vld [vmem:[#allocation3 + $0x28] sm:$0xff]  ;;  %v2647_v36 = vld [vmem:[#allocation24_spill] sm:$0xff] }
 0x2dc   : > { %v697_v15 = vmul.f32 %v1625_v18, %v633_v58  ;;  %v1627_v27 = vpop.eup %1626  ;;  %1638 = vpow2.f32 %v682_v62  ;;  %v2649_v14 = vsub.f32 %v2647_v36, %v2648_v6  ;;  %v2651_v18 = vld [vmem:[#allocation27_spill] sm:$0xff]  ;;  %v639_v23 = vld [vmem:[#allocation3 + $0x38] sm:$0xff] }
 0x2dd   : > { %v698_v39 = vmul.f32 %v1627_v27, %v634_v22  ;;  %v1629_v60 = vpop.eup %1628  ;;  %1640 = vpow2.f32 %v680_v45  ;;  %v2654_v27 = vld [vmem:[#allocation30_spill] sm:$0xff]  ;;  %v2662_v62 = vld [vmem:[#allocation33_spill] sm:$0xff] }
 0x2de   : > { %v1631_v51 = vpop.eup %1630  ;;  %v699_v48 = vmul.f32 %v1629_v60, %v635_v43 }
 0x2df   : > { %v700_v47 = vmul.f32 %v1631_v51, %v636_v32  ;;  %v1633_v59 = vpop.eup %1632  ;;  %v2660_v51 = vld [vmem:[#allocation34_spill] sm:$0xff] }
 0x2e0   : > { %v701_v2 = vmul.f32 %v1633_v59, %v637_v24  ;;  %v1635_v3 = vpop.eup %1634  ;;  %v640_v24 = vld [vmem:[#allocation3 + $0x40] sm:$0xff] }
 0x2e5   : > { %v1637_v43 = vpop.eup %1636 }
 0x2e6   : > { %v1639_v45 = vpop.eup %1638 }
 0x33a   : > { %v890_v30 = vpop.xlane.xlu1 %889 }
 0x33b   : > { %v936_v54 = vadd.f32 %v890_v30, %v696_v0  ;;  %v686_v0 = vmul.f32 1.442695, %v2649_v14  ;;  %v2652_v30 = vsub.f32 %v2650_v42, %v2651_v18 }
 0x33d   : > { %953 = vst.msk [vmem:[#allocation3] sm:$0xff] %vm952_vm1, %v936_v54  ;;  %v684_v58 = vmul.f32 1.442695, %v2652_v30  ;;  %v638_v54 = vld [vmem:[#allocation3 + $0x30] sm:$0xff]  ;;  %1642 = vpow2.f32 %v686_v0  ;;  %v643_v30 = vld [vmem:[#allocation3 + $0x58] sm:$0xff] }
 0x33e   : > { %v893_v26 = vpop.xlane.xlu0 %892 }
 0x33f   : > { %v937_v61 = vadd.f32 %v893_v26, %v697_v15  ;;  %v2653_v15 = vld [vmem:[#allocation28_spill] sm:$0xff]  ;;  %1644 = vpow2.f32 %v684_v58 }
 0x340   : > { %v2655_v26 = vsub.f32 %v2653_v15, %v2654_v27  ;;  %v642_v58 = vld [vmem:[#allocation3 + $0x50] sm:$0xff] }
 0x341   : > { %954 = vst.msk [vmem:[#allocation3 + $0x8] sm:$0xff] %vm952_vm1, %v937_v61  ;;  %v2657_v61 = vld [vmem:[#allocation31_spill] sm:$0xff] }
 0x342   : > { %v896_v31 = vpop.xlane.xlu0 %895  ;;  %v690_v22 = vmul.f32 1.442695, %v2655_v26 }
 0x343   : > { %v938_v4 = vadd.f32 %v896_v31, %v698_v39  ;;  %v2658_v39 = vsub.f32 %v2656_v46, %v2657_v61  ;;  %v702_v31 = vmul.f32 %v1635_v3, %v638_v54  ;;  %v644_v46 = vld [vmem:[#allocation3 + $0x60] sm:$0xff] }
 0x344   : > { %1646 = vpow2.f32 %v690_v22 }
 0x345   : > { %955 = vst.msk [vmem:[#allocation3 + $0x10] sm:$0xff] %vm952_vm1, %v938_v4  ;;  %v688_v60 = vmul.f32 1.442695, %v2658_v39  ;;  %v2659_v4 = vld [vmem:[#allocation32_spill] sm:$0xff] }
 0x346   : > { %v899_v33 = vpop.xlane.xlu1 %898 }
 0x347   : > { %v939_v44 = vadd.f32 %v899_v33, %v699_v48  ;;  %v2661_v48 = vsub.f32 %v2659_v4, %v2660_v51  ;;  %1648 = vpow2.f32 %v688_v60  ;;  %v2663_v33 = vld [vmem:[#allocation35_spill] sm:$0xff]  ;;  %v647_v51 = vld [vmem:[#allocation3 + $0x78] sm:$0xff] }
 0x348   : > { %v2664_v10 = vsub.f32 %v2662_v62, %v2663_v33 }
 0x349   : > { %956 = vst.msk [vmem:[#allocation3 + $0x18] sm:$0xff] %vm952_vm1, %v939_v44  ;;  %v694_v32 = vmul.f32 1.442695, %v2661_v48  ;;  %v703_v44 = vmul.f32 %v1637_v43, %v639_v23  ;;  %v646_v48 = vld [vmem:[#allocation3 + $0x70] sm:$0xff] }
 0x34a   : > { %v902_v7 = vpop.xlane.xlu0 %901  ;;  %v692_v55 = vmul.f32 1.442695, %v2664_v10 }
 0x34b   : > { %v940_v63 = vadd.f32 %v902_v7, %v700_v47  ;;  %v1641_v47 = vpop.eup %1640  ;;  %v641_v7 = vld [vmem:[#allocation3 + $0x48] sm:$0xff]  ;;  %1650 = vpow2.f32 %v694_v32 }
 0x34c   : > { %1652 = vpow2.f32 %v692_v55  ;;  %v1643_v6 = vpop.eup %1642  ;;  %v705_v14 = vmul.f32 %v1639_v45, %v641_v7  ;;  %v704_v0 = vmul.f32 %v1641_v47, %v640_v24 }
 0x34d   : > { %957 = vst.msk [vmem:[#allocation3 + $0x20] sm:$0xff] %vm952_vm1, %v940_v63  ;;  %v1645_v63 = vpop.eup %1644  ;;  %v707_v54 = vmul.f32 %v1643_v6, %v643_v30 }
 0x34e   : > { %v905_v11 = vpop.xlane.xlu1 %904  ;;  %v706_v15 = vmul.f32 %v1645_v63, %v642_v58 }
 0x34f   : > { %v941_v38 = vadd.f32 %v905_v11, %v701_v2  ;;  %v1647_v11 = vpop.eup %1646 }
 0x351   : > { %958 = vst.msk [vmem:[#allocation3 + $0x28] sm:$0xff] %vm952_vm1, %v941_v38  ;;  %v1649_v27 = vpop.eup %1648  ;;  %v645_v38 = vld [vmem:[#allocation3 + $0x68] sm:$0xff] }
 0x352   : > { %v908_v19 = vpop.xlane.xlu0 %907  ;;  %v708_v43 = vmul.f32 %v1649_v27, %v644_v46 }
 0x353   : > { %v942_v50 = vadd.f32 %v908_v19, %v702_v31  ;;  %v709_v31 = vmul.f32 %v1647_v11, %v645_v38 }
 0x355   : > { %959 = vst.msk [vmem:[#allocation3 + $0x30] sm:$0xff] %vm952_vm1, %v942_v50  ;;  %v1651_v60 = vpop.eup %1650 }
 0x356   : > { %v911_v59 = vpop.xlane.xlu1 %910  ;;  %v1653_v19 = vpop.eup %1652  ;;  %v711_v62 = vmul.f32 %v1651_v60, %v647_v51 }
 0x357   : > { %v943_v36 = vadd.f32 %v911_v59, %v703_v44  ;;  %v710_v33 = vmul.f32 %v1653_v19, %v646_v48 }
 0x359   : > { %960 = vst.msk [vmem:[#allocation3 + $0x38] sm:$0xff] %vm952_vm1, %v943_v36 }
 0x35a   : > { %v917_v42 = vpop.xlane.xlu1 %916  ;;  %v914_v18 = vpop.xlane.xlu0 %913 }
 0x35b   : > { %v945_v2 = vadd.f32 %v917_v42, %v705_v14  ;;  %v944_v3 = vadd.f32 %v914_v18, %v704_v0 }
 0x35d   : > { %962 = vst.msk [vmem:[#allocation3 + $0x48] sm:$0xff] %vm952_vm1, %v945_v2  ;;  %961 = vst.msk [vmem:[#allocation3 + $0x40] sm:$0xff] %vm952_vm1, %v944_v3 }
 0x35e   : > { %v923_v26 = vpop.xlane.xlu1 %922  ;;  %v920_v22 = vpop.xlane.xlu0 %919 }
 0x35f   : > { %v947_v61 = vadd.f32 %v923_v26, %v707_v54  ;;  %v946_v39 = vadd.f32 %v920_v22, %v706_v15 }
 0x361   : > { %964 = vst.msk [vmem:[#allocation3 + $0x58] sm:$0xff] %vm952_vm1, %v947_v61  ;;  %963 = vst.msk [vmem:[#allocation3 + $0x50] sm:$0xff] %vm952_vm1, %v946_v39 }
 0x362   : > { %v929_v23 = vpop.xlane.xlu1 %928  ;;  %v926_v4 = vpop.xlane.xlu0 %925 }
 0x363   : > { %v949_v32 = vadd.f32 %v929_v23, %v709_v31  ;;  %v948_v50 = vadd.f32 %v926_v4, %v708_v43 }
 0x365   : > { %966 = vst.msk [vmem:[#allocation3 + $0x68] sm:$0xff] %vm952_vm1, %v949_v32  ;;  %965 = vst.msk [vmem:[#allocation3 + $0x60] sm:$0xff] %vm952_vm1, %v948_v50 }
 0x366   : > { %v935_v10 = vpop.xlane.xlu1 %934  ;;  %v932_v55 = vpop.xlane.xlu0 %931 }
 0x367   : > { %v951_v45 = vadd.f32 %v935_v10, %v711_v62  ;;  %v950_v44 = vadd.f32 %v932_v55, %v710_v33 }
 0x369   : > { %968 = vst.msk [vmem:[#allocation3 + $0x78] sm:$0xff] %vm952_vm1, %v951_v45  ;;  %967 = vst.msk [vmem:[#allocation3 + $0x70] sm:$0xff] %vm952_vm1, %v950_v44 }
 0x36a PF: > { %987 = sbr.rel (%p1376_p12) target bundleno = 906 (0x38a), region = 56  ;;  %v1004_v47 = vld [vmem:[#allocation3] sm:$0xff] (!%p1376_p12)  ;;  %v1005_v59 = vld [vmem:[#allocation3 + $0x8] sm:$0xff] (!%p1376_p12)  ;;  %v1006_v7 = vld [vmem:[#allocation3 + $0x10] sm:$0xff] (!%p1376_p12)  ;;  %vm1068_vm2 = vcmask (!%p1376_p12), 7168  }
 0x36b   : > { %1654 = vlog2.f32 (!%p1376_p12), %v1004_v47  ;;  %v1007_v24 = vld [vmem:[#allocation3 + $0x18] sm:$0xff] (!%p1376_p12)  ;;  %v1008_v36 = vld [vmem:[#allocation3 + $0x20] sm:$0xff] (!%p1376_p12)  ;;  %v1009_v6 = vld [vmem:[#allocation3 + $0x28] sm:$0xff] (!%p1376_p12) }
 0x36c   : > { %1656 = vlog2.f32 (!%p1376_p12), %v1005_v59  ;;  %v1010_v14 = vld [vmem:[#allocation3 + $0x30] sm:$0xff] (!%p1376_p12)  ;;  %v1011_v0 = vld [vmem:[#allocation3 + $0x38] sm:$0xff] (!%p1376_p12)  ;;  %v1012_v63 = vld [vmem:[#allocation3 + $0x40] sm:$0xff] (!%p1376_p12) }
 0x36d   : > { %1658 = vlog2.f32 (!%p1376_p12), %v1006_v7  ;;  %v1013_v42 = vld [vmem:[#allocation3 + $0x48] sm:$0xff] (!%p1376_p12)  ;;  %v1014_v18 = vld [vmem:[#allocation3 + $0x50] sm:$0xff] (!%p1376_p12)  ;;  %v1015_v30 = vld [vmem:[#allocation3 + $0x58] sm:$0xff] (!%p1376_p12) }
 0x36e   : > { %1660 = vlog2.f32 (!%p1376_p12), %v1007_v24  ;;  %v1016_v58 = vld [vmem:[#allocation3 + $0x60] sm:$0xff] (!%p1376_p12)  ;;  %v1017_v11 = vld [vmem:[#allocation3 + $0x68] sm:$0xff] (!%p1376_p12)  ;;  %v990_v46 = vld [vmem:[#allocation2 + $0x10] sm:$0xff] (!%p1376_p12) }
 0x36f   : > { %1662 = vlog2.f32 (!%p1376_p12), %v1008_v36  ;;  %v988_v3 = vld [vmem:[#allocation2] sm:$0xff] (!%p1376_p12)  ;;  %v989_v27 = vld [vmem:[#allocation2 + $0x8] sm:$0xff] (!%p1376_p12)  ;;  %v991_v43 = vld [vmem:[#allocation2 + $0x18] sm:$0xff] (!%p1376_p12) }
 0x370   : > { %1664 = vlog2.f32 (!%p1376_p12), %v1009_v6  ;;  %v1018_v26 = vld [vmem:[#allocation3 + $0x70] sm:$0xff] (!%p1376_p12)  ;;  %v1019_v61 = vld [vmem:[#allocation3 + $0x78] sm:$0xff] (!%p1376_p12)  ;;  %v992_v51 = vld [vmem:[#allocation2 + $0x20] sm:$0xff] (!%p1376_p12) }
 0x371   : > { %1666 = vlog2.f32 %v1010_v14  ;;  %v993_v62 = vld [vmem:[#allocation2 + $0x28] sm:$0xff]  ;;  %v994_v45 = vld [vmem:[#allocation2 + $0x30] sm:$0xff]  ;;  %v995_v7 = vld [vmem:[#allocation2 + $0x38] sm:$0xff] }
 0x372   : > { %1668 = vlog2.f32 %v1011_v0  ;;  %v996_v14 = vld [vmem:[#allocation2 + $0x40] sm:$0xff] }
 0x373   : > { %1670 = vlog2.f32 %v1012_v63 }
 0x374   : > { %1672 = vlog2.f32 %v1013_v42 }
 0x375   : > { %v1655_v2 = vpop.eup %1654  ;;  %1674 = vlog2.f32 %v1014_v18  ;;  %v997_v18 = vld [vmem:[#allocation2 + $0x48] sm:$0xff] }
 0x376   : > { %v1657_v54 = vpop.eup %1656  ;;  %v1021_v15 = vmul.f32 0.6931472, %v1655_v2  ;;  %1676 = vlog2.f32 %v1015_v30 }
 0x377   : > { %v1659_v22 = vpop.eup %1658  ;;  %v1023_v38 = vmul.f32 0.6931472, %v1657_v54  ;;  %1678 = vlog2.f32 %v1016_v58 }
 0x378   : > { %v1661_v39 = vpop.eup %1660  ;;  %v1052_v60 = vadd.f32 %v1021_v15, %v988_v3  ;;  %v1025_v31 = vmul.f32 0.6931472, %v1659_v22  ;;  %1680 = vlog2.f32 %v1017_v11  ;;  %v998_v3 = vld [vmem:[#allocation2 + $0x50] sm:$0xff] }
 0x379   : > { %v1663_v19 = vpop.eup %1662  ;;  %v1053_v23 = vadd.f32 %v1023_v38, %v989_v27  ;;  %v1027_v4 = vmul.f32 0.6931472, %v1661_v39  ;;  %1682 = vlog2.f32 %v1018_v26  ;;  %v999_v27 = vld [vmem:[#allocation2 + $0x58] sm:$0xff] }
 0x37a   : > { %v1665_v48 = vpop.eup %1664  ;;  %1069 = vst.msk [vmem:[#allocation2] sm:$0xff] %vm1068_vm2, %v1052_v60  ;;  %v1054_v32 = vadd.f32 %v1025_v31, %v990_v46  ;;  %v1029_v50 = vmul.f32 0.6931472, %v1663_v19  ;;  %1684 = vlog2.f32 %v1019_v61  ;;  %v1000_v46 = vld [vmem:[#allocation2 + $0x60] sm:$0xff]  ;;  %v1001_v31 = vld [vmem:[#allocation2 + $0x68] sm:$0xff] }
 0x37b   : > { %v1667_v33 = vpop.eup %1666  ;;  %1070 = vst.msk [vmem:[#allocation2 + $0x8] sm:$0xff] %vm1068_vm2, %v1053_v23  ;;  %v1055_v10 = vadd.f32 %v1027_v4, %v991_v43  ;;  %v1031_v55 = vmul.f32 0.6931472, %v1665_v48  ;;  %v1002_v4 = vld [vmem:[#allocation2 + $0x70] sm:$0xff] }
 0x37c   : > { %v1669_v44 = vpop.eup %1668  ;;  %1071 = vst.msk [vmem:[#allocation2 + $0x10] sm:$0xff] %vm1068_vm2, %v1054_v32  ;;  %v1056_v47 = vadd.f32 %v1029_v50, %v992_v51  ;;  %v1033_v59 = vmul.f32 0.6931472, %v1667_v33  ;;  %v1003_v50 = vld [vmem:[#allocation2 + $0x78] sm:$0xff] }
 0x37d   : > { %v1671_v24 = vpop.eup %1670  ;;  %1072 = vst.msk [vmem:[#allocation2 + $0x18] sm:$0xff] %vm1068_vm2, %v1055_v10  ;;  %v1057_v36 = vadd.f32 %v1031_v55, %v993_v62  ;;  %v1035_v6 = vmul.f32 0.6931472, %v1669_v44 }
 0x37e   : > { %v1673_v0 = vpop.eup %1672  ;;  %1073 = vst.msk [vmem:[#allocation2 + $0x20] sm:$0xff] %vm1068_vm2, %v1056_v47  ;;  %v1058_v63 = vadd.f32 %v1033_v59, %v994_v45  ;;  %v1037_v42 = vmul.f32 0.6931472, %v1671_v24 }
 0x37f   : > { %v1675_v30 = vpop.eup %1674  ;;  %1074 = vst.msk [vmem:[#allocation2 + $0x28] sm:$0xff] %vm1068_vm2, %v1057_v36  ;;  %v1059_v58 = vadd.f32 %v1035_v6, %v995_v7  ;;  %v1039_v2 = vmul.f32 0.6931472, %v1673_v0 }
 0x380   : > { %v1677_v11 = vpop.eup %1676  ;;  %1075 = vst.msk [vmem:[#allocation2 + $0x30] sm:$0xff] %vm1068_vm2, %v1058_v63  ;;  %v1060_v54 = vadd.f32 %v1037_v42, %v996_v14  ;;  %v1041_v15 = vmul.f32 0.6931472, %v1675_v30 }
 0x381   : > { %v1679_v26 = vpop.eup %1678  ;;  %1076 = vst.msk [vmem:[#allocation2 + $0x38] sm:$0xff] %vm1068_vm2, %v1059_v58  ;;  %v1061_v22 = vadd.f32 %v1039_v2, %v997_v18  ;;  %v1043_v38 = vmul.f32 0.6931472, %v1677_v11 }
 0x382   : > { %v1681_v61 = vpop.eup %1680  ;;  %1077 = vst.msk [vmem:[#allocation2 + $0x40] sm:$0xff] %vm1068_vm2, %v1060_v54  ;;  %v1062_v39 = vadd.f32 %v1041_v15, %v998_v3  ;;  %v1045_v60 = vmul.f32 0.6931472, %v1679_v26 }
 0x383   : > { %v1683_v43 = vpop.eup %1682  ;;  %1078 = vst.msk [vmem:[#allocation2 + $0x48] sm:$0xff] %vm1068_vm2, %v1061_v22  ;;  %v1063_v19 = vadd.f32 %v1043_v38, %v999_v27  ;;  %v1047_v23 = vmul.f32 0.6931472, %v1681_v61 }
 0x384   : > { %v1685_v51 = vpop.eup %1684  ;;  %1079 = vst.msk [vmem:[#allocation2 + $0x50] sm:$0xff] %vm1068_vm2, %v1062_v39  ;;  %v1064_v48 = vadd.f32 %v1045_v60, %v1000_v46  ;;  %v1049_v32 = vmul.f32 0.6931472, %v1683_v43 }
 0x385   : > { %1080 = vst.msk [vmem:[#allocation2 + $0x58] sm:$0xff] %vm1068_vm2, %v1063_v19  ;;  %v1065_v62 = vadd.f32 %v1047_v23, %v1001_v31  ;;  %v1051_v33 = vmul.f32 0.6931472, %v1685_v51 }
 0x386   : > { %1081 = vst.msk [vmem:[#allocation2 + $0x60] sm:$0xff] %vm1068_vm2, %v1064_v48  ;;  %v1066_v10 = vadd.f32 %v1049_v32, %v1002_v4 }
 0x387   : > { %1082 = vst.msk [vmem:[#allocation2 + $0x68] sm:$0xff] %vm1068_vm2, %v1065_v62  ;;  %v1067_v55 = vadd.f32 %v1051_v33, %v1003_v50 }
 0x388   : > { %1083 = vst.msk [vmem:[#allocation2 + $0x70] sm:$0xff] %vm1068_vm2, %v1066_v10 }
 0x389   : > { %1084 = vst.msk [vmem:[#allocation2 + $0x78] sm:$0xff] %vm1068_vm2, %v1067_v55 }
 0x38a PF: > { %p1403_p9 = scmp.lt.s32.totalorder %s1847_s14, 1 }
 0x38b   : > { %v1091_v45 = vld [vmem:[#allocation2 + $0x10] sm:$0xff] (!%p1403_p9)  ;;  %v1089_v44 = vld [vmem:[#allocation2] sm:$0xff] (!%p1403_p9)  ;;  %v1868_v47 = vmov (!%p1403_p9), 0   ;;  %v1092_v59 = vld [vmem:[#allocation2 + $0x18] sm:$0xff] (!%p1403_p9) }
 0x38c   : > { %1088 = sbr.rel (%p1403_p9) target bundleno = 1069 (0x42d), region = 60  ;;  %1687 = vset.pattern.permute.xlu1 (!%p1403_p9), %v1868_v47  ;;  %1686 = vset.pattern.permute.xlu0 (!%p1403_p9), %v1868_v47  ;;  %v1090_v7 = vld [vmem:[#allocation2 + $0x8] sm:$0xff] (!%p1403_p9)  ;;  %v1093_v36 = vld [vmem:[#allocation2 + $0x20] sm:$0xff] (!%p1403_p9)  ;;  %v1096_v6 = vld [vmem:[#allocation2 + $0x38] sm:$0xff] (!%p1403_p9) }
 0x38d   : > { %1117 = vperm.xlu1 (!%p1403_p9), %1687, %v1091_v45   ;;  %1107 = vperm.xlu0 (!%p1403_p9), %1686, %v1089_v44   ;;  %v1094_v24 = vld [vmem:[#allocation2 + $0x28] sm:$0xff] (!%p1403_p9)  ;;  %v1095_v14 = vld [vmem:[#allocation2 + $0x30] sm:$0xff] (!%p1403_p9)  ;;  %v1097_v63 = vld [vmem:[#allocation2 + $0x40] sm:$0xff] (!%p1403_p9) }
 0x38e   : > { %v1098_v0 = vld [vmem:[#allocation2 + $0x48] sm:$0xff] (!%p1403_p9)  ;;  %v1100_v42 = vld [vmem:[#allocation2 + $0x58] sm:$0xff] (!%p1403_p9)  ;;  %v1099_v18 = vld [vmem:[#allocation2 + $0x50] sm:$0xff] (!%p1403_p9) }
 0x38f   : > { %v1102_v30 = vld [vmem:[#allocation2 + $0x68] sm:$0xff] (!%p1403_p9)  ;;  %v1101_v58 = vld [vmem:[#allocation2 + $0x60] sm:$0xff] (!%p1403_p9)  ;;  %v1103_v3 = vld [vmem:[#allocation2 + $0x70] sm:$0xff] (!%p1403_p9) }
 0x390   : > { %v1104_v2 = vld [vmem:[#allocation2 + $0x78] sm:$0xff] (!%p1403_p9)  ;;  %v2665_v26 = vld [vmem:[#allocation14_spill] sm:$0xff] (!%p1403_p9)  ;;  %v2668_v43 = vld [vmem:[#allocation15_spill] sm:$0xff] (!%p1403_p9) }
 0x391   : > { %1122 = vperm.xlu1 (!%p1403_p9), %1687, %v1092_v59   ;;  %1112 = vperm.xlu0 (!%p1403_p9), %1686, %v1090_v7   ;;  %v2666_v39 = vld [vmem:[#allocation18_spill] sm:$0xff] (!%p1403_p9)  ;;  %v2667_v31 = vld [vmem:[#allocation20_spill] sm:$0xff] (!%p1403_p9)  ;;  %v2669_v19 = vld [vmem:[#allocation17_spill] sm:$0xff] (!%p1403_p9) }
 0x392   : > { %v2670_v32 = vld [vmem:[#allocation21_spill] sm:$0xff] (!%p1403_p9)  ;;  %v2671_v45 = vld [vmem:[#allocation22_spill] sm:$0xff] (!%p1403_p9)  ;;  %v2672_v59 = vld [vmem:[#allocation16_spill] sm:$0xff] (!%p1403_p9) }
 0x395   : > { %1132 = vperm.xlu1 %1687, %v1094_v24   ;;  %1127 = vperm.xlu0 %1686, %v1093_v36  }
 0x399   : > { %1142 = vperm.xlu1 %1687, %v1096_v6   ;;  %1137 = vperm.xlu0 %1686, %v1095_v14   ;;  %v2673_v6 = vld [vmem:[#allocation19_spill] sm:$0xff] }
 0x39d   : > { %1152 = vperm.xlu1 %1687, %v1098_v0   ;;  %1147 = vperm.xlu0 %1686, %v1097_v63  }
 0x3a1   : > { %1162 = vperm.xlu1 %1687, %v1100_v42   ;;  %1157 = vperm.xlu0 %1686, %v1099_v18  }
 0x3a5   : > { %1172 = vperm.xlu1 %1687, %v1102_v30   ;;  %1167 = vperm.xlu0 %1686, %v1101_v58  }
 0x3a9   : > { %1182 = vperm.xlu1 %1687, %v1104_v2   ;;  %1177 = vperm.xlu0 %1686, %v1103_v3  }
 0x40c   : > { %v1118_v11 = vpop.permute.xlu1 %1117  ;;  %v1108_v54 = vpop.permute.xlu0 %1107 }
 0x40d   : > { %v1189_v15 = vsub.f32 %v2091_v52, %v1118_v11  ;;  %v1190_v27 = vsub.f32 %v2096_v56, %v1118_v11  ;;  %v1185_v22 = vsub.f32 %v2665_v26, %v1108_v54  ;;  %v1186_v38 = vsub.f32 %v2076_v40, %v1108_v54 }
 0x40f   : > { %1221 = vst [vmem:[%s2024_s9 + $0x20] sm:$0xff] %v1189_v15  ;;  %1222 = vst [vmem:[%s2024_s9 + $0x28] sm:$0xff] %v1190_v27 }
 0x410   : > { %1217 = vst [vmem:[%s2024_s9] sm:$0xff] %v1185_v22  ;;  %1218 = vst [vmem:[%s2024_s9 + $0x8] sm:$0xff] %v1186_v38  ;;  %v1123_v46 = vpop.permute.xlu1 %1122  ;;  %v1113_v61 = vpop.permute.xlu0 %1112 }
 0x411   : > { %v1191_v60 = vsub.f32 %v2666_v39, %v1123_v46  ;;  %v1192_v52 = vsub.f32 %v2667_v31, %v1123_v46  ;;  %v1187_v56 = vsub.f32 %v2668_v43, %v1113_v61  ;;  %v1188_v23 = vsub.f32 %v2669_v19, %v1113_v61 }
 0x413   : > { %1223 = vst [vmem:[%s2024_s9 + $0x30] sm:$0xff] %v1191_v60  ;;  %1224 = vst [vmem:[%s2024_s9 + $0x38] sm:$0xff] %v1192_v52 }
 0x414   : > { %1219 = vst [vmem:[%s2024_s9 + $0x10] sm:$0xff] %v1187_v56  ;;  %1220 = vst [vmem:[%s2024_s9 + $0x18] sm:$0xff] %v1188_v23  ;;  %v1133_v40 = vpop.permute.xlu1 %1132  ;;  %v1128_v4 = vpop.permute.xlu0 %1127 }
 0x415   : > { %v1195_v51 = vsub.f32 %v2121_v12, %v1133_v40  ;;  %v1196_v48 = vsub.f32 %v2126_v16, %v1133_v40  ;;  %v1193_v50 = vsub.f32 %v2670_v32, %v1128_v4  ;;  %v1194_v62 = vsub.f32 %v2116_v8, %v1128_v4 }
 0x417   : > { %1227 = vst [vmem:[%s2024_s9 + $0x50] sm:$0xff] %v1195_v51  ;;  %1228 = vst [vmem:[%s2024_s9 + $0x58] sm:$0xff] %v1196_v48 }
 0x418   : > { %1225 = vst [vmem:[%s2024_s9 + $0x40] sm:$0xff] %v1193_v50  ;;  %1226 = vst [vmem:[%s2024_s9 + $0x48] sm:$0xff] %v1194_v62  ;;  %v1143_v33 = vpop.permute.xlu1 %1142  ;;  %v1138_v10 = vpop.permute.xlu0 %1137 }
 0x419   : > { %v1199_v55 = vsub.f32 %v2141_v28, %v1143_v33  ;;  %v1200_v12 = vsub.f32 %v2146_v34, %v1143_v33  ;;  %v1197_v16 = vsub.f32 %v2131_v20, %v1138_v10  ;;  %v1198_v44 = vsub.f32 %v2671_v45, %v1138_v10 }
 0x41b   : > { %1231 = vst [vmem:[%s2024_s9 + $0x70] sm:$0xff] %v1199_v55  ;;  %1232 = vst [vmem:[%s2024_s9 + $0x78] sm:$0xff] %v1200_v12 }
 0x41c   : > { %1229 = vst [vmem:[%s2024_s9 + $0x60] sm:$0xff] %v1197_v16  ;;  %1230 = vst [vmem:[%s2024_s9 + $0x68] sm:$0xff] %v1198_v44  ;;  %v1153_v8 = vpop.permute.xlu1 %1152  ;;  %v1148_v47 = vpop.permute.xlu0 %1147 }
 0x41d   : > { %v1203_v7 = vsub.f32 %v2672_v59, %v1153_v8  ;;  %v1204_v28 = vsub.f32 %v2089_v49, %v1153_v8  ;;  %v1201_v34 = vsub.f32 %v2073_v37, %v1148_v47  ;;  %v1202_v20 = vsub.f32 %v2079_v41, %v1148_v47 }
 0x41f   : > { %1235 = vst [vmem:[%s2024_s9 + $0x90] sm:$0xff] %v1203_v7  ;;  %1236 = vst [vmem:[%s2024_s9 + $0x98] sm:$0xff] %v1204_v28 }
 0x420   : > { %1233 = vst [vmem:[%s2024_s9 + $0x80] sm:$0xff] %v1201_v34  ;;  %1234 = vst [vmem:[%s2024_s9 + $0x88] sm:$0xff] %v1202_v20  ;;  %v1163_v24 = vpop.permute.xlu1 %1162  ;;  %v1158_v36 = vpop.permute.xlu0 %1157 }
 0x421   : > { %v1207_v14 = vsub.f32 %v2673_v6, %v1163_v24  ;;  %v1208_v0 = vsub.f32 %v2109_v1, %v1163_v24  ;;  %v1205_v49 = vsub.f32 %v2093_v53, %v1158_v36  ;;  %v1206_v37 = vsub.f32 %v2099_v57, %v1158_v36 }
 0x423   : > { %1239 = vst [vmem:[%s2024_s9 + $0xb0] sm:$0xff] %v1207_v14  ;;  %1240 = vst [vmem:[%s2024_s9 + $0xb8] sm:$0xff] %v1208_v0 }
 0x424   : > { %1237 = vst [vmem:[%s2024_s9 + $0xa0] sm:$0xff] %v1205_v49  ;;  %1238 = vst [vmem:[%s2024_s9 + $0xa8] sm:$0xff] %v1206_v37  ;;  %v1173_v41 = vpop.permute.xlu1 %1172  ;;  %v1168_v63 = vpop.permute.xlu0 %1167 }
 0x425   : > { %v1211_v42 = vsub.f32 %v2123_v13, %v1173_v41  ;;  %v1212_v18 = vsub.f32 %v2129_v17, %v1173_v41  ;;  %v1209_v1 = vsub.f32 %v2113_v5, %v1168_v63  ;;  %v1210_v53 = vsub.f32 %v2119_v9, %v1168_v63 }
 0x427   : > { %1243 = vst [vmem:[%s2024_s9 + $0xd0] sm:$0xff] %v1211_v42  ;;  %1244 = vst [vmem:[%s2024_s9 + $0xd8] sm:$0xff] %v1212_v18 }
 0x428   : > { %1241 = vst [vmem:[%s2024_s9 + $0xc0] sm:$0xff] %v1209_v1  ;;  %1242 = vst [vmem:[%s2024_s9 + $0xc8] sm:$0xff] %v1210_v53  ;;  %v1183_v57 = vpop.permute.xlu1 %1182  ;;  %v1178_v30 = vpop.permute.xlu0 %1177 }
 0x429   : > { %v1215_v58 = vsub.f32 %v2143_v29, %v1183_v57  ;;  %v1216_v2 = vsub.f32 %v2149_v35, %v1183_v57  ;;  %v1213_v13 = vsub.f32 %v2133_v21, %v1178_v30  ;;  %v1214_v3 = vsub.f32 %v2139_v25, %v1178_v30 }
 0x42b   : > { %1247 = vst [vmem:[%s2024_s9 + $0xf0] sm:$0xff] %v1215_v58  ;;  %1248 = vst [vmem:[%s2024_s9 + $0xf8] sm:$0xff] %v1216_v2 }
 0x42c   : > { %1245 = vst [vmem:[%s2024_s9 + $0xe0] sm:$0xff] %v1213_v13  ;;  %1246 = vst [vmem:[%s2024_s9 + $0xe8] sm:$0xff] %v1214_v3 }
 0x42d PF: > { %s1405_s22 = sadd.s32 4294967295, %s1847_s14  ;;  %s1269_s23 = sshll.u32 %s2024_s9, 4  ;;  %s2525_s23 = int_to_ptr.vmem [resolvable:$true] %s1269_s23 }
 0x42e   : > { %p1258_p10 = scmp.gt.s32.totalorder %s1405_s22, 0  ;;  %s2534_s27 = scalar_lea.sflag [#allocation6], %s216_s26 }
 0x42f   : > { %s1772_s28 = scalar_lea.vmem %s2525_s23, 4096  ;;  %p2674_p1 = scmp.ne.s32.totalorder %s2606_s20, 0 }
 0x430   : > { %s2682_s22 = smov (!%p1258_p10, %s1405_s22), 0  ;;  %p1773_p13 = scmp.ne.s32.totalorder %s2525_s23, %s1772_s28 }
 0x431   : > { %s1410_s10 = sshll.u32 %s2682_s22, 8  ;;  %s1869_s14 = smov [#allocation10]  }
 0x432   : > { %s2530_s18 = scalar_lea.hbm %s2579_s3, %s1410_s10  ;;  %p1774_p2 = pnand %p1773_p13, %p2674_p1 }
 0x433   : > { %s1776_s29 = sshll.u32 %s1869_s14, 4  ;;  %s1777_s29 = int_to_ptr.vmem [resolvable:$false] %s1776_s29 }
 0x434   : > { %p1775_p3 = pneg %p1774_p2  ;;  %s1778_s30 = scalar_lea.vmem %s1777_s29, 8192 }
 0x435   : > { %p1779_p5 = scmp.lt.s32.totalorder %s2525_s23, %s1777_s29  ;;  %p1780_p7 = scmp.lt.s32.totalorder %s1778_s30, %s1772_s28 }
 0x437   : > { %p1781_p8 = por %p1780_p7, %p1779_p5 }
 0x439   : > { %p1782_p11 = pnand %p1781_p8, %p1775_p3 }
 0x43b   : > { %1785 = shalt.err (!%p1782_p11)
}
 0x43c   : > { %s1786_s4 = scalar_lea.hbm %s2530_s18, 4096  ;;  %s1790_s24 = scalar_lea.hbm %s2579_s3, 4096 }
 0x43d   : > { %p1787_p4 = scmp.ne.s32.totalorder %s2530_s18, %s1786_s4  ;;  %p1791_p0 = scmp.lt.u32.totalorder %s2530_s18, %s2579_s3 }
 0x43e   : > { %p1792_p9 = scmp.lt.u32.totalorder %s1790_s24, %s1786_s4  ;;  %p1794_p13 = scmp.lt.u32.totalorder %s1786_s4, %s2530_s18 }
 0x43f   : > { %p1788_p6 = pnand %p1787_p4, %p2674_p1 }
 0x440   : > { %p1793_p10 = por %p1792_p9, %p1791_p0 }
 0x441   : > { %p1789_p12 = pneg %p1788_p6 }
 0x442   : > { %p1795_p2 = por %p1794_p13, %p1793_p10 }
 0x444   : > { %p1796_p3 = pnand %p1795_p2, %p1789_p12 }
 0x446   : > { %1799 = shalt.err (!%p1796_p3)
}
 0x447   : > { %s1870_s26 = smov 256   ;;  %s1871_s5 = smov 16  }
 0x448   : > { %1439 = dma.vmem_to_hbm [thread:$0]  (%p2674_p1), %s2525_s23, 4096, %s2530_s18, %s2534_s27, %s1870_s26, %s1870_s26, %s1871_s5  }
 0x449 PF: > { %p1461_p5 = scmp.ge.s32.totalorder %s1855_s16, 2  ;;  %s1284_s9 = sand.u32 1, %s1839_s12  }
 0x44a   : > { %p2675_p7 = scmp.ne.s32.totalorder %s2607_s21, 0  ;;  %s1285_s22 = scalar_lea.sflag [#allocation6], %s1284_s9 }
 0x44c   : > { %p1452_p8 = pnand %p1461_p5, %p2675_p7 }
 0x44e   : > { %1833 = dma.done.wait (!%p1452_p8), %s1285_s22, 4096  }
 0x44f   : > { %1835 = vsyncadd (!%p1452_p8), %s1285_s22, 4294963200  ;;  %s18_s16 = sadd.s32 1, %s1855_s16   ;;  %s2676_s12 = smov %s1843_s13 }
 0x450   : > { %p15_p11 = scmp.ge.s32.totalorder %s18_s16, 4   ;;  %s2566_s13 = smov 0  }
 0x451   : > { %s2677_s14 = smov %s1851_s15  ;;  %s2678_s15 = smov %s2680_s19 }
 0x452   :  { %17 = sbr.rel (!%p15_p11) target bundleno = 6 (0x6), region = 94 }
 0x459   :  { %1290 = vsyncpa [#allocation5], 1 }
 0x45a   :  { %1292 = vsyncpa [#allocation5 + $0x1], 1 }
 0x45b   :  { %1293 = vsyncpa [#allocation8], 1 }
 0x45c   :  { %1294 = vsyncpa [#allocation6], 1 }
 0x45d   :  { %1296 = vsyncpa [#allocation6 + $0x1], 1 }

// kernel: decoder_rnn_forward.2
= control target key start
LH: loop header
LB: loop body
LE: loop exit
PB: predicated region body
PF: predicated region fallthrough
CT: control target
= control target key end

     0   :  { %12 = vsyncpa [#allocation6], 0  ;;  %s8005_s0 = inlined_call_operand.hbm [shape: bf16[8,16,128], index: 0, kind: input, shape index: {}]   ;;  %s8006_s1 = inlined_call_operand.hbm [shape: bf16[128,512], index: 1, kind: input, shape index: {}]   ;;  %s8007_s2 = inlined_call_operand.hbm [shape: bf16[128,512], index: 2, kind: input, shape index: {}]   ;;  %s8008_s3 = inlined_call_operand.hbm [shape: bf16[128,512], index: 3, kind: input, shape index: {}]   ;;  %s8009_s4 = inlined_call_operand.hbm [shape: bf16[128,512], index: 4, kind: input, shape index: {}]   ;;  %s8010_s5 = inlined_call_operand.hbm [shape: f32[1,512], index: 5, kind: input, shape index: {}]   ;;  %s8011_s6 = inlined_call_operand.hbm [shape: f32[1,512], index: 6, kind: input, shape index: {}]   ;;  %s8012_s7 = inlined_call_operand.hbm [shape: bf16[8,16,128], index: 7, kind: output, shape index: {}]  }
   0x1   :  { %13 = vsyncpa [#allocation9], 0 }
   0x2   :  { %14 = vsyncpa [#allocation12], 0 }
   0x3   :  { %15 = vsyncpa [#allocation15], 0 }
   0x4   :  { %16 = vsyncpa [#allocation7], 0  ;;  %s6063_s24 = smov [#allocation8]   ;;  %s5877_s28 = scalar_lea.hbm %s8006_s1, 4096 }
   0x5   :  { %s34_s25 = sshll.u32 %s6063_s24, 4  ;;  %p5878_p0 = scmp.ne.s32.totalorder %s8006_s1, %s5877_s28  ;;  %s35_s25 = int_to_ptr.vmem [resolvable:$true] %s34_s25 }
   0x6   :  { %p5881_p1 = scmp.lt.u32.totalorder %s5877_s28, %s8006_s1 }
   0x8   :  { %p5883_p2 = pnand %p5881_p1, %p5878_p0 }
   0xa   :  { %5886 = shalt.err (!%p5883_p2)
}
   0xb   :  { %s5887_s10 = scalar_lea.vmem %s35_s25, 4096  ;;  %p5892_p4 = scmp.lt.s32.totalorder %s35_s25, %s35_s25 }
   0xc   :  { %p5888_p3 = scmp.ne.s32.totalorder %s35_s25, %s5887_s10  ;;  %p5893_p5 = scmp.lt.s32.totalorder %s5887_s10, %s5887_s10 }
   0xe   :  { %p5894_p6 = por %p5893_p5, %p5892_p4 }
  0x10   :  { %p5895_p7 = pnand %p5894_p6, %p5888_p3 }
  0x12   :  { %5898 = shalt.err (!%p5895_p7)
}
  0x13   :  { %s6064_s11 = smov 256   ;;  %s6065_s12 = smov 16  }
  0x14   :  { %40 = dma.hbm_to_vmem [thread:$0]  %s8006_s1, 4096, %s35_s25, [#allocation9], %s6064_s11, %s6064_s11, %s6065_s12  }
  0x15   :  { %s6066_s15 = smov [#allocation11]   ;;  %s6067_s17 = smov [#allocation14]  }
  0x16   :  { %s58_s16 = sshll.u32 %s6066_s15, 4  ;;  %s83_s18 = sshll.u32 %s6067_s17, 4  ;;  %s59_s16 = int_to_ptr.vmem [resolvable:$true] %s58_s16  ;;  %s84_s18 = int_to_ptr.vmem [resolvable:$true] %s83_s18 }
  0x17   :  { %s5899_s21 = scalar_lea.hbm %s8008_s3, 4096 }
  0x18   :  { %p5900_p8 = scmp.ne.s32.totalorder %s8008_s3, %s5899_s21  ;;  %p5903_p9 = scmp.lt.u32.totalorder %s5899_s21, %s8008_s3 }
  0x1a   :  { %p5905_p10 = pnand %p5903_p9, %p5900_p8 }
  0x1c   :  { %5908 = shalt.err (!%p5905_p10)
}
  0x1d   :  { %s5909_s1 = scalar_lea.vmem %s59_s16, 4096  ;;  %p5914_p12 = scmp.lt.s32.totalorder %s59_s16, %s59_s16 }
  0x1e   :  { %p5910_p11 = scmp.ne.s32.totalorder %s59_s16, %s5909_s1  ;;  %p5915_p13 = scmp.lt.s32.totalorder %s5909_s1, %s5909_s1 }
  0x20   :  { %p5916_p0 = por %p5915_p13, %p5914_p12 }
  0x22   :  { %p5917_p1 = pnand %p5916_p0, %p5910_p11 }
  0x24   :  { %5920 = shalt.err (!%p5917_p1)
}
  0x25   :  { %64 = dma.hbm_to_vmem [thread:$0]  %s8008_s3, 4096, %s59_s16, [#allocation12], %s6064_s11, %s6064_s11, %s6065_s12  }
  0x26   :  { %s5921_s30 = scalar_lea.hbm %s8010_s5, 64 }
  0x27   :  { %p5922_p2 = scmp.ne.s32.totalorder %s8010_s5, %s5921_s30  ;;  %p5925_p3 = scmp.lt.u32.totalorder %s5921_s30, %s8010_s5 }
  0x29   :  { %p5927_p4 = pnand %p5925_p3, %p5922_p2 }
  0x2b   :  { %5930 = shalt.err (!%p5927_p4)
}
  0x2c   :  { %s5931_s14 = scalar_lea.vmem %s84_s18, 64  ;;  %p5936_p6 = scmp.lt.s32.totalorder %s84_s18, %s84_s18 }
  0x2d   :  { %p5932_p5 = scmp.ne.s32.totalorder %s84_s18, %s5931_s14  ;;  %p5937_p7 = scmp.lt.s32.totalorder %s5931_s14, %s5931_s14 }
  0x2f   :  { %p5938_p8 = por %p5937_p7, %p5936_p6 }
  0x31   :  { %p5939_p9 = pnand %p5938_p8, %p5932_p5 }
  0x33   :  { %5942 = shalt.err (!%p5939_p9)
}
  0x34   :  { %86 = dma.hbm_to_vmem [thread:$0]  %s8010_s5, 64, %s84_s18, [#allocation15]  }
  0x35   :  { %s6068_s16 = smov [#allocation5]   ;;  %s5943_s21 = scalar_lea.hbm %s8005_s0, 1024 }
  0x36   :  { %s22_s17 = sshll.u32 %s6068_s16, 4  ;;  %p5944_p10 = scmp.ne.s32.totalorder %s8005_s0, %s5943_s21  ;;  %s23_s17 = int_to_ptr.vmem [resolvable:$true] %s22_s17 }
  0x37   :  { %p5947_p11 = scmp.lt.u32.totalorder %s5943_s21, %s8005_s0 }
  0x39   :  { %p5949_p12 = pnand %p5947_p11, %p5944_p10 }
  0x3b   :  { %5952 = shalt.err (!%p5949_p12)
}
  0x3c   :  { %s5953_s1 = scalar_lea.vmem %s23_s17, 1024  ;;  %p5958_p0 = scmp.lt.s32.totalorder %s23_s17, %s23_s17 }
  0x3d   :  { %p5954_p13 = scmp.ne.s32.totalorder %s23_s17, %s5953_s1  ;;  %p5959_p1 = scmp.lt.s32.totalorder %s5953_s1, %s5953_s1 }
  0x3f   :  { %p5960_p2 = por %p5959_p1, %p5958_p0 }
  0x41   :  { %p5961_p3 = pnand %p5960_p2, %p5954_p13 }
  0x43   :  { %5964 = shalt.err (!%p5961_p3)
}
  0x44   :  { %s6069_s5 = smov 64   ;;  %s6070_s18 = smov 4  }
  0x45   :  { %28 = dma.hbm_to_vmem [thread:$0]  %s8005_s0, 1024, %s23_s17, [#allocation6], %s6069_s5, %s6069_s5, %s6070_s18  }
  0x46   :  { %s6071_s28 = smov [#allocation10]   ;;  %s6072_s30 = smov [#allocation13]  }
  0x47   :  { %s46_s29 = sshll.u32 %s6071_s28, 4  ;;  %s70_s8 = sshll.u32 %s6072_s30, 4  ;;  %s47_s29 = int_to_ptr.vmem [resolvable:$true] %s46_s29  ;;  %s6174_s8 = int_to_ptr.vmem [resolvable:$true] %s70_s8 }
  0x48   :  { %s5965_s13 = scalar_lea.hbm %s8007_s2, 4096 }
  0x49   :  { %p5966_p4 = scmp.ne.s32.totalorder %s8007_s2, %s5965_s13  ;;  %p5969_p5 = scmp.lt.u32.totalorder %s5965_s13, %s8007_s2 }
  0x4b   :  { %p5971_p6 = pnand %p5969_p5, %p5966_p4 }
  0x4d   :  { %5974 = shalt.err (!%p5971_p6)
}
  0x4e   :  { %s5975_s0 = scalar_lea.vmem %s47_s29, 4096  ;;  %p5980_p8 = scmp.lt.s32.totalorder %s47_s29, %s47_s29 }
  0x4f   :  { %p5976_p7 = scmp.ne.s32.totalorder %s47_s29, %s5975_s0  ;;  %p5981_p9 = scmp.lt.s32.totalorder %s5975_s0, %s5975_s0 }
  0x51   :  { %p5982_p10 = por %p5981_p9, %p5980_p8 }
  0x53   :  { %p5983_p11 = pnand %p5982_p10, %p5976_p7 }
  0x55   :  { %5986 = shalt.err (!%p5983_p11)
}
  0x56   :  { %52 = dma.hbm_to_vmem [thread:$0]  %s8007_s2, 4096, %s47_s29, [#allocation9], %s6064_s11, %s6064_s11, %s6065_s12  }
  0x57   :  { %s5987_s22 = scalar_lea.hbm %s8009_s4, 4096 }
  0x58   :  { %p5988_p12 = scmp.ne.s32.totalorder %s8009_s4, %s5987_s22  ;;  %p5991_p13 = scmp.lt.u32.totalorder %s5987_s22, %s8009_s4 }
  0x5a   :  { %p5993_p0 = pnand %p5991_p13, %p5988_p12 }
  0x5c   :  { %5996 = shalt.err (!%p5993_p0)
}
  0x5d   :  { %s5997_s25 = scalar_lea.vmem %s6174_s8, 4096  ;;  %p6002_p2 = scmp.lt.s32.totalorder %s6174_s8, %s6174_s8 }
  0x5e   :  { %p5998_p1 = scmp.ne.s32.totalorder %s6174_s8, %s5997_s25  ;;  %p6003_p3 = scmp.lt.s32.totalorder %s5997_s25, %s5997_s25 }
  0x60   :  { %p6004_p4 = por %p6003_p3, %p6002_p2 }
  0x62   :  { %p6005_p5 = pnand %p6004_p4, %p5998_p1 }
  0x64   :  { %6008 = shalt.err (!%p6005_p5)
}
  0x65   :  { %76 = dma.hbm_to_vmem [thread:$0]  %s8009_s4, 4096, %s6174_s8, [#allocation12], %s6064_s11, %s6064_s11, %s6065_s12  }
  0x66   :  { %s6073_s28 = smov [#allocation16]   ;;  %s6009_s10 = scalar_lea.hbm %s8011_s6, 64 }
  0x67   :  { %s93_s29 = sshll.u32 %s6073_s28, 4  ;;  %p6010_p6 = scmp.ne.s32.totalorder %s8011_s6, %s6009_s10  ;;  %s94_s29 = int_to_ptr.vmem [resolvable:$true] %s93_s29 }
  0x68   :  { %p6013_p7 = scmp.lt.u32.totalorder %s6009_s10, %s8011_s6 }
  0x6a   :  { %p6015_p8 = pnand %p6013_p7, %p6010_p6 }
  0x6c   :  { %6018 = shalt.err (!%p6015_p8)
}
  0x6d   :  { %s6019_s16 = scalar_lea.vmem %s94_s29, 64  ;;  %p6024_p10 = scmp.lt.s32.totalorder %s94_s29, %s94_s29 }
  0x6e   :  { %p6020_p9 = scmp.ne.s32.totalorder %s94_s29, %s6019_s16  ;;  %p6025_p11 = scmp.lt.s32.totalorder %s6019_s16, %s6019_s16 }
  0x70   :  { %p6026_p12 = por %p6025_p11, %p6024_p10 }
  0x72   :  { %p6027_p13 = pnand %p6026_p12, %p6020_p9 }
  0x74   :  { %6030 = shalt.err (!%p6027_p13)
}
  0x75   :  { %96 = dma.hbm_to_vmem [thread:$0]  %s8011_s6, 64, %s94_s29, [#allocation15]  }
  0x76   :  { %6053 = dma.done.wait [#allocation6], 1024  }
  0x77   :  { %6054 = vsyncadd [#allocation6], 4294966272 }
  0x78   :  { %6055 = dma.done.wait [#allocation9], 8192  }
  0x79   :  { %6056 = vsyncadd [#allocation9], 4294959104 }
  0x7a   :  { %6057 = dma.done.wait [#allocation12], 8192  }
  0x7b   :  { %6058 = vsyncadd [#allocation12], 4294959104 }
  0x7c   :  { %6059 = dma.done.wait [#allocation15], 128  }
  0x7d   :  { %6060 = vsyncadd [#allocation15], 4294967168  ;;  %v8015_v0 = vmov 0   ;;  %v4973_v1 = vld [vmem:[#allocation8 + $0x4] ss:$16 sps:$4 sm:$0xff]   ;;  %v5025_v43 = vld [vmem:[#allocation5 + $0x8] sm:$0xff]  }
  0x7e   :  { %441 = vmatprep.mubr.bf16.mxu0 %v8015_v0  ;;  %554 = vmatprep.mubr.bf16.mxu1 %v8015_v0  ;;  %v4975_v2 = vld [vmem:[#allocation8 + $0xc] ss:$16 sps:$4 sm:$0xff]   ;;  %v4977_v3 = vld [vmem:[#allocation8] ss:$16 sps:$4 sm:$0xff]   ;;  %v4978_v4 = vld [vmem:[#allocation8 + $0x8] ss:$16 sps:$4 sm:$0xff]  }
  0x7f   :  { %409 = vmatprep.subr.bf16.mxu0 %v4973_v1  ;;  %522 = vmatprep.subr.bf16.mxu1 %v4975_v2  ;;  %v4979_v5 = vld [vmem:[#allocation8 + $0x24] ss:$16 sps:$4 sm:$0xff]   ;;  %v4981_v6 = vld [vmem:[#allocation8 + $0x2c] ss:$16 sps:$4 sm:$0xff]   ;;  %v4983_v7 = vld [vmem:[#allocation8 + $0x20] ss:$16 sps:$4 sm:$0xff]  }
  0x80   :  { %410 = vmatpush1.bf16.msra.mxu0 %v4977_v3  ;;  %523 = vmatpush1.bf16.msra.mxu1 %v4978_v4  ;;  %v4984_v8 = vld [vmem:[#allocation8 + $0x28] ss:$16 sps:$4 sm:$0xff]   ;;  %v4985_v9 = vld [vmem:[#allocation8 + $0x44] ss:$16 sps:$4 sm:$0xff]   ;;  %v4987_v10 = vld [vmem:[#allocation8 + $0x4c] ss:$16 sps:$4 sm:$0xff]  }
  0x81   :  { %411 = vmatprep.subr.bf16.mxu0 %v4979_v5  ;;  %524 = vmatprep.subr.bf16.mxu1 %v4981_v6  ;;  %v4989_v11 = vld [vmem:[#allocation8 + $0x40] ss:$16 sps:$4 sm:$0xff]   ;;  %v4990_v12 = vld [vmem:[#allocation8 + $0x48] ss:$16 sps:$4 sm:$0xff]   ;;  %v4991_v13 = vld [vmem:[#allocation8 + $0x64] ss:$16 sps:$4 sm:$0xff]  }
  0x82   :  { %v4993_v14 = vld [vmem:[#allocation8 + $0x6c] ss:$16 sps:$4 sm:$0xff]   ;;  %v4995_v15 = vld [vmem:[#allocation8 + $0x60] ss:$16 sps:$4 sm:$0xff]   ;;  %v4996_v16 = vld [vmem:[#allocation8 + $0x68] ss:$16 sps:$4 sm:$0xff]  }
  0x83   :  { %v4997_v17 = vld [vmem:[#allocation8 + $0x84] ss:$16 sps:$4 sm:$0xff]   ;;  %v4999_v18 = vld [vmem:[#allocation8 + $0x8c] ss:$16 sps:$4 sm:$0xff]   ;;  %v5001_v19 = vld [vmem:[#allocation8 + $0x80] ss:$16 sps:$4 sm:$0xff]  }
  0x84   :  { %412 = vmatpush1.bf16.msra.mxu0 %v4983_v7  ;;  %525 = vmatpush1.bf16.msra.mxu1 %v4984_v8  ;;  %v5002_v20 = vld [vmem:[#allocation8 + $0x88] ss:$16 sps:$4 sm:$0xff]   ;;  %v5003_v21 = vld [vmem:[#allocation8 + $0xa4] ss:$16 sps:$4 sm:$0xff]   ;;  %v5005_v22 = vld [vmem:[#allocation8 + $0xac] ss:$16 sps:$4 sm:$0xff]  }
  0x85   :  { %413 = vmatprep.subr.bf16.mxu0 %v4985_v9  ;;  %526 = vmatprep.subr.bf16.mxu1 %v4987_v10  ;;  %v5007_v23 = vld [vmem:[#allocation8 + $0xa0] ss:$16 sps:$4 sm:$0xff]   ;;  %v5008_v24 = vld [vmem:[#allocation8 + $0xa8] ss:$16 sps:$4 sm:$0xff]   ;;  %v5009_v25 = vld [vmem:[#allocation8 + $0xc4] ss:$16 sps:$4 sm:$0xff]  }
  0x86   :  { %v5011_v26 = vld [vmem:[#allocation8 + $0xcc] ss:$16 sps:$4 sm:$0xff]   ;;  %v5013_v27 = vld [vmem:[#allocation8 + $0xc0] ss:$16 sps:$4 sm:$0xff]   ;;  %v5014_v28 = vld [vmem:[#allocation8 + $0xc8] ss:$16 sps:$4 sm:$0xff]  }
  0x87   :  { %v5015_v29 = vld [vmem:[#allocation8 + $0xe4] ss:$16 sps:$4 sm:$0xff]   ;;  %v5017_v30 = vld [vmem:[#allocation8 + $0xec] ss:$16 sps:$4 sm:$0xff]   ;;  %v5019_v31 = vld [vmem:[#allocation8 + $0xe0] ss:$16 sps:$4 sm:$0xff]  }
  0x88   :  { %414 = vmatpush1.bf16.msra.mxu0 %v4989_v11  ;;  %527 = vmatpush1.bf16.msra.mxu1 %v4990_v12  ;;  %v5020_v32 = vld [vmem:[#allocation8 + $0xe8] ss:$16 sps:$4 sm:$0xff]   ;;  %v6225_v33 = vld [vmem:[#allocation10 + $0x4] ss:$16 sps:$4 sm:$0xff]   ;;  %v6227_v34 = vld [vmem:[#allocation10 + $0xc] ss:$16 sps:$4 sm:$0xff]  }
  0x89   :  { %415 = vmatprep.subr.bf16.mxu0 %v4991_v13  ;;  %528 = vmatprep.subr.bf16.mxu1 %v4993_v14  ;;  %v5021_v35 = vld [vmem:[#allocation5] sm:$0xff]   ;;  %v6235_v38 = vld [vmem:[#allocation10 + $0x8] ss:$16 sps:$4 sm:$0xff]   ;;  %v6237_v39 = vld [vmem:[#allocation10 + $0x2c] ss:$16 sps:$4 sm:$0xff]   ;;  %v8013_v10 = vmov 0.0|0.0  }
  0x8a   :  { %v6229_v36 = vld [vmem:[#allocation10] ss:$16 sps:$4 sm:$0xff]   ;;  %v6232_v37 = vld [vmem:[#allocation10 + $0x24] ss:$16 sps:$4 sm:$0xff]   ;;  %v6248_v42 = vld [vmem:[#allocation10 + $0x28] ss:$16 sps:$4 sm:$0xff]  }
  0x8b   :  { %v6241_v40 = vld [vmem:[#allocation10 + $0x20] ss:$16 sps:$4 sm:$0xff]   ;;  %v6245_v41 = vld [vmem:[#allocation10 + $0x44] ss:$16 sps:$4 sm:$0xff]   ;;  %v6257_v46 = vld [vmem:[#allocation10 + $0x4c] ss:$16 sps:$4 sm:$0xff]  }
  0x8c   :  { %416 = vmatpush1.bf16.msra.mxu0 %v4995_v15  ;;  %529 = vmatpush1.bf16.msra.mxu1 %v4996_v16  ;;  %v6252_v44 = vld [vmem:[#allocation10 + $0x40] ss:$16 sps:$4 sm:$0xff]   ;;  %v6254_v45 = vld [vmem:[#allocation10 + $0x64] ss:$16 sps:$4 sm:$0xff]   ;;  %v6260_v47 = vld [vmem:[#allocation10 + $0x48] ss:$16 sps:$4 sm:$0xff]  }
  0x8d   :  { %417 = vmatprep.subr.bf16.mxu0 %v4997_v17  ;;  %530 = vmatprep.subr.bf16.mxu1 %v4999_v18  ;;  %v6262_v48 = vld [vmem:[#allocation10 + $0x6c] ss:$16 sps:$4 sm:$0xff]   ;;  %v6267_v49 = vld [vmem:[#allocation10 + $0x60] ss:$16 sps:$4 sm:$0xff]   ;;  %v6270_v50 = vld [vmem:[#allocation10 + $0x84] ss:$16 sps:$4 sm:$0xff]  }
  0x8e   :  { %v6274_v51 = vld [vmem:[#allocation10 + $0x68] ss:$16 sps:$4 sm:$0xff]   ;;  %v5031_v52 = vld [vmem:[#allocation5 + $0x10] sm:$0xff]   ;;  %v6280_v54 = vld [vmem:[#allocation10 + $0x8c] ss:$16 sps:$4 sm:$0xff]   ;;  %s6076_s6 = smov [#allocation17]  }
  0x8f   :  { %v6277_v53 = vld [vmem:[#allocation10 + $0x80] ss:$16 sps:$4 sm:$0xff]   ;;  %v6283_v55 = vld [vmem:[#allocation10 + $0xa4] ss:$16 sps:$4 sm:$0xff]   ;;  %v6286_v56 = vld [vmem:[#allocation10 + $0x88] ss:$16 sps:$4 sm:$0xff]  }
  0x90   :  { %418 = vmatpush1.bf16.msra.mxu0 %v5001_v19  ;;  %531 = vmatpush1.bf16.msra.mxu1 %v5002_v20  ;;  %v6288_v57 = vld [vmem:[#allocation10 + $0xac] ss:$16 sps:$4 sm:$0xff]   ;;  %v6290_v58 = vld [vmem:[#allocation10 + $0xa0] ss:$16 sps:$4 sm:$0xff]   ;;  %v6294_v59 = vld [vmem:[#allocation10 + $0xc4] ss:$16 sps:$4 sm:$0xff]  }
  0x91   :  { %419 = vmatprep.subr.bf16.mxu0 %v5003_v21  ;;  %532 = vmatprep.subr.bf16.mxu1 %v5005_v22  ;;  %v6296_v60 = vld [vmem:[#allocation10 + $0xa8] ss:$16 sps:$4 sm:$0xff]   ;;  %v6302_v62 = vld [vmem:[#allocation10 + $0xc0] ss:$16 sps:$4 sm:$0xff]   ;;  %v6305_v63 = vld [vmem:[#allocation10 + $0xcc] ss:$16 sps:$4 sm:$0xff]  }
  0x92   :  { %v5038_v61 = vld [vmem:[#allocation5 + $0x18] sm:$0xff]   ;;  %v6307_v1 = vld [vmem:[#allocation10 + $0xe4] ss:$16 sps:$4 sm:$0xff]   ;;  %v6316_v4 = vld [vmem:[#allocation10 + $0xe0] ss:$16 sps:$4 sm:$0xff]   ;;  %s4448_s12 = sshll.u32 %s6076_s6, 4  ;;  %s4449_s12 = int_to_ptr.vmem [resolvable:$true] %s4448_s12 }
  0x93   :  { %v6309_v2 = vld [vmem:[#allocation10 + $0xc8] ss:$16 sps:$4 sm:$0xff]   ;;  %v6312_v3 = vld [vmem:[#allocation10 + $0xec] ss:$16 sps:$4 sm:$0xff]   ;;  %v5045_v6 = vld [vmem:[#allocation5 + $0x20] sm:$0xff]   ;;  %s6031_s8 = scalar_lea.vmem %s4449_s12, 1024  ;;  %p6036_p1 = scmp.lt.s32.totalorder %s4449_s12, %s4449_s12 }
  0x94   :  { %420 = vmatpush1.bf16.msra.mxu0 %v5007_v23  ;;  %533 = vmatpush1.bf16.msra.mxu1 %v5008_v24  ;;  %v6320_v5 = vld [vmem:[#allocation10 + $0xe8] ss:$16 sps:$4 sm:$0xff]   ;;  %v5059_v8 = vld [vmem:[#allocation5 + $0x30] sm:$0xff]   ;;  %v6343_v12 = vld [vmem:[#allocation11 + $0xc] ss:$16 sps:$4 sm:$0xff]   ;;  %p6032_p0 = scmp.ne.s32.totalorder %s4449_s12, %s6031_s8  ;;  %p6037_p2 = scmp.lt.s32.totalorder %s6031_s8, %s6031_s8 }
  0x95   :  { %421 = vmatprep.subr.bf16.mxu0 %v5009_v25  ;;  %534 = vmatprep.subr.bf16.mxu1 %v5011_v26  ;;  %v5052_v7 = vld [vmem:[#allocation5 + $0x28] sm:$0xff]   ;;  %v5067_v9 = vld [vmem:[#allocation5 + $0x38] sm:$0xff]   ;;  %v6341_v11 = vld [vmem:[#allocation11 + $0x4] ss:$16 sps:$4 sm:$0xff]  }
  0x96   :  { %v6345_v13 = vld [vmem:[#allocation11] ss:$16 sps:$4 sm:$0xff]   ;;  %v6347_v14 = vld [vmem:[#allocation11 + $0x8] ss:$16 sps:$4 sm:$0xff]   ;;  %v6353_v15 = vld [vmem:[#allocation11 + $0x24] ss:$16 sps:$4 sm:$0xff]   ;;  %p6038_p3 = por %p6037_p2, %p6036_p1 }
  0x97   :  { %v6355_v16 = vld [vmem:[#allocation11 + $0x2c] ss:$16 sps:$4 sm:$0xff]   ;;  %v6357_v17 = vld [vmem:[#allocation11 + $0x20] ss:$16 sps:$4 sm:$0xff]   ;;  %v6359_v18 = vld [vmem:[#allocation11 + $0x28] ss:$16 sps:$4 sm:$0xff]  }
  0x98   :  { %422 = vmatpush1.bf16.msra.mxu0 %v5013_v27  ;;  %535 = vmatpush1.bf16.msra.mxu1 %v5014_v28  ;;  %v6365_v19 = vld [vmem:[#allocation11 + $0x44] ss:$16 sps:$4 sm:$0xff]   ;;  %v6367_v20 = vld [vmem:[#allocation11 + $0x4c] ss:$16 sps:$4 sm:$0xff]   ;;  %v6369_v21 = vld [vmem:[#allocation11 + $0x40] ss:$16 sps:$4 sm:$0xff]   ;;  %p6039_p4 = pnand %p6038_p3, %p6032_p0 }
  0x99   :  { %423 = vmatprep.subr.bf16.mxu0 %v5015_v29  ;;  %536 = vmatprep.subr.bf16.mxu1 %v5017_v30  ;;  %8272 = vst [vmem:[#allocation23_spill] sm:$0xff] %v6369_v21  ;;  %v6371_v22 = vld [vmem:[#allocation11 + $0x48] ss:$16 sps:$4 sm:$0xff]   ;;  %v6377_v23 = vld [vmem:[#allocation11 + $0x64] ss:$16 sps:$4 sm:$0xff]  }
  0x9a   :  { %8273 = vst [vmem:[#allocation24_spill] sm:$0xff] %v6371_v22  ;;  %8274 = vst [vmem:[#allocation25_spill] sm:$0xff] %v6377_v23  ;;  %v6379_v24 = vld [vmem:[#allocation11 + $0x6c] ss:$16 sps:$4 sm:$0xff]   ;;  %v6381_v25 = vld [vmem:[#allocation11 + $0x60] ss:$16 sps:$4 sm:$0xff]  }
  0x9b   :  { %8275 = vst [vmem:[#allocation26_spill] sm:$0xff] %v6379_v24  ;;  %8276 = vst [vmem:[#allocation27_spill] sm:$0xff] %v6381_v25  ;;  %v6383_v26 = vld [vmem:[#allocation11 + $0x68] ss:$16 sps:$4 sm:$0xff]   ;;  %v6389_v27 = vld [vmem:[#allocation11 + $0x84] ss:$16 sps:$4 sm:$0xff]  }
  0x9c   :  { %424 = vmatpush1.bf16.msra.mxu0 %v5019_v31  ;;  %537 = vmatpush1.bf16.msra.mxu1 %v5020_v32  ;;  %8277 = vst [vmem:[#allocation28_spill] sm:$0xff] %v6383_v26  ;;  %8278 = vst [vmem:[#allocation29_spill] sm:$0xff] %v6389_v27  ;;  %v6391_v28 = vld [vmem:[#allocation11 + $0x8c] ss:$16 sps:$4 sm:$0xff]   ;;  %v6393_v29 = vld [vmem:[#allocation11 + $0x80] ss:$16 sps:$4 sm:$0xff]  }
  0x9d   :  { %997 = vmatprep.subr.bf16.mxu0 %v6225_v33  ;;  %1040 = vmatprep.subr.bf16.mxu1 %v6227_v34  ;;  %8279 = vst [vmem:[#allocation30_spill] sm:$0xff] %v6391_v28  ;;  %8280 = vst [vmem:[#allocation31_spill] sm:$0xff] %v6393_v29  ;;  %v6395_v30 = vld [vmem:[#allocation11 + $0x88] ss:$16 sps:$4 sm:$0xff]   ;;  %v6399_v31 = vld [vmem:[#allocation11 + $0xa4] ss:$16 sps:$4 sm:$0xff]  }
  0x9e   :  { %8281 = vst [vmem:[#allocation32_spill] sm:$0xff] %v6395_v30  ;;  %8282 = vst [vmem:[#allocation33_spill] sm:$0xff] %v6399_v31  ;;  %v6401_v32 = vld [vmem:[#allocation11 + $0xac] ss:$16 sps:$4 sm:$0xff]  }
  0x9f   :  { %442 = vmatmul.mubr.bf16.vlgmr.msra.gmra.mrb[0].mxu0 %v5021_v35  ;;  %555 = vmatmul.mubr.bf16.vlgmr.msra.gmra.mrb[0].mxu1 %v5021_v35  ;;  %8283 = vst [vmem:[#allocation34_spill] sm:$0xff] %v6401_v32  ;;  %v6405_v35 = vld [vmem:[#allocation11 + $0xa0] ss:$16 sps:$4 sm:$0xff]  }
  0xa0   :  { %998 = vmatpush1.bf16.msra.mxu0 %v6229_v36  ;;  %451 = vmatprep.mubr.bf16.mxu0 %v8015_v0  ;;  %8284 = vst [vmem:[#allocation35_spill] sm:$0xff] %v6405_v35 }
  0xa1   :  { %564 = vmatprep.mubr.bf16.mxu1 %v8015_v0  ;;  %999 = vmatprep.subr.bf16.mxu0 %v6232_v37 }
  0xa2   :  { %1041 = vmatpush1.bf16.msra.mxu1 %v6235_v38 }
  0xa3   :  { %1042 = vmatprep.subr.bf16.mxu1 %v6237_v39 }
  0xa4   :  { %1000 = vmatpush1.bf16.msra.mxu0 %v6241_v40 }
  0xa5   :  { %1001 = vmatprep.subr.bf16.mxu0 %v6245_v41 }
  0xa6   :  { %1043 = vmatpush1.bf16.msra.mxu1 %v6248_v42 }
  0xa7   :  { %452 = vmatmul.mubr.bf16.gmra.mrb[4].mxu0 %v5025_v43  ;;  %565 = vmatmul.mubr.bf16.gmra.mrb[4].mxu1 %v5025_v43  ;;  %v6407_v43 = vld [vmem:[#allocation11 + $0xa8] ss:$16 sps:$4 sm:$0xff]  }
  0xa8   :  { %461 = vmatprep.mubr.bf16.mxu0 %v8015_v0  ;;  %574 = vmatprep.mubr.bf16.mxu1 %v8015_v0  ;;  %8285 = vst [vmem:[#allocation36_spill] sm:$0xff] %v6407_v43 }
  0xa9   :  { %1002 = vmatpush1.bf16.msra.mxu0 %v6252_v44  ;;  %1044 = vmatprep.subr.bf16.mxu1 %v6257_v46 }
  0xaa   :  { %1003 = vmatprep.subr.bf16.mxu0 %v6254_v45  ;;  %1045 = vmatpush1.bf16.msra.mxu1 %v6260_v47 }
  0xab   :  { %1046 = vmatprep.subr.bf16.mxu1 %v6262_v48 }
  0xad   :  { %1004 = vmatpush1.bf16.msra.mxu0 %v6267_v49 }
  0xae   :  { %1005 = vmatprep.subr.bf16.mxu0 %v6270_v50  ;;  %1047 = vmatpush1.bf16.msra.mxu1 %v6274_v51 }
  0xaf   :  { %462 = vmatmul.mubr.bf16.gmra.mrb[8].mxu0 %v5031_v52  ;;  %575 = vmatmul.mubr.bf16.gmra.mrb[8].mxu1 %v5031_v52  ;;  %v6411_v52 = vld [vmem:[#allocation11 + $0xc4] ss:$16 sps:$4 sm:$0xff]  }
  0xb0   :  { %471 = vmatprep.mubr.bf16.mxu0 %v8015_v0  ;;  %584 = vmatprep.mubr.bf16.mxu1 %v8015_v0  ;;  %8286 = vst [vmem:[#allocation37_spill] sm:$0xff] %v6411_v52 }
  0xb1   :  { %1006 = vmatpush1.bf16.msra.mxu0 %v6277_v53  ;;  %1048 = vmatprep.subr.bf16.mxu1 %v6280_v54 }
  0xb2   :  { %1007 = vmatprep.subr.bf16.mxu0 %v6283_v55  ;;  %1049 = vmatpush1.bf16.msra.mxu1 %v6286_v56 }
  0xb3   :  { %1050 = vmatprep.subr.bf16.mxu1 %v6288_v57 }
  0xb5   :  { %1008 = vmatpush1.bf16.msra.mxu0 %v6290_v58 }
  0xb6   :  { %1009 = vmatprep.subr.bf16.mxu0 %v6294_v59  ;;  %1051 = vmatpush1.bf16.msra.mxu1 %v6296_v60 }
  0xb7   :  { %472 = vmatmul.mubr.bf16.gmra.mrb[12].mxu0 %v5038_v61  ;;  %585 = vmatmul.mubr.bf16.gmra.mrb[12].mxu1 %v5038_v61  ;;  %v6413_v61 = vld [vmem:[#allocation11 + $0xcc] ss:$16 sps:$4 sm:$0xff]  }
  0xb8   :  { %481 = vmatprep.mubr.bf16.mxu0 %v8015_v0  ;;  %594 = vmatprep.mubr.bf16.mxu1 %v8015_v0  ;;  %8287 = vst [vmem:[#allocation38_spill] sm:$0xff] %v6413_v61 }
  0xb9   :  { %1010 = vmatpush1.bf16.msra.mxu0 %v6302_v62  ;;  %1052 = vmatprep.subr.bf16.mxu1 %v6305_v63 }
  0xba   :  { %1011 = vmatprep.subr.bf16.mxu0 %v6307_v1  ;;  %1053 = vmatpush1.bf16.msra.mxu1 %v6309_v2 }
  0xbb   :  { %1054 = vmatprep.subr.bf16.mxu1 %v6312_v3 }
  0xbd   :  { %1012 = vmatpush1.bf16.msra.mxu0 %v6316_v4 }
  0xbe   :  { %1055 = vmatpush1.bf16.msra.mxu1 %v6320_v5  ;;  %1300 = vmatprep.subr.bf16.mxu0 %v6341_v11 }
  0xbf   :  { %482 = vmatmul.mubr.bf16.gmra.mrb[16].mxu0 %v5045_v6  ;;  %595 = vmatmul.mubr.bf16.gmra.mrb[16].mxu1 %v5045_v6  ;;  %v6417_v6 = vld [vmem:[#allocation11 + $0xc0] ss:$16 sps:$4 sm:$0xff]  }
  0xc0   :  { %491 = vmatprep.mubr.bf16.mxu0 %v8015_v0  ;;  %604 = vmatprep.mubr.bf16.mxu1 %v8015_v0  ;;  %8288 = vst [vmem:[#allocation39_spill] sm:$0xff] %v6417_v6 }
  0xc1   :  { %1343 = vmatprep.subr.bf16.mxu1 %v6343_v12 }
  0xc7   :  { %492 = vmatmul.mubr.bf16.gmra.mrb[20].mxu0 %v5052_v7  ;;  %605 = vmatmul.mubr.bf16.gmra.mrb[20].mxu1 %v5052_v7  ;;  %v6419_v7 = vld [vmem:[#allocation11 + $0xc8] ss:$16 sps:$4 sm:$0xff]  }
  0xc8   :  { %501 = vmatprep.mubr.bf16.mxu0 %v8015_v0  ;;  %614 = vmatprep.mubr.bf16.mxu1 %v8015_v0  ;;  %8289 = vst [vmem:[#allocation40_spill] sm:$0xff] %v6419_v7 }
  0xcf   :  { %502 = vmatmul.mubr.bf16.gmra.mrb[24].mxu0 %v5059_v8  ;;  %615 = vmatmul.mubr.bf16.gmra.mrb[24].mxu1 %v5059_v8  ;;  %v6423_v8 = vld [vmem:[#allocation11 + $0xe4] ss:$16 sps:$4 sm:$0xff]  }
  0xd0   :  { %511 = vmatprep.mubr.bf16.mxu0 %v8015_v0  ;;  %624 = vmatprep.mubr.bf16.mxu1 %v8015_v0  ;;  %8290 = vst [vmem:[#allocation41_spill] sm:$0xff] %v6423_v8 }
  0xd7   :  { %512 = vmatmul.mubr.bf16.gmra.mrb[28].mxu0 %v5067_v9  ;;  %625 = vmatmul.mubr.bf16.gmra.mrb[28].mxu1 %v5067_v9  ;;  %v6425_v9 = vld [vmem:[#allocation11 + $0xec] ss:$16 sps:$4 sm:$0xff]  }
  0xd8   :  { %1029 = vmatprep.mubr.bf16.mxu0 %v8015_v0  ;;  %1072 = vmatprep.mubr.bf16.mxu1 %v8015_v0  ;;  %8291 = vst [vmem:[#allocation42_spill] sm:$0xff] %v6425_v9 }
  0xdf   :  { %1030 = vmatmul.mubr.bf16.vlgmr.msra.gmra.mrb[0].mxu0 %v8013_v10  ;;  %1073 = vmatmul.mubr.bf16.vlgmr.msra.gmra.mrb[0].mxu1 %v8013_v10  ;;  %v6429_v10 = vld [vmem:[#allocation11 + $0xe0] ss:$16 sps:$4 sm:$0xff]  }
  0xe0   :  { %1332 = vmatprep.mubr.bf16.mxu0 %v8015_v0  ;;  %1375 = vmatprep.mubr.bf16.mxu1 %v8015_v0  ;;  %8292 = vst [vmem:[#allocation43_spill] sm:$0xff] %v6429_v10  ;;  %v6431_v0 = vld [vmem:[#allocation11 + $0xe8] ss:$16 sps:$4 sm:$0xff]  }
  0xe1   :  { %1301 = vmatpush1.bf16.msra.mxu0 %v6345_v13  ;;  %1344 = vmatpush1.bf16.msra.mxu1 %v6347_v14  ;;  %8293 = vst [vmem:[#allocation44_spill] sm:$0xff] %v6431_v0 }
  0xe2   :  { %1302 = vmatprep.subr.bf16.mxu0 %v6353_v15  ;;  %1345 = vmatprep.subr.bf16.mxu1 %v6355_v16 }
  0xe5   :  { %1303 = vmatpush1.bf16.msra.mxu0 %v6357_v17  ;;  %1346 = vmatpush1.bf16.msra.mxu1 %v6359_v18 }
  0xe6   :  { %1304 = vmatprep.subr.bf16.mxu0 %v6365_v19  ;;  %1347 = vmatprep.subr.bf16.mxu1 %v6367_v20 }
  0xe9   :  { %1305 = vmatpush1.bf16.msra.mxu0 %v6369_v21  ;;  %1348 = vmatpush1.bf16.msra.mxu1 %v6371_v22 }
  0xea   :  { %1306 = vmatprep.subr.bf16.mxu0 %v6377_v23  ;;  %1349 = vmatprep.subr.bf16.mxu1 %v6379_v24 }
  0xed   :  { %1307 = vmatpush1.bf16.msra.mxu0 %v6381_v25  ;;  %1350 = vmatpush1.bf16.msra.mxu1 %v6383_v26 }
  0xee   :  { %1308 = vmatprep.subr.bf16.mxu0 %v6389_v27  ;;  %1351 = vmatprep.subr.bf16.mxu1 %v6391_v28 }
  0xf1   :  { %1309 = vmatpush1.bf16.msra.mxu0 %v6393_v29  ;;  %1352 = vmatpush1.bf16.msra.mxu1 %v6395_v30 }
  0xf2   :  { %1310 = vmatprep.subr.bf16.mxu0 %v6399_v31  ;;  %1353 = vmatprep.subr.bf16.mxu1 %v6401_v32 }
  0xf5   :  { %1311 = vmatpush1.bf16.msra.mxu0 %v6405_v35  ;;  %1354 = vmatpush1.bf16.msra.mxu1 %v6407_v43  ;;  %v6435_v43 = vld [vmem:[#allocation13 + $0x4] ss:$16 sps:$4 sm:$0xff]  }
  0xf6   :  { %1312 = vmatprep.subr.bf16.mxu0 %v6411_v52  ;;  %1355 = vmatprep.subr.bf16.mxu1 %v6413_v61  ;;  %8294 = vst [vmem:[#allocation45_spill] sm:$0xff] %v6435_v43  ;;  %v6437_v52 = vld [vmem:[#allocation13 + $0xc] ss:$16 sps:$4 sm:$0xff]  }
  0xf7   :  { %8295 = vst [vmem:[#allocation46_spill] sm:$0xff] %v6437_v52 }
  0xf9   :  { %1313 = vmatpush1.bf16.msra.mxu0 %v6417_v6  ;;  %1356 = vmatpush1.bf16.msra.mxu1 %v6419_v7  ;;  %v181_v7 = vlaneseq }
  0xfa   :  { %1314 = vmatprep.subr.bf16.mxu0 %v6423_v8  ;;  %1357 = vmatprep.subr.bf16.mxu1 %v6425_v9  ;;  %v179_v8 = vld [vmem:[#allocation14] sm:$0xf] }
  0xfb   :  { %v6443_v6 = vshrl.u32 %v181_v7, 7 }
  0xfd   :  { %1315 = vmatpush1.bf16.msra.mxu0 %v6429_v10  ;;  %1358 = vmatpush1.bf16.msra.mxu1 %v6431_v0  ;;  %v8053_v61 = vsub.s32 0, %v6443_v6  ;;  %v8058_v9 = vsub.s32 1, %v6443_v6 }
  0xfe   :  { %1546 = vmatprep.subr.bf16.mxu0 %v6435_v43  ;;  %1589 = vmatprep.subr.bf16.mxu1 %v6437_v52  ;;  %v8067_v52 = vsub.s32 3, %v6443_v6 }
  0xff   :  { %v6449_v35 = vrot.slane %v179_v8, %v8053_v61  ;;  %v6453_v10 = vrot.slane %v179_v8, %v8058_v9  ;;  %v8070_v61 = vsub.s32 2, %v6443_v6 }
 0x100   :  { %v6462_v23 = vrot.slane %v179_v8, %v8067_v52 }
 0x101   :  { %8296 = vst [vmem:[#allocation47_spill] sm:$0xff] %v6449_v35  ;;  %8297 = vst [vmem:[#allocation48_spill] sm:$0xff] %v6453_v10 }
 0x1b2   :  { %v1031_v0 = vpop.f32.mrb[0].mxu0  ;;  %v1074_v43 = vpop.f32.mrb[0].mxu1 }
 0x1b3   :  { %v4767_v7 = vadd.f32 %v1031_v0, %v6449_v35  ;;  %v1033_v32 = vpop.f32.mrb[1].mxu0  ;;  %v1076_v31 = vpop.f32.mrb[1].mxu1 }
 0x1b4   :  { %v4768_v30 = vadd.f32 %v1033_v32, %v6453_v10  ;;  %v1035_v29 = vpop.f32.mrb[2].mxu0  ;;  %v1078_v28 = vpop.f32.mrb[2].mxu1  ;;  %v4800_v21 = vadd.f32 %v1076_v31, %v6462_v23 }
 0x1b5   :  { %v4535_v27 = vmul.f32 -1.442695, %v4767_v7  ;;  %v4769_v26 = vadd.f32 %v1035_v29, %v6449_v35  ;;  %v1037_v25 = vpop.f32.mrb[3].mxu0  ;;  %v1080_v9 = vpop.f32.mrb[3].mxu1  ;;  %v6467_v7 = vrot.slane %v179_v8, %v8070_v61 }
 0x1b6   :  { %v4537_v24 = vmul.f32 -1.442695, %v4768_v30  ;;  %v4770_v0 = vadd.f32 %v1037_v25, %v6453_v10  ;;  %v4539_v30 = vmul.f32 -1.442695, %v4800_v21  ;;  %v4802_v52 = vadd.f32 %v1080_v9, %v6462_v23 }
 0x1b7   :  { %5173 = vpow2.f32 %v4535_v27  ;;  %v4536_v22 = vmul.f32 -1.442695, %v4769_v26  ;;  %8298 = vst [vmem:[#allocation49_spill] sm:$0xff] %v6467_v7  ;;  %v4799_v29 = vadd.f32 %v1074_v43, %v6467_v7  ;;  %v4801_v35 = vadd.f32 %v1078_v28, %v6467_v7 }
 0x1b8   :  { %5175 = vpow2.f32 %v4537_v24  ;;  %v4538_v32 = vmul.f32 -1.442695, %v4770_v0  ;;  %v4540_v27 = vmul.f32 -1.442695, %v4802_v52 }
 0x1b9   :  { %5177 = vpow2.f32 %v4536_v22 }
 0x1ba   :  { %5179 = vpow2.f32 %v4538_v32 }
 0x1bb   :  { %5181 = vtanh.f32 %v4799_v29 }
 0x1bc   :  { %5183 = vpow2.f32 %v4539_v30 }
 0x1bd   :  { %5185 = vtanh.f32 %v4801_v35 }
 0x1c1   :  { %v5174_v25 = vpop.eup %5173 }
 0x1c2   :  { %v5176_v26 = vpop.eup %5175  ;;  %v1097_v24 = vadd.f32 1.0, %v5174_v25 }
 0x1c3   :  { %v1109_v0 = vadd.f32 1.0, %v5176_v26  ;;  %v5178_v8 = vpop.eup %5177 }
 0x1c4   :  { %5187 = vrcp.f32 %v1097_v24  ;;  %v1098_v22 = vadd.f32 1.0, %v5178_v8  ;;  %v5180_v31 = vpop.eup %5179 }
 0x1c5   :  { %5189 = vrcp.f32 %v1109_v0  ;;  %v1110_v21 = vadd.f32 1.0, %v5180_v31  ;;  %v5182_v43 = vpop.eup %5181 }
 0x1c6   :  { %5191 = vpow2.f32 %v4540_v27  ;;  %v5184_v9 = vpop.eup %5183 }
 0x1c7   :  { %5193 = vrcp.f32 %v1098_v22  ;;  %v5186_v28 = vpop.eup %5185  ;;  %v1123_v26 = vadd.f32 1.0, %v5184_v9 }
 0x1c8   :  { %5195 = vrcp.f32 %v1110_v21 }
 0x1c9   :  { %5197 = vrcp.f32 %v1123_v26  ;;  %v6499_v26 = vld [vmem:[#allocation13 + $0x44] ss:$16 sps:$4 sm:$0xff]  }
 0x1ca   :  { %8299 = vst [vmem:[#allocation50_spill] sm:$0xff] %v6499_v26 }
 0x1ce   :  { %v5188_v32 = vpop.eup %5187 }
 0x1cf   :  { %v5190_v29 = vpop.eup %5189  ;;  %v1131_v61 = vmul.f32 %v5188_v32, %v5182_v43 }
 0x1d0   :  { %v5192_v25 = vpop.eup %5191  ;;  %v1129_v30 = vmul.f32 0.0, %v5190_v29 }
 0x1d1   :  { %v5194_v52 = vpop.eup %5193  ;;  %v1124_v8 = vadd.f32 1.0, %v5192_v25  ;;  %v6485_v25 = vld [vmem:[#allocation13 + $0x24] ss:$16 sps:$4 sm:$0xff]  }
 0x1d2   :  { %v6473_v35 = vadd.f32 %v1131_v61, %v1129_v30  ;;  %v1132_v24 = vmul.f32 %v5194_v52, %v5186_v28  ;;  %v5196_v0 = vpop.eup %5195  ;;  %v6479_v61 = vld [vmem:[#allocation13] ss:$16 sps:$4 sm:$0xff]   ;;  %v6481_v28 = vld [vmem:[#allocation13 + $0x8] ss:$16 sps:$4 sm:$0xff]   ;;  %v6487_v30 = vld [vmem:[#allocation13 + $0x2c] ss:$16 sps:$4 sm:$0xff]  }
 0x1d3   :  { %v1130_v7 = vmul.f32 0.0, %v5196_v0  ;;  %v5198_v22 = vpop.eup %5197  ;;  %v6495_v52 = vld [vmem:[#allocation13 + $0x28] ss:$16 sps:$4 sm:$0xff]   ;;  %v8301_v0 = vmov 0  }
 0x1d4   :  { %5199 = vtanh.f32 %v6473_v35 }
 0x1d5   :  { %v6476_v27 = vadd.f32 %v1132_v24, %v1130_v7  ;;  %5201 = vrcp.f32 %v1124_v8  ;;  %v6493_v7 = vld [vmem:[#allocation13 + $0x20] ss:$16 sps:$4 sm:$0xff]   ;;  %v6501_v24 = vld [vmem:[#allocation13 + $0x4c] ss:$16 sps:$4 sm:$0xff]  }
 0x1d6   :  { %8300 = vst [vmem:[#allocation51_spill] sm:$0xff] %v6501_v24  ;;  %v6507_v8 = vld [vmem:[#allocation13 + $0x40] ss:$16 sps:$4 sm:$0xff]  }
 0x1d7   :  { %5203 = vtanh.f32 %v6476_v27  ;;  %8302 = vst [vmem:[#allocation52_spill] sm:$0xff] %v6507_v8 }
 0x1de   :  { %v5200_v31 = vpop.eup %5199 }
 0x1df   :  { %v5202_v21 = vpop.eup %5201  ;;  %v1137_v32 = vmul.f32 %v5200_v31, %v5198_v22  ;;  %v6509_v22 = vld [vmem:[#allocation13 + $0x48] ss:$16 sps:$4 sm:$0xff]   ;;  %v6513_v31 = vld [vmem:[#allocation13 + $0x64] ss:$16 sps:$4 sm:$0xff]  }
 0x1e0   :  { %8303 = vst [vmem:[#allocation53_spill] sm:$0xff] %v6509_v22  ;;  %8304 = vst [vmem:[#allocation54_spill] sm:$0xff] %v6513_v31 }
 0x1e1   :  { %v5204_v43 = vpop.eup %5203 }
 0x1e2   :  { %v1138_v9 = vmul.f32 %v5204_v43, %v5202_v21  ;;  %v6515_v21 = vld [vmem:[#allocation13 + $0x6c] ss:$16 sps:$4 sm:$0xff]   ;;  %v6519_v43 = vld [vmem:[#allocation13 + $0x60] ss:$16 sps:$4 sm:$0xff]  }
 0x1e3   :  { %8305 = vst [vmem:[#allocation55_spill] sm:$0xff] %v6515_v21  ;;  %8306 = vst [vmem:[#allocation56_spill] sm:$0xff] %v6519_v43 }
 0x1e4   :  { %v6483_v29 = vpack.c.bf16 %v1138_v9, %v1137_v32  ;;  %v6521_v32 = vld [vmem:[#allocation13 + $0x68] ss:$16 sps:$4 sm:$0xff]   ;;  %v6525_v9 = vld [vmem:[#allocation13 + $0x84] ss:$16 sps:$4 sm:$0xff]  }
 0x1e5   :  { %8307 = vst [vmem:[#allocation57_spill] sm:$0xff] %v6521_v32  ;;  %8308 = vst [vmem:[#allocation58_spill] sm:$0xff] %v6525_v9 }
 0x1e6   :  { %1333 = vmatmul.mubr.bf16.vlgmr.msra.gmra.mrb[32].mxu0 %v6483_v29  ;;  %1376 = vmatmul.mubr.bf16.vlgmr.msra.gmra.mrb[32].mxu1 %v6483_v29 }
 0x1e7   :  { %1547 = vmatpush1.bf16.msra.mxu0 %v6479_v61  ;;  %1590 = vmatpush1.bf16.msra.mxu1 %v6481_v28 }
 0x1e8   :  { %1548 = vmatprep.subr.bf16.mxu0 %v6485_v25  ;;  %1591 = vmatprep.subr.bf16.mxu1 %v6487_v30 }
 0x1e9   :  { %1578 = vmatprep.mubr.bf16.mxu0 %v8301_v0  ;;  %1621 = vmatprep.mubr.bf16.mxu1 %v8301_v0 }
 0x1eb   :  { %1549 = vmatpush1.bf16.msra.mxu0 %v6493_v7  ;;  %1592 = vmatpush1.bf16.msra.mxu1 %v6495_v52 }
 0x1ec   :  { %1550 = vmatprep.subr.bf16.mxu0 %v6499_v26  ;;  %1593 = vmatprep.subr.bf16.mxu1 %v6501_v24  ;;  %v6527_v26 = vld [vmem:[#allocation13 + $0x8c] ss:$16 sps:$4 sm:$0xff]   ;;  %v6531_v24 = vld [vmem:[#allocation13 + $0x80] ss:$16 sps:$4 sm:$0xff]  }
 0x1ed   :  { %8309 = vst [vmem:[#allocation59_spill] sm:$0xff] %v6527_v26  ;;  %8310 = vst [vmem:[#allocation60_spill] sm:$0xff] %v6531_v24 }
 0x1ef   :  { %1551 = vmatpush1.bf16.msra.mxu0 %v6507_v8  ;;  %1594 = vmatpush1.bf16.msra.mxu1 %v6509_v22  ;;  %v6533_v8 = vld [vmem:[#allocation13 + $0x88] ss:$16 sps:$4 sm:$0xff]   ;;  %v6537_v22 = vld [vmem:[#allocation13 + $0xa4] ss:$16 sps:$4 sm:$0xff]  }
 0x1f0   :  { %1552 = vmatprep.subr.bf16.mxu0 %v6513_v31  ;;  %1595 = vmatprep.subr.bf16.mxu1 %v6515_v21  ;;  %8311 = vst [vmem:[#allocation61_spill] sm:$0xff] %v6533_v8  ;;  %8312 = vst [vmem:[#allocation62_spill] sm:$0xff] %v6537_v22  ;;  %v6539_v31 = vld [vmem:[#allocation13 + $0xac] ss:$16 sps:$4 sm:$0xff]   ;;  %v6543_v21 = vld [vmem:[#allocation13 + $0xa0] ss:$16 sps:$4 sm:$0xff]  }
 0x1f1   :  { %8313 = vst [vmem:[#allocation63_spill] sm:$0xff] %v6539_v31  ;;  %8314 = vst [vmem:[#allocation64_spill] sm:$0xff] %v6543_v21 }
 0x1f3   :  { %1553 = vmatpush1.bf16.msra.mxu0 %v6519_v43  ;;  %1596 = vmatpush1.bf16.msra.mxu1 %v6521_v32  ;;  %v6545_v43 = vld [vmem:[#allocation13 + $0xa8] ss:$16 sps:$4 sm:$0xff]   ;;  %v6549_v32 = vld [vmem:[#allocation13 + $0xc4] ss:$16 sps:$4 sm:$0xff]  }
 0x1f4   :  { %1554 = vmatprep.subr.bf16.mxu0 %v6525_v9  ;;  %1597 = vmatprep.subr.bf16.mxu1 %v6527_v26  ;;  %v6551_v9 = vld [vmem:[#allocation13 + $0xcc] ss:$16 sps:$4 sm:$0xff]   ;;  %v6555_v26 = vld [vmem:[#allocation13 + $0xc0] ss:$16 sps:$4 sm:$0xff]  }
 0x1f5   :  { %8315 = vst [vmem:[#allocation65_spill] sm:$0xff] %v6551_v9 }
 0x1f7   :  { %1555 = vmatpush1.bf16.msra.mxu0 %v6531_v24  ;;  %1598 = vmatpush1.bf16.msra.mxu1 %v6533_v8  ;;  %v6557_v24 = vld [vmem:[#allocation13 + $0xc8] ss:$16 sps:$4 sm:$0xff]   ;;  %v6561_v8 = vld [vmem:[#allocation13 + $0xe4] ss:$16 sps:$4 sm:$0xff]  }
 0x1f8   :  { %1556 = vmatprep.subr.bf16.mxu0 %v6537_v22  ;;  %1599 = vmatprep.subr.bf16.mxu1 %v6539_v31  ;;  %v6563_v22 = vld [vmem:[#allocation13 + $0xec] ss:$16 sps:$4 sm:$0xff]   ;;  %v6567_v31 = vld [vmem:[#allocation13 + $0xe0] ss:$16 sps:$4 sm:$0xff]  }
 0x1fb   :  { %1557 = vmatpush1.bf16.msra.mxu0 %v6543_v21  ;;  %1600 = vmatpush1.bf16.msra.mxu1 %v6545_v43  ;;  %v6569_v21 = vld [vmem:[#allocation13 + $0xe8] ss:$16 sps:$4 sm:$0xff]  }
 0x1fc   :  { %1558 = vmatprep.subr.bf16.mxu0 %v6549_v32  ;;  %1601 = vmatprep.subr.bf16.mxu1 %v6551_v9  ;;  %v8316_v9 = vmov 0.0|0.0  }
 0x1ff   :  { %1559 = vmatpush1.bf16.msra.mxu0 %v6555_v26  ;;  %1602 = vmatpush1.bf16.msra.mxu1 %v6557_v24 }
 0x200   :  { %1560 = vmatprep.subr.bf16.mxu0 %v6561_v8  ;;  %1603 = vmatprep.subr.bf16.mxu1 %v6563_v22 }
 0x203   :  { %1561 = vmatpush1.bf16.msra.mxu0 %v6567_v31  ;;  %1604 = vmatpush1.bf16.msra.mxu1 %v6569_v21 }
 0x204   :  { %1707 = vmatprep.subr.bf16.mxu0 %v6225_v33  ;;  %1750 = vmatprep.subr.bf16.mxu1 %v6227_v34  ;;  %v8317_v33 = vld [vmem:[#allocation23_spill] sm:$0xff]  ;;  %v8318_v34 = vld [vmem:[#allocation24_spill] sm:$0xff] }
 0x206   :  { %1579 = vmatmul.mubr.bf16.vlgmr.msra.gmra.mrb[32].mxu0 %v8316_v9  ;;  %1622 = vmatmul.mubr.bf16.vlgmr.msra.gmra.mrb[32].mxu1 %v8316_v9 }
 0x207   :  { %1708 = vmatpush1.bf16.msra.mxu0 %v6229_v36  ;;  %1751 = vmatpush1.bf16.msra.mxu1 %v6235_v38  ;;  %v8319_v36 = vld [vmem:[#allocation25_spill] sm:$0xff]  ;;  %v8321_v38 = vld [vmem:[#allocation27_spill] sm:$0xff] }
 0x208   :  { %1709 = vmatprep.subr.bf16.mxu0 %v6232_v37  ;;  %1752 = vmatprep.subr.bf16.mxu1 %v6237_v39  ;;  %v8320_v37 = vld [vmem:[#allocation26_spill] sm:$0xff]  ;;  %v8322_v39 = vld [vmem:[#allocation28_spill] sm:$0xff] }
 0x209   :  { %1739 = vmatprep.mubr.bf16.mxu0 %v8301_v0  ;;  %1782 = vmatprep.mubr.bf16.mxu1 %v8301_v0 }
 0x20b   :  { %1710 = vmatpush1.bf16.msra.mxu0 %v6241_v40  ;;  %1753 = vmatpush1.bf16.msra.mxu1 %v6248_v42  ;;  %v8323_v40 = vld [vmem:[#allocation29_spill] sm:$0xff]  ;;  %v8325_v42 = vld [vmem:[#allocation31_spill] sm:$0xff] }
 0x20c   :  { %1711 = vmatprep.subr.bf16.mxu0 %v6245_v41  ;;  %1754 = vmatprep.subr.bf16.mxu1 %v6257_v46  ;;  %v8324_v41 = vld [vmem:[#allocation30_spill] sm:$0xff] }
 0x20d   :  { %v8328_v46 = vld [vmem:[#allocation34_spill] sm:$0xff] }
 0x20f   :  { %1712 = vmatpush1.bf16.msra.mxu0 %v6252_v44  ;;  %1755 = vmatpush1.bf16.msra.mxu1 %v6260_v47  ;;  %v8326_v44 = vld [vmem:[#allocation32_spill] sm:$0xff]  ;;  %v8329_v47 = vld [vmem:[#allocation35_spill] sm:$0xff] }
 0x210   :  { %1713 = vmatprep.subr.bf16.mxu0 %v6254_v45  ;;  %1756 = vmatprep.subr.bf16.mxu1 %v6262_v48  ;;  %v8327_v45 = vld [vmem:[#allocation33_spill] sm:$0xff]  ;;  %v8330_v48 = vld [vmem:[#allocation36_spill] sm:$0xff] }
 0x213   :  { %1714 = vmatpush1.bf16.msra.mxu0 %v6267_v49  ;;  %1757 = vmatpush1.bf16.msra.mxu1 %v6274_v51  ;;  %v8331_v49 = vld [vmem:[#allocation37_spill] sm:$0xff]  ;;  %v8333_v51 = vld [vmem:[#allocation39_spill] sm:$0xff] }
 0x214   :  { %1715 = vmatprep.subr.bf16.mxu0 %v6270_v50  ;;  %1758 = vmatprep.subr.bf16.mxu1 %v6280_v54  ;;  %v8332_v50 = vld [vmem:[#allocation38_spill] sm:$0xff]  ;;  %v8335_v54 = vld [vmem:[#allocation41_spill] sm:$0xff] }
 0x217   :  { %1716 = vmatpush1.bf16.msra.mxu0 %v6277_v53  ;;  %1759 = vmatpush1.bf16.msra.mxu1 %v6286_v56  ;;  %v8334_v53 = vld [vmem:[#allocation40_spill] sm:$0xff]  ;;  %v8337_v56 = vld [vmem:[#allocation43_spill] sm:$0xff] }
 0x218   :  { %1717 = vmatprep.subr.bf16.mxu0 %v6283_v55  ;;  %1760 = vmatprep.subr.bf16.mxu1 %v6288_v57  ;;  %v8336_v55 = vld [vmem:[#allocation42_spill] sm:$0xff]  ;;  %v8338_v57 = vld [vmem:[#allocation44_spill] sm:$0xff] }
 0x21b   :  { %1718 = vmatpush1.bf16.msra.mxu0 %v6290_v58  ;;  %1761 = vmatpush1.bf16.msra.mxu1 %v6296_v60  ;;  %v8339_v58 = vld [vmem:[#allocation45_spill] sm:$0xff]  ;;  %v795_v60 = vld [vmem:[#allocation16] sm:$0xf] }
 0x21c   :  { %1719 = vmatprep.subr.bf16.mxu0 %v6294_v59  ;;  %1762 = vmatprep.subr.bf16.mxu1 %v6305_v63  ;;  %v8340_v59 = vld [vmem:[#allocation46_spill] sm:$0xff] }
 0x21f   :  { %1720 = vmatpush1.bf16.msra.mxu0 %v6302_v62  ;;  %1763 = vmatpush1.bf16.msra.mxu1 %v6309_v2  ;;  %v8341_v62 = vsub.s32 0, %v6443_v6 }
 0x220   :  { %1721 = vmatprep.subr.bf16.mxu0 %v6307_v1  ;;  %1764 = vmatprep.subr.bf16.mxu1 %v6312_v3  ;;  %v8343_v1 = vsub.s32 1, %v6443_v6 }
 0x221   :  { %v6651_v63 = vrot.slane %v795_v60, %v8341_v62 }
 0x222   :  { %v6655_v2 = vrot.slane %v795_v60, %v8343_v1 }
 0x223   :  { %1722 = vmatpush1.bf16.msra.mxu0 %v6316_v4  ;;  %1765 = vmatpush1.bf16.msra.mxu1 %v6320_v5  ;;  %8342 = vst [vmem:[#allocation23_spill] sm:$0xff] %v6651_v63 }
 0x224   :  { %1850 = vmatprep.subr.bf16.mxu0 %v6341_v11  ;;  %1893 = vmatprep.subr.bf16.mxu1 %v6343_v12 }
 0x226   :  { %1740 = vmatmul.mubr.bf16.vlgmr.msra.gmra.mrb[4].mxu0 %v6483_v29  ;;  %1783 = vmatmul.mubr.bf16.vlgmr.msra.gmra.mrb[4].mxu1 %v6483_v29 }
 0x227   :  { %1851 = vmatpush1.bf16.msra.mxu0 %v6345_v13  ;;  %1894 = vmatpush1.bf16.msra.mxu1 %v6347_v14 }
 0x228   :  { %1852 = vmatprep.subr.bf16.mxu0 %v6353_v15  ;;  %1895 = vmatprep.subr.bf16.mxu1 %v6355_v16 }
 0x229   :  { %1882 = vmatprep.mubr.bf16.mxu0 %v8301_v0  ;;  %1925 = vmatprep.mubr.bf16.mxu1 %v8301_v0 }
 0x22b   :  { %1853 = vmatpush1.bf16.msra.mxu0 %v6357_v17  ;;  %1896 = vmatpush1.bf16.msra.mxu1 %v6359_v18 }
 0x22c   :  { %1854 = vmatprep.subr.bf16.mxu0 %v6365_v19  ;;  %1897 = vmatprep.subr.bf16.mxu1 %v6367_v20 }
 0x22f   :  { %1855 = vmatpush1.bf16.msra.mxu0 %v8317_v33  ;;  %1898 = vmatpush1.bf16.msra.mxu1 %v8318_v34 }
 0x230   :  { %1856 = vmatprep.subr.bf16.mxu0 %v8319_v36  ;;  %1899 = vmatprep.subr.bf16.mxu1 %v8320_v37 }
 0x233   :  { %1857 = vmatpush1.bf16.msra.mxu0 %v8321_v38  ;;  %1900 = vmatpush1.bf16.msra.mxu1 %v8322_v39 }
 0x234   :  { %1858 = vmatprep.subr.bf16.mxu0 %v8323_v40  ;;  %1901 = vmatprep.subr.bf16.mxu1 %v8324_v41 }
 0x237   :  { %1859 = vmatpush1.bf16.msra.mxu0 %v8325_v42  ;;  %1902 = vmatpush1.bf16.msra.mxu1 %v8326_v44 }
 0x238   :  { %1860 = vmatprep.subr.bf16.mxu0 %v8327_v45  ;;  %1903 = vmatprep.subr.bf16.mxu1 %v8328_v46 }
 0x23b   :  { %1861 = vmatpush1.bf16.msra.mxu0 %v8329_v47  ;;  %1904 = vmatpush1.bf16.msra.mxu1 %v8330_v48 }
 0x23c   :  { %1862 = vmatprep.subr.bf16.mxu0 %v8331_v49  ;;  %1905 = vmatprep.subr.bf16.mxu1 %v8332_v50 }
 0x23f   :  { %1863 = vmatpush1.bf16.msra.mxu0 %v8333_v51  ;;  %1906 = vmatpush1.bf16.msra.mxu1 %v8334_v53  ;;  %v8344_v51 = vsub.s32 3, %v6443_v6 }
 0x240   :  { %1864 = vmatprep.subr.bf16.mxu0 %v8335_v54  ;;  %1907 = vmatprep.subr.bf16.mxu1 %v8336_v55 }
 0x241   :  { %v6662_v1 = vrot.slane %v795_v60, %v8344_v51 }
 0x243   :  { %1865 = vmatpush1.bf16.msra.mxu0 %v8337_v56  ;;  %1908 = vmatpush1.bf16.msra.mxu1 %v8338_v57  ;;  %8345 = vst [vmem:[#allocation24_spill] sm:$0xff] %v6662_v1 }
 0x244   :  { %1936 = vmatprep.subr.bf16.mxu0 %v8339_v58  ;;  %1979 = vmatprep.subr.bf16.mxu1 %v8340_v59 }
 0x2d9   :  { %v1580_v3 = vpop.f32.mrb[32].mxu0  ;;  %v1623_v4 = vpop.f32.mrb[32].mxu1 }
 0x2da   :  { %v1632_v5 = vadd.f32 %v1580_v3, %v6651_v63  ;;  %v1582_v29 = vpop.f32.mrb[33].mxu0  ;;  %v1625_v9 = vpop.f32.mrb[33].mxu1 }
 0x2db   :  { %v1633_v57 = vadd.f32 %v1582_v29, %v6655_v2  ;;  %v1584_v58 = vpop.f32.mrb[34].mxu0  ;;  %v1627_v56 = vpop.f32.mrb[34].mxu1  ;;  %v8346_v29 = vsub.s32 2, %v6443_v6 }
 0x2dc   :  { %v4605_v59 = vmul.f32 -1.442695, %v1632_v5  ;;  %v1636_v55 = vadd.f32 %v1584_v58, %v6651_v63  ;;  %v1586_v54 = vpop.f32.mrb[35].mxu0  ;;  %v1629_v62 = vpop.f32.mrb[35].mxu1  ;;  %v1635_v5 = vadd.f32 %v1625_v9, %v6662_v1 }
 0x2dd   :  { %v4607_v53 = vmul.f32 -1.442695, %v1633_v57  ;;  %v1637_v50 = vadd.f32 %v1586_v54, %v6655_v2  ;;  %v6667_v48 = vrot.slane %v795_v60, %v8346_v29  ;;  %v1639_v58 = vadd.f32 %v1629_v62, %v6662_v1 }
 0x2de   :  { %5205 = vpow2.f32 %v4605_v59  ;;  %v4606_v3 = vmul.f32 -1.442695, %v1636_v55  ;;  %v4609_v51 = vmul.f32 -1.442695, %v1635_v5 }
 0x2df   :  { %5207 = vpow2.f32 %v4607_v53  ;;  %v4608_v49 = vmul.f32 -1.442695, %v1637_v50  ;;  %8347 = vst [vmem:[#allocation25_spill] sm:$0xff] %v6667_v48  ;;  %v1634_v57 = vadd.f32 %v1623_v4, %v6667_v48  ;;  %v4610_v63 = vmul.f32 -1.442695, %v1639_v58 }
 0x2e0   :  { %5209 = vpow2.f32 %v4606_v3  ;;  %v1638_v50 = vadd.f32 %v1627_v56, %v6667_v48 }
 0x2e1   :  { %5211 = vpow2.f32 %v4608_v49 }
 0x2e2   :  { %5213 = vtanh.f32 %v1634_v57 }
 0x2e3   :  { %5215 = vpow2.f32 %v4609_v51 }
 0x2e4   :  { %5217 = vpow2.f32 %v4610_v63 }
 0x2e8   :  { %v5206_v47 = vpop.eup %5205 }
 0x2e9   :  { %v5208_v54 = vpop.eup %5207  ;;  %v1646_v55 = vadd.f32 1.0, %v5206_v47 }
 0x2ea   :  { %v1658_v6 = vadd.f32 1.0, %v5208_v54  ;;  %v5210_v53 = vpop.eup %5209 }
 0x2eb   :  { %5219 = vrcp.f32 %v1646_v55  ;;  %v1647_v59 = vadd.f32 1.0, %v5210_v53  ;;  %v5212_v60 = vpop.eup %5211  ;;  %v8348_v53 = vld [vmem:[#allocation47_spill] sm:$0xff] }
 0x2ec   :  { %5221 = vrcp.f32 %v1658_v6  ;;  %v1659_v49 = vadd.f32 1.0, %v5212_v60  ;;  %v5214_v4 = vpop.eup %5213 }
 0x2ed   :  { %5223 = vtanh.f32 %v1638_v50  ;;  %v5216_v9 = vpop.eup %5215 }
 0x2ee   :  { %5225 = vrcp.f32 %v1647_v59  ;;  %v5218_v62 = vpop.eup %5217  ;;  %v1672_v56 = vadd.f32 1.0, %v5216_v9 }
 0x2ef   :  { %5227 = vrcp.f32 %v1659_v49  ;;  %v1673_v63 = vadd.f32 1.0, %v5218_v62 }
 0x2f0   :  { %5229 = vrcp.f32 %v1672_v56 }
 0x2f1   :  { %5231 = vrcp.f32 %v1673_v63 }
 0x2f5   :  { %v5220_v3 = vpop.eup %5219 }
 0x2f6   :  { %v5222_v29 = vpop.eup %5221  ;;  %v1680_v47 = vmul.f32 %v5220_v3, %v5214_v4 }
 0x2f7   :  { %v5224_v5 = vpop.eup %5223  ;;  %v1678_v58 = vmul.f32 0.0, %v5222_v29 }
 0x2f8   :  { %v5226_v57 = vpop.eup %5225 }
 0x2f9   :  { %v6673_v51 = vadd.f32 %v1680_v47, %v1678_v58  ;;  %v1681_v54 = vmul.f32 %v5226_v57, %v5224_v5  ;;  %v1741_v55 = vpop.f32.mrb[4].mxu0  ;;  %v1784_v6 = vpop.f32.mrb[4].mxu1 }
 0x2fa   :  { %v5228_v50 = vpop.eup %5227  ;;  %v4771_v59 = vadd.f32 %v1741_v55, %v8348_v53  ;;  %v1743_v60 = vpop.f32.mrb[5].mxu0 }
 0x2fb   :  { %v1786_v49 = vpop.f32.mrb[5].mxu1  ;;  %v1679_v48 = vmul.f32 0.0, %v5228_v50  ;;  %v4772_v1 = vadd.f32 %v1743_v60, %v6453_v10  ;;  %v1745_v4 = vpop.f32.mrb[6].mxu0  ;;  %5233 = vtanh.f32 %v6673_v51 }
 0x2fc   :  { %v1788_v3 = vpop.f32.mrb[6].mxu1  ;;  %v4613_v9 = vmul.f32 -1.442695, %v4771_v59  ;;  %v4773_v62 = vadd.f32 %v1745_v4, %v8348_v53  ;;  %v1747_v29 = vpop.f32.mrb[7].mxu0  ;;  %v4804_v63 = vadd.f32 %v1786_v49, %v6462_v23  ;;  %v8349_v59 = vld [vmem:[#allocation49_spill] sm:$0xff] }
 0x2fd   :  { %v1790_v47 = vpop.f32.mrb[7].mxu1  ;;  %v6679_v5 = vadd.f32 %v1681_v54, %v1679_v48  ;;  %v4615_v58 = vmul.f32 -1.442695, %v4772_v1  ;;  %v4774_v57 = vadd.f32 %v1747_v29, %v6453_v10  ;;  %v5230_v50 = vpop.eup %5229  ;;  %v4803_v60 = vadd.f32 %v1784_v6, %v8349_v59 }
 0x2fe   :  { %5235 = vpow2.f32 %v4613_v9  ;;  %v4614_v56 = vmul.f32 -1.442695, %v4773_v62  ;;  %v5232_v4 = vpop.eup %5231  ;;  %v4617_v53 = vmul.f32 -1.442695, %v4804_v63  ;;  %v4806_v48 = vadd.f32 %v1790_v47, %v6462_v23 }
 0x2ff   :  { %5237 = vtanh.f32 %v6679_v5  ;;  %v4616_v55 = vmul.f32 -1.442695, %v4774_v57  ;;  %v4805_v9 = vadd.f32 %v1788_v3, %v8349_v59 }
 0x300   :  { %5239 = vpow2.f32 %v4615_v58  ;;  %v4618_v57 = vmul.f32 -1.442695, %v4806_v48 }
 0x301   :  { %5241 = vpow2.f32 %v4614_v56 }
 0x302   :  { %5243 = vpow2.f32 %v4616_v55 }
 0x303   :  { %5245 = vtanh.f32 %v4803_v60 }
 0x304   :  { %5247 = vpow2.f32 %v4617_v53 }
 0x305   :  { %v5234_v1 = vpop.eup %5233 }
 0x306   :  { %v1686_v49 = vmul.f32 %v5234_v1, %v5230_v50 }
 0x308   :  { %v5236_v54 = vpop.eup %5235 }
 0x309   :  { %v5238_v62 = vpop.eup %5237  ;;  %v1807_v29 = vadd.f32 1.0, %v5236_v54 }
 0x30a   :  { %v5240_v58 = vpop.eup %5239  ;;  %v1687_v56 = vmul.f32 %v5238_v62, %v5232_v4 }
 0x30b   :  { %5249 = vrcp.f32 %v1807_v29  ;;  %v1819_v55 = vadd.f32 1.0, %v5240_v58  ;;  %v5242_v10 = vpop.eup %5241 }
 0x30c   :  { %5251 = vtanh.f32 %v4805_v9  ;;  %v6687_v6 = vpack.c.bf16 %v1687_v56, %v1686_v49  ;;  %v1808_v47 = vadd.f32 1.0, %v5242_v10  ;;  %v5244_v63 = vpop.eup %5243 }
 0x30d   :  { %5253 = vrcp.f32 %v1819_v55  ;;  %v1820_v3 = vadd.f32 1.0, %v5244_v63  ;;  %v5246_v60 = vpop.eup %5245 }
 0x30e   :  { %5255 = vpow2.f32 %v4618_v57  ;;  %4731 = vst [vmem:[#allocation17] sm:$0xff] %v6687_v6   ;;  %v5248_v53 = vpop.eup %5247 }
 0x30f   :  { %5257 = vrcp.f32 %v1808_v47  ;;  %v1833_v29 = vadd.f32 1.0, %v5248_v53 }
 0x310   :  { %5259 = vrcp.f32 %v1820_v3 }
 0x311   :  { %5261 = vrcp.f32 %v1833_v29  ;;  %v8363_v29 = vld [vmem:[#allocation63_spill] sm:$0xff] }
 0x315   :  { %v5250_v48 = vpop.eup %5249 }
 0x316   :  { %v5252_v50 = vpop.eup %5251  ;;  %v1841_v4 = vmul.f32 %v5250_v48, %v5246_v60 }
 0x317   :  { %v5254_v1 = vpop.eup %5253 }
 0x318   :  { %v5256_v54 = vpop.eup %5255  ;;  %v1839_v9 = vmul.f32 %v5254_v1, %v6473_v35  ;;  %v8357_v1 = vld [vmem:[#allocation57_spill] sm:$0xff] }
 0x319   :  { %v5258_v62 = vpop.eup %5257  ;;  %v1834_v49 = vadd.f32 1.0, %v5256_v54  ;;  %v8358_v54 = vld [vmem:[#allocation58_spill] sm:$0xff] }
 0x31a   :  { %v6691_v58 = vadd.f32 %v1841_v4, %v1839_v9  ;;  %v1842_v10 = vmul.f32 %v5258_v62, %v5252_v50  ;;  %v5260_v57 = vpop.eup %5259  ;;  %v8351_v50 = vld [vmem:[#allocation51_spill] sm:$0xff]  ;;  %v8352_v4 = vld [vmem:[#allocation52_spill] sm:$0xff]  ;;  %v8361_v9 = vld [vmem:[#allocation61_spill] sm:$0xff] }
 0x31b   :  { %v1840_v56 = vmul.f32 %v5260_v57, %v6476_v27  ;;  %v5262_v47 = vpop.eup %5261  ;;  %v8350_v27 = vld [vmem:[#allocation50_spill] sm:$0xff]  ;;  %v8365_v57 = vld [vmem:[#allocation65_spill] sm:$0xff] }
 0x31c   :  { %5263 = vtanh.f32 %v6691_v58  ;;  %v8362_v62 = vld [vmem:[#allocation62_spill] sm:$0xff] }
 0x31d   :  { %v6695_v55 = vadd.f32 %v1842_v10, %v1840_v56  ;;  %5265 = vrcp.f32 %v1834_v49  ;;  %v8364_v10 = vld [vmem:[#allocation64_spill] sm:$0xff]  ;;  %v6737_v56 = vld [vmem:[#allocation10 + $0xc] ss:$16 sps:$4 sm:$0xff]  }
 0x31e   :  { %v6734_v49 = vld [vmem:[#allocation10 + $0x4] ss:$16 sps:$4 sm:$0xff]  }
 0x31f   :  { %5267 = vtanh.f32 %v6695_v55 }
 0x326   :  { %v5264_v63 = vpop.eup %5263 }
 0x327   :  { %v5266_v35 = vpop.eup %5265  ;;  %v1847_v60 = vmul.f32 %v5264_v63, %v5262_v47  ;;  %v6742_v47 = vld [vmem:[#allocation10] ss:$16 sps:$4 sm:$0xff]   ;;  %v6745_v63 = vld [vmem:[#allocation10 + $0x8] ss:$16 sps:$4 sm:$0xff]  }
 0x329   :  { %v5268_v3 = vpop.eup %5267 }
 0x32a   :  { %v1848_v53 = vmul.f32 %v5268_v3, %v5266_v35  ;;  %v6748_v35 = vld [vmem:[#allocation10 + $0x24] ss:$16 sps:$4 sm:$0xff]   ;;  %v6751_v3 = vld [vmem:[#allocation10 + $0x2c] ss:$16 sps:$4 sm:$0xff]  }
 0x32c   :  { %v6698_v48 = vpack.c.bf16 %v1848_v53, %v1847_v60  ;;  %v6759_v60 = vld [vmem:[#allocation10 + $0x28] ss:$16 sps:$4 sm:$0xff]   ;;  %v6762_v53 = vld [vmem:[#allocation10 + $0x44] ss:$16 sps:$4 sm:$0xff]  }
 0x32e   :  { %1883 = vmatmul.mubr.bf16.vlgmr.msra.gmra.mrb[36].mxu0 %v6698_v48  ;;  %1926 = vmatmul.mubr.bf16.vlgmr.msra.gmra.mrb[36].mxu1 %v6698_v48 }
 0x32f   :  { %1937 = vmatpush1.bf16.msra.mxu0 %v6479_v61  ;;  %1980 = vmatpush1.bf16.msra.mxu1 %v6481_v28  ;;  %v8353_v61 = vld [vmem:[#allocation53_spill] sm:$0xff]  ;;  %v8354_v28 = vld [vmem:[#allocation54_spill] sm:$0xff] }
 0x330   :  { %1938 = vmatprep.subr.bf16.mxu0 %v6485_v25  ;;  %1981 = vmatprep.subr.bf16.mxu1 %v6487_v30  ;;  %v8355_v25 = vld [vmem:[#allocation55_spill] sm:$0xff]  ;;  %v8356_v30 = vld [vmem:[#allocation56_spill] sm:$0xff] }
 0x331   :  { %1968 = vmatprep.mubr.bf16.mxu0 %v8301_v0  ;;  %2011 = vmatprep.mubr.bf16.mxu1 %v8301_v0 }
 0x333   :  { %1939 = vmatpush1.bf16.msra.mxu0 %v6493_v7  ;;  %1982 = vmatpush1.bf16.msra.mxu1 %v6495_v52  ;;  %v8359_v7 = vld [vmem:[#allocation59_spill] sm:$0xff]  ;;  %v8360_v52 = vld [vmem:[#allocation60_spill] sm:$0xff] }
 0x334   :  { %1940 = vmatprep.subr.bf16.mxu0 %v8350_v27  ;;  %1983 = vmatprep.subr.bf16.mxu1 %v8351_v50  ;;  %v6765_v27 = vld [vmem:[#allocation10 + $0x4c] ss:$16 sps:$4 sm:$0xff]   ;;  %v6768_v50 = vld [vmem:[#allocation10 + $0x40] ss:$16 sps:$4 sm:$0xff]  }
 0x337   :  { %1941 = vmatpush1.bf16.msra.mxu0 %v8352_v4  ;;  %1984 = vmatpush1.bf16.msra.mxu1 %v8353_v61  ;;  %v6771_v4 = vld [vmem:[#allocation10 + $0x48] ss:$16 sps:$4 sm:$0xff]   ;;  %v6774_v61 = vld [vmem:[#allocation10 + $0x64] ss:$16 sps:$4 sm:$0xff]  }
 0x338   :  { %1942 = vmatprep.subr.bf16.mxu0 %v8354_v28  ;;  %1985 = vmatprep.subr.bf16.mxu1 %v8355_v25  ;;  %v6777_v28 = vld [vmem:[#allocation10 + $0x6c] ss:$16 sps:$4 sm:$0xff]   ;;  %v6780_v25 = vld [vmem:[#allocation10 + $0x60] ss:$16 sps:$4 sm:$0xff]  }
 0x33b   :  { %1943 = vmatpush1.bf16.msra.mxu0 %v8356_v30  ;;  %1986 = vmatpush1.bf16.msra.mxu1 %v8357_v1  ;;  %v6783_v30 = vld [vmem:[#allocation10 + $0x68] ss:$16 sps:$4 sm:$0xff]   ;;  %v6786_v1 = vld [vmem:[#allocation10 + $0x84] ss:$16 sps:$4 sm:$0xff]  }
 0x33c   :  { %1944 = vmatprep.subr.bf16.mxu0 %v8358_v54  ;;  %1987 = vmatprep.subr.bf16.mxu1 %v8359_v7  ;;  %8366 = vst [vmem:[#allocation26_spill] sm:$0xff] %v6783_v30  ;;  %8367 = vst [vmem:[#allocation27_spill] sm:$0xff] %v6786_v1  ;;  %v6789_v54 = vld [vmem:[#allocation10 + $0x8c] ss:$16 sps:$4 sm:$0xff]   ;;  %v6792_v7 = vld [vmem:[#allocation10 + $0x80] ss:$16 sps:$4 sm:$0xff]  }
 0x33d   :  { %8368 = vst [vmem:[#allocation28_spill] sm:$0xff] %v6789_v54  ;;  %8369 = vst [vmem:[#allocation29_spill] sm:$0xff] %v6792_v7 }
 0x33f   :  { %1945 = vmatpush1.bf16.msra.mxu0 %v8360_v52  ;;  %1988 = vmatpush1.bf16.msra.mxu1 %v8361_v9  ;;  %v6795_v52 = vld [vmem:[#allocation10 + $0x88] ss:$16 sps:$4 sm:$0xff]   ;;  %v6798_v9 = vld [vmem:[#allocation10 + $0xa4] ss:$16 sps:$4 sm:$0xff]  }
 0x340   :  { %1946 = vmatprep.subr.bf16.mxu0 %v8362_v62  ;;  %1989 = vmatprep.subr.bf16.mxu1 %v8363_v29  ;;  %8370 = vst [vmem:[#allocation30_spill] sm:$0xff] %v6795_v52  ;;  %8371 = vst [vmem:[#allocation31_spill] sm:$0xff] %v6798_v9  ;;  %v6801_v62 = vld [vmem:[#allocation10 + $0xac] ss:$16 sps:$4 sm:$0xff]   ;;  %v6804_v29 = vld [vmem:[#allocation10 + $0xa0] ss:$16 sps:$4 sm:$0xff]  }
 0x341   :  { %8372 = vst [vmem:[#allocation32_spill] sm:$0xff] %v6801_v62  ;;  %8373 = vst [vmem:[#allocation33_spill] sm:$0xff] %v6804_v29 }
 0x343   :  { %1947 = vmatpush1.bf16.msra.mxu0 %v8364_v10  ;;  %1990 = vmatpush1.bf16.msra.mxu1 %v6545_v43 }
 0x344   :  { %1948 = vmatprep.subr.bf16.mxu0 %v6549_v32  ;;  %1991 = vmatprep.subr.bf16.mxu1 %v8365_v57 }
 0x347   :  { %1949 = vmatpush1.bf16.msra.mxu0 %v6555_v26  ;;  %1992 = vmatpush1.bf16.msra.mxu1 %v6557_v24 }
 0x348   :  { %1950 = vmatprep.subr.bf16.mxu0 %v6561_v8  ;;  %1993 = vmatprep.subr.bf16.mxu1 %v6563_v22 }
 0x34b   :  { %1951 = vmatpush1.bf16.msra.mxu0 %v6567_v31  ;;  %1994 = vmatpush1.bf16.msra.mxu1 %v6569_v21 }
 0x34c   :  { %2098 = vmatprep.subr.bf16.mxu0 %v6734_v49  ;;  %2141 = vmatprep.subr.bf16.mxu1 %v6737_v56 }
 0x34e   :  { %1969 = vmatmul.mubr.bf16.vlgmr.msra.gmra.mrb[36].mxu0 %v6687_v6  ;;  %2012 = vmatmul.mubr.bf16.vlgmr.msra.gmra.mrb[36].mxu1 %v6687_v6  ;;  %v6756_v6 = vld [vmem:[#allocation10 + $0x20] ss:$16 sps:$4 sm:$0xff]  }
 0x34f   :  { %2099 = vmatpush1.bf16.msra.mxu0 %v6742_v47  ;;  %2142 = vmatpush1.bf16.msra.mxu1 %v6745_v63 }
 0x350   :  { %2100 = vmatprep.subr.bf16.mxu0 %v6748_v35  ;;  %2143 = vmatprep.subr.bf16.mxu1 %v6751_v3 }
 0x351   :  { %2130 = vmatprep.mubr.bf16.mxu0 %v8301_v0  ;;  %2173 = vmatprep.mubr.bf16.mxu1 %v8301_v0 }
 0x353   :  { %2101 = vmatpush1.bf16.msra.mxu0 %v6756_v6  ;;  %2144 = vmatpush1.bf16.msra.mxu1 %v6759_v60 }
 0x354   :  { %2102 = vmatprep.subr.bf16.mxu0 %v6762_v53  ;;  %2145 = vmatprep.subr.bf16.mxu1 %v6765_v27 }
 0x357   :  { %2103 = vmatpush1.bf16.msra.mxu0 %v6768_v50  ;;  %2146 = vmatpush1.bf16.msra.mxu1 %v6771_v4 }
 0x358   :  { %2104 = vmatprep.subr.bf16.mxu0 %v6774_v61  ;;  %2147 = vmatprep.subr.bf16.mxu1 %v6777_v28 }
 0x35b   :  { %2105 = vmatpush1.bf16.msra.mxu0 %v6780_v25  ;;  %2148 = vmatpush1.bf16.msra.mxu1 %v6783_v30 }
 0x35c   :  { %2106 = vmatprep.subr.bf16.mxu0 %v6786_v1  ;;  %2149 = vmatprep.subr.bf16.mxu1 %v6789_v54  ;;  %v6807_v54 = vld [vmem:[#allocation10 + $0xa8] ss:$16 sps:$4 sm:$0xff]  }
 0x35d   :  { %8374 = vst [vmem:[#allocation34_spill] sm:$0xff] %v6807_v54 }
 0x35f   :  { %2107 = vmatpush1.bf16.msra.mxu0 %v6792_v7  ;;  %2150 = vmatpush1.bf16.msra.mxu1 %v6795_v52  ;;  %v6810_v7 = vld [vmem:[#allocation10 + $0xc4] ss:$16 sps:$4 sm:$0xff]   ;;  %v6813_v52 = vld [vmem:[#allocation10 + $0xcc] ss:$16 sps:$4 sm:$0xff]  }
 0x360   :  { %2108 = vmatprep.subr.bf16.mxu0 %v6798_v9  ;;  %2151 = vmatprep.subr.bf16.mxu1 %v6801_v62  ;;  %8375 = vst [vmem:[#allocation49_spill] sm:$0xff] %v6810_v7  ;;  %8376 = vst [vmem:[#allocation50_spill] sm:$0xff] %v6813_v52  ;;  %v6816_v9 = vld [vmem:[#allocation10 + $0xc0] ss:$16 sps:$4 sm:$0xff]   ;;  %v6819_v62 = vld [vmem:[#allocation10 + $0xc8] ss:$16 sps:$4 sm:$0xff]  }
 0x361   :  { %8377 = vst [vmem:[#allocation51_spill] sm:$0xff] %v6816_v9  ;;  %8378 = vst [vmem:[#allocation52_spill] sm:$0xff] %v6819_v62 }
 0x363   :  { %2109 = vmatpush1.bf16.msra.mxu0 %v6804_v29  ;;  %2152 = vmatpush1.bf16.msra.mxu1 %v6807_v54  ;;  %v6822_v29 = vld [vmem:[#allocation10 + $0xe4] ss:$16 sps:$4 sm:$0xff]   ;;  %v6825_v54 = vld [vmem:[#allocation10 + $0xec] ss:$16 sps:$4 sm:$0xff]  }
 0x364   :  { %2110 = vmatprep.subr.bf16.mxu0 %v6810_v7  ;;  %2153 = vmatprep.subr.bf16.mxu1 %v6813_v52  ;;  %8379 = vst [vmem:[#allocation53_spill] sm:$0xff] %v6822_v29  ;;  %8380 = vst [vmem:[#allocation54_spill] sm:$0xff] %v6825_v54  ;;  %v6828_v7 = vld [vmem:[#allocation10 + $0xe0] ss:$16 sps:$4 sm:$0xff]   ;;  %v6831_v52 = vld [vmem:[#allocation10 + $0xe8] ss:$16 sps:$4 sm:$0xff]  }
 0x365   :  { %8381 = vst [vmem:[#allocation55_spill] sm:$0xff] %v6828_v7  ;;  %8382 = vst [vmem:[#allocation56_spill] sm:$0xff] %v6831_v52 }
 0x367   :  { %2111 = vmatpush1.bf16.msra.mxu0 %v6816_v9  ;;  %2154 = vmatpush1.bf16.msra.mxu1 %v6819_v62 }
 0x368   :  { %2112 = vmatprep.subr.bf16.mxu0 %v6822_v29  ;;  %2155 = vmatprep.subr.bf16.mxu1 %v6825_v54 }
 0x36b   :  { %2113 = vmatpush1.bf16.msra.mxu0 %v6828_v7  ;;  %2156 = vmatpush1.bf16.msra.mxu1 %v6831_v52 }
 0x36c   :  { %2241 = vmatprep.subr.bf16.mxu0 %v6341_v11  ;;  %2284 = vmatprep.subr.bf16.mxu1 %v6343_v12  ;;  %v8383_v11 = vld [vmem:[#allocation35_spill] sm:$0xff]  ;;  %v8384_v12 = vld [vmem:[#allocation36_spill] sm:$0xff] }
 0x36e   :  { %2131 = vmatmul.mubr.bf16.vlgmr.msra.gmra.mrb[8].mxu0 %v6698_v48  ;;  %2174 = vmatmul.mubr.bf16.vlgmr.msra.gmra.mrb[8].mxu1 %v6698_v48 }
 0x36f   :  { %2242 = vmatpush1.bf16.msra.mxu0 %v6345_v13  ;;  %2285 = vmatpush1.bf16.msra.mxu1 %v6347_v14  ;;  %v8385_v13 = vld [vmem:[#allocation37_spill] sm:$0xff]  ;;  %v8386_v14 = vld [vmem:[#allocation38_spill] sm:$0xff] }
 0x370   :  { %2243 = vmatprep.subr.bf16.mxu0 %v6353_v15  ;;  %2286 = vmatprep.subr.bf16.mxu1 %v6355_v16  ;;  %v8387_v15 = vld [vmem:[#allocation39_spill] sm:$0xff]  ;;  %v8388_v16 = vld [vmem:[#allocation40_spill] sm:$0xff] }
 0x371   :  { %2273 = vmatprep.mubr.bf16.mxu0 %v8301_v0  ;;  %2316 = vmatprep.mubr.bf16.mxu1 %v8301_v0 }
 0x373   :  { %2244 = vmatpush1.bf16.msra.mxu0 %v6357_v17  ;;  %2287 = vmatpush1.bf16.msra.mxu1 %v6359_v18  ;;  %v8389_v17 = vld [vmem:[#allocation41_spill] sm:$0xff]  ;;  %v8390_v18 = vld [vmem:[#allocation42_spill] sm:$0xff] }
 0x374   :  { %2245 = vmatprep.subr.bf16.mxu0 %v6365_v19  ;;  %2288 = vmatprep.subr.bf16.mxu1 %v6367_v20  ;;  %v8391_v19 = vld [vmem:[#allocation43_spill] sm:$0xff]  ;;  %v8392_v20 = vld [vmem:[#allocation44_spill] sm:$0xff] }
 0x377   :  { %2246 = vmatpush1.bf16.msra.mxu0 %v8317_v33  ;;  %2289 = vmatpush1.bf16.msra.mxu1 %v8318_v34  ;;  %v8393_v33 = vld [vmem:[#allocation45_spill] sm:$0xff]  ;;  %v8394_v34 = vld [vmem:[#allocation46_spill] sm:$0xff] }
 0x378   :  { %2247 = vmatprep.subr.bf16.mxu0 %v8319_v36  ;;  %2290 = vmatprep.subr.bf16.mxu1 %v8320_v37 }
 0x37b   :  { %2248 = vmatpush1.bf16.msra.mxu0 %v8321_v38  ;;  %2291 = vmatpush1.bf16.msra.mxu1 %v8322_v39  ;;  %v8395_v38 = vld [vmem:[#allocation23_spill] sm:$0xff] }
 0x37c   :  { %2249 = vmatprep.subr.bf16.mxu0 %v8323_v40  ;;  %2292 = vmatprep.subr.bf16.mxu1 %v8324_v41 }
 0x37f   :  { %2250 = vmatpush1.bf16.msra.mxu0 %v8325_v42  ;;  %2293 = vmatpush1.bf16.msra.mxu1 %v8326_v44 }
 0x380   :  { %2251 = vmatprep.subr.bf16.mxu0 %v8327_v45  ;;  %2294 = vmatprep.subr.bf16.mxu1 %v8328_v46 }
 0x383   :  { %2252 = vmatpush1.bf16.msra.mxu0 %v8383_v11  ;;  %2295 = vmatpush1.bf16.msra.mxu1 %v8384_v12 }
 0x384   :  { %2253 = vmatprep.subr.bf16.mxu0 %v8385_v13  ;;  %2296 = vmatprep.subr.bf16.mxu1 %v8386_v14 }
 0x387   :  { %2254 = vmatpush1.bf16.msra.mxu0 %v8387_v15  ;;  %2297 = vmatpush1.bf16.msra.mxu1 %v8388_v16 }
 0x388   :  { %2255 = vmatprep.subr.bf16.mxu0 %v8389_v17  ;;  %2298 = vmatprep.subr.bf16.mxu1 %v8390_v18  ;;  %v8396_v17 = vld [vmem:[#allocation24_spill] sm:$0xff] }
 0x38b   :  { %2256 = vmatpush1.bf16.msra.mxu0 %v8391_v19  ;;  %2299 = vmatpush1.bf16.msra.mxu1 %v8392_v20  ;;  %v8397_v20 = vld [vmem:[#allocation25_spill] sm:$0xff] }
 0x38c   :  { %2327 = vmatprep.subr.bf16.mxu0 %v8393_v33  ;;  %2370 = vmatprep.subr.bf16.mxu1 %v8394_v34 }
 0x421   :  { %v1970_v36 = vpop.f32.mrb[36].mxu0  ;;  %v2013_v37 = vpop.f32.mrb[36].mxu1 }
 0x422   :  { %v2022_v39 = vadd.f32 %v1970_v36, %v8395_v38  ;;  %v1972_v40 = vpop.f32.mrb[37].mxu0  ;;  %v2015_v41 = vpop.f32.mrb[37].mxu1  ;;  %v2024_v33 = vadd.f32 %v2013_v37, %v8397_v20 }
 0x423   :  { %v2023_v42 = vadd.f32 %v1972_v40, %v6655_v2  ;;  %v1974_v44 = vpop.f32.mrb[38].mxu0  ;;  %v2017_v45 = vpop.f32.mrb[38].mxu1  ;;  %v2025_v18 = vadd.f32 %v2015_v41, %v8396_v17 }
 0x424   :  { %v4619_v46 = vmul.f32 -1.442695, %v2022_v39  ;;  %v2026_v48 = vadd.f32 %v1974_v44, %v8395_v38  ;;  %v1976_v11 = vpop.f32.mrb[39].mxu0  ;;  %v2019_v12 = vpop.f32.mrb[39].mxu1  ;;  %v2028_v44 = vadd.f32 %v2017_v45, %v8397_v20 }
 0x425   :  { %v4621_v13 = vmul.f32 -1.442695, %v2023_v42  ;;  %v2027_v14 = vadd.f32 %v1976_v11, %v6655_v2  ;;  %v2029_v19 = vadd.f32 %v2019_v12, %v8396_v17  ;;  %v4623_v34 = vmul.f32 -1.442695, %v2025_v18 }
 0x426   :  { %5269 = vpow2.f32 %v4619_v46  ;;  %v4620_v15 = vmul.f32 -1.442695, %v2026_v48 }
 0x427   :  { %5271 = vpow2.f32 %v4621_v13  ;;  %v4622_v16 = vmul.f32 -1.442695, %v2027_v14  ;;  %v4624_v36 = vmul.f32 -1.442695, %v2029_v19 }
 0x428   :  { %5273 = vpow2.f32 %v4620_v15 }
 0x429   :  { %5275 = vpow2.f32 %v4622_v16 }
 0x42a   :  { %5277 = vtanh.f32 %v2024_v33 }
 0x42b   :  { %5279 = vpow2.f32 %v4623_v34 }
 0x42c   :  { %5281 = vpow2.f32 %v4624_v36 }
 0x430   :  { %v5270_v39 = vpop.eup %5269 }
 0x431   :  { %v5272_v40 = vpop.eup %5271  ;;  %v2036_v42 = vadd.f32 1.0, %v5270_v39 }
 0x432   :  { %v2048_v46 = vadd.f32 1.0, %v5272_v40  ;;  %v5274_v48 = vpop.eup %5273 }
 0x433   :  { %5283 = vrcp.f32 %v2036_v42  ;;  %v2037_v41 = vadd.f32 1.0, %v5274_v48  ;;  %v5276_v11 = vpop.eup %5275  ;;  %v8398_v48 = vld [vmem:[#allocation47_spill] sm:$0xff] }
 0x434   :  { %5285 = vrcp.f32 %v2048_v46  ;;  %v2049_v12 = vadd.f32 1.0, %v5276_v11  ;;  %v5278_v37 = vpop.eup %5277 }
 0x435   :  { %5287 = vtanh.f32 %v2028_v44  ;;  %v5280_v13 = vpop.eup %5279 }
 0x436   :  { %5289 = vrcp.f32 %v2037_v41  ;;  %v5282_v14 = vpop.eup %5281  ;;  %v2062_v33 = vadd.f32 1.0, %v5280_v13 }
 0x437   :  { %5291 = vrcp.f32 %v2049_v12  ;;  %v2063_v36 = vadd.f32 1.0, %v5282_v14 }
 0x438   :  { %5293 = vrcp.f32 %v2062_v33 }
 0x439   :  { %5295 = vrcp.f32 %v2063_v36 }
 0x43d   :  { %v5284_v15 = vpop.eup %5283 }
 0x43e   :  { %v5286_v16 = vpop.eup %5285  ;;  %v2070_v18 = vmul.f32 %v5284_v15, %v5278_v37  ;;  %v8399_v37 = vld [vmem:[#allocation48_spill] sm:$0xff] }
 0x43f   :  { %v5288_v19 = vpop.eup %5287  ;;  %v2068_v45 = vmul.f32 %v5286_v16, %v6673_v51 }
 0x440   :  { %v5290_v34 = vpop.eup %5289 }
 0x441   :  { %v6881_v39 = vadd.f32 %v2070_v18, %v2068_v45  ;;  %v2071_v40 = vmul.f32 %v5290_v34, %v5288_v19  ;;  %v2132_v42 = vpop.f32.mrb[8].mxu0  ;;  %v2175_v44 = vpop.f32.mrb[8].mxu1 }
 0x442   :  { %v5292_v46 = vpop.eup %5291  ;;  %v4775_v41 = vadd.f32 %v2132_v42, %v8398_v48  ;;  %v2134_v11 = vpop.f32.mrb[9].mxu0  ;;  %v4807_v42 = vadd.f32 %v2175_v44, %v8349_v59 }
 0x443   :  { %v2177_v12 = vpop.f32.mrb[9].mxu1  ;;  %v2069_v20 = vmul.f32 %v5292_v46, %v6679_v5  ;;  %v4776_v15 = vadd.f32 %v2134_v11, %v8399_v37  ;;  %v2136_v17 = vpop.f32.mrb[10].mxu0  ;;  %5297 = vtanh.f32 %v6881_v39 }
 0x444   :  { %v2179_v51 = vpop.f32.mrb[10].mxu1  ;;  %v4627_v13 = vmul.f32 -1.442695, %v4775_v41  ;;  %v4777_v14 = vadd.f32 %v2136_v17, %v8398_v48  ;;  %v2138_v16 = vpop.f32.mrb[11].mxu0  ;;  %v4808_v36 = vadd.f32 %v2177_v12, %v6462_v23 }
 0x445   :  { %v2181_v18 = vpop.f32.mrb[11].mxu1  ;;  %v6888_v19 = vadd.f32 %v2071_v40, %v2069_v20  ;;  %v4629_v45 = vmul.f32 -1.442695, %v4776_v15  ;;  %v4778_v34 = vadd.f32 %v2138_v16, %v8399_v37  ;;  %v5294_v17 = vpop.eup %5293  ;;  %v4809_v15 = vadd.f32 %v2179_v51, %v8349_v59 }
 0x446   :  { %5299 = vpow2.f32 %v4627_v13  ;;  %v4628_v33 = vmul.f32 -1.442695, %v4777_v14  ;;  %v5296_v46 = vpop.eup %5295  ;;  %v4631_v41 = vmul.f32 -1.442695, %v4808_v36  ;;  %v4810_v20 = vadd.f32 %v2181_v18, %v6462_v23 }
 0x447   :  { %5301 = vtanh.f32 %v6888_v19  ;;  %v4630_v5 = vmul.f32 -1.442695, %v4778_v34 }
 0x448   :  { %5303 = vpow2.f32 %v4629_v45  ;;  %v4632_v45 = vmul.f32 -1.442695, %v4810_v20 }
 0x449   :  { %5305 = vpow2.f32 %v4628_v33 }
 0x44a   :  { %5307 = vpow2.f32 %v4630_v5 }
 0x44b   :  { %5309 = vtanh.f32 %v4807_v42 }
 0x44c   :  { %5311 = vpow2.f32 %v4631_v41 }
 0x44d   :  { %v5298_v40 = vpop.eup %5297 }
 0x44e   :  { %v2076_v12 = vmul.f32 %v5298_v40, %v5294_v17 }
 0x450   :  { %v5300_v11 = vpop.eup %5299 }
 0x451   :  { %v5302_v13 = vpop.eup %5301  ;;  %v2198_v14 = vadd.f32 1.0, %v5300_v11 }
 0x452   :  { %v5304_v16 = vpop.eup %5303  ;;  %v2077_v34 = vmul.f32 %v5302_v13, %v5296_v46 }
 0x453   :  { %5313 = vrcp.f32 %v2198_v14  ;;  %v2210_v33 = vadd.f32 1.0, %v5304_v16  ;;  %v5306_v5 = vpop.eup %5305 }
 0x454   :  { %5315 = vtanh.f32 %v4809_v15  ;;  %v6896_v44 = vpack.c.bf16 %v2077_v34, %v2076_v12  ;;  %v2199_v18 = vadd.f32 1.0, %v5306_v5  ;;  %v5308_v36 = vpop.eup %5307 }
 0x455   :  { %5317 = vrcp.f32 %v2210_v33  ;;  %v2211_v51 = vadd.f32 1.0, %v5308_v36  ;;  %v5310_v42 = vpop.eup %5309 }
 0x456   :  { %5319 = vpow2.f32 %v4632_v45  ;;  %4736 = vst [vmem:[#allocation17 + $0x8] sm:$0xff] %v6896_v44   ;;  %v5312_v41 = vpop.eup %5311 }
 0x457   :  { %5321 = vrcp.f32 %v2199_v18  ;;  %v2224_v14 = vadd.f32 1.0, %v5312_v41 }
 0x458   :  { %5323 = vrcp.f32 %v2211_v51 }
 0x459   :  { %5325 = vrcp.f32 %v2224_v14  ;;  %v6934_v14 = vld [vmem:[#allocation13 + $0x4c] ss:$16 sps:$4 sm:$0xff]  }
 0x45d   :  { %v5314_v20 = vpop.eup %5313 }
 0x45e   :  { %v5316_v17 = vpop.eup %5315  ;;  %v2232_v46 = vmul.f32 %v5314_v20, %v5310_v42 }
 0x45f   :  { %v5318_v40 = vpop.eup %5317 }
 0x460   :  { %v5320_v11 = vpop.eup %5319  ;;  %v2230_v15 = vmul.f32 %v5318_v40, %v6691_v58  ;;  %v6920_v40 = vld [vmem:[#allocation13 + $0x2c] ss:$16 sps:$4 sm:$0xff]  }
 0x461   :  { %v5322_v13 = vpop.eup %5321  ;;  %v2225_v34 = vadd.f32 1.0, %v5320_v11  ;;  %v6925_v11 = vld [vmem:[#allocation13 + $0x20] ss:$16 sps:$4 sm:$0xff]  }
 0x462   :  { %v6900_v16 = vadd.f32 %v2232_v46, %v2230_v15  ;;  %v2233_v12 = vmul.f32 %v5322_v13, %v5316_v17  ;;  %v5324_v45 = vpop.eup %5323  ;;  %v6914_v17 = vld [vmem:[#allocation13 + $0x8] ss:$16 sps:$4 sm:$0xff]   ;;  %v6917_v46 = vld [vmem:[#allocation13 + $0x24] ss:$16 sps:$4 sm:$0xff]  }
 0x463   :  { %v2231_v33 = vmul.f32 %v5324_v45, %v6695_v55  ;;  %v5326_v18 = vpop.eup %5325  ;;  %v6911_v55 = vld [vmem:[#allocation13] ss:$16 sps:$4 sm:$0xff]   ;;  %v6928_v15 = vld [vmem:[#allocation13 + $0x28] ss:$16 sps:$4 sm:$0xff]   ;;  %v6931_v13 = vld [vmem:[#allocation13 + $0x44] ss:$16 sps:$4 sm:$0xff]  }
 0x464   :  { %5327 = vtanh.f32 %v6900_v16  ;;  %v6940_v45 = vld [vmem:[#allocation13 + $0x48] ss:$16 sps:$4 sm:$0xff]  }
 0x465   :  { %v6904_v5 = vadd.f32 %v2233_v12, %v2231_v33  ;;  %5329 = vrcp.f32 %v2225_v34  ;;  %v6937_v12 = vld [vmem:[#allocation13 + $0x40] ss:$16 sps:$4 sm:$0xff]   ;;  %v6943_v34 = vld [vmem:[#allocation13 + $0x64] ss:$16 sps:$4 sm:$0xff]   ;;  %v6946_v33 = vld [vmem:[#allocation13 + $0x6c] ss:$16 sps:$4 sm:$0xff]  }
 0x467   :  { %5331 = vtanh.f32 %v6904_v5 }
 0x46e   :  { %v5328_v36 = vpop.eup %5327 }
 0x46f   :  { %v5330_v58 = vpop.eup %5329  ;;  %v2238_v42 = vmul.f32 %v5328_v36, %v5326_v18  ;;  %v6949_v18 = vld [vmem:[#allocation13 + $0x60] ss:$16 sps:$4 sm:$0xff]   ;;  %v6952_v36 = vld [vmem:[#allocation13 + $0x68] ss:$16 sps:$4 sm:$0xff]  }
 0x470   :  { %8400 = vst [vmem:[#allocation57_spill] sm:$0xff] %v6949_v18  ;;  %8401 = vst [vmem:[#allocation58_spill] sm:$0xff] %v6952_v36 }
 0x471   :  { %v5332_v51 = vpop.eup %5331 }
 0x472   :  { %v2239_v41 = vmul.f32 %v5332_v51, %v5330_v58  ;;  %v6955_v58 = vld [vmem:[#allocation13 + $0x84] ss:$16 sps:$4 sm:$0xff]   ;;  %v6958_v51 = vld [vmem:[#allocation13 + $0x8c] ss:$16 sps:$4 sm:$0xff]  }
 0x474   :  { %v6907_v20 = vpack.c.bf16 %v2239_v41, %v2238_v42  ;;  %v6961_v42 = vld [vmem:[#allocation13 + $0x80] ss:$16 sps:$4 sm:$0xff]   ;;  %v6964_v41 = vld [vmem:[#allocation13 + $0x88] ss:$16 sps:$4 sm:$0xff]  }
 0x476   :  { %2274 = vmatmul.mubr.bf16.vlgmr.msra.gmra.mrb[40].mxu0 %v6907_v20  ;;  %2317 = vmatmul.mubr.bf16.vlgmr.msra.gmra.mrb[40].mxu1 %v6907_v20 }
 0x477   :  { %2328 = vmatpush1.bf16.msra.mxu0 %v6911_v55  ;;  %2371 = vmatpush1.bf16.msra.mxu1 %v6914_v17 }
 0x478   :  { %2329 = vmatprep.subr.bf16.mxu0 %v6917_v46  ;;  %2372 = vmatprep.subr.bf16.mxu1 %v6920_v40 }
 0x479   :  { %2359 = vmatprep.mubr.bf16.mxu0 %v8301_v0  ;;  %2402 = vmatprep.mubr.bf16.mxu1 %v8301_v0 }
 0x47b   :  { %2330 = vmatpush1.bf16.msra.mxu0 %v6925_v11  ;;  %2373 = vmatpush1.bf16.msra.mxu1 %v6928_v15 }
 0x47c   :  { %2331 = vmatprep.subr.bf16.mxu0 %v6931_v13  ;;  %2374 = vmatprep.subr.bf16.mxu1 %v6934_v14 }
 0x47f   :  { %2332 = vmatpush1.bf16.msra.mxu0 %v6937_v12  ;;  %2375 = vmatpush1.bf16.msra.mxu1 %v6940_v45 }
 0x480   :  { %2333 = vmatprep.subr.bf16.mxu0 %v6943_v34  ;;  %2376 = vmatprep.subr.bf16.mxu1 %v6946_v33 }
 0x483   :  { %2334 = vmatpush1.bf16.msra.mxu0 %v6949_v18  ;;  %2377 = vmatpush1.bf16.msra.mxu1 %v6952_v36  ;;  %v6967_v18 = vld [vmem:[#allocation13 + $0xa4] ss:$16 sps:$4 sm:$0xff]   ;;  %v6970_v36 = vld [vmem:[#allocation13 + $0xac] ss:$16 sps:$4 sm:$0xff]  }
 0x484   :  { %2335 = vmatprep.subr.bf16.mxu0 %v6955_v58  ;;  %2378 = vmatprep.subr.bf16.mxu1 %v6958_v51 }
 0x487   :  { %2336 = vmatpush1.bf16.msra.mxu0 %v6961_v42  ;;  %2379 = vmatpush1.bf16.msra.mxu1 %v6964_v41 }
 0x488   :  { %2337 = vmatprep.subr.bf16.mxu0 %v6967_v18  ;;  %2380 = vmatprep.subr.bf16.mxu1 %v6970_v36 }
 0x48b   :  { %2338 = vmatpush1.bf16.msra.mxu0 %v8364_v10  ;;  %2381 = vmatpush1.bf16.msra.mxu1 %v6545_v43  ;;  %v8408_v43 = vld [vmem:[#allocation34_spill] sm:$0xff] }
 0x48c   :  { %2339 = vmatprep.subr.bf16.mxu0 %v6549_v32  ;;  %2382 = vmatprep.subr.bf16.mxu1 %v8365_v57  ;;  %v8409_v32 = vld [vmem:[#allocation49_spill] sm:$0xff]  ;;  %v8410_v10 = vld [vmem:[#allocation50_spill] sm:$0xff] }
 0x48d   :  { %v7019_v57 = vld [vmem:[#allocation11 + $0x4] ss:$16 sps:$4 sm:$0xff]  }
 0x48e   :  { %8411 = vst [vmem:[#allocation59_spill] sm:$0xff] %v7019_v57 }
 0x48f   :  { %2340 = vmatpush1.bf16.msra.mxu0 %v6555_v26  ;;  %2383 = vmatpush1.bf16.msra.mxu1 %v6557_v24  ;;  %v8402_v26 = vld [vmem:[#allocation28_spill] sm:$0xff]  ;;  %v8403_v24 = vld [vmem:[#allocation29_spill] sm:$0xff] }
 0x490   :  { %2341 = vmatprep.subr.bf16.mxu0 %v6561_v8  ;;  %2384 = vmatprep.subr.bf16.mxu1 %v6563_v22  ;;  %v8404_v8 = vld [vmem:[#allocation30_spill] sm:$0xff]  ;;  %v8405_v22 = vld [vmem:[#allocation31_spill] sm:$0xff] }
 0x493   :  { %2342 = vmatpush1.bf16.msra.mxu0 %v6567_v31  ;;  %2385 = vmatpush1.bf16.msra.mxu1 %v6569_v21  ;;  %v8406_v31 = vld [vmem:[#allocation32_spill] sm:$0xff]  ;;  %v8407_v21 = vld [vmem:[#allocation33_spill] sm:$0xff] }
 0x494   :  { %2489 = vmatprep.subr.bf16.mxu0 %v6734_v49  ;;  %2532 = vmatprep.subr.bf16.mxu1 %v6737_v56 }
 0x496   :  { %2360 = vmatmul.mubr.bf16.vlgmr.msra.gmra.mrb[40].mxu0 %v6896_v44  ;;  %2403 = vmatmul.mubr.bf16.vlgmr.msra.gmra.mrb[40].mxu1 %v6896_v44  ;;  %v7022_v44 = vld [vmem:[#allocation11 + $0xc] ss:$16 sps:$4 sm:$0xff]  }
 0x497   :  { %2490 = vmatpush1.bf16.msra.mxu0 %v6742_v47  ;;  %2533 = vmatpush1.bf16.msra.mxu1 %v6745_v63  ;;  %8412 = vst [vmem:[#allocation60_spill] sm:$0xff] %v7022_v44 }
 0x498   :  { %2491 = vmatprep.subr.bf16.mxu0 %v6748_v35  ;;  %2534 = vmatprep.subr.bf16.mxu1 %v6751_v3 }
 0x499   :  { %2521 = vmatprep.mubr.bf16.mxu0 %v8301_v0  ;;  %2564 = vmatprep.mubr.bf16.mxu1 %v8301_v0 }
 0x49b   :  { %2492 = vmatpush1.bf16.msra.mxu0 %v6756_v6  ;;  %2535 = vmatpush1.bf16.msra.mxu1 %v6759_v60 }
 0x49c   :  { %2493 = vmatprep.subr.bf16.mxu0 %v6762_v53  ;;  %2536 = vmatprep.subr.bf16.mxu1 %v6765_v27 }
 0x49f   :  { %2494 = vmatpush1.bf16.msra.mxu0 %v6768_v50  ;;  %2537 = vmatpush1.bf16.msra.mxu1 %v6771_v4 }
 0x4a0   :  { %2495 = vmatprep.subr.bf16.mxu0 %v6774_v61  ;;  %2538 = vmatprep.subr.bf16.mxu1 %v6777_v28 }
 0x4a3   :  { %2496 = vmatpush1.bf16.msra.mxu0 %v6780_v25  ;;  %2539 = vmatpush1.bf16.msra.mxu1 %v6783_v30 }
 0x4a4   :  { %2497 = vmatprep.subr.bf16.mxu0 %v6786_v1  ;;  %2540 = vmatprep.subr.bf16.mxu1 %v8402_v26 }
 0x4a7   :  { %2498 = vmatpush1.bf16.msra.mxu0 %v8403_v24  ;;  %2541 = vmatpush1.bf16.msra.mxu1 %v8404_v8  ;;  %v8445_v24 = vld [vmem:[#allocation24_spill] sm:$0xff] }
 0x4a8   :  { %2499 = vmatprep.subr.bf16.mxu0 %v8405_v22  ;;  %2542 = vmatprep.subr.bf16.mxu1 %v8406_v31 }
 0x4ab   :  { %2500 = vmatpush1.bf16.msra.mxu0 %v8407_v21  ;;  %2543 = vmatpush1.bf16.msra.mxu1 %v8408_v43 }
 0x4ac   :  { %2501 = vmatprep.subr.bf16.mxu0 %v8409_v32  ;;  %2544 = vmatprep.subr.bf16.mxu1 %v8410_v10 }
 0x4af   :  { %2502 = vmatpush1.bf16.msra.mxu0 %v6816_v9  ;;  %2545 = vmatpush1.bf16.msra.mxu1 %v6819_v62  ;;  %v7027_v62 = vld [vmem:[#allocation11] ss:$16 sps:$4 sm:$0xff]  }
 0x4b0   :  { %2503 = vmatprep.subr.bf16.mxu0 %v6822_v29  ;;  %2546 = vmatprep.subr.bf16.mxu1 %v6825_v54  ;;  %8413 = vst [vmem:[#allocation61_spill] sm:$0xff] %v7027_v62  ;;  %v7030_v54 = vld [vmem:[#allocation11 + $0x8] ss:$16 sps:$4 sm:$0xff]  }
 0x4b1   :  { %8414 = vst [vmem:[#allocation62_spill] sm:$0xff] %v7030_v54 }
 0x4b3   :  { %2504 = vmatpush1.bf16.msra.mxu0 %v6828_v7  ;;  %2547 = vmatpush1.bf16.msra.mxu1 %v6831_v52  ;;  %v7033_v52 = vld [vmem:[#allocation11 + $0x24] ss:$16 sps:$4 sm:$0xff]  }
 0x4b4   :  { %2632 = vmatprep.subr.bf16.mxu0 %v7019_v57  ;;  %2675 = vmatprep.subr.bf16.mxu1 %v7022_v44  ;;  %8415 = vst [vmem:[#allocation63_spill] sm:$0xff] %v7033_v52  ;;  %v7036_v57 = vld [vmem:[#allocation11 + $0x2c] ss:$16 sps:$4 sm:$0xff]   ;;  %v7056_v44 = vld [vmem:[#allocation11 + $0x48] ss:$16 sps:$4 sm:$0xff]  }
 0x4b5   :  { %8416 = vst [vmem:[#allocation64_spill] sm:$0xff] %v7036_v57  ;;  %8422 = vst [vmem:[#allocation39_spill] sm:$0xff] %v7056_v44 }
 0x4b6   :  { %2522 = vmatmul.mubr.bf16.vlgmr.msra.gmra.mrb[12].mxu0 %v6907_v20  ;;  %2565 = vmatmul.mubr.bf16.vlgmr.msra.gmra.mrb[12].mxu1 %v6907_v20  ;;  %v7041_v20 = vld [vmem:[#allocation11 + $0x20] ss:$16 sps:$4 sm:$0xff]  }
 0x4b7   :  { %2633 = vmatpush1.bf16.msra.mxu0 %v7027_v62  ;;  %2676 = vmatpush1.bf16.msra.mxu1 %v7030_v54  ;;  %8417 = vst [vmem:[#allocation65_spill] sm:$0xff] %v7041_v20  ;;  %v7044_v62 = vld [vmem:[#allocation11 + $0x28] ss:$16 sps:$4 sm:$0xff]   ;;  %v7047_v54 = vld [vmem:[#allocation11 + $0x44] ss:$16 sps:$4 sm:$0xff]  }
 0x4b8   :  { %2634 = vmatprep.subr.bf16.mxu0 %v7033_v52  ;;  %2677 = vmatprep.subr.bf16.mxu1 %v7036_v57  ;;  %8418 = vst [vmem:[#allocation35_spill] sm:$0xff] %v7044_v62  ;;  %8419 = vst [vmem:[#allocation36_spill] sm:$0xff] %v7047_v54  ;;  %v7050_v52 = vld [vmem:[#allocation11 + $0x4c] ss:$16 sps:$4 sm:$0xff]   ;;  %v7053_v57 = vld [vmem:[#allocation11 + $0x40] ss:$16 sps:$4 sm:$0xff]  }
 0x4b9   :  { %2664 = vmatprep.mubr.bf16.mxu0 %v8301_v0  ;;  %2707 = vmatprep.mubr.bf16.mxu1 %v8301_v0  ;;  %8420 = vst [vmem:[#allocation37_spill] sm:$0xff] %v7050_v52  ;;  %8421 = vst [vmem:[#allocation38_spill] sm:$0xff] %v7053_v57 }
 0x4bb   :  { %2635 = vmatpush1.bf16.msra.mxu0 %v7041_v20  ;;  %2678 = vmatpush1.bf16.msra.mxu1 %v7044_v62  ;;  %v7059_v20 = vld [vmem:[#allocation11 + $0x64] ss:$16 sps:$4 sm:$0xff]   ;;  %v7062_v62 = vld [vmem:[#allocation11 + $0x6c] ss:$16 sps:$4 sm:$0xff]  }
 0x4bc   :  { %2636 = vmatprep.subr.bf16.mxu0 %v7047_v54  ;;  %2679 = vmatprep.subr.bf16.mxu1 %v7050_v52  ;;  %8423 = vst [vmem:[#allocation40_spill] sm:$0xff] %v7059_v20  ;;  %8424 = vst [vmem:[#allocation41_spill] sm:$0xff] %v7062_v62  ;;  %v7065_v54 = vld [vmem:[#allocation11 + $0x60] ss:$16 sps:$4 sm:$0xff]   ;;  %v7068_v52 = vld [vmem:[#allocation11 + $0x68] ss:$16 sps:$4 sm:$0xff]  }
 0x4bd   :  { %8425 = vst [vmem:[#allocation42_spill] sm:$0xff] %v7065_v54  ;;  %8426 = vst [vmem:[#allocation43_spill] sm:$0xff] %v7068_v52 }
 0x4bf   :  { %2637 = vmatpush1.bf16.msra.mxu0 %v7053_v57  ;;  %2680 = vmatpush1.bf16.msra.mxu1 %v7056_v44  ;;  %v7071_v57 = vld [vmem:[#allocation11 + $0x84] ss:$16 sps:$4 sm:$0xff]   ;;  %v7074_v44 = vld [vmem:[#allocation11 + $0x8c] ss:$16 sps:$4 sm:$0xff]  }
 0x4c0   :  { %2638 = vmatprep.subr.bf16.mxu0 %v7059_v20  ;;  %2681 = vmatprep.subr.bf16.mxu1 %v7062_v62  ;;  %8427 = vst [vmem:[#allocation44_spill] sm:$0xff] %v7071_v57  ;;  %8428 = vst [vmem:[#allocation45_spill] sm:$0xff] %v7074_v44  ;;  %v7077_v20 = vld [vmem:[#allocation11 + $0x80] ss:$16 sps:$4 sm:$0xff]   ;;  %v7080_v62 = vld [vmem:[#allocation11 + $0x88] ss:$16 sps:$4 sm:$0xff]  }
 0x4c1   :  { %8429 = vst [vmem:[#allocation46_spill] sm:$0xff] %v7077_v20  ;;  %8430 = vst [vmem:[#allocation47_spill] sm:$0xff] %v7080_v62 }
 0x4c3   :  { %2639 = vmatpush1.bf16.msra.mxu0 %v7065_v54  ;;  %2682 = vmatpush1.bf16.msra.mxu1 %v7068_v52  ;;  %v7083_v54 = vld [vmem:[#allocation11 + $0xa4] ss:$16 sps:$4 sm:$0xff]   ;;  %v7086_v52 = vld [vmem:[#allocation11 + $0xac] ss:$16 sps:$4 sm:$0xff]  }
 0x4c4   :  { %2640 = vmatprep.subr.bf16.mxu0 %v7071_v57  ;;  %2683 = vmatprep.subr.bf16.mxu1 %v7074_v44  ;;  %8431 = vst [vmem:[#allocation48_spill] sm:$0xff] %v7083_v54  ;;  %8432 = vst [vmem:[#allocation66_spill] sm:$0xff] %v7086_v52  ;;  %v7089_v57 = vld [vmem:[#allocation11 + $0xa0] ss:$16 sps:$4 sm:$0xff]   ;;  %v7092_v44 = vld [vmem:[#allocation11 + $0xa8] ss:$16 sps:$4 sm:$0xff]  }
 0x4c5   :  { %8433 = vst [vmem:[#allocation67_spill] sm:$0xff] %v7089_v57  ;;  %8434 = vst [vmem:[#allocation68_spill] sm:$0xff] %v7092_v44 }
 0x4c7   :  { %2641 = vmatpush1.bf16.msra.mxu0 %v7077_v20  ;;  %2684 = vmatpush1.bf16.msra.mxu1 %v7080_v62  ;;  %v7095_v20 = vld [vmem:[#allocation11 + $0xc4] ss:$16 sps:$4 sm:$0xff]   ;;  %v7098_v62 = vld [vmem:[#allocation11 + $0xcc] ss:$16 sps:$4 sm:$0xff]  }
 0x4c8   :  { %2642 = vmatprep.subr.bf16.mxu0 %v7083_v54  ;;  %2685 = vmatprep.subr.bf16.mxu1 %v7086_v52  ;;  %8435 = vst [vmem:[#allocation69_spill] sm:$0xff] %v7095_v20  ;;  %8436 = vst [vmem:[#allocation70_spill] sm:$0xff] %v7098_v62  ;;  %v7101_v54 = vld [vmem:[#allocation11 + $0xc0] ss:$16 sps:$4 sm:$0xff]   ;;  %v7104_v52 = vld [vmem:[#allocation11 + $0xc8] ss:$16 sps:$4 sm:$0xff]  }
 0x4c9   :  { %8437 = vst [vmem:[#allocation71_spill] sm:$0xff] %v7101_v54  ;;  %8438 = vst [vmem:[#allocation72_spill] sm:$0xff] %v7104_v52 }
 0x4cb   :  { %2643 = vmatpush1.bf16.msra.mxu0 %v7089_v57  ;;  %2686 = vmatpush1.bf16.msra.mxu1 %v7092_v44  ;;  %v7107_v57 = vld [vmem:[#allocation11 + $0xe4] ss:$16 sps:$4 sm:$0xff]   ;;  %v7110_v44 = vld [vmem:[#allocation11 + $0xec] ss:$16 sps:$4 sm:$0xff]  }
 0x4cc   :  { %2644 = vmatprep.subr.bf16.mxu0 %v7095_v20  ;;  %2687 = vmatprep.subr.bf16.mxu1 %v7098_v62  ;;  %8439 = vst [vmem:[#allocation73_spill] sm:$0xff] %v7107_v57  ;;  %8440 = vst [vmem:[#allocation74_spill] sm:$0xff] %v7110_v44  ;;  %v7113_v20 = vld [vmem:[#allocation11 + $0xe0] ss:$16 sps:$4 sm:$0xff]   ;;  %v7116_v62 = vld [vmem:[#allocation11 + $0xe8] ss:$16 sps:$4 sm:$0xff]  }
 0x4cd   :  { %8441 = vst [vmem:[#allocation75_spill] sm:$0xff] %v7113_v20  ;;  %8442 = vst [vmem:[#allocation76_spill] sm:$0xff] %v7116_v62 }
 0x4cf   :  { %2645 = vmatpush1.bf16.msra.mxu0 %v7101_v54  ;;  %2688 = vmatpush1.bf16.msra.mxu1 %v7104_v52  ;;  %v7119_v54 = vld [vmem:[#allocation13 + $0x4] ss:$16 sps:$4 sm:$0xff]   ;;  %v7122_v52 = vld [vmem:[#allocation13 + $0xc] ss:$16 sps:$4 sm:$0xff]  }
 0x4d0   :  { %2646 = vmatprep.subr.bf16.mxu0 %v7107_v57  ;;  %2689 = vmatprep.subr.bf16.mxu1 %v7110_v44  ;;  %8443 = vst [vmem:[#allocation77_spill] sm:$0xff] %v7119_v54  ;;  %8444 = vst [vmem:[#allocation78_spill] sm:$0xff] %v7122_v52 }
 0x4d3   :  { %2647 = vmatpush1.bf16.msra.mxu0 %v7113_v20  ;;  %2690 = vmatpush1.bf16.msra.mxu1 %v7116_v62 }
 0x4d4   :  { %2718 = vmatprep.subr.bf16.mxu0 %v7119_v54  ;;  %2761 = vmatprep.subr.bf16.mxu1 %v7122_v52 }
 0x569   :  { %v2361_v57 = vpop.f32.mrb[40].mxu0  ;;  %v2404_v7 = vpop.f32.mrb[40].mxu1 }
 0x56a   :  { %v2413_v44 = vadd.f32 %v2361_v57, %v8395_v38  ;;  %v2363_v29 = vpop.f32.mrb[41].mxu0  ;;  %v2406_v9 = vpop.f32.mrb[41].mxu1 }
 0x56b   :  { %v2414_v20 = vadd.f32 %v2363_v29, %v6655_v2  ;;  %v2365_v10 = vpop.f32.mrb[42].mxu0  ;;  %v2408_v32 = vpop.f32.mrb[42].mxu1  ;;  %v2416_v57 = vadd.f32 %v2406_v9, %v8445_v24  ;;  %v8446_v29 = vld [vmem:[#allocation25_spill] sm:$0xff] }
 0x56c   :  { %v4633_v43 = vmul.f32 -1.442695, %v2413_v44  ;;  %v2417_v62 = vadd.f32 %v2365_v10, %v8395_v38  ;;  %v2367_v21 = vpop.f32.mrb[43].mxu0  ;;  %v2410_v31 = vpop.f32.mrb[43].mxu1  ;;  %v2415_v1 = vadd.f32 %v2404_v7, %v8446_v29 }
 0x56d   :  { %v4635_v54 = vmul.f32 -1.442695, %v2414_v20  ;;  %v2418_v22 = vadd.f32 %v2367_v21, %v6655_v2  ;;  %v2420_v26 = vadd.f32 %v2410_v31, %v8445_v24  ;;  %v4637_v44 = vmul.f32 -1.442695, %v2416_v57 }
 0x56e   :  { %5333 = vpow2.f32 %v4633_v43  ;;  %v4634_v52 = vmul.f32 -1.442695, %v2417_v62  ;;  %v2419_v21 = vadd.f32 %v2408_v32, %v8446_v29 }
 0x56f   :  { %5335 = vpow2.f32 %v4635_v54  ;;  %v4636_v8 = vmul.f32 -1.442695, %v2418_v22  ;;  %v4638_v30 = vmul.f32 -1.442695, %v2420_v26 }
 0x570   :  { %5337 = vpow2.f32 %v4634_v52 }
 0x571   :  { %5339 = vpow2.f32 %v4636_v8 }
 0x572   :  { %5341 = vtanh.f32 %v2415_v1 }
 0x573   :  { %5343 = vpow2.f32 %v4637_v44 }
 0x574   :  { %5345 = vpow2.f32 %v4638_v30 }
 0x578   :  { %v5334_v10 = vpop.eup %5333 }
 0x579   :  { %v5336_v38 = vpop.eup %5335  ;;  %v2427_v20 = vadd.f32 1.0, %v5334_v10 }
 0x57a   :  { %v2439_v62 = vadd.f32 1.0, %v5336_v38  ;;  %v5338_v54 = vpop.eup %5337 }
 0x57b   :  { %5347 = vrcp.f32 %v2427_v20  ;;  %v2428_v52 = vadd.f32 1.0, %v5338_v54  ;;  %v5340_v9 = vpop.eup %5339 }
 0x57c   :  { %5349 = vrcp.f32 %v2439_v62  ;;  %v2440_v8 = vadd.f32 1.0, %v5340_v9  ;;  %v5342_v7 = vpop.eup %5341 }
 0x57d   :  { %5351 = vtanh.f32 %v2419_v21  ;;  %v5344_v26 = vpop.eup %5343 }
 0x57e   :  { %5353 = vrcp.f32 %v2428_v52  ;;  %v5346_v22 = vpop.eup %5345  ;;  %v2453_v38 = vadd.f32 1.0, %v5344_v26 }
 0x57f   :  { %5355 = vrcp.f32 %v2440_v8  ;;  %v2454_v44 = vadd.f32 1.0, %v5346_v22 }
 0x580   :  { %5357 = vrcp.f32 %v2453_v38 }
 0x581   :  { %5359 = vrcp.f32 %v2454_v44 }
 0x585   :  { %v5348_v1 = vpop.eup %5347 }
 0x586   :  { %v5350_v31 = vpop.eup %5349  ;;  %v2461_v43 = vmul.f32 %v5348_v1, %v5342_v7 }
 0x587   :  { %v5352_v57 = vpop.eup %5351  ;;  %v2459_v32 = vmul.f32 %v5350_v31, %v6881_v39 }
 0x588   :  { %v5354_v30 = vpop.eup %5353 }
 0x589   :  { %v7134_v10 = vadd.f32 %v2461_v43, %v2459_v32  ;;  %v2462_v20 = vmul.f32 %v5354_v30, %v5352_v57  ;;  %v2523_v62 = vpop.f32.mrb[12].mxu0  ;;  %v2566_v21 = vpop.f32.mrb[12].mxu1 }
 0x58a   :  { %v5356_v54 = vpop.eup %5355  ;;  %v4779_v52 = vadd.f32 %v2523_v62, %v8398_v48  ;;  %v2525_v9 = vpop.f32.mrb[13].mxu0 }
 0x58b   :  { %v2568_v8 = vpop.f32.mrb[13].mxu1  ;;  %v2460_v29 = vmul.f32 %v5356_v54, %v6888_v19  ;;  %v4780_v7 = vadd.f32 %v2525_v9, %v8399_v37  ;;  %v2527_v1 = vpop.f32.mrb[14].mxu0  ;;  %5361 = vtanh.f32 %v7134_v10  ;;  %v4811_v54 = vadd.f32 %v2566_v21, %v8349_v59 }
 0x58c   :  { %v2570_v39 = vpop.f32.mrb[14].mxu1  ;;  %v4641_v26 = vmul.f32 -1.442695, %v4779_v52  ;;  %v4781_v22 = vadd.f32 %v2527_v1, %v8398_v48  ;;  %v2529_v31 = vpop.f32.mrb[15].mxu0  ;;  %v4812_v44 = vadd.f32 %v2568_v8, %v6462_v23 }
 0x58d   :  { %v2572_v43 = vpop.f32.mrb[15].mxu1  ;;  %v7141_v57 = vadd.f32 %v2462_v20, %v2460_v29  ;;  %v4643_v32 = vmul.f32 -1.442695, %v4780_v7  ;;  %v4782_v30 = vadd.f32 %v2529_v31, %v8399_v37  ;;  %v5358_v62 = vpop.eup %5357  ;;  %v4813_v1 = vadd.f32 %v2570_v39, %v8349_v59 }
 0x58e   :  { %5363 = vpow2.f32 %v4641_v26  ;;  %v4642_v38 = vmul.f32 -1.442695, %v4781_v22  ;;  %v5360_v52 = vpop.eup %5359  ;;  %v4645_v9 = vmul.f32 -1.442695, %v4812_v44  ;;  %v4814_v29 = vadd.f32 %v2572_v43, %v6462_v23 }
 0x58f   :  { %5365 = vtanh.f32 %v7141_v57  ;;  %v4644_v19 = vmul.f32 -1.442695, %v4782_v30 }
 0x590   :  { %5367 = vpow2.f32 %v4643_v32  ;;  %v4646_v32 = vmul.f32 -1.442695, %v4814_v29 }
 0x591   :  { %5369 = vpow2.f32 %v4642_v38 }
 0x592   :  { %5371 = vpow2.f32 %v4644_v19 }
 0x593   :  { %5373 = vtanh.f32 %v4811_v54 }
 0x594   :  { %5375 = vpow2.f32 %v4645_v9 }
 0x595   :  { %v5362_v20 = vpop.eup %5361 }
 0x596   :  { %v2467_v8 = vmul.f32 %v5362_v20, %v5358_v62 }
 0x598   :  { %v5364_v7 = vpop.eup %5363 }
 0x599   :  { %v5366_v26 = vpop.eup %5365  ;;  %v2589_v22 = vadd.f32 1.0, %v5364_v7 }
 0x59a   :  { %v5368_v31 = vpop.eup %5367  ;;  %v2468_v30 = vmul.f32 %v5366_v26, %v5360_v52 }
 0x59b   :  { %5377 = vrcp.f32 %v2589_v22  ;;  %v2601_v38 = vadd.f32 1.0, %v5368_v31  ;;  %v5370_v19 = vpop.eup %5369 }
 0x59c   :  { %5379 = vtanh.f32 %v4813_v1  ;;  %v7149_v21 = vpack.c.bf16 %v2468_v30, %v2467_v8  ;;  %v2590_v43 = vadd.f32 1.0, %v5370_v19  ;;  %v5372_v44 = vpop.eup %5371 }
 0x59d   :  { %5381 = vrcp.f32 %v2601_v38  ;;  %v2602_v39 = vadd.f32 1.0, %v5372_v44  ;;  %v5374_v54 = vpop.eup %5373 }
 0x59e   :  { %5383 = vpow2.f32 %v4646_v32  ;;  %4741 = vst [vmem:[#allocation17 + $0x10] sm:$0xff] %v7149_v21   ;;  %v5376_v9 = vpop.eup %5375 }
 0x59f   :  { %5385 = vrcp.f32 %v2590_v43  ;;  %v2615_v22 = vadd.f32 1.0, %v5376_v9 }
 0x5a0   :  { %5387 = vrcp.f32 %v2602_v39 }
 0x5a1   :  { %5389 = vrcp.f32 %v2615_v22  ;;  %v7201_v22 = vld [vmem:[#allocation13 + $0xc8] ss:$16 sps:$4 sm:$0xff]  }
 0x5a5   :  { %v5378_v29 = vpop.eup %5377 }
 0x5a6   :  { %v5380_v62 = vpop.eup %5379  ;;  %v2623_v52 = vmul.f32 %v5378_v29, %v5374_v54 }
 0x5a7   :  { %v5382_v20 = vpop.eup %5381 }
 0x5a8   :  { %v5384_v7 = vpop.eup %5383  ;;  %v2621_v1 = vmul.f32 %v5382_v20, %v6900_v16  ;;  %v7189_v20 = vld [vmem:[#allocation13 + $0xa8] ss:$16 sps:$4 sm:$0xff]  }
 0x5a9   :  { %v5386_v26 = vpop.eup %5385  ;;  %v2616_v30 = vadd.f32 1.0, %v5384_v7  ;;  %v7192_v7 = vld [vmem:[#allocation13 + $0xc4] ss:$16 sps:$4 sm:$0xff]  }
 0x5aa   :  { %v7153_v31 = vadd.f32 %v2623_v52, %v2621_v1  ;;  %v2624_v8 = vmul.f32 %v5386_v26, %v5380_v62  ;;  %v5388_v32 = vpop.eup %5387  ;;  %v8448_v62 = vld [vmem:[#allocation58_spill] sm:$0xff]  ;;  %v7195_v1 = vld [vmem:[#allocation13 + $0xcc] ss:$16 sps:$4 sm:$0xff]  }
 0x5ab   :  { %v2622_v38 = vmul.f32 %v5388_v32, %v6904_v5  ;;  %v5390_v43 = vpop.eup %5389  ;;  %v8447_v5 = vld [vmem:[#allocation57_spill] sm:$0xff]  ;;  %v7186_v52 = vld [vmem:[#allocation13 + $0xa0] ss:$16 sps:$4 sm:$0xff]  }
 0x5ac   :  { %5391 = vtanh.f32 %v7153_v31  ;;  %v7198_v26 = vld [vmem:[#allocation13 + $0xc0] ss:$16 sps:$4 sm:$0xff]   ;;  %v7207_v32 = vld [vmem:[#allocation13 + $0xec] ss:$16 sps:$4 sm:$0xff]  }
 0x5ad   :  { %v7157_v19 = vadd.f32 %v2624_v8, %v2622_v38  ;;  %5393 = vrcp.f32 %v2616_v30  ;;  %v7204_v8 = vld [vmem:[#allocation13 + $0xe4] ss:$16 sps:$4 sm:$0xff]   ;;  %v7210_v30 = vld [vmem:[#allocation13 + $0xe0] ss:$16 sps:$4 sm:$0xff]   ;;  %v7213_v38 = vld [vmem:[#allocation13 + $0xe8] ss:$16 sps:$4 sm:$0xff]  }
 0x5af   :  { %5395 = vtanh.f32 %v7157_v19 }
 0x5b6   :  { %v5392_v44 = vpop.eup %5391 }
 0x5b7   :  { %v5394_v16 = vpop.eup %5393  ;;  %v2629_v54 = vmul.f32 %v5392_v44, %v5390_v43  ;;  %v8465_v43 = vld [vmem:[#allocation56_spill] sm:$0xff]  ;;  %v8466_v44 = vld [vmem:[#allocation59_spill] sm:$0xff] }
 0x5b9   :  { %v5396_v39 = vpop.eup %5395 }
 0x5ba   :  { %v2630_v9 = vmul.f32 %v5396_v39, %v5394_v16  ;;  %v8467_v16 = vld [vmem:[#allocation60_spill] sm:$0xff]  ;;  %v8468_v39 = vld [vmem:[#allocation61_spill] sm:$0xff] }
 0x5bc   :  { %v7160_v29 = vpack.c.bf16 %v2630_v9, %v2629_v54  ;;  %v8469_v54 = vld [vmem:[#allocation62_spill] sm:$0xff]  ;;  %v8470_v9 = vld [vmem:[#allocation63_spill] sm:$0xff] }
 0x5be   :  { %2665 = vmatmul.mubr.bf16.vlgmr.msra.gmra.mrb[44].mxu0 %v7160_v29  ;;  %2708 = vmatmul.mubr.bf16.vlgmr.msra.gmra.mrb[44].mxu1 %v7160_v29 }
 0x5bf   :  { %2719 = vmatpush1.bf16.msra.mxu0 %v6911_v55  ;;  %2762 = vmatpush1.bf16.msra.mxu1 %v6914_v17 }
 0x5c0   :  { %2720 = vmatprep.subr.bf16.mxu0 %v6917_v46  ;;  %2763 = vmatprep.subr.bf16.mxu1 %v6920_v40 }
 0x5c1   :  { %2750 = vmatprep.mubr.bf16.mxu0 %v8301_v0  ;;  %2793 = vmatprep.mubr.bf16.mxu1 %v8301_v0 }
 0x5c3   :  { %2721 = vmatpush1.bf16.msra.mxu0 %v6925_v11  ;;  %2764 = vmatpush1.bf16.msra.mxu1 %v6928_v15 }
 0x5c4   :  { %2722 = vmatprep.subr.bf16.mxu0 %v6931_v13  ;;  %2765 = vmatprep.subr.bf16.mxu1 %v6934_v14 }
 0x5c7   :  { %2723 = vmatpush1.bf16.msra.mxu0 %v6937_v12  ;;  %2766 = vmatpush1.bf16.msra.mxu1 %v6940_v45 }
 0x5c8   :  { %2724 = vmatprep.subr.bf16.mxu0 %v6943_v34  ;;  %2767 = vmatprep.subr.bf16.mxu1 %v6946_v33 }
 0x5cb   :  { %2725 = vmatpush1.bf16.msra.mxu0 %v8447_v5  ;;  %2768 = vmatpush1.bf16.msra.mxu1 %v8448_v62 }
 0x5cc   :  { %2726 = vmatprep.subr.bf16.mxu0 %v6955_v58  ;;  %2769 = vmatprep.subr.bf16.mxu1 %v6958_v51 }
 0x5cf   :  { %2727 = vmatpush1.bf16.msra.mxu0 %v6961_v42  ;;  %2770 = vmatpush1.bf16.msra.mxu1 %v6964_v41 }
 0x5d0   :  { %2728 = vmatprep.subr.bf16.mxu0 %v6967_v18  ;;  %2771 = vmatprep.subr.bf16.mxu1 %v6970_v36 }
 0x5d3   :  { %2729 = vmatpush1.bf16.msra.mxu0 %v7186_v52  ;;  %2772 = vmatpush1.bf16.msra.mxu1 %v7189_v20 }
 0x5d4   :  { %2730 = vmatprep.subr.bf16.mxu0 %v7192_v7  ;;  %2773 = vmatprep.subr.bf16.mxu1 %v7195_v1 }
 0x5d7   :  { %2731 = vmatpush1.bf16.msra.mxu0 %v7198_v26  ;;  %2774 = vmatpush1.bf16.msra.mxu1 %v7201_v22 }
 0x5d8   :  { %2732 = vmatprep.subr.bf16.mxu0 %v7204_v8  ;;  %2775 = vmatprep.subr.bf16.mxu1 %v7207_v32 }
 0x5db   :  { %2733 = vmatpush1.bf16.msra.mxu0 %v7210_v30  ;;  %2776 = vmatpush1.bf16.msra.mxu1 %v7213_v38 }
 0x5dc   :  { %2880 = vmatprep.subr.bf16.mxu0 %v6734_v49  ;;  %2923 = vmatprep.subr.bf16.mxu1 %v6737_v56  ;;  %v8449_v49 = vld [vmem:[#allocation26_spill] sm:$0xff]  ;;  %v8450_v56 = vld [vmem:[#allocation27_spill] sm:$0xff] }
 0x5de   :  { %2751 = vmatmul.mubr.bf16.vlgmr.msra.gmra.mrb[44].mxu0 %v7149_v21  ;;  %2794 = vmatmul.mubr.bf16.vlgmr.msra.gmra.mrb[44].mxu1 %v7149_v21  ;;  %v8464_v21 = vld [vmem:[#allocation55_spill] sm:$0xff] }
 0x5df   :  { %2881 = vmatpush1.bf16.msra.mxu0 %v6742_v47  ;;  %2924 = vmatpush1.bf16.msra.mxu1 %v6745_v63  ;;  %v8451_v47 = vld [vmem:[#allocation28_spill] sm:$0xff]  ;;  %v8452_v63 = vld [vmem:[#allocation29_spill] sm:$0xff] }
 0x5e0   :  { %2882 = vmatprep.subr.bf16.mxu0 %v6748_v35  ;;  %2925 = vmatprep.subr.bf16.mxu1 %v6751_v3  ;;  %v8453_v35 = vld [vmem:[#allocation30_spill] sm:$0xff]  ;;  %v8454_v3 = vld [vmem:[#allocation31_spill] sm:$0xff] }
 0x5e1   :  { %2912 = vmatprep.mubr.bf16.mxu0 %v8301_v0  ;;  %2955 = vmatprep.mubr.bf16.mxu1 %v8301_v0 }
 0x5e3   :  { %2883 = vmatpush1.bf16.msra.mxu0 %v6756_v6  ;;  %2926 = vmatpush1.bf16.msra.mxu1 %v6759_v60  ;;  %v8455_v6 = vld [vmem:[#allocation32_spill] sm:$0xff]  ;;  %v8456_v60 = vld [vmem:[#allocation33_spill] sm:$0xff] }
 0x5e4   :  { %2884 = vmatprep.subr.bf16.mxu0 %v6762_v53  ;;  %2927 = vmatprep.subr.bf16.mxu1 %v6765_v27  ;;  %v8457_v53 = vld [vmem:[#allocation34_spill] sm:$0xff]  ;;  %v8458_v27 = vld [vmem:[#allocation49_spill] sm:$0xff] }
 0x5e7   :  { %2885 = vmatpush1.bf16.msra.mxu0 %v6768_v50  ;;  %2928 = vmatpush1.bf16.msra.mxu1 %v6771_v4  ;;  %v8459_v50 = vld [vmem:[#allocation50_spill] sm:$0xff]  ;;  %v8460_v4 = vld [vmem:[#allocation51_spill] sm:$0xff] }
 0x5e8   :  { %2886 = vmatprep.subr.bf16.mxu0 %v6774_v61  ;;  %2929 = vmatprep.subr.bf16.mxu1 %v6777_v28  ;;  %v8461_v61 = vld [vmem:[#allocation52_spill] sm:$0xff]  ;;  %v8462_v28 = vld [vmem:[#allocation53_spill] sm:$0xff] }
 0x5eb   :  { %2887 = vmatpush1.bf16.msra.mxu0 %v6780_v25  ;;  %2930 = vmatpush1.bf16.msra.mxu1 %v8449_v49  ;;  %v8463_v25 = vld [vmem:[#allocation54_spill] sm:$0xff]  ;;  %v8471_v49 = vld [vmem:[#allocation64_spill] sm:$0xff] }
 0x5ec   :  { %2888 = vmatprep.subr.bf16.mxu0 %v8450_v56  ;;  %2931 = vmatprep.subr.bf16.mxu1 %v8451_v47  ;;  %v8472_v56 = vld [vmem:[#allocation65_spill] sm:$0xff]  ;;  %v8473_v47 = vld [vmem:[#allocation35_spill] sm:$0xff] }
 0x5ef   :  { %2889 = vmatpush1.bf16.msra.mxu0 %v8452_v63  ;;  %2932 = vmatpush1.bf16.msra.mxu1 %v8453_v35  ;;  %v8474_v63 = vld [vmem:[#allocation36_spill] sm:$0xff]  ;;  %v8475_v35 = vld [vmem:[#allocation37_spill] sm:$0xff] }
 0x5f0   :  { %2890 = vmatprep.subr.bf16.mxu0 %v8454_v3  ;;  %2933 = vmatprep.subr.bf16.mxu1 %v8455_v6  ;;  %v8477_v3 = vld [vmem:[#allocation39_spill] sm:$0xff]  ;;  %v8478_v6 = vld [vmem:[#allocation40_spill] sm:$0xff] }
 0x5f3   :  { %2891 = vmatpush1.bf16.msra.mxu0 %v8456_v60  ;;  %2934 = vmatpush1.bf16.msra.mxu1 %v8457_v53  ;;  %v8479_v60 = vld [vmem:[#allocation41_spill] sm:$0xff]  ;;  %v8480_v53 = vld [vmem:[#allocation42_spill] sm:$0xff] }
 0x5f4   :  { %2892 = vmatprep.subr.bf16.mxu0 %v8458_v27  ;;  %2935 = vmatprep.subr.bf16.mxu1 %v8459_v50  ;;  %v8481_v27 = vld [vmem:[#allocation43_spill] sm:$0xff]  ;;  %v8482_v50 = vld [vmem:[#allocation44_spill] sm:$0xff] }
 0x5f7   :  { %2893 = vmatpush1.bf16.msra.mxu0 %v8460_v4  ;;  %2936 = vmatpush1.bf16.msra.mxu1 %v8461_v61  ;;  %v8483_v4 = vld [vmem:[#allocation45_spill] sm:$0xff]  ;;  %v8484_v61 = vld [vmem:[#allocation46_spill] sm:$0xff] }
 0x5f8   :  { %2894 = vmatprep.subr.bf16.mxu0 %v8462_v28  ;;  %2937 = vmatprep.subr.bf16.mxu1 %v8463_v25  ;;  %v8485_v28 = vld [vmem:[#allocation47_spill] sm:$0xff]  ;;  %v8486_v25 = vld [vmem:[#allocation48_spill] sm:$0xff] }
 0x5fb   :  { %2895 = vmatpush1.bf16.msra.mxu0 %v8464_v21  ;;  %2938 = vmatpush1.bf16.msra.mxu1 %v8465_v43  ;;  %v8487_v21 = vld [vmem:[#allocation66_spill] sm:$0xff]  ;;  %v8488_v43 = vld [vmem:[#allocation67_spill] sm:$0xff] }
 0x5fc   :  { %3023 = vmatprep.subr.bf16.mxu0 %v8466_v44  ;;  %3066 = vmatprep.subr.bf16.mxu1 %v8467_v16 }
 0x5fe   :  { %2913 = vmatmul.mubr.bf16.vlgmr.msra.gmra.mrb[16].mxu0 %v7160_v29  ;;  %2956 = vmatmul.mubr.bf16.vlgmr.msra.gmra.mrb[16].mxu1 %v7160_v29  ;;  %v8476_v29 = vld [vmem:[#allocation38_spill] sm:$0xff] }
 0x5ff   :  { %3024 = vmatpush1.bf16.msra.mxu0 %v8468_v39  ;;  %3067 = vmatpush1.bf16.msra.mxu1 %v8469_v54 }
 0x600   :  { %3025 = vmatprep.subr.bf16.mxu0 %v8470_v9  ;;  %3068 = vmatprep.subr.bf16.mxu1 %v8471_v49 }
 0x601   :  { %3055 = vmatprep.mubr.bf16.mxu0 %v8301_v0  ;;  %3098 = vmatprep.mubr.bf16.mxu1 %v8301_v0 }
 0x603   :  { %3026 = vmatpush1.bf16.msra.mxu0 %v8472_v56  ;;  %3069 = vmatpush1.bf16.msra.mxu1 %v8473_v47 }
 0x604   :  { %3027 = vmatprep.subr.bf16.mxu0 %v8474_v63  ;;  %3070 = vmatprep.subr.bf16.mxu1 %v8475_v35 }
 0x607   :  { %3028 = vmatpush1.bf16.msra.mxu0 %v8476_v29  ;;  %3071 = vmatpush1.bf16.msra.mxu1 %v8477_v3  ;;  %v8500_v3 = vld [vmem:[#allocation23_spill] sm:$0xff] }
 0x608   :  { %3029 = vmatprep.subr.bf16.mxu0 %v8478_v6  ;;  %3072 = vmatprep.subr.bf16.mxu1 %v8479_v60  ;;  %v8489_v6 = vld [vmem:[#allocation68_spill] sm:$0xff]  ;;  %v8490_v60 = vld [vmem:[#allocation69_spill] sm:$0xff] }
 0x60b   :  { %3030 = vmatpush1.bf16.msra.mxu0 %v8480_v53  ;;  %3073 = vmatpush1.bf16.msra.mxu1 %v8481_v27  ;;  %v8491_v53 = vld [vmem:[#allocation70_spill] sm:$0xff]  ;;  %v8492_v27 = vld [vmem:[#allocation71_spill] sm:$0xff] }
 0x60c   :  { %3031 = vmatprep.subr.bf16.mxu0 %v8482_v50  ;;  %3074 = vmatprep.subr.bf16.mxu1 %v8483_v4  ;;  %v8493_v50 = vld [vmem:[#allocation72_spill] sm:$0xff]  ;;  %v8494_v4 = vld [vmem:[#allocation73_spill] sm:$0xff] }
 0x60f   :  { %3032 = vmatpush1.bf16.msra.mxu0 %v8484_v61  ;;  %3075 = vmatpush1.bf16.msra.mxu1 %v8485_v28  ;;  %v8495_v61 = vld [vmem:[#allocation74_spill] sm:$0xff]  ;;  %v8496_v28 = vld [vmem:[#allocation75_spill] sm:$0xff] }
 0x610   :  { %3033 = vmatprep.subr.bf16.mxu0 %v8486_v25  ;;  %3076 = vmatprep.subr.bf16.mxu1 %v8487_v21  ;;  %v8497_v25 = vld [vmem:[#allocation76_spill] sm:$0xff]  ;;  %v8498_v21 = vld [vmem:[#allocation77_spill] sm:$0xff] }
 0x613   :  { %3034 = vmatpush1.bf16.msra.mxu0 %v8488_v43  ;;  %3077 = vmatpush1.bf16.msra.mxu1 %v8489_v6  ;;  %v8499_v43 = vld [vmem:[#allocation78_spill] sm:$0xff] }
 0x614   :  { %3035 = vmatprep.subr.bf16.mxu0 %v8490_v60  ;;  %3078 = vmatprep.subr.bf16.mxu1 %v8491_v53 }
 0x617   :  { %3036 = vmatpush1.bf16.msra.mxu0 %v8492_v27  ;;  %3079 = vmatpush1.bf16.msra.mxu1 %v8493_v50 }
 0x618   :  { %3037 = vmatprep.subr.bf16.mxu0 %v8494_v4  ;;  %3080 = vmatprep.subr.bf16.mxu1 %v8495_v61 }
 0x61b   :  { %3038 = vmatpush1.bf16.msra.mxu0 %v8496_v28  ;;  %3081 = vmatpush1.bf16.msra.mxu1 %v8497_v25 }
 0x61c   :  { %3109 = vmatprep.subr.bf16.mxu0 %v8498_v21  ;;  %3152 = vmatprep.subr.bf16.mxu1 %v8499_v43 }
 0x6b1   :  { %v2752_v6 = vpop.f32.mrb[44].mxu0  ;;  %v2795_v60 = vpop.f32.mrb[44].mxu1 }
 0x6b2   :  { %v2804_v53 = vadd.f32 %v2752_v6, %v8500_v3  ;;  %v2754_v29 = vpop.f32.mrb[45].mxu0  ;;  %v2797_v27 = vpop.f32.mrb[45].mxu1 }
 0x6b3   :  { %v2805_v50 = vadd.f32 %v2754_v29, %v6655_v2  ;;  %v2756_v35 = vpop.f32.mrb[46].mxu0  ;;  %v2799_v4 = vpop.f32.mrb[46].mxu1  ;;  %v2807_v6 = vadd.f32 %v2797_v27, %v8445_v24  ;;  %v8501_v29 = vld [vmem:[#allocation25_spill] sm:$0xff] }
 0x6b4   :  { %v4647_v63 = vmul.f32 -1.442695, %v2804_v53  ;;  %v2808_v61 = vadd.f32 %v2756_v35, %v8500_v3  ;;  %v2758_v28 = vpop.f32.mrb[47].mxu0  ;;  %v2801_v47 = vpop.f32.mrb[47].mxu1  ;;  %v2806_v9 = vadd.f32 %v2795_v60, %v8501_v29 }
 0x6b5   :  { %v4649_v25 = vmul.f32 -1.442695, %v2805_v50  ;;  %v2809_v21 = vadd.f32 %v2758_v28, %v6655_v2  ;;  %v2811_v49 = vadd.f32 %v2801_v47, %v8445_v24  ;;  %v4651_v53 = vmul.f32 -1.442695, %v2807_v6 }
 0x6b6   :  { %5397 = vpow2.f32 %v4647_v63  ;;  %v4648_v43 = vmul.f32 -1.442695, %v2808_v61  ;;  %v2810_v63 = vadd.f32 %v2799_v4, %v8501_v29 }
 0x6b7   :  { %5399 = vpow2.f32 %v4649_v25  ;;  %v4650_v56 = vmul.f32 -1.442695, %v2809_v21  ;;  %v4652_v54 = vmul.f32 -1.442695, %v2811_v49 }
 0x6b8   :  { %5401 = vpow2.f32 %v4648_v43 }
 0x6b9   :  { %5403 = vpow2.f32 %v4650_v56 }
 0x6ba   :  { %5405 = vtanh.f32 %v2806_v9 }
 0x6bb   :  { %5407 = vpow2.f32 %v4651_v53 }
 0x6bc   :  { %5409 = vpow2.f32 %v4652_v54 }
 0x6c0   :  { %v5398_v35 = vpop.eup %5397 }
 0x6c1   :  { %v5400_v3 = vpop.eup %5399  ;;  %v2818_v50 = vadd.f32 1.0, %v5398_v35 }
 0x6c2   :  { %v2830_v61 = vadd.f32 1.0, %v5400_v3  ;;  %v5402_v28 = vpop.eup %5401 }
 0x6c3   :  { %5411 = vrcp.f32 %v2818_v50  ;;  %v2819_v27 = vadd.f32 1.0, %v5402_v28  ;;  %v5404_v25 = vpop.eup %5403 }
 0x6c4   :  { %5413 = vrcp.f32 %v2830_v61  ;;  %v2831_v56 = vadd.f32 1.0, %v5404_v25  ;;  %v5406_v47 = vpop.eup %5405 }
 0x6c5   :  { %5415 = vtanh.f32 %v2810_v63  ;;  %v5408_v49 = vpop.eup %5407 }
 0x6c6   :  { %5417 = vrcp.f32 %v2819_v27  ;;  %v5410_v60 = vpop.eup %5409  ;;  %v2844_v3 = vadd.f32 1.0, %v5408_v49 }
 0x6c7   :  { %5419 = vrcp.f32 %v2831_v56  ;;  %v2845_v53 = vadd.f32 1.0, %v5410_v60 }
 0x6c8   :  { %5421 = vrcp.f32 %v2844_v3 }
 0x6c9   :  { %5423 = vrcp.f32 %v2845_v53 }
 0x6cd   :  { %v5412_v9 = vpop.eup %5411 }
 0x6ce   :  { %v5414_v21 = vpop.eup %5413  ;;  %v2852_v43 = vmul.f32 %v5412_v9, %v5406_v47 }
 0x6cf   :  { %v5416_v6 = vpop.eup %5415  ;;  %v2850_v4 = vmul.f32 %v5414_v21, %v7134_v10 }
 0x6d0   :  { %v5418_v54 = vpop.eup %5417 }
 0x6d1   :  { %v7299_v35 = vadd.f32 %v2852_v43, %v2850_v4  ;;  %v2853_v50 = vmul.f32 %v5418_v54, %v5416_v6  ;;  %v2914_v61 = vpop.f32.mrb[16].mxu0  ;;  %v2957_v63 = vpop.f32.mrb[16].mxu1 }
 0x6d2   :  { %v5420_v28 = vpop.eup %5419  ;;  %v4783_v27 = vadd.f32 %v2914_v61, %v8398_v48  ;;  %v2916_v25 = vpop.f32.mrb[17].mxu0 }
 0x6d3   :  { %v2959_v56 = vpop.f32.mrb[17].mxu1  ;;  %v2851_v29 = vmul.f32 %v5420_v28, %v7141_v57  ;;  %v4784_v47 = vadd.f32 %v2916_v25, %v8399_v37  ;;  %v2918_v9 = vpop.f32.mrb[18].mxu0  ;;  %5425 = vtanh.f32 %v7299_v35  ;;  %v4815_v28 = vadd.f32 %v2957_v63, %v8349_v59 }
 0x6d4   :  { %v2961_v10 = vpop.f32.mrb[18].mxu1  ;;  %v4655_v49 = vmul.f32 -1.442695, %v4783_v27  ;;  %v4785_v60 = vadd.f32 %v2918_v9, %v8398_v48  ;;  %v2920_v21 = vpop.f32.mrb[19].mxu0  ;;  %v4816_v53 = vadd.f32 %v2959_v56, %v6462_v23 }
 0x6d5   :  { %v2963_v43 = vpop.f32.mrb[19].mxu1  ;;  %v7306_v6 = vadd.f32 %v2853_v50, %v2851_v29  ;;  %v4657_v4 = vmul.f32 -1.442695, %v4784_v47  ;;  %v4786_v54 = vadd.f32 %v2920_v21, %v8399_v37  ;;  %v5422_v61 = vpop.eup %5421  ;;  %v4817_v9 = vadd.f32 %v2961_v10, %v8349_v59 }
 0x6d6   :  { %5427 = vpow2.f32 %v4655_v49  ;;  %v4656_v3 = vmul.f32 -1.442695, %v4785_v60  ;;  %v5424_v27 = vpop.eup %5423  ;;  %v4659_v25 = vmul.f32 -1.442695, %v4816_v53  ;;  %v4818_v29 = vadd.f32 %v2963_v43, %v6462_v23 }
 0x6d7   :  { %5429 = vtanh.f32 %v7306_v6  ;;  %v4658_v57 = vmul.f32 -1.442695, %v4786_v54 }
 0x6d8   :  { %5431 = vpow2.f32 %v4657_v4  ;;  %v4660_v4 = vmul.f32 -1.442695, %v4818_v29 }
 0x6d9   :  { %5433 = vpow2.f32 %v4656_v3 }
 0x6da   :  { %5435 = vpow2.f32 %v4658_v57 }
 0x6db   :  { %5437 = vtanh.f32 %v4815_v28 }
 0x6dc   :  { %5439 = vpow2.f32 %v4659_v25 }
 0x6dd   :  { %v5426_v50 = vpop.eup %5425 }
 0x6de   :  { %v2858_v56 = vmul.f32 %v5426_v50, %v5422_v61 }
 0x6e0   :  { %v5428_v47 = vpop.eup %5427 }
 0x6e1   :  { %v5430_v49 = vpop.eup %5429  ;;  %v2980_v60 = vadd.f32 1.0, %v5428_v47 }
 0x6e2   :  { %v5432_v21 = vpop.eup %5431  ;;  %v2859_v54 = vmul.f32 %v5430_v49, %v5424_v27 }
 0x6e3   :  { %5441 = vrcp.f32 %v2980_v60  ;;  %v2992_v3 = vadd.f32 1.0, %v5432_v21  ;;  %v5434_v57 = vpop.eup %5433 }
 0x6e4   :  { %5443 = vtanh.f32 %v4817_v9  ;;  %v7314_v63 = vpack.c.bf16 %v2859_v54, %v2858_v56  ;;  %v2981_v43 = vadd.f32 1.0, %v5434_v57  ;;  %v5436_v53 = vpop.eup %5435 }
 0x6e5   :  { %5445 = vrcp.f32 %v2992_v3  ;;  %v2993_v10 = vadd.f32 1.0, %v5436_v53  ;;  %v5438_v28 = vpop.eup %5437 }
 0x6e6   :  { %5447 = vpow2.f32 %v4660_v4  ;;  %4746 = vst [vmem:[#allocation17 + $0x18] sm:$0xff] %v7314_v63   ;;  %v5440_v25 = vpop.eup %5439 }
 0x6e7   :  { %5449 = vrcp.f32 %v2981_v43  ;;  %v3006_v60 = vadd.f32 1.0, %v5440_v25 }
 0x6e8   :  { %5451 = vrcp.f32 %v2993_v10 }
 0x6e9   :  { %5453 = vrcp.f32 %v3006_v60  ;;  %v7449_v60 = vld [vmem:[#allocation10 + $0xe4] ss:$16 sps:$4 sm:$0xff]  }
 0x6ea   :  { %8515 = vst [vmem:[#allocation50_spill] sm:$0xff] %v7449_v60 }
 0x6ed   :  { %v5442_v29 = vpop.eup %5441 }
 0x6ee   :  { %v5444_v61 = vpop.eup %5443  ;;  %v3014_v27 = vmul.f32 %v5442_v29, %v5438_v28 }
 0x6ef   :  { %v5446_v50 = vpop.eup %5445 }
 0x6f0   :  { %v5448_v47 = vpop.eup %5447  ;;  %v3012_v9 = vmul.f32 %v5446_v50, %v7153_v31  ;;  %v7437_v50 = vld [vmem:[#allocation10 + $0xc4] ss:$16 sps:$4 sm:$0xff]  }
 0x6f1   :  { %v5450_v49 = vpop.eup %5449  ;;  %v3007_v54 = vadd.f32 1.0, %v5448_v47  ;;  %8511 = vst [vmem:[#allocation32_spill] sm:$0xff] %v7437_v50  ;;  %v7440_v47 = vld [vmem:[#allocation10 + $0xcc] ss:$16 sps:$4 sm:$0xff]  }
 0x6f2   :  { %v7318_v21 = vadd.f32 %v3014_v27, %v3012_v9  ;;  %v3015_v56 = vmul.f32 %v5450_v49, %v5444_v61  ;;  %v5452_v4 = vpop.eup %5451  ;;  %v7431_v61 = vld [vmem:[#allocation10 + $0xa0] ss:$16 sps:$4 sm:$0xff]   ;;  %v7434_v27 = vld [vmem:[#allocation10 + $0xa8] ss:$16 sps:$4 sm:$0xff]   ;;  %8512 = vst [vmem:[#allocation33_spill] sm:$0xff] %v7440_v47 }
 0x6f3   :  { %v3013_v3 = vmul.f32 %v5452_v4, %v7157_v19  ;;  %v5454_v43 = vpop.eup %5453  ;;  %v7419_v19 = vld [vmem:[#allocation10 + $0x80] ss:$16 sps:$4 sm:$0xff]   ;;  %8509 = vst [vmem:[#allocation30_spill] sm:$0xff] %v7431_v61  ;;  %8510 = vst [vmem:[#allocation31_spill] sm:$0xff] %v7434_v27  ;;  %v7446_v49 = vld [vmem:[#allocation10 + $0xc8] ss:$16 sps:$4 sm:$0xff]  }
 0x6f4   :  { %5455 = vtanh.f32 %v7318_v21  ;;  %8505 = vst [vmem:[#allocation26_spill] sm:$0xff] %v7419_v19  ;;  %v7443_v9 = vld [vmem:[#allocation10 + $0xc0] ss:$16 sps:$4 sm:$0xff]   ;;  %8514 = vst [vmem:[#allocation49_spill] sm:$0xff] %v7446_v49 }
 0x6f5   :  { %v7322_v57 = vadd.f32 %v3015_v56, %v3013_v3  ;;  %5457 = vrcp.f32 %v3007_v54  ;;  %8513 = vst [vmem:[#allocation34_spill] sm:$0xff] %v7443_v9  ;;  %v7452_v56 = vld [vmem:[#allocation10 + $0xec] ss:$16 sps:$4 sm:$0xff]   ;;  %v7455_v4 = vld [vmem:[#allocation10 + $0xe0] ss:$16 sps:$4 sm:$0xff]  }
 0x6f6   :  { %8516 = vst [vmem:[#allocation51_spill] sm:$0xff] %v7452_v56  ;;  %8517 = vst [vmem:[#allocation52_spill] sm:$0xff] %v7455_v4  ;;  %v7458_v54 = vld [vmem:[#allocation10 + $0xe8] ss:$16 sps:$4 sm:$0xff]   ;;  %v8519_v3 = vld [vmem:[#allocation62_spill] sm:$0xff] }
 0x6f7   :  { %5459 = vtanh.f32 %v7322_v57  ;;  %8518 = vst [vmem:[#allocation53_spill] sm:$0xff] %v7458_v54 }
 0x6fe   :  { %v5456_v53 = vpop.eup %5455 }
 0x6ff   :  { %v5458_v31 = vpop.eup %5457  ;;  %v3020_v28 = vmul.f32 %v5456_v53, %v5454_v43  ;;  %v8520_v43 = vld [vmem:[#allocation63_spill] sm:$0xff]  ;;  %v8521_v53 = vld [vmem:[#allocation64_spill] sm:$0xff] }
 0x701   :  { %v5460_v10 = vpop.eup %5459 }
 0x702   :  { %v3021_v25 = vmul.f32 %v5460_v10, %v5458_v31  ;;  %v8522_v31 = vld [vmem:[#allocation65_spill] sm:$0xff] }
 0x703   :  { %v8525_v10 = vld [vmem:[#allocation37_spill] sm:$0xff] }
 0x704   :  { %v7325_v29 = vpack.c.bf16 %v3021_v25, %v3020_v28  ;;  %v8526_v28 = vld [vmem:[#allocation38_spill] sm:$0xff]  ;;  %v8528_v25 = vld [vmem:[#allocation40_spill] sm:$0xff] }
 0x706   :  { %3056 = vmatmul.mubr.bf16.vlgmr.msra.gmra.mrb[48].mxu0 %v7325_v29  ;;  %3099 = vmatmul.mubr.bf16.vlgmr.msra.gmra.mrb[48].mxu1 %v7325_v29 }
 0x707   :  { %3110 = vmatpush1.bf16.msra.mxu0 %v6911_v55  ;;  %3153 = vmatpush1.bf16.msra.mxu1 %v6914_v17  ;;  %v7361_v55 = vld [vmem:[#allocation10 + $0x4] ss:$16 sps:$4 sm:$0xff]   ;;  %v7364_v17 = vld [vmem:[#allocation10 + $0xc] ss:$16 sps:$4 sm:$0xff]  }
 0x708   :  { %3111 = vmatprep.subr.bf16.mxu0 %v6917_v46  ;;  %3154 = vmatprep.subr.bf16.mxu1 %v6920_v40  ;;  %v7369_v46 = vld [vmem:[#allocation10] ss:$16 sps:$4 sm:$0xff]   ;;  %v7372_v40 = vld [vmem:[#allocation10 + $0x8] ss:$16 sps:$4 sm:$0xff]  }
 0x709   :  { %3141 = vmatprep.mubr.bf16.mxu0 %v8301_v0  ;;  %3184 = vmatprep.mubr.bf16.mxu1 %v8301_v0 }
 0x70b   :  { %3112 = vmatpush1.bf16.msra.mxu0 %v6925_v11  ;;  %3155 = vmatpush1.bf16.msra.mxu1 %v6928_v15  ;;  %v7375_v11 = vld [vmem:[#allocation10 + $0x24] ss:$16 sps:$4 sm:$0xff]   ;;  %v7378_v15 = vld [vmem:[#allocation10 + $0x2c] ss:$16 sps:$4 sm:$0xff]  }
 0x70c   :  { %3113 = vmatprep.subr.bf16.mxu0 %v6931_v13  ;;  %3156 = vmatprep.subr.bf16.mxu1 %v6934_v14  ;;  %v7383_v13 = vld [vmem:[#allocation10 + $0x20] ss:$16 sps:$4 sm:$0xff]   ;;  %v7386_v14 = vld [vmem:[#allocation10 + $0x28] ss:$16 sps:$4 sm:$0xff]  }
 0x70f   :  { %3114 = vmatpush1.bf16.msra.mxu0 %v6937_v12  ;;  %3157 = vmatpush1.bf16.msra.mxu1 %v6940_v45  ;;  %v7389_v12 = vld [vmem:[#allocation10 + $0x44] ss:$16 sps:$4 sm:$0xff]   ;;  %v7392_v45 = vld [vmem:[#allocation10 + $0x4c] ss:$16 sps:$4 sm:$0xff]  }
 0x710   :  { %3115 = vmatprep.subr.bf16.mxu0 %v6943_v34  ;;  %3158 = vmatprep.subr.bf16.mxu1 %v6946_v33  ;;  %v7395_v34 = vld [vmem:[#allocation10 + $0x40] ss:$16 sps:$4 sm:$0xff]   ;;  %v7398_v33 = vld [vmem:[#allocation10 + $0x48] ss:$16 sps:$4 sm:$0xff]  }
 0x713   :  { %3116 = vmatpush1.bf16.msra.mxu0 %v8447_v5  ;;  %3159 = vmatpush1.bf16.msra.mxu1 %v8448_v62  ;;  %v7422_v5 = vld [vmem:[#allocation10 + $0x88] ss:$16 sps:$4 sm:$0xff]   ;;  %v7425_v62 = vld [vmem:[#allocation10 + $0xa4] ss:$16 sps:$4 sm:$0xff]  }
 0x714   :  { %3117 = vmatprep.subr.bf16.mxu0 %v6955_v58  ;;  %3160 = vmatprep.subr.bf16.mxu1 %v6958_v51  ;;  %v7407_v58 = vld [vmem:[#allocation10 + $0x60] ss:$16 sps:$4 sm:$0xff]   ;;  %v7410_v51 = vld [vmem:[#allocation10 + $0x68] ss:$16 sps:$4 sm:$0xff]   ;;  %8506 = vst [vmem:[#allocation27_spill] sm:$0xff] %v7422_v5  ;;  %8507 = vst [vmem:[#allocation28_spill] sm:$0xff] %v7425_v62 }
 0x715   :  { %8502 = vst [vmem:[#allocation24_spill] sm:$0xff] %v7410_v51 }
 0x717   :  { %3118 = vmatpush1.bf16.msra.mxu0 %v6961_v42  ;;  %3161 = vmatpush1.bf16.msra.mxu1 %v6964_v41  ;;  %v7413_v42 = vld [vmem:[#allocation10 + $0x84] ss:$16 sps:$4 sm:$0xff]   ;;  %v7416_v41 = vld [vmem:[#allocation10 + $0x8c] ss:$16 sps:$4 sm:$0xff]  }
 0x718   :  { %3119 = vmatprep.subr.bf16.mxu0 %v6967_v18  ;;  %3162 = vmatprep.subr.bf16.mxu1 %v6970_v36  ;;  %v7401_v18 = vld [vmem:[#allocation10 + $0x64] ss:$16 sps:$4 sm:$0xff]   ;;  %v7404_v36 = vld [vmem:[#allocation10 + $0x6c] ss:$16 sps:$4 sm:$0xff]   ;;  %8503 = vst [vmem:[#allocation57_spill] sm:$0xff] %v7413_v42  ;;  %8504 = vst [vmem:[#allocation58_spill] sm:$0xff] %v7416_v41 }
 0x71b   :  { %3120 = vmatpush1.bf16.msra.mxu0 %v7186_v52  ;;  %3163 = vmatpush1.bf16.msra.mxu1 %v7189_v20 }
 0x71c   :  { %3121 = vmatprep.subr.bf16.mxu0 %v7192_v7  ;;  %3164 = vmatprep.subr.bf16.mxu1 %v7195_v1 }
 0x71f   :  { %3122 = vmatpush1.bf16.msra.mxu0 %v7198_v26  ;;  %3165 = vmatpush1.bf16.msra.mxu1 %v7201_v22 }
 0x720   :  { %3123 = vmatprep.subr.bf16.mxu0 %v7204_v8  ;;  %3166 = vmatprep.subr.bf16.mxu1 %v7207_v32 }
 0x723   :  { %3124 = vmatpush1.bf16.msra.mxu0 %v7210_v30  ;;  %3167 = vmatpush1.bf16.msra.mxu1 %v7213_v38 }
 0x724   :  { %3271 = vmatprep.subr.bf16.mxu0 %v7361_v55  ;;  %3314 = vmatprep.subr.bf16.mxu1 %v7364_v17 }
 0x726   :  { %3142 = vmatmul.mubr.bf16.vlgmr.msra.gmra.mrb[48].mxu0 %v7314_v63  ;;  %3185 = vmatmul.mubr.bf16.vlgmr.msra.gmra.mrb[48].mxu1 %v7314_v63  ;;  %v7428_v63 = vld [vmem:[#allocation10 + $0xac] ss:$16 sps:$4 sm:$0xff]  }
 0x727   :  { %3272 = vmatpush1.bf16.msra.mxu0 %v7369_v46  ;;  %3315 = vmatpush1.bf16.msra.mxu1 %v7372_v40  ;;  %8508 = vst [vmem:[#allocation29_spill] sm:$0xff] %v7428_v63 }
 0x728   :  { %3273 = vmatprep.subr.bf16.mxu0 %v7375_v11  ;;  %3316 = vmatprep.subr.bf16.mxu1 %v7378_v15 }
 0x729   :  { %3303 = vmatprep.mubr.bf16.mxu0 %v8301_v0  ;;  %3346 = vmatprep.mubr.bf16.mxu1 %v8301_v0 }
 0x72b   :  { %3274 = vmatpush1.bf16.msra.mxu0 %v7383_v13  ;;  %3317 = vmatpush1.bf16.msra.mxu1 %v7386_v14 }
 0x72c   :  { %3275 = vmatprep.subr.bf16.mxu0 %v7389_v12  ;;  %3318 = vmatprep.subr.bf16.mxu1 %v7392_v45 }
 0x72f   :  { %3276 = vmatpush1.bf16.msra.mxu0 %v7395_v34  ;;  %3319 = vmatpush1.bf16.msra.mxu1 %v7398_v33 }
 0x730   :  { %3277 = vmatprep.subr.bf16.mxu0 %v7401_v18  ;;  %3320 = vmatprep.subr.bf16.mxu1 %v7404_v36 }
 0x733   :  { %3278 = vmatpush1.bf16.msra.mxu0 %v7407_v58  ;;  %3321 = vmatpush1.bf16.msra.mxu1 %v7410_v51 }
 0x734   :  { %3279 = vmatprep.subr.bf16.mxu0 %v7413_v42  ;;  %3322 = vmatprep.subr.bf16.mxu1 %v7416_v41 }
 0x737   :  { %3280 = vmatpush1.bf16.msra.mxu0 %v7419_v19  ;;  %3323 = vmatpush1.bf16.msra.mxu1 %v7422_v5 }
 0x738   :  { %3281 = vmatprep.subr.bf16.mxu0 %v7425_v62  ;;  %3324 = vmatprep.subr.bf16.mxu1 %v7428_v63 }
 0x73b   :  { %3282 = vmatpush1.bf16.msra.mxu0 %v7431_v61  ;;  %3325 = vmatpush1.bf16.msra.mxu1 %v7434_v27 }
 0x73c   :  { %3283 = vmatprep.subr.bf16.mxu0 %v7437_v50  ;;  %3326 = vmatprep.subr.bf16.mxu1 %v7440_v47 }
 0x73f   :  { %3284 = vmatpush1.bf16.msra.mxu0 %v7443_v9  ;;  %3327 = vmatpush1.bf16.msra.mxu1 %v7446_v49 }
 0x740   :  { %3285 = vmatprep.subr.bf16.mxu0 %v7449_v60  ;;  %3328 = vmatprep.subr.bf16.mxu1 %v7452_v56 }
 0x743   :  { %3286 = vmatpush1.bf16.msra.mxu0 %v7455_v4  ;;  %3329 = vmatpush1.bf16.msra.mxu1 %v7458_v54  ;;  %v8550_v54 = vld [vmem:[#allocation23_spill] sm:$0xff] }
 0x744   :  { %3414 = vmatprep.subr.bf16.mxu0 %v8466_v44  ;;  %3457 = vmatprep.subr.bf16.mxu1 %v8467_v16  ;;  %v8523_v44 = vld [vmem:[#allocation35_spill] sm:$0xff]  ;;  %v8524_v16 = vld [vmem:[#allocation36_spill] sm:$0xff] }
 0x746   :  { %3304 = vmatmul.mubr.bf16.vlgmr.msra.gmra.mrb[20].mxu0 %v7325_v29  ;;  %3347 = vmatmul.mubr.bf16.vlgmr.msra.gmra.mrb[20].mxu1 %v7325_v29  ;;  %v8529_v29 = vld [vmem:[#allocation41_spill] sm:$0xff] }
 0x747   :  { %3415 = vmatpush1.bf16.msra.mxu0 %v8468_v39  ;;  %3458 = vmatpush1.bf16.msra.mxu1 %v8519_v3  ;;  %v8527_v39 = vld [vmem:[#allocation39_spill] sm:$0xff]  ;;  %v8530_v3 = vld [vmem:[#allocation42_spill] sm:$0xff] }
 0x748   :  { %3416 = vmatprep.subr.bf16.mxu0 %v8520_v43  ;;  %3459 = vmatprep.subr.bf16.mxu1 %v8521_v53  ;;  %v8531_v43 = vld [vmem:[#allocation43_spill] sm:$0xff]  ;;  %v8532_v53 = vld [vmem:[#allocation44_spill] sm:$0xff] }
 0x749   :  { %3446 = vmatprep.mubr.bf16.mxu0 %v8301_v0  ;;  %3489 = vmatprep.mubr.bf16.mxu1 %v8301_v0 }
 0x74b   :  { %3417 = vmatpush1.bf16.msra.mxu0 %v8522_v31  ;;  %3460 = vmatpush1.bf16.msra.mxu1 %v8523_v44  ;;  %v8533_v31 = vld [vmem:[#allocation45_spill] sm:$0xff]  ;;  %v8534_v44 = vld [vmem:[#allocation46_spill] sm:$0xff] }
 0x74c   :  { %3418 = vmatprep.subr.bf16.mxu0 %v8524_v16  ;;  %3461 = vmatprep.subr.bf16.mxu1 %v8525_v10  ;;  %v8535_v16 = vld [vmem:[#allocation47_spill] sm:$0xff]  ;;  %v8536_v10 = vld [vmem:[#allocation48_spill] sm:$0xff] }
 0x74f   :  { %3419 = vmatpush1.bf16.msra.mxu0 %v8526_v28  ;;  %3462 = vmatpush1.bf16.msra.mxu1 %v8527_v39  ;;  %v8537_v28 = vld [vmem:[#allocation66_spill] sm:$0xff]  ;;  %v8538_v39 = vld [vmem:[#allocation67_spill] sm:$0xff] }
 0x750   :  { %3420 = vmatprep.subr.bf16.mxu0 %v8528_v25  ;;  %3463 = vmatprep.subr.bf16.mxu1 %v8529_v29  ;;  %v8539_v25 = vld [vmem:[#allocation68_spill] sm:$0xff]  ;;  %v8540_v29 = vld [vmem:[#allocation69_spill] sm:$0xff] }
 0x753   :  { %3421 = vmatpush1.bf16.msra.mxu0 %v8530_v3  ;;  %3464 = vmatpush1.bf16.msra.mxu1 %v8531_v43  ;;  %v8541_v3 = vld [vmem:[#allocation70_spill] sm:$0xff]  ;;  %v8542_v43 = vld [vmem:[#allocation71_spill] sm:$0xff] }
 0x754   :  { %3422 = vmatprep.subr.bf16.mxu0 %v8532_v53  ;;  %3465 = vmatprep.subr.bf16.mxu1 %v8533_v31  ;;  %v8543_v53 = vld [vmem:[#allocation72_spill] sm:$0xff]  ;;  %v8544_v31 = vld [vmem:[#allocation73_spill] sm:$0xff] }
 0x757   :  { %3423 = vmatpush1.bf16.msra.mxu0 %v8534_v44  ;;  %3466 = vmatpush1.bf16.msra.mxu1 %v8535_v16  ;;  %v8545_v44 = vld [vmem:[#allocation74_spill] sm:$0xff]  ;;  %v8546_v16 = vld [vmem:[#allocation75_spill] sm:$0xff] }
 0x758   :  { %3424 = vmatprep.subr.bf16.mxu0 %v8536_v10  ;;  %3467 = vmatprep.subr.bf16.mxu1 %v8537_v28  ;;  %v8547_v10 = vld [vmem:[#allocation76_spill] sm:$0xff]  ;;  %v8548_v28 = vld [vmem:[#allocation77_spill] sm:$0xff] }
 0x75b   :  { %3425 = vmatpush1.bf16.msra.mxu0 %v8538_v39  ;;  %3468 = vmatpush1.bf16.msra.mxu1 %v8539_v25  ;;  %v8549_v39 = vld [vmem:[#allocation78_spill] sm:$0xff] }
 0x75c   :  { %3426 = vmatprep.subr.bf16.mxu0 %v8540_v29  ;;  %3469 = vmatprep.subr.bf16.mxu1 %v8541_v3 }
 0x75f   :  { %3427 = vmatpush1.bf16.msra.mxu0 %v8542_v43  ;;  %3470 = vmatpush1.bf16.msra.mxu1 %v8543_v53 }
 0x760   :  { %3428 = vmatprep.subr.bf16.mxu0 %v8544_v31  ;;  %3471 = vmatprep.subr.bf16.mxu1 %v8545_v44 }
 0x763   :  { %3429 = vmatpush1.bf16.msra.mxu0 %v8546_v16  ;;  %3472 = vmatpush1.bf16.msra.mxu1 %v8547_v10 }
 0x764   :  { %3500 = vmatprep.subr.bf16.mxu0 %v8548_v28  ;;  %3543 = vmatprep.subr.bf16.mxu1 %v8549_v39 }
 0x7f9   :  { %v3143_v25 = vpop.f32.mrb[48].mxu0  ;;  %v3186_v29 = vpop.f32.mrb[48].mxu1 }
 0x7fa   :  { %v3195_v3 = vadd.f32 %v3143_v25, %v8550_v54  ;;  %v3145_v4 = vpop.f32.mrb[49].mxu0  ;;  %v3188_v43 = vpop.f32.mrb[49].mxu1 }
 0x7fb   :  { %v3196_v53 = vadd.f32 %v3145_v4, %v6655_v2  ;;  %v3147_v56 = vpop.f32.mrb[50].mxu0  ;;  %v3190_v31 = vpop.f32.mrb[50].mxu1  ;;  %v3198_v25 = vadd.f32 %v3188_v43, %v8445_v24  ;;  %v8551_v4 = vld [vmem:[#allocation25_spill] sm:$0xff] }
 0x7fc   :  { %v4661_v60 = vmul.f32 -1.442695, %v3195_v3  ;;  %v3199_v44 = vadd.f32 %v3147_v56, %v8550_v54  ;;  %v3149_v16 = vpop.f32.mrb[51].mxu0  ;;  %v3192_v49 = vpop.f32.mrb[51].mxu1  ;;  %v3197_v50 = vadd.f32 %v3186_v29, %v8551_v4 }
 0x7fd   :  { %v4663_v10 = vmul.f32 -1.442695, %v3196_v53  ;;  %v3200_v28 = vadd.f32 %v3149_v16, %v6655_v2  ;;  %v3202_v47 = vadd.f32 %v3192_v49, %v8445_v24  ;;  %v4665_v3 = vmul.f32 -1.442695, %v3198_v25 }
 0x7fe   :  { %5461 = vpow2.f32 %v4661_v60  ;;  %v4662_v39 = vmul.f32 -1.442695, %v3199_v44  ;;  %v3201_v60 = vadd.f32 %v3190_v31, %v8551_v4 }
 0x7ff   :  { %5463 = vpow2.f32 %v4663_v10  ;;  %v4664_v9 = vmul.f32 -1.442695, %v3200_v28  ;;  %v4666_v27 = vmul.f32 -1.442695, %v3202_v47 }
 0x800   :  { %5465 = vpow2.f32 %v4662_v39 }
 0x801   :  { %5467 = vpow2.f32 %v4664_v9 }
 0x802   :  { %5469 = vtanh.f32 %v3197_v50 }
 0x803   :  { %5471 = vpow2.f32 %v4665_v3 }
 0x804   :  { %5473 = vpow2.f32 %v4666_v27 }
 0x808   :  { %v5462_v56 = vpop.eup %5461 }
 0x809   :  { %v5464_v54 = vpop.eup %5463  ;;  %v3209_v53 = vadd.f32 1.0, %v5462_v56 }
 0x80a   :  { %v3221_v44 = vadd.f32 1.0, %v5464_v54  ;;  %v5466_v16 = vpop.eup %5465 }
 0x80b   :  { %5475 = vrcp.f32 %v3209_v53  ;;  %v3210_v43 = vadd.f32 1.0, %v5466_v16  ;;  %v5468_v10 = vpop.eup %5467 }
 0x80c   :  { %5477 = vrcp.f32 %v3221_v44  ;;  %v3222_v9 = vadd.f32 1.0, %v5468_v10  ;;  %v5470_v49 = vpop.eup %5469 }
 0x80d   :  { %5479 = vtanh.f32 %v3201_v60  ;;  %v5472_v47 = vpop.eup %5471 }
 0x80e   :  { %5481 = vrcp.f32 %v3210_v43  ;;  %v5474_v29 = vpop.eup %5473  ;;  %v3235_v54 = vadd.f32 1.0, %v5472_v47 }
 0x80f   :  { %5483 = vrcp.f32 %v3222_v9  ;;  %v3236_v3 = vadd.f32 1.0, %v5474_v29 }
 0x810   :  { %5485 = vrcp.f32 %v3235_v54 }
 0x811   :  { %5487 = vrcp.f32 %v3236_v3 }
 0x815   :  { %v5476_v50 = vpop.eup %5475 }
 0x816   :  { %v5478_v28 = vpop.eup %5477  ;;  %v3243_v39 = vmul.f32 %v5476_v50, %v5470_v49 }
 0x817   :  { %v5480_v25 = vpop.eup %5479  ;;  %v3241_v31 = vmul.f32 %v5478_v28, %v7299_v35 }
 0x818   :  { %v5482_v27 = vpop.eup %5481 }
 0x819   :  { %v7508_v56 = vadd.f32 %v3243_v39, %v3241_v31  ;;  %v3244_v53 = vmul.f32 %v5482_v27, %v5480_v25  ;;  %v3305_v44 = vpop.f32.mrb[20].mxu0  ;;  %v3348_v60 = vpop.f32.mrb[20].mxu1 }
 0x81a   :  { %v5484_v16 = vpop.eup %5483  ;;  %v4787_v43 = vadd.f32 %v3305_v44, %v8398_v48  ;;  %v3307_v10 = vpop.f32.mrb[21].mxu0 }
 0x81b   :  { %v3350_v9 = vpop.f32.mrb[21].mxu1  ;;  %v3242_v4 = vmul.f32 %v5484_v16, %v7306_v6  ;;  %v4788_v49 = vadd.f32 %v3307_v10, %v8399_v37  ;;  %v3309_v50 = vpop.f32.mrb[22].mxu0  ;;  %5489 = vtanh.f32 %v7508_v56  ;;  %v4819_v16 = vadd.f32 %v3348_v60, %v8349_v59 }
 0x81c   :  { %v3352_v35 = vpop.f32.mrb[22].mxu1  ;;  %v4669_v47 = vmul.f32 -1.442695, %v4787_v43  ;;  %v4789_v29 = vadd.f32 %v3309_v50, %v8398_v48  ;;  %v3311_v28 = vpop.f32.mrb[23].mxu0  ;;  %v4820_v3 = vadd.f32 %v3350_v9, %v6462_v23 }
 0x81d   :  { %v3354_v39 = vpop.f32.mrb[23].mxu1  ;;  %v7515_v25 = vadd.f32 %v3244_v53, %v3242_v4  ;;  %v4671_v31 = vmul.f32 -1.442695, %v4788_v49  ;;  %v4790_v27 = vadd.f32 %v3311_v28, %v8399_v37  ;;  %v5486_v44 = vpop.eup %5485  ;;  %v4821_v50 = vadd.f32 %v3352_v35, %v8349_v59 }
 0x81e   :  { %5491 = vpow2.f32 %v4669_v47  ;;  %v4670_v54 = vmul.f32 -1.442695, %v4789_v29  ;;  %v5488_v43 = vpop.eup %5487  ;;  %v4673_v10 = vmul.f32 -1.442695, %v4820_v3  ;;  %v4822_v4 = vadd.f32 %v3354_v39, %v6462_v23 }
 0x81f   :  { %5493 = vtanh.f32 %v7515_v25  ;;  %v4672_v6 = vmul.f32 -1.442695, %v4790_v27 }
 0x820   :  { %5495 = vpow2.f32 %v4671_v31  ;;  %v4674_v31 = vmul.f32 -1.442695, %v4822_v4 }
 0x821   :  { %5497 = vpow2.f32 %v4670_v54 }
 0x822   :  { %5499 = vpow2.f32 %v4672_v6 }
 0x823   :  { %5501 = vtanh.f32 %v4819_v16 }
 0x824   :  { %5503 = vpow2.f32 %v4673_v10 }
 0x825   :  { %v5490_v53 = vpop.eup %5489 }
 0x826   :  { %v3249_v9 = vmul.f32 %v5490_v53, %v5486_v44 }
 0x828   :  { %v5492_v49 = vpop.eup %5491 }
 0x829   :  { %v5494_v47 = vpop.eup %5493  ;;  %v3371_v29 = vadd.f32 1.0, %v5492_v49 }
 0x82a   :  { %v5496_v28 = vpop.eup %5495  ;;  %v3250_v27 = vmul.f32 %v5494_v47, %v5488_v43 }
 0x82b   :  { %5505 = vrcp.f32 %v3371_v29  ;;  %v3383_v54 = vadd.f32 1.0, %v5496_v28  ;;  %v5498_v6 = vpop.eup %5497 }
 0x82c   :  { %5507 = vtanh.f32 %v4821_v50  ;;  %v7523_v60 = vpack.c.bf16 %v3250_v27, %v3249_v9  ;;  %v3372_v39 = vadd.f32 1.0, %v5498_v6  ;;  %v5500_v3 = vpop.eup %5499 }
 0x82d   :  { %5509 = vrcp.f32 %v3383_v54  ;;  %v3384_v35 = vadd.f32 1.0, %v5500_v3  ;;  %v5502_v16 = vpop.eup %5501 }
 0x82e   :  { %5511 = vpow2.f32 %v4674_v31  ;;  %4751 = vst [vmem:[#allocation17 + $0x20] sm:$0xff] %v7523_v60   ;;  %v5504_v10 = vpop.eup %5503 }
 0x82f   :  { %5513 = vrcp.f32 %v3372_v39  ;;  %v3397_v29 = vadd.f32 1.0, %v5504_v10 }
 0x830   :  { %5515 = vrcp.f32 %v3384_v35 }
 0x831   :  { %5517 = vrcp.f32 %v3397_v29  ;;  %v7561_v29 = vld [vmem:[#allocation13 + $0x4c] ss:$16 sps:$4 sm:$0xff]  }
 0x835   :  { %v5506_v4 = vpop.eup %5505 }
 0x836   :  { %v5508_v44 = vpop.eup %5507  ;;  %v3405_v43 = vmul.f32 %v5506_v4, %v5502_v16 }
 0x837   :  { %v5510_v53 = vpop.eup %5509 }
 0x838   :  { %v5512_v49 = vpop.eup %5511  ;;  %v3403_v50 = vmul.f32 %v5510_v53, %v7318_v21  ;;  %v7547_v53 = vld [vmem:[#allocation13 + $0x2c] ss:$16 sps:$4 sm:$0xff]  }
 0x839   :  { %v5514_v47 = vpop.eup %5513  ;;  %v3398_v27 = vadd.f32 1.0, %v5512_v49  ;;  %v7552_v49 = vld [vmem:[#allocation13 + $0x20] ss:$16 sps:$4 sm:$0xff]  }
 0x83a   :  { %v7527_v28 = vadd.f32 %v3405_v43, %v3403_v50  ;;  %v3406_v9 = vmul.f32 %v5514_v47, %v5508_v44  ;;  %v5516_v31 = vpop.eup %5515  ;;  %v7541_v44 = vld [vmem:[#allocation13 + $0x8] ss:$16 sps:$4 sm:$0xff]   ;;  %v7544_v43 = vld [vmem:[#allocation13 + $0x24] ss:$16 sps:$4 sm:$0xff]  }
 0x83b   :  { %v3404_v54 = vmul.f32 %v5516_v31, %v7322_v57  ;;  %v5518_v39 = vpop.eup %5517  ;;  %v7538_v57 = vld [vmem:[#allocation13] ss:$16 sps:$4 sm:$0xff]   ;;  %v7555_v50 = vld [vmem:[#allocation13 + $0x28] ss:$16 sps:$4 sm:$0xff]   ;;  %v7558_v47 = vld [vmem:[#allocation13 + $0x44] ss:$16 sps:$4 sm:$0xff]  }
 0x83c   :  { %5519 = vtanh.f32 %v7527_v28  ;;  %v7567_v31 = vld [vmem:[#allocation13 + $0x48] ss:$16 sps:$4 sm:$0xff]  }
 0x83d   :  { %v7531_v6 = vadd.f32 %v3406_v9, %v3404_v54  ;;  %5521 = vrcp.f32 %v3398_v27  ;;  %v7564_v9 = vld [vmem:[#allocation13 + $0x40] ss:$16 sps:$4 sm:$0xff]   ;;  %v7570_v27 = vld [vmem:[#allocation13 + $0x64] ss:$16 sps:$4 sm:$0xff]   ;;  %v7573_v54 = vld [vmem:[#allocation13 + $0x6c] ss:$16 sps:$4 sm:$0xff]  }
 0x83f   :  { %5523 = vtanh.f32 %v7531_v6 }
 0x846   :  { %v5520_v3 = vpop.eup %5519 }
 0x847   :  { %v5522_v21 = vpop.eup %5521  ;;  %v3411_v16 = vmul.f32 %v5520_v3, %v5518_v39  ;;  %v7576_v39 = vld [vmem:[#allocation13 + $0x60] ss:$16 sps:$4 sm:$0xff]   ;;  %v7579_v3 = vld [vmem:[#allocation13 + $0x68] ss:$16 sps:$4 sm:$0xff]  }
 0x848   :  { %8552 = vst [vmem:[#allocation54_spill] sm:$0xff] %v7576_v39  ;;  %8553 = vst [vmem:[#allocation55_spill] sm:$0xff] %v7579_v3 }
 0x849   :  { %v5524_v35 = vpop.eup %5523 }
 0x84a   :  { %v3412_v10 = vmul.f32 %v5524_v35, %v5522_v21  ;;  %v7582_v21 = vld [vmem:[#allocation13 + $0x84] ss:$16 sps:$4 sm:$0xff]   ;;  %v7585_v35 = vld [vmem:[#allocation13 + $0x8c] ss:$16 sps:$4 sm:$0xff]  }
 0x84c   :  { %v7534_v4 = vpack.c.bf16 %v3412_v10, %v3411_v16  ;;  %v7588_v16 = vld [vmem:[#allocation13 + $0x80] ss:$16 sps:$4 sm:$0xff]   ;;  %v7591_v10 = vld [vmem:[#allocation13 + $0x88] ss:$16 sps:$4 sm:$0xff]  }
 0x84e   :  { %3447 = vmatmul.mubr.bf16.vlgmr.msra.gmra.mrb[52].mxu0 %v7534_v4  ;;  %3490 = vmatmul.mubr.bf16.vlgmr.msra.gmra.mrb[52].mxu1 %v7534_v4 }
 0x84f   :  { %3501 = vmatpush1.bf16.msra.mxu0 %v7538_v57  ;;  %3544 = vmatpush1.bf16.msra.mxu1 %v7541_v44 }
 0x850   :  { %3502 = vmatprep.subr.bf16.mxu0 %v7544_v43  ;;  %3545 = vmatprep.subr.bf16.mxu1 %v7547_v53 }
 0x851   :  { %3532 = vmatprep.mubr.bf16.mxu0 %v8301_v0  ;;  %3575 = vmatprep.mubr.bf16.mxu1 %v8301_v0 }
 0x853   :  { %3503 = vmatpush1.bf16.msra.mxu0 %v7552_v49  ;;  %3546 = vmatpush1.bf16.msra.mxu1 %v7555_v50 }
 0x854   :  { %3504 = vmatprep.subr.bf16.mxu0 %v7558_v47  ;;  %3547 = vmatprep.subr.bf16.mxu1 %v7561_v29 }
 0x857   :  { %3505 = vmatpush1.bf16.msra.mxu0 %v7564_v9  ;;  %3548 = vmatpush1.bf16.msra.mxu1 %v7567_v31 }
 0x858   :  { %3506 = vmatprep.subr.bf16.mxu0 %v7570_v27  ;;  %3549 = vmatprep.subr.bf16.mxu1 %v7573_v54 }
 0x85b   :  { %3507 = vmatpush1.bf16.msra.mxu0 %v7576_v39  ;;  %3550 = vmatpush1.bf16.msra.mxu1 %v7579_v3  ;;  %v7594_v39 = vld [vmem:[#allocation13 + $0xa4] ss:$16 sps:$4 sm:$0xff]   ;;  %v7597_v3 = vld [vmem:[#allocation13 + $0xac] ss:$16 sps:$4 sm:$0xff]  }
 0x85c   :  { %3508 = vmatprep.subr.bf16.mxu0 %v7582_v21  ;;  %3551 = vmatprep.subr.bf16.mxu1 %v7585_v35 }
 0x85f   :  { %3509 = vmatpush1.bf16.msra.mxu0 %v7588_v16  ;;  %3552 = vmatpush1.bf16.msra.mxu1 %v7591_v10 }
 0x860   :  { %3510 = vmatprep.subr.bf16.mxu0 %v7594_v39  ;;  %3553 = vmatprep.subr.bf16.mxu1 %v7597_v3 }
 0x863   :  { %3511 = vmatpush1.bf16.msra.mxu0 %v7186_v52  ;;  %3554 = vmatpush1.bf16.msra.mxu1 %v7189_v20  ;;  %v8554_v52 = vld [vmem:[#allocation31_spill] sm:$0xff]  ;;  %v8555_v20 = vld [vmem:[#allocation32_spill] sm:$0xff] }
 0x864   :  { %3512 = vmatprep.subr.bf16.mxu0 %v7192_v7  ;;  %3555 = vmatprep.subr.bf16.mxu1 %v7195_v1  ;;  %v8556_v7 = vld [vmem:[#allocation33_spill] sm:$0xff]  ;;  %v8557_v1 = vld [vmem:[#allocation34_spill] sm:$0xff] }
 0x867   :  { %3513 = vmatpush1.bf16.msra.mxu0 %v7198_v26  ;;  %3556 = vmatpush1.bf16.msra.mxu1 %v7201_v22  ;;  %v8558_v26 = vld [vmem:[#allocation49_spill] sm:$0xff]  ;;  %v8559_v22 = vld [vmem:[#allocation50_spill] sm:$0xff] }
 0x868   :  { %3514 = vmatprep.subr.bf16.mxu0 %v7204_v8  ;;  %3557 = vmatprep.subr.bf16.mxu1 %v7207_v32  ;;  %v8560_v8 = vld [vmem:[#allocation51_spill] sm:$0xff]  ;;  %v8561_v32 = vld [vmem:[#allocation52_spill] sm:$0xff] }
 0x86b   :  { %3515 = vmatpush1.bf16.msra.mxu0 %v7210_v30  ;;  %3558 = vmatpush1.bf16.msra.mxu1 %v7213_v38  ;;  %v8562_v30 = vld [vmem:[#allocation53_spill] sm:$0xff]  ;;  %v7646_v38 = vld [vmem:[#allocation11 + $0x4] ss:$16 sps:$4 sm:$0xff]  }
 0x86c   :  { %3662 = vmatprep.subr.bf16.mxu0 %v7361_v55  ;;  %3705 = vmatprep.subr.bf16.mxu1 %v7364_v17  ;;  %8563 = vst [vmem:[#allocation56_spill] sm:$0xff] %v7646_v38 }
 0x86e   :  { %3533 = vmatmul.mubr.bf16.vlgmr.msra.gmra.mrb[52].mxu0 %v7523_v60  ;;  %3576 = vmatmul.mubr.bf16.vlgmr.msra.gmra.mrb[52].mxu1 %v7523_v60  ;;  %v7649_v60 = vld [vmem:[#allocation11 + $0xc] ss:$16 sps:$4 sm:$0xff]  }
 0x86f   :  { %3663 = vmatpush1.bf16.msra.mxu0 %v7369_v46  ;;  %3706 = vmatpush1.bf16.msra.mxu1 %v7372_v40  ;;  %8564 = vst [vmem:[#allocation59_spill] sm:$0xff] %v7649_v60 }
 0x870   :  { %3664 = vmatprep.subr.bf16.mxu0 %v7375_v11  ;;  %3707 = vmatprep.subr.bf16.mxu1 %v7378_v15 }
 0x871   :  { %3694 = vmatprep.mubr.bf16.mxu0 %v8301_v0  ;;  %3737 = vmatprep.mubr.bf16.mxu1 %v8301_v0 }
 0x873   :  { %3665 = vmatpush1.bf16.msra.mxu0 %v7383_v13  ;;  %3708 = vmatpush1.bf16.msra.mxu1 %v7386_v14 }
 0x874   :  { %3666 = vmatprep.subr.bf16.mxu0 %v7389_v12  ;;  %3709 = vmatprep.subr.bf16.mxu1 %v7392_v45 }
 0x877   :  { %3667 = vmatpush1.bf16.msra.mxu0 %v7395_v34  ;;  %3710 = vmatpush1.bf16.msra.mxu1 %v7398_v33 }
 0x878   :  { %3668 = vmatprep.subr.bf16.mxu0 %v7401_v18  ;;  %3711 = vmatprep.subr.bf16.mxu1 %v7404_v36 }
 0x87b   :  { %3669 = vmatpush1.bf16.msra.mxu0 %v7407_v58  ;;  %3712 = vmatpush1.bf16.msra.mxu1 %v7410_v51 }
 0x87c   :  { %3670 = vmatprep.subr.bf16.mxu0 %v7413_v42  ;;  %3713 = vmatprep.subr.bf16.mxu1 %v7416_v41 }
 0x87f   :  { %3671 = vmatpush1.bf16.msra.mxu0 %v7419_v19  ;;  %3714 = vmatpush1.bf16.msra.mxu1 %v7422_v5 }
 0x880   :  { %3672 = vmatprep.subr.bf16.mxu0 %v7425_v62  ;;  %3715 = vmatprep.subr.bf16.mxu1 %v7428_v63 }
 0x883   :  { %3673 = vmatpush1.bf16.msra.mxu0 %v7431_v61  ;;  %3716 = vmatpush1.bf16.msra.mxu1 %v8554_v52 }
 0x884   :  { %3674 = vmatprep.subr.bf16.mxu0 %v8555_v20  ;;  %3717 = vmatprep.subr.bf16.mxu1 %v8556_v7 }
 0x887   :  { %3675 = vmatpush1.bf16.msra.mxu0 %v8557_v1  ;;  %3718 = vmatpush1.bf16.msra.mxu1 %v8558_v26  ;;  %v7654_v26 = vld [vmem:[#allocation11] ss:$16 sps:$4 sm:$0xff]  }
 0x888   :  { %3676 = vmatprep.subr.bf16.mxu0 %v8559_v22  ;;  %3719 = vmatprep.subr.bf16.mxu1 %v8560_v8  ;;  %8565 = vst [vmem:[#allocation60_spill] sm:$0xff] %v7654_v26  ;;  %v7657_v8 = vld [vmem:[#allocation11 + $0x8] ss:$16 sps:$4 sm:$0xff]  }
 0x889   :  { %8566 = vst [vmem:[#allocation61_spill] sm:$0xff] %v7657_v8  ;;  %v8597_v22 = vld [vmem:[#allocation23_spill] sm:$0xff] }
 0x88b   :  { %3677 = vmatpush1.bf16.msra.mxu0 %v8561_v32  ;;  %3720 = vmatpush1.bf16.msra.mxu1 %v8562_v30  ;;  %v7660_v30 = vld [vmem:[#allocation11 + $0x24] ss:$16 sps:$4 sm:$0xff]  }
 0x88c   :  { %3805 = vmatprep.subr.bf16.mxu0 %v7646_v38  ;;  %3848 = vmatprep.subr.bf16.mxu1 %v7649_v60  ;;  %8567 = vst [vmem:[#allocation62_spill] sm:$0xff] %v7660_v30  ;;  %v7663_v38 = vld [vmem:[#allocation11 + $0x2c] ss:$16 sps:$4 sm:$0xff]   ;;  %v7683_v60 = vld [vmem:[#allocation11 + $0x48] ss:$16 sps:$4 sm:$0xff]  }
 0x88d   :  { %8568 = vst [vmem:[#allocation63_spill] sm:$0xff] %v7663_v38  ;;  %8574 = vst [vmem:[#allocation38_spill] sm:$0xff] %v7683_v60 }
 0x88e   :  { %3695 = vmatmul.mubr.bf16.vlgmr.msra.gmra.mrb[24].mxu0 %v7534_v4  ;;  %3738 = vmatmul.mubr.bf16.vlgmr.msra.gmra.mrb[24].mxu1 %v7534_v4  ;;  %v7668_v4 = vld [vmem:[#allocation11 + $0x20] ss:$16 sps:$4 sm:$0xff]  }
 0x88f   :  { %3806 = vmatpush1.bf16.msra.mxu0 %v7654_v26  ;;  %3849 = vmatpush1.bf16.msra.mxu1 %v7657_v8  ;;  %8569 = vst [vmem:[#allocation64_spill] sm:$0xff] %v7668_v4  ;;  %v7671_v26 = vld [vmem:[#allocation11 + $0x28] ss:$16 sps:$4 sm:$0xff]   ;;  %v7674_v8 = vld [vmem:[#allocation11 + $0x44] ss:$16 sps:$4 sm:$0xff]  }
 0x890   :  { %3807 = vmatprep.subr.bf16.mxu0 %v7660_v30  ;;  %3850 = vmatprep.subr.bf16.mxu1 %v7663_v38  ;;  %8570 = vst [vmem:[#allocation65_spill] sm:$0xff] %v7671_v26  ;;  %8571 = vst [vmem:[#allocation35_spill] sm:$0xff] %v7674_v8  ;;  %v7677_v30 = vld [vmem:[#allocation11 + $0x4c] ss:$16 sps:$4 sm:$0xff]   ;;  %v7680_v38 = vld [vmem:[#allocation11 + $0x40] ss:$16 sps:$4 sm:$0xff]  }
 0x891   :  { %3837 = vmatprep.mubr.bf16.mxu0 %v8301_v0  ;;  %3880 = vmatprep.mubr.bf16.mxu1 %v8301_v0  ;;  %8572 = vst [vmem:[#allocation36_spill] sm:$0xff] %v7677_v30  ;;  %8573 = vst [vmem:[#allocation37_spill] sm:$0xff] %v7680_v38 }
 0x893   :  { %3808 = vmatpush1.bf16.msra.mxu0 %v7668_v4  ;;  %3851 = vmatpush1.bf16.msra.mxu1 %v7671_v26  ;;  %v7686_v4 = vld [vmem:[#allocation11 + $0x64] ss:$16 sps:$4 sm:$0xff]   ;;  %v7689_v26 = vld [vmem:[#allocation11 + $0x6c] ss:$16 sps:$4 sm:$0xff]  }
 0x894   :  { %3809 = vmatprep.subr.bf16.mxu0 %v7674_v8  ;;  %3852 = vmatprep.subr.bf16.mxu1 %v7677_v30  ;;  %8575 = vst [vmem:[#allocation39_spill] sm:$0xff] %v7686_v4  ;;  %8576 = vst [vmem:[#allocation40_spill] sm:$0xff] %v7689_v26  ;;  %v7692_v8 = vld [vmem:[#allocation11 + $0x60] ss:$16 sps:$4 sm:$0xff]   ;;  %v7695_v30 = vld [vmem:[#allocation11 + $0x68] ss:$16 sps:$4 sm:$0xff]  }
 0x895   :  { %8577 = vst [vmem:[#allocation41_spill] sm:$0xff] %v7692_v8  ;;  %8578 = vst [vmem:[#allocation42_spill] sm:$0xff] %v7695_v30 }
 0x897   :  { %3810 = vmatpush1.bf16.msra.mxu0 %v7680_v38  ;;  %3853 = vmatpush1.bf16.msra.mxu1 %v7683_v60  ;;  %v7698_v38 = vld [vmem:[#allocation11 + $0x84] ss:$16 sps:$4 sm:$0xff]   ;;  %v7701_v60 = vld [vmem:[#allocation11 + $0x8c] ss:$16 sps:$4 sm:$0xff]  }
 0x898   :  { %3811 = vmatprep.subr.bf16.mxu0 %v7686_v4  ;;  %3854 = vmatprep.subr.bf16.mxu1 %v7689_v26  ;;  %8579 = vst [vmem:[#allocation43_spill] sm:$0xff] %v7698_v38  ;;  %8580 = vst [vmem:[#allocation44_spill] sm:$0xff] %v7701_v60  ;;  %v7704_v4 = vld [vmem:[#allocation11 + $0x80] ss:$16 sps:$4 sm:$0xff]   ;;  %v7707_v26 = vld [vmem:[#allocation11 + $0x88] ss:$16 sps:$4 sm:$0xff]  }
 0x899   :  { %8581 = vst [vmem:[#allocation45_spill] sm:$0xff] %v7704_v4  ;;  %8582 = vst [vmem:[#allocation46_spill] sm:$0xff] %v7707_v26 }
 0x89b   :  { %3812 = vmatpush1.bf16.msra.mxu0 %v7692_v8  ;;  %3855 = vmatpush1.bf16.msra.mxu1 %v7695_v30  ;;  %v7710_v8 = vld [vmem:[#allocation11 + $0xa4] ss:$16 sps:$4 sm:$0xff]   ;;  %v7713_v30 = vld [vmem:[#allocation11 + $0xac] ss:$16 sps:$4 sm:$0xff]  }
 0x89c   :  { %3813 = vmatprep.subr.bf16.mxu0 %v7698_v38  ;;  %3856 = vmatprep.subr.bf16.mxu1 %v7701_v60  ;;  %8583 = vst [vmem:[#allocation47_spill] sm:$0xff] %v7710_v8  ;;  %8584 = vst [vmem:[#allocation48_spill] sm:$0xff] %v7713_v30  ;;  %v7716_v38 = vld [vmem:[#allocation11 + $0xa0] ss:$16 sps:$4 sm:$0xff]   ;;  %v7719_v60 = vld [vmem:[#allocation11 + $0xa8] ss:$16 sps:$4 sm:$0xff]  }
 0x89d   :  { %8585 = vst [vmem:[#allocation66_spill] sm:$0xff] %v7716_v38  ;;  %8586 = vst [vmem:[#allocation67_spill] sm:$0xff] %v7719_v60 }
 0x89f   :  { %3814 = vmatpush1.bf16.msra.mxu0 %v7704_v4  ;;  %3857 = vmatpush1.bf16.msra.mxu1 %v7707_v26  ;;  %v7722_v4 = vld [vmem:[#allocation11 + $0xc4] ss:$16 sps:$4 sm:$0xff]   ;;  %v7725_v26 = vld [vmem:[#allocation11 + $0xcc] ss:$16 sps:$4 sm:$0xff]  }
 0x8a0   :  { %3815 = vmatprep.subr.bf16.mxu0 %v7710_v8  ;;  %3858 = vmatprep.subr.bf16.mxu1 %v7713_v30  ;;  %8587 = vst [vmem:[#allocation68_spill] sm:$0xff] %v7722_v4  ;;  %8588 = vst [vmem:[#allocation69_spill] sm:$0xff] %v7725_v26  ;;  %v7728_v8 = vld [vmem:[#allocation11 + $0xc0] ss:$16 sps:$4 sm:$0xff]   ;;  %v7731_v30 = vld [vmem:[#allocation11 + $0xc8] ss:$16 sps:$4 sm:$0xff]  }
 0x8a1   :  { %8589 = vst [vmem:[#allocation70_spill] sm:$0xff] %v7728_v8  ;;  %8590 = vst [vmem:[#allocation71_spill] sm:$0xff] %v7731_v30 }
 0x8a3   :  { %3816 = vmatpush1.bf16.msra.mxu0 %v7716_v38  ;;  %3859 = vmatpush1.bf16.msra.mxu1 %v7719_v60  ;;  %v7734_v38 = vld [vmem:[#allocation11 + $0xe4] ss:$16 sps:$4 sm:$0xff]   ;;  %v7737_v60 = vld [vmem:[#allocation11 + $0xec] ss:$16 sps:$4 sm:$0xff]  }
 0x8a4   :  { %3817 = vmatprep.subr.bf16.mxu0 %v7722_v4  ;;  %3860 = vmatprep.subr.bf16.mxu1 %v7725_v26  ;;  %8591 = vst [vmem:[#allocation72_spill] sm:$0xff] %v7734_v38  ;;  %8592 = vst [vmem:[#allocation73_spill] sm:$0xff] %v7737_v60  ;;  %v7740_v4 = vld [vmem:[#allocation11 + $0xe0] ss:$16 sps:$4 sm:$0xff]   ;;  %v7743_v26 = vld [vmem:[#allocation11 + $0xe8] ss:$16 sps:$4 sm:$0xff]  }
 0x8a5   :  { %8593 = vst [vmem:[#allocation74_spill] sm:$0xff] %v7740_v4  ;;  %8594 = vst [vmem:[#allocation75_spill] sm:$0xff] %v7743_v26 }
 0x8a7   :  { %3818 = vmatpush1.bf16.msra.mxu0 %v7728_v8  ;;  %3861 = vmatpush1.bf16.msra.mxu1 %v7731_v30  ;;  %v7746_v8 = vld [vmem:[#allocation13 + $0x4] ss:$16 sps:$4 sm:$0xff]   ;;  %v7749_v30 = vld [vmem:[#allocation13 + $0xc] ss:$16 sps:$4 sm:$0xff]  }
 0x8a8   :  { %3819 = vmatprep.subr.bf16.mxu0 %v7734_v38  ;;  %3862 = vmatprep.subr.bf16.mxu1 %v7737_v60  ;;  %8595 = vst [vmem:[#allocation76_spill] sm:$0xff] %v7746_v8  ;;  %8596 = vst [vmem:[#allocation77_spill] sm:$0xff] %v7749_v30 }
 0x8ab   :  { %3820 = vmatpush1.bf16.msra.mxu0 %v7740_v4  ;;  %3863 = vmatpush1.bf16.msra.mxu1 %v7743_v26 }
 0x8ac   :  { %3891 = vmatprep.subr.bf16.mxu0 %v7746_v8  ;;  %3934 = vmatprep.subr.bf16.mxu1 %v7749_v30 }
 0x941   :  { %v3534_v38 = vpop.f32.mrb[52].mxu0  ;;  %v3577_v32 = vpop.f32.mrb[52].mxu1 }
 0x942   :  { %v3586_v60 = vadd.f32 %v3534_v38, %v8597_v22  ;;  %v3536_v1 = vpop.f32.mrb[53].mxu0  ;;  %v3579_v7 = vpop.f32.mrb[53].mxu1 }
 0x943   :  { %v3587_v4 = vadd.f32 %v3536_v1, %v6655_v2  ;;  %v3538_v20 = vpop.f32.mrb[54].mxu0  ;;  %v3581_v52 = vpop.f32.mrb[54].mxu1  ;;  %v3589_v38 = vadd.f32 %v3579_v7, %v8445_v24  ;;  %v8598_v1 = vld [vmem:[#allocation25_spill] sm:$0xff] }
 0x944   :  { %v4675_v61 = vmul.f32 -1.442695, %v3586_v60  ;;  %v3590_v26 = vadd.f32 %v3538_v20, %v8597_v22  ;;  %v3540_v63 = vpop.f32.mrb[55].mxu0  ;;  %v3583_v62 = vpop.f32.mrb[55].mxu1  ;;  %v3588_v42 = vadd.f32 %v3577_v32, %v8598_v1 }
 0x945   :  { %v4677_v8 = vmul.f32 -1.442695, %v3587_v4  ;;  %v3591_v5 = vadd.f32 %v3540_v63, %v6655_v2  ;;  %v3593_v41 = vadd.f32 %v3583_v62, %v8445_v24  ;;  %v4679_v60 = vmul.f32 -1.442695, %v3589_v38 }
 0x946   :  { %5525 = vpow2.f32 %v4675_v61  ;;  %v4676_v30 = vmul.f32 -1.442695, %v3590_v26  ;;  %v3592_v63 = vadd.f32 %v3581_v52, %v8598_v1 }
 0x947   :  { %5527 = vpow2.f32 %v4677_v8  ;;  %v4678_v19 = vmul.f32 -1.442695, %v3591_v5  ;;  %v4680_v51 = vmul.f32 -1.442695, %v3593_v41 }
 0x948   :  { %5529 = vpow2.f32 %v4676_v30 }
 0x949   :  { %5531 = vpow2.f32 %v4678_v19 }
 0x94a   :  { %5533 = vtanh.f32 %v3588_v42 }
 0x94b   :  { %5535 = vpow2.f32 %v4679_v60 }
 0x94c   :  { %5537 = vpow2.f32 %v4680_v51 }
 0x950   :  { %v5526_v20 = vpop.eup %5525 }
 0x951   :  { %v5528_v22 = vpop.eup %5527  ;;  %v3600_v4 = vadd.f32 1.0, %v5526_v20 }
 0x952   :  { %v3612_v61 = vadd.f32 1.0, %v5528_v22  ;;  %v5530_v5 = vpop.eup %5529 }
 0x953   :  { %5539 = vrcp.f32 %v3600_v4  ;;  %v3601_v7 = vadd.f32 1.0, %v5530_v5  ;;  %v5532_v26 = vpop.eup %5531 }
 0x954   :  { %5541 = vrcp.f32 %v3612_v61  ;;  %v3613_v19 = vadd.f32 1.0, %v5532_v26  ;;  %v5534_v62 = vpop.eup %5533 }
 0x955   :  { %5543 = vtanh.f32 %v3592_v63  ;;  %v5536_v41 = vpop.eup %5535 }
 0x956   :  { %5545 = vrcp.f32 %v3601_v7  ;;  %v5538_v8 = vpop.eup %5537  ;;  %v3626_v22 = vadd.f32 1.0, %v5536_v41 }
 0x957   :  { %5547 = vrcp.f32 %v3613_v19  ;;  %v3627_v60 = vadd.f32 1.0, %v5538_v8 }
 0x958   :  { %5549 = vrcp.f32 %v3626_v22 }
 0x959   :  { %5551 = vrcp.f32 %v3627_v60 }
 0x95d   :  { %v5540_v42 = vpop.eup %5539 }
 0x95e   :  { %v5542_v32 = vpop.eup %5541  ;;  %v3634_v30 = vmul.f32 %v5540_v42, %v5534_v62 }
 0x95f   :  { %v5544_v38 = vpop.eup %5543  ;;  %v3632_v52 = vmul.f32 %v5542_v32, %v7508_v56 }
 0x960   :  { %v5546_v51 = vpop.eup %5545 }
 0x961   :  { %v7761_v20 = vadd.f32 %v3634_v30, %v3632_v52  ;;  %v3635_v4 = vmul.f32 %v5546_v51, %v5544_v38  ;;  %v3696_v61 = vpop.f32.mrb[24].mxu0  ;;  %v3739_v63 = vpop.f32.mrb[24].mxu1 }
 0x962   :  { %v5548_v5 = vpop.eup %5547  ;;  %v4791_v7 = vadd.f32 %v3696_v61, %v8398_v48  ;;  %v3698_v26 = vpop.f32.mrb[25].mxu0 }
 0x963   :  { %v3741_v19 = vpop.f32.mrb[25].mxu1  ;;  %v3633_v1 = vmul.f32 %v5548_v5, %v7515_v25  ;;  %v4792_v62 = vadd.f32 %v3698_v26, %v8399_v37  ;;  %v3700_v42 = vpop.f32.mrb[26].mxu0  ;;  %5553 = vtanh.f32 %v7761_v20  ;;  %v4823_v5 = vadd.f32 %v3739_v63, %v8349_v59 }
 0x964   :  { %v3743_v56 = vpop.f32.mrb[26].mxu1  ;;  %v4683_v41 = vmul.f32 -1.442695, %v4791_v7  ;;  %v4793_v8 = vadd.f32 %v3700_v42, %v8398_v48  ;;  %v3702_v32 = vpop.f32.mrb[27].mxu0  ;;  %v4824_v60 = vadd.f32 %v3741_v19, %v6462_v23 }
 0x965   :  { %v3745_v30 = vpop.f32.mrb[27].mxu1  ;;  %v7768_v38 = vadd.f32 %v3635_v4, %v3633_v1  ;;  %v4685_v52 = vmul.f32 -1.442695, %v4792_v62  ;;  %v4794_v51 = vadd.f32 %v3702_v32, %v8399_v37  ;;  %v5550_v61 = vpop.eup %5549  ;;  %v4825_v42 = vadd.f32 %v3743_v56, %v8349_v59 }
 0x966   :  { %5555 = vpow2.f32 %v4683_v41  ;;  %v4684_v22 = vmul.f32 -1.442695, %v4793_v8  ;;  %v5552_v7 = vpop.eup %5551  ;;  %v4687_v26 = vmul.f32 -1.442695, %v4824_v60  ;;  %v4826_v1 = vadd.f32 %v3745_v30, %v6462_v23 }
 0x967   :  { %5557 = vtanh.f32 %v7768_v38  ;;  %v4686_v25 = vmul.f32 -1.442695, %v4794_v51 }
 0x968   :  { %5559 = vpow2.f32 %v4685_v52  ;;  %v4688_v52 = vmul.f32 -1.442695, %v4826_v1 }
 0x969   :  { %5561 = vpow2.f32 %v4684_v22 }
 0x96a   :  { %5563 = vpow2.f32 %v4686_v25 }
 0x96b   :  { %5565 = vtanh.f32 %v4823_v5 }
 0x96c   :  { %5567 = vpow2.f32 %v4687_v26 }
 0x96d   :  { %v5554_v4 = vpop.eup %5553 }
 0x96e   :  { %v3640_v19 = vmul.f32 %v5554_v4, %v5550_v61 }
 0x970   :  { %v5556_v62 = vpop.eup %5555 }
 0x971   :  { %v5558_v41 = vpop.eup %5557  ;;  %v3762_v8 = vadd.f32 1.0, %v5556_v62 }
 0x972   :  { %v5560_v32 = vpop.eup %5559  ;;  %v3641_v51 = vmul.f32 %v5558_v41, %v5552_v7 }
 0x973   :  { %5569 = vrcp.f32 %v3762_v8  ;;  %v3774_v22 = vadd.f32 1.0, %v5560_v32  ;;  %v5562_v25 = vpop.eup %5561 }
 0x974   :  { %5571 = vtanh.f32 %v4825_v42  ;;  %v7776_v63 = vpack.c.bf16 %v3641_v51, %v3640_v19  ;;  %v3763_v30 = vadd.f32 1.0, %v5562_v25  ;;  %v5564_v60 = vpop.eup %5563 }
 0x975   :  { %5573 = vrcp.f32 %v3774_v22  ;;  %v3775_v56 = vadd.f32 1.0, %v5564_v60  ;;  %v5566_v5 = vpop.eup %5565 }
 0x976   :  { %5575 = vpow2.f32 %v4688_v52  ;;  %4756 = vst [vmem:[#allocation17 + $0x28] sm:$0xff] %v7776_v63   ;;  %v5568_v26 = vpop.eup %5567 }
 0x977   :  { %5577 = vrcp.f32 %v3763_v30  ;;  %v3788_v8 = vadd.f32 1.0, %v5568_v26 }
 0x978   :  { %5579 = vrcp.f32 %v3775_v56 }
 0x979   :  { %5581 = vrcp.f32 %v3788_v8  ;;  %v7828_v8 = vld [vmem:[#allocation13 + $0xc8] ss:$16 sps:$4 sm:$0xff]  }
 0x97d   :  { %v5570_v1 = vpop.eup %5569 }
 0x97e   :  { %v5572_v61 = vpop.eup %5571  ;;  %v3796_v7 = vmul.f32 %v5570_v1, %v5566_v5 }
 0x97f   :  { %v5574_v4 = vpop.eup %5573 }
 0x980   :  { %v5576_v62 = vpop.eup %5575  ;;  %v3794_v42 = vmul.f32 %v5574_v4, %v7527_v28  ;;  %v7816_v4 = vld [vmem:[#allocation13 + $0xa8] ss:$16 sps:$4 sm:$0xff]  }
 0x981   :  { %v5578_v41 = vpop.eup %5577  ;;  %v3789_v51 = vadd.f32 1.0, %v5576_v62  ;;  %v7819_v62 = vld [vmem:[#allocation13 + $0xc4] ss:$16 sps:$4 sm:$0xff]  }
 0x982   :  { %v7780_v32 = vadd.f32 %v3796_v7, %v3794_v42  ;;  %v3797_v19 = vmul.f32 %v5578_v41, %v5572_v61  ;;  %v5580_v52 = vpop.eup %5579  ;;  %v8600_v61 = vld [vmem:[#allocation55_spill] sm:$0xff]  ;;  %v7813_v7 = vld [vmem:[#allocation13 + $0xa0] ss:$16 sps:$4 sm:$0xff]  }
 0x983   :  { %v3795_v22 = vmul.f32 %v5580_v52, %v7531_v6  ;;  %v5582_v30 = vpop.eup %5581  ;;  %v8599_v6 = vld [vmem:[#allocation54_spill] sm:$0xff]  ;;  %v7822_v42 = vld [vmem:[#allocation13 + $0xcc] ss:$16 sps:$4 sm:$0xff]  }
 0x984   :  { %5583 = vtanh.f32 %v7780_v32  ;;  %v7825_v41 = vld [vmem:[#allocation13 + $0xc0] ss:$16 sps:$4 sm:$0xff]   ;;  %v7834_v52 = vld [vmem:[#allocation13 + $0xec] ss:$16 sps:$4 sm:$0xff]  }
 0x985   :  { %v7784_v25 = vadd.f32 %v3797_v19, %v3795_v22  ;;  %5585 = vrcp.f32 %v3789_v51  ;;  %v7831_v19 = vld [vmem:[#allocation13 + $0xe4] ss:$16 sps:$4 sm:$0xff]   ;;  %v7837_v51 = vld [vmem:[#allocation13 + $0xe0] ss:$16 sps:$4 sm:$0xff]   ;;  %v7840_v22 = vld [vmem:[#allocation13 + $0xe8] ss:$16 sps:$4 sm:$0xff]  }
 0x987   :  { %5587 = vtanh.f32 %v7784_v25 }
 0x98e   :  { %v5584_v60 = vpop.eup %5583 }
 0x98f   :  { %v5586_v28 = vpop.eup %5585  ;;  %v3802_v5 = vmul.f32 %v5584_v60, %v5582_v30  ;;  %v8617_v30 = vld [vmem:[#allocation53_spill] sm:$0xff]  ;;  %v8618_v60 = vld [vmem:[#allocation56_spill] sm:$0xff] }
 0x991   :  { %v5588_v56 = vpop.eup %5587 }
 0x992   :  { %v3803_v26 = vmul.f32 %v5588_v56, %v5586_v28  ;;  %v8619_v28 = vld [vmem:[#allocation59_spill] sm:$0xff]  ;;  %v8620_v56 = vld [vmem:[#allocation60_spill] sm:$0xff] }
 0x994   :  { %v7787_v1 = vpack.c.bf16 %v3803_v26, %v3802_v5  ;;  %v8621_v5 = vld [vmem:[#allocation61_spill] sm:$0xff]  ;;  %v8622_v26 = vld [vmem:[#allocation62_spill] sm:$0xff] }
 0x996   :  { %3838 = vmatmul.mubr.bf16.vlgmr.msra.gmra.mrb[56].mxu0 %v7787_v1  ;;  %3881 = vmatmul.mubr.bf16.vlgmr.msra.gmra.mrb[56].mxu1 %v7787_v1 }
 0x997   :  { %3892 = vmatpush1.bf16.msra.mxu0 %v7538_v57  ;;  %3935 = vmatpush1.bf16.msra.mxu1 %v7541_v44 }
 0x998   :  { %3893 = vmatprep.subr.bf16.mxu0 %v7544_v43  ;;  %3936 = vmatprep.subr.bf16.mxu1 %v7547_v53 }
 0x999   :  { %3923 = vmatprep.mubr.bf16.mxu0 %v8301_v0  ;;  %3966 = vmatprep.mubr.bf16.mxu1 %v8301_v0 }
 0x99b   :  { %3894 = vmatpush1.bf16.msra.mxu0 %v7552_v49  ;;  %3937 = vmatpush1.bf16.msra.mxu1 %v7555_v50 }
 0x99c   :  { %3895 = vmatprep.subr.bf16.mxu0 %v7558_v47  ;;  %3938 = vmatprep.subr.bf16.mxu1 %v7561_v29 }
 0x99f   :  { %3896 = vmatpush1.bf16.msra.mxu0 %v7564_v9  ;;  %3939 = vmatpush1.bf16.msra.mxu1 %v7567_v31 }
 0x9a0   :  { %3897 = vmatprep.subr.bf16.mxu0 %v7570_v27  ;;  %3940 = vmatprep.subr.bf16.mxu1 %v7573_v54 }
 0x9a3   :  { %3898 = vmatpush1.bf16.msra.mxu0 %v8599_v6  ;;  %3941 = vmatpush1.bf16.msra.mxu1 %v8600_v61 }
 0x9a4   :  { %3899 = vmatprep.subr.bf16.mxu0 %v7582_v21  ;;  %3942 = vmatprep.subr.bf16.mxu1 %v7585_v35 }
 0x9a7   :  { %3900 = vmatpush1.bf16.msra.mxu0 %v7588_v16  ;;  %3943 = vmatpush1.bf16.msra.mxu1 %v7591_v10 }
 0x9a8   :  { %3901 = vmatprep.subr.bf16.mxu0 %v7594_v39  ;;  %3944 = vmatprep.subr.bf16.mxu1 %v7597_v3 }
 0x9ab   :  { %3902 = vmatpush1.bf16.msra.mxu0 %v7813_v7  ;;  %3945 = vmatpush1.bf16.msra.mxu1 %v7816_v4 }
 0x9ac   :  { %3903 = vmatprep.subr.bf16.mxu0 %v7819_v62  ;;  %3946 = vmatprep.subr.bf16.mxu1 %v7822_v42 }
 0x9af   :  { %3904 = vmatpush1.bf16.msra.mxu0 %v7825_v41  ;;  %3947 = vmatpush1.bf16.msra.mxu1 %v7828_v8 }
 0x9b0   :  { %3905 = vmatprep.subr.bf16.mxu0 %v7831_v19  ;;  %3948 = vmatprep.subr.bf16.mxu1 %v7834_v52 }
 0x9b3   :  { %3906 = vmatpush1.bf16.msra.mxu0 %v7837_v51  ;;  %3949 = vmatpush1.bf16.msra.mxu1 %v7840_v22 }
 0x9b4   :  { %4053 = vmatprep.subr.bf16.mxu0 %v7361_v55  ;;  %4096 = vmatprep.subr.bf16.mxu1 %v7364_v17  ;;  %v8601_v55 = vld [vmem:[#allocation24_spill] sm:$0xff]  ;;  %v8602_v17 = vld [vmem:[#allocation57_spill] sm:$0xff] }
 0x9b6   :  { %3924 = vmatmul.mubr.bf16.vlgmr.msra.gmra.mrb[56].mxu0 %v7776_v63  ;;  %3967 = vmatmul.mubr.bf16.vlgmr.msra.gmra.mrb[56].mxu1 %v7776_v63  ;;  %v8616_v63 = vld [vmem:[#allocation52_spill] sm:$0xff] }
 0x9b7   :  { %4054 = vmatpush1.bf16.msra.mxu0 %v7369_v46  ;;  %4097 = vmatpush1.bf16.msra.mxu1 %v7372_v40  ;;  %v8603_v46 = vld [vmem:[#allocation58_spill] sm:$0xff] }
 0x9b8   :  { %4055 = vmatprep.subr.bf16.mxu0 %v7375_v11  ;;  %4098 = vmatprep.subr.bf16.mxu1 %v7378_v15  ;;  %v8604_v40 = vld [vmem:[#allocation26_spill] sm:$0xff]  ;;  %v8605_v11 = vld [vmem:[#allocation27_spill] sm:$0xff]  ;;  %v8606_v15 = vld [vmem:[#allocation28_spill] sm:$0xff] }
 0x9b9   :  { %4085 = vmatprep.mubr.bf16.mxu0 %v8301_v0  ;;  %4128 = vmatprep.mubr.bf16.mxu1 %v8301_v0 }
 0x9bb   :  { %4056 = vmatpush1.bf16.msra.mxu0 %v7383_v13  ;;  %4099 = vmatpush1.bf16.msra.mxu1 %v7386_v14  ;;  %v8607_v13 = vld [vmem:[#allocation29_spill] sm:$0xff]  ;;  %v8608_v14 = vld [vmem:[#allocation30_spill] sm:$0xff] }
 0x9bc   :  { %4057 = vmatprep.subr.bf16.mxu0 %v7389_v12  ;;  %4100 = vmatprep.subr.bf16.mxu1 %v7392_v45  ;;  %v8609_v12 = vld [vmem:[#allocation31_spill] sm:$0xff]  ;;  %v8610_v45 = vld [vmem:[#allocation32_spill] sm:$0xff] }
 0x9bf   :  { %4058 = vmatpush1.bf16.msra.mxu0 %v7395_v34  ;;  %4101 = vmatpush1.bf16.msra.mxu1 %v7398_v33  ;;  %v8611_v34 = vld [vmem:[#allocation33_spill] sm:$0xff]  ;;  %v8612_v33 = vld [vmem:[#allocation34_spill] sm:$0xff] }
 0x9c0   :  { %4059 = vmatprep.subr.bf16.mxu0 %v7401_v18  ;;  %4102 = vmatprep.subr.bf16.mxu1 %v7404_v36  ;;  %v8613_v18 = vld [vmem:[#allocation49_spill] sm:$0xff]  ;;  %v8614_v36 = vld [vmem:[#allocation50_spill] sm:$0xff] }
 0x9c3   :  { %4060 = vmatpush1.bf16.msra.mxu0 %v7407_v58  ;;  %4103 = vmatpush1.bf16.msra.mxu1 %v8601_v55  ;;  %v8615_v58 = vld [vmem:[#allocation51_spill] sm:$0xff] }
 0x9c4   :  { %4061 = vmatprep.subr.bf16.mxu0 %v8602_v17  ;;  %4104 = vmatprep.subr.bf16.mxu1 %v8603_v46  ;;  %v8623_v55 = vld [vmem:[#allocation63_spill] sm:$0xff]  ;;  %v8624_v17 = vld [vmem:[#allocation64_spill] sm:$0xff]  ;;  %v8625_v46 = vld [vmem:[#allocation65_spill] sm:$0xff] }
 0x9c7   :  { %4062 = vmatpush1.bf16.msra.mxu0 %v8604_v40  ;;  %4105 = vmatpush1.bf16.msra.mxu1 %v8605_v11  ;;  %v8626_v40 = vld [vmem:[#allocation35_spill] sm:$0xff]  ;;  %v8627_v11 = vld [vmem:[#allocation36_spill] sm:$0xff] }
 0x9c8   :  { %4063 = vmatprep.subr.bf16.mxu0 %v8606_v15  ;;  %4106 = vmatprep.subr.bf16.mxu1 %v8607_v13  ;;  %v8629_v15 = vld [vmem:[#allocation38_spill] sm:$0xff]  ;;  %v8630_v13 = vld [vmem:[#allocation39_spill] sm:$0xff] }
 0x9cb   :  { %4064 = vmatpush1.bf16.msra.mxu0 %v8608_v14  ;;  %4107 = vmatpush1.bf16.msra.mxu1 %v8609_v12  ;;  %v8631_v14 = vld [vmem:[#allocation40_spill] sm:$0xff]  ;;  %v8632_v12 = vld [vmem:[#allocation41_spill] sm:$0xff] }
 0x9cc   :  { %4065 = vmatprep.subr.bf16.mxu0 %v8610_v45  ;;  %4108 = vmatprep.subr.bf16.mxu1 %v8611_v34  ;;  %v8633_v45 = vld [vmem:[#allocation42_spill] sm:$0xff]  ;;  %v8634_v34 = vld [vmem:[#allocation43_spill] sm:$0xff] }
 0x9cf   :  { %4066 = vmatpush1.bf16.msra.mxu0 %v8612_v33  ;;  %4109 = vmatpush1.bf16.msra.mxu1 %v8613_v18  ;;  %v8635_v33 = vld [vmem:[#allocation44_spill] sm:$0xff]  ;;  %v8636_v18 = vld [vmem:[#allocation45_spill] sm:$0xff] }
 0x9d0   :  { %4067 = vmatprep.subr.bf16.mxu0 %v8614_v36  ;;  %4110 = vmatprep.subr.bf16.mxu1 %v8615_v58  ;;  %v8637_v36 = vld [vmem:[#allocation46_spill] sm:$0xff]  ;;  %v8638_v58 = vld [vmem:[#allocation47_spill] sm:$0xff] }
 0x9d3   :  { %4068 = vmatpush1.bf16.msra.mxu0 %v8616_v63  ;;  %4111 = vmatpush1.bf16.msra.mxu1 %v8617_v30  ;;  %v8639_v63 = vld [vmem:[#allocation48_spill] sm:$0xff]  ;;  %v8640_v30 = vld [vmem:[#allocation66_spill] sm:$0xff] }
 0x9d4   :  { %4196 = vmatprep.subr.bf16.mxu0 %v8618_v60  ;;  %4239 = vmatprep.subr.bf16.mxu1 %v8619_v28  ;;  %v8641_v60 = vld [vmem:[#allocation67_spill] sm:$0xff]  ;;  %v8642_v28 = vld [vmem:[#allocation68_spill] sm:$0xff] }
 0x9d6   :  { %4086 = vmatmul.mubr.bf16.vlgmr.msra.gmra.mrb[28].mxu0 %v7787_v1  ;;  %4129 = vmatmul.mubr.bf16.vlgmr.msra.gmra.mrb[28].mxu1 %v7787_v1  ;;  %v8628_v1 = vld [vmem:[#allocation37_spill] sm:$0xff] }
 0x9d7   :  { %4197 = vmatpush1.bf16.msra.mxu0 %v8620_v56  ;;  %4240 = vmatpush1.bf16.msra.mxu1 %v8621_v5  ;;  %v8643_v56 = vld [vmem:[#allocation69_spill] sm:$0xff]  ;;  %v8644_v5 = vld [vmem:[#allocation70_spill] sm:$0xff] }
 0x9d8   :  { %4198 = vmatprep.subr.bf16.mxu0 %v8622_v26  ;;  %4241 = vmatprep.subr.bf16.mxu1 %v8623_v55  ;;  %v8645_v26 = vld [vmem:[#allocation71_spill] sm:$0xff]  ;;  %v8646_v55 = vld [vmem:[#allocation72_spill] sm:$0xff] }
 0x9d9   :  { %4228 = vmatprep.mubr.bf16.mxu0 %v8301_v0  ;;  %4271 = vmatprep.mubr.bf16.mxu1 %v8301_v0 }
 0x9db   :  { %4199 = vmatpush1.bf16.msra.mxu0 %v8624_v17  ;;  %4242 = vmatpush1.bf16.msra.mxu1 %v8625_v46  ;;  %v8647_v17 = vld [vmem:[#allocation73_spill] sm:$0xff]  ;;  %v8648_v46 = vld [vmem:[#allocation74_spill] sm:$0xff] }
 0x9dc   :  { %4200 = vmatprep.subr.bf16.mxu0 %v8626_v40  ;;  %4243 = vmatprep.subr.bf16.mxu1 %v8627_v11  ;;  %v8649_v40 = vld [vmem:[#allocation75_spill] sm:$0xff]  ;;  %v8650_v11 = vld [vmem:[#allocation76_spill] sm:$0xff] }
 0x9df   :  { %4201 = vmatpush1.bf16.msra.mxu0 %v8628_v1  ;;  %4244 = vmatpush1.bf16.msra.mxu1 %v8629_v15  ;;  %v8651_v1 = vld [vmem:[#allocation77_spill] sm:$0xff] }
 0x9e0   :  { %4202 = vmatprep.subr.bf16.mxu0 %v8630_v13  ;;  %4245 = vmatprep.subr.bf16.mxu1 %v8631_v14  ;;  %v8652_v14 = vld [vmem:[#allocation23_spill] sm:$0xff] }
 0x9e3   :  { %4203 = vmatpush1.bf16.msra.mxu0 %v8632_v12  ;;  %4246 = vmatpush1.bf16.msra.mxu1 %v8633_v45 }
 0x9e4   :  { %4204 = vmatprep.subr.bf16.mxu0 %v8634_v34  ;;  %4247 = vmatprep.subr.bf16.mxu1 %v8635_v33 }
 0x9e7   :  { %4205 = vmatpush1.bf16.msra.mxu0 %v8636_v18  ;;  %4248 = vmatpush1.bf16.msra.mxu1 %v8637_v36 }
 0x9e8   :  { %4206 = vmatprep.subr.bf16.mxu0 %v8638_v58  ;;  %4249 = vmatprep.subr.bf16.mxu1 %v8639_v63 }
 0x9eb   :  { %4207 = vmatpush1.bf16.msra.mxu0 %v8640_v30  ;;  %4250 = vmatpush1.bf16.msra.mxu1 %v8641_v60 }
 0x9ec   :  { %4208 = vmatprep.subr.bf16.mxu0 %v8642_v28  ;;  %4251 = vmatprep.subr.bf16.mxu1 %v8643_v56 }
 0x9ef   :  { %4209 = vmatpush1.bf16.msra.mxu0 %v8644_v5  ;;  %4252 = vmatpush1.bf16.msra.mxu1 %v8645_v26 }
 0x9f0   :  { %4210 = vmatprep.subr.bf16.mxu0 %v8646_v55  ;;  %4253 = vmatprep.subr.bf16.mxu1 %v8647_v17 }
 0x9f3   :  { %4211 = vmatpush1.bf16.msra.mxu0 %v8648_v46  ;;  %4254 = vmatpush1.bf16.msra.mxu1 %v8649_v40  ;;  %v8653_v46 = vld [vmem:[#allocation25_spill] sm:$0xff] }
 0x9f4   :  { %4282 = vmatprep.subr.bf16.mxu0 %v8650_v11  ;;  %4325 = vmatprep.subr.bf16.mxu1 %v8651_v1 }
 0xa89   :  { %v3925_v15 = vpop.f32.mrb[56].mxu0  ;;  %v3968_v13 = vpop.f32.mrb[56].mxu1 }
 0xa8a   :  { %v3977_v12 = vadd.f32 %v3925_v15, %v8652_v14  ;;  %v3927_v45 = vpop.f32.mrb[57].mxu0  ;;  %v3970_v34 = vpop.f32.mrb[57].mxu1  ;;  %v3979_v40 = vadd.f32 %v3968_v13, %v8653_v46 }
 0xa8b   :  { %v3978_v33 = vadd.f32 %v3927_v45, %v6655_v2  ;;  %v3929_v18 = vpop.f32.mrb[58].mxu0  ;;  %v3972_v36 = vpop.f32.mrb[58].mxu1  ;;  %v3980_v55 = vadd.f32 %v3970_v34, %v8445_v24 }
 0xa8c   :  { %v4689_v58 = vmul.f32 -1.442695, %v3977_v12  ;;  %v3981_v63 = vadd.f32 %v3929_v18, %v8652_v14  ;;  %v3931_v30 = vpop.f32.mrb[59].mxu0  ;;  %v3974_v60 = vpop.f32.mrb[59].mxu1 }
 0xa8d   :  { %v4691_v28 = vmul.f32 -1.442695, %v3978_v33  ;;  %v3982_v56 = vadd.f32 %v3931_v30, %v6655_v2  ;;  %v3984_v17 = vadd.f32 %v3974_v60, %v8445_v24  ;;  %v4693_v11 = vmul.f32 -1.442695, %v3980_v55 }
 0xa8e   :  { %5589 = vpow2.f32 %v4689_v58  ;;  %v4690_v5 = vmul.f32 -1.442695, %v3981_v63  ;;  %v3983_v33 = vadd.f32 %v3972_v36, %v8653_v46 }
 0xa8f   :  { %5591 = vpow2.f32 %v4691_v28  ;;  %v4692_v26 = vmul.f32 -1.442695, %v3982_v56  ;;  %v4694_v1 = vmul.f32 -1.442695, %v3984_v17 }
 0xa90   :  { %5593 = vpow2.f32 %v4690_v5 }
 0xa91   :  { %5595 = vpow2.f32 %v4692_v26 }
 0xa92   :  { %5597 = vtanh.f32 %v3979_v40 }
 0xa93   :  { %5599 = vpow2.f32 %v4693_v11 }
 0xa94   :  { %5601 = vpow2.f32 %v4694_v1 }
 0xa98   :  { %v5590_v15 = vpop.eup %5589 }
 0xa99   :  { %v5592_v12 = vpop.eup %5591  ;;  %v3991_v45 = vadd.f32 1.0, %v5590_v15 }
 0xa9a   :  { %v4003_v18 = vadd.f32 1.0, %v5592_v12  ;;  %v5594_v58 = vpop.eup %5593 }
 0xa9b   :  { %5603 = vrcp.f32 %v3991_v45  ;;  %v3992_v34 = vadd.f32 1.0, %v5594_v58  ;;  %v5596_v63 = vpop.eup %5595 }
 0xa9c   :  { %5605 = vrcp.f32 %v4003_v18  ;;  %v4004_v30 = vadd.f32 1.0, %v5596_v63  ;;  %v5598_v13 = vpop.eup %5597 }
 0xa9d   :  { %5607 = vtanh.f32 %v3983_v33  ;;  %v5600_v60 = vpop.eup %5599 }
 0xa9e   :  { %5609 = vrcp.f32 %v3992_v34  ;;  %v5602_v28 = vpop.eup %5601  ;;  %v4017_v17 = vadd.f32 1.0, %v5600_v60 }
 0xa9f   :  { %5611 = vrcp.f32 %v4004_v30  ;;  %v4018_v11 = vadd.f32 1.0, %v5602_v28 }
 0xaa0   :  { %5613 = vrcp.f32 %v4017_v17 }
 0xaa1   :  { %5615 = vrcp.f32 %v4018_v11 }
 0xaa5   :  { %v5604_v56 = vpop.eup %5603 }
 0xaa6   :  { %v5606_v5 = vpop.eup %5605  ;;  %v4025_v26 = vmul.f32 %v5604_v56, %v5598_v13 }
 0xaa7   :  { %v5608_v55 = vpop.eup %5607  ;;  %v4023_v36 = vmul.f32 %v5606_v5, %v7761_v20 }
 0xaa8   :  { %v5610_v40 = vpop.eup %5609 }
 0xaa9   :  { %v7926_v1 = vadd.f32 %v4025_v26, %v4023_v36  ;;  %v4026_v15 = vmul.f32 %v5610_v40, %v5608_v55  ;;  %v4087_v12 = vpop.f32.mrb[28].mxu0  ;;  %v4130_v45 = vpop.f32.mrb[28].mxu1 }
 0xaaa   :  { %v5612_v33 = vpop.eup %5611  ;;  %v4795_v18 = vadd.f32 %v4087_v12, %v8398_v48  ;;  %v4089_v58 = vpop.f32.mrb[29].mxu0  ;;  %v4827_v11 = vadd.f32 %v4130_v45, %v8349_v59 }
 0xaab   :  { %v4132_v34 = vpop.f32.mrb[29].mxu1  ;;  %v4024_v63 = vmul.f32 %v5612_v33, %v7768_v38  ;;  %v4796_v30 = vadd.f32 %v4089_v58, %v8399_v37  ;;  %v4091_v13 = vpop.f32.mrb[30].mxu0  ;;  %5617 = vtanh.f32 %v7926_v1 }
 0xaac   :  { %v4134_v20 = vpop.f32.mrb[30].mxu1  ;;  %v4697_v60 = vmul.f32 -1.442695, %v4795_v18  ;;  %v4797_v28 = vadd.f32 %v4091_v13, %v8398_v48  ;;  %v4093_v56 = vpop.f32.mrb[31].mxu0  ;;  %v4828_v40 = vadd.f32 %v4132_v34, %v6462_v23 }
 0xaad   :  { %v4136_v5 = vpop.f32.mrb[31].mxu1  ;;  %v7933_v26 = vadd.f32 %v4026_v15, %v4024_v63  ;;  %v4699_v55 = vmul.f32 -1.442695, %v4796_v30  ;;  %v4798_v36 = vadd.f32 %v4093_v56, %v8399_v37  ;;  %v5614_v48 = vpop.eup %5613  ;;  %v4829_v37 = vadd.f32 %v4134_v20, %v8349_v59 }
 0xaae   :  { %5619 = vpow2.f32 %v4697_v60  ;;  %v4698_v17 = vmul.f32 -1.442695, %v4797_v28  ;;  %v5616_v12 = vpop.eup %5615  ;;  %v4701_v33 = vmul.f32 -1.442695, %v4828_v40  ;;  %v4830_v15 = vadd.f32 %v4136_v5, %v6462_v23 }
 0xaaf   :  { %5621 = vtanh.f32 %v7933_v26  ;;  %v4700_v38 = vmul.f32 -1.442695, %v4798_v36 }
 0xab0   :  { %5623 = vpow2.f32 %v4699_v55  ;;  %v4702_v60 = vmul.f32 -1.442695, %v4830_v15 }
 0xab1   :  { %5625 = vpow2.f32 %v4698_v17 }
 0xab2   :  { %5627 = vpow2.f32 %v4700_v38 }
 0xab3   :  { %5629 = vtanh.f32 %v4827_v11 }
 0xab4   :  { %5631 = vpow2.f32 %v4701_v33 }
 0xab5   :  { %v5618_v18 = vpop.eup %5617 }
 0xab6   :  { %v4031_v34 = vmul.f32 %v5618_v18, %v5614_v48 }
 0xab8   :  { %v5620_v58 = vpop.eup %5619 }
 0xab9   :  { %v5622_v63 = vpop.eup %5621  ;;  %v4153_v30 = vadd.f32 1.0, %v5620_v58 }
 0xaba   :  { %v5624_v13 = vpop.eup %5623  ;;  %v4032_v28 = vmul.f32 %v5622_v63, %v5616_v12 }
 0xabb   :  { %5633 = vrcp.f32 %v4153_v30  ;;  %v4165_v56 = vadd.f32 1.0, %v5624_v13  ;;  %v5626_v55 = vpop.eup %5625 }
 0xabc   :  { %5635 = vtanh.f32 %v4829_v37  ;;  %v7941_v45 = vpack.c.bf16 %v4032_v28, %v4031_v34  ;;  %v4154_v23 = vadd.f32 1.0, %v5626_v55  ;;  %v5628_v5 = vpop.eup %5627 }
 0xabd   :  { %5637 = vrcp.f32 %v4165_v56  ;;  %v4166_v59 = vadd.f32 1.0, %v5628_v5  ;;  %v5630_v20 = vpop.eup %5629 }
 0xabe   :  { %5639 = vpow2.f32 %v4702_v60  ;;  %4761 = vst [vmem:[#allocation17 + $0x30] sm:$0xff] %v7941_v45   ;;  %v5632_v36 = vpop.eup %5631 }
 0xabf   :  { %5641 = vrcp.f32 %v4154_v23  ;;  %v4179_v11 = vadd.f32 1.0, %v5632_v36 }
 0xac0   :  { %5643 = vrcp.f32 %v4166_v59 }
 0xac1   :  { %5645 = vrcp.f32 %v4179_v11 }
 0xac5   :  { %v5634_v17 = vpop.eup %5633 }
 0xac6   :  { %v5636_v38 = vpop.eup %5635  ;;  %v4187_v40 = vmul.f32 %v5634_v17, %v5630_v20 }
 0xac7   :  { %v5638_v48 = vpop.eup %5637 }
 0xac8   :  { %v5640_v12 = vpop.eup %5639  ;;  %v4185_v33 = vmul.f32 %v5638_v48, %v7780_v32 }
 0xac9   :  { %v5642_v15 = vpop.eup %5641  ;;  %v4180_v63 = vadd.f32 1.0, %v5640_v12 }
 0xaca   :  { %v4189_v18 = vadd.f32 %v4187_v40, %v4185_v33  ;;  %v4188_v58 = vmul.f32 %v5642_v15, %v5636_v38  ;;  %v5644_v37 = vpop.eup %5643 }
 0xacb   :  { %v4186_v30 = vmul.f32 %v5644_v37, %v7784_v25  ;;  %v5646_v60 = vpop.eup %5645 }
 0xacc   :  { %5647 = vtanh.f32 %v4189_v18 }
 0xacd   :  { %v4190_v13 = vadd.f32 %v4188_v58, %v4186_v30  ;;  %5649 = vrcp.f32 %v4180_v63 }
 0xacf   :  { %5651 = vtanh.f32 %v4190_v13 }
 0xad6   :  { %v5648_v34 = vpop.eup %5647 }
 0xad7   :  { %v4193_v28 = vmul.f32 %v5648_v34, %v5646_v60  ;;  %v5650_v56 = vpop.eup %5649 }
 0xad9   :  { %v5652_v55 = vpop.eup %5651 }
 0xada   :  { %v4194_v23 = vmul.f32 %v5652_v55, %v5650_v56 }
 0xadc   :  { %v4195_v5 = vpack.c.bf16 %v4194_v23, %v4193_v28 }
 0xade   :  { %4229 = vmatmul.mubr.bf16.vlgmr.msra.gmra.mrb[60].mxu0 %v4195_v5  ;;  %4272 = vmatmul.mubr.bf16.vlgmr.msra.gmra.mrb[60].mxu1 %v4195_v5 }
 0xadf   :  { %4283 = vmatpush1.bf16.msra.mxu0 %v7538_v57  ;;  %4326 = vmatpush1.bf16.msra.mxu1 %v7541_v44 }
 0xae0   :  { %4284 = vmatprep.subr.bf16.mxu0 %v7544_v43  ;;  %4327 = vmatprep.subr.bf16.mxu1 %v7547_v53 }
 0xae1   :  { %4314 = vmatprep.mubr.bf16.mxu0 %v8301_v0  ;;  %4357 = vmatprep.mubr.bf16.mxu1 %v8301_v0 }
 0xae3   :  { %4285 = vmatpush1.bf16.msra.mxu0 %v7552_v49  ;;  %4328 = vmatpush1.bf16.msra.mxu1 %v7555_v50 }
 0xae4   :  { %4286 = vmatprep.subr.bf16.mxu0 %v7558_v47  ;;  %4329 = vmatprep.subr.bf16.mxu1 %v7561_v29 }
 0xae7   :  { %4287 = vmatpush1.bf16.msra.mxu0 %v7564_v9  ;;  %4330 = vmatpush1.bf16.msra.mxu1 %v7567_v31 }
 0xae8   :  { %4288 = vmatprep.subr.bf16.mxu0 %v7570_v27  ;;  %4331 = vmatprep.subr.bf16.mxu1 %v7573_v54 }
 0xaeb   :  { %4289 = vmatpush1.bf16.msra.mxu0 %v8599_v6  ;;  %4332 = vmatpush1.bf16.msra.mxu1 %v8600_v61 }
 0xaec   :  { %4290 = vmatprep.subr.bf16.mxu0 %v7582_v21  ;;  %4333 = vmatprep.subr.bf16.mxu1 %v7585_v35 }
 0xaef   :  { %4291 = vmatpush1.bf16.msra.mxu0 %v7588_v16  ;;  %4334 = vmatpush1.bf16.msra.mxu1 %v7591_v10 }
 0xaf0   :  { %4292 = vmatprep.subr.bf16.mxu0 %v7594_v39  ;;  %4335 = vmatprep.subr.bf16.mxu1 %v7597_v3 }
 0xaf3   :  { %4293 = vmatpush1.bf16.msra.mxu0 %v7813_v7  ;;  %4336 = vmatpush1.bf16.msra.mxu1 %v7816_v4 }
 0xaf4   :  { %4294 = vmatprep.subr.bf16.mxu0 %v7819_v62  ;;  %4337 = vmatprep.subr.bf16.mxu1 %v7822_v42 }
 0xaf7   :  { %4295 = vmatpush1.bf16.msra.mxu0 %v7825_v41  ;;  %4338 = vmatpush1.bf16.msra.mxu1 %v7828_v8 }
 0xaf8   :  { %4296 = vmatprep.subr.bf16.mxu0 %v7831_v19  ;;  %4339 = vmatprep.subr.bf16.mxu1 %v7834_v52 }
 0xafb   :  { %4297 = vmatpush1.bf16.msra.mxu0 %v7837_v51  ;;  %4340 = vmatpush1.bf16.msra.mxu1 %v7840_v22 }
 0xafe   :  { %4315 = vmatmul.mubr.bf16.vlgmr.msra.gmra.mrb[60].mxu0 %v7941_v45  ;;  %4358 = vmatmul.mubr.bf16.vlgmr.msra.gmra.mrb[60].mxu1 %v7941_v45 }
 0xbd1   :  { %v4316_v0 = vpop.f32.mrb[60].mxu0  ;;  %v4359_v57 = vpop.f32.mrb[60].mxu1 }
 0xbd2   :  { %v4368_v44 = vadd.f32 %v4316_v0, %v8652_v14  ;;  %v4318_v43 = vpop.f32.mrb[61].mxu0  ;;  %v4361_v53 = vpop.f32.mrb[61].mxu1  ;;  %v4370_v16 = vadd.f32 %v4359_v57, %v8653_v46 }
 0xbd3   :  { %v4369_v49 = vadd.f32 %v4318_v43, %v6655_v2  ;;  %v4320_v50 = vpop.f32.mrb[62].mxu0  ;;  %v4363_v47 = vpop.f32.mrb[62].mxu1  ;;  %v4371_v35 = vadd.f32 %v4361_v53, %v8445_v24 }
 0xbd4   :  { %v4703_v29 = vmul.f32 -1.442695, %v4368_v44  ;;  %v4372_v9 = vadd.f32 %v4320_v50, %v8652_v14  ;;  %v4322_v31 = vpop.f32.mrb[63].mxu0  ;;  %v4365_v27 = vpop.f32.mrb[63].mxu1  ;;  %v4374_v25 = vadd.f32 %v4363_v47, %v8653_v46 }
 0xbd5   :  { %v4705_v54 = vmul.f32 -1.442695, %v4369_v49  ;;  %v4373_v39 = vadd.f32 %v4322_v31, %v6655_v2  ;;  %v4707_v10 = vmul.f32 -1.442695, %v4371_v35  ;;  %v4375_v32 = vadd.f32 %v4365_v27, %v8445_v24 }
 0xbd6   :  { %5653 = vpow2.f32 %v4703_v29  ;;  %v4704_v3 = vmul.f32 -1.442695, %v4372_v9 }
 0xbd7   :  { %5655 = vpow2.f32 %v4705_v54  ;;  %v4706_v21 = vmul.f32 -1.442695, %v4373_v39  ;;  %v4708_v2 = vmul.f32 -1.442695, %v4375_v32 }
 0xbd8   :  { %5657 = vpow2.f32 %v4704_v3 }
 0xbd9   :  { %5659 = vpow2.f32 %v4706_v21 }
 0xbda   :  { %5661 = vtanh.f32 %v4370_v16 }
 0xbdb   :  { %5663 = vpow2.f32 %v4707_v10 }
 0xbdc   :  { %5665 = vtanh.f32 %v4374_v25 }
 0xbe0   :  { %v5654_v6 = vpop.eup %5653 }
 0xbe1   :  { %v5656_v61 = vpop.eup %5655  ;;  %v4382_v7 = vadd.f32 1.0, %v5654_v6 }
 0xbe2   :  { %v4394_v4 = vadd.f32 1.0, %v5656_v61  ;;  %v5658_v62 = vpop.eup %5657 }
 0xbe3   :  { %5667 = vrcp.f32 %v4382_v7  ;;  %v4383_v42 = vadd.f32 1.0, %v5658_v62  ;;  %v5660_v41 = vpop.eup %5659 }
 0xbe4   :  { %5669 = vrcp.f32 %v4394_v4  ;;  %v4395_v8 = vadd.f32 1.0, %v5660_v41  ;;  %v5662_v24 = vpop.eup %5661 }
 0xbe5   :  { %5671 = vpow2.f32 %v4708_v2  ;;  %v5664_v19 = vpop.eup %5663 }
 0xbe6   :  { %5673 = vrcp.f32 %v4383_v42  ;;  %v5666_v52 = vpop.eup %5665  ;;  %v4408_v46 = vadd.f32 1.0, %v5664_v19 }
 0xbe7   :  { %5675 = vrcp.f32 %v4395_v8 }
 0xbe8   :  { %5677 = vrcp.f32 %v4408_v46 }
 0xbed   :  { %v5668_v51 = vpop.eup %5667 }
 0xbee   :  { %v5670_v22 = vpop.eup %5669  ;;  %v4416_v14 = vmul.f32 %v5668_v51, %v5662_v24 }
 0xbef   :  { %v5672_v45 = vpop.eup %5671  ;;  %v4414_v59 = vmul.f32 %v5670_v22, %v7926_v1 }
 0xbf0   :  { %v5674_v20 = vpop.eup %5673  ;;  %v4409_v40 = vadd.f32 1.0, %v5672_v45 }
 0xbf1   :  { %v4418_v36 = vadd.f32 %v4416_v14, %v4414_v59  ;;  %v4417_v17 = vmul.f32 %v5674_v20, %v5666_v52  ;;  %v5676_v38 = vpop.eup %5675 }
 0xbf2   :  { %v4415_v48 = vmul.f32 %v5676_v38, %v7933_v26  ;;  %v5678_v12 = vpop.eup %5677 }
 0xbf3   :  { %5679 = vtanh.f32 %v4418_v36 }
 0xbf4   :  { %v4419_v11 = vadd.f32 %v4417_v17, %v4415_v48  ;;  %5681 = vrcp.f32 %v4409_v40 }
 0xbf6   :  { %5683 = vtanh.f32 %v4419_v11 }
 0xbfd   :  { %v5680_v33 = vpop.eup %5679 }
 0xbfe   :  { %v4422_v15 = vmul.f32 %v5680_v33, %v5678_v12  ;;  %v5682_v18 = vpop.eup %5681 }
 0xc00   :  { %v5684_v58 = vpop.eup %5683 }
 0xc01   :  { %v4423_v1 = vmul.f32 %v5684_v58, %v5682_v18 }
 0xc03   :  { %v4765_v37 = vpack.c.bf16 %v4423_v1, %v4422_v15 }
 0xc05   :  { %4766 = vst [vmem:[#allocation17 + $0x38] sm:$0xff] %v4765_v37  }
 0xc06   :  { %6042 = shalt.err (!%p6039_p4)
}
 0xc07   :  { %s6043_s19 = scalar_lea.hbm %s8012_s7, 1024 }
 0xc08   :  { %p6044_p5 = scmp.ne.s32.totalorder %s8012_s7, %s6043_s19  ;;  %p6047_p6 = scmp.lt.u32.totalorder %s6043_s19, %s8012_s7 }
 0xc0a   :  { %p6049_p7 = pnand %p6047_p6, %p6044_p5 }
 0xc0c   :  { %6052 = shalt.err (!%p6049_p7)
}
 0xc0d   :  { %4454 = dma.vmem_to_hbm [thread:$0]  %s4449_s12, 1024, %s8012_s7, [#allocation7], %s6069_s5, %s6069_s5, %s6070_s18  }
 0xc0e   :  { %6061 = dma.done.wait [#allocation7], 1024  }
 0xc0f   :  { %6062 = vsyncadd [#allocation7], 4294966272 }
 0xc10   :  { %4458 = vsyncpa [#allocation6], 1 }
 0xc11   :  { %4459 = vsyncpa [#allocation9], 1 }
 0xc12   :  { %4460 = vsyncpa [#allocation12], 1 }
 0xc13   :  { %4461 = vsyncpa [#allocation15], 1 }
 0xc14   :  { %4462 = vsyncpa [#allocation7], 1 }

</bundles_post_ra>
